<compile_context>
chip_gen: v7x
topology: tpu7x:2x2x1
jax: 0.10.0
libtpu: 0.0.40
codegen_flags: <defaults>
</compile_context>

<pallas_src>
import jax
import jax.numpy as jnp
import numpy as np
from jax.experimental import pallas as pl
from jax.experimental.pallas import tpu as pltpu


# ----------------------------------------------------------------------------
# Fused conv stack: three conv3x3(pad=1)+ReLU layers, one image per grid step.
# Layout: activations are (C, H*W) "CHW-flat"; taps are shifted windows of a
# flat, lane-padded VMEM scratch; each tap is one (16, Cin) x (Cin, 1024) dot.
# ----------------------------------------------------------------------------
_H = _W = 32
_HW = _H * _W                 # 1024 lanes (fully lane-dense)
_PAD = 128                    # lane halo on each side (>= 33, lane-tile aligned)
_SCR_W = _HW + 2 * _PAD       # 1280 = 10 lane tiles


def _conv_stack_kernel(x_ref, w1_ref, b1_ref, w2_ref, b2_ref, w3_ref, b3_ref,
                       o_ref, scr):
    # x_ref : (1, 8, 1024) f32   CHW-flat image, channels zero-padded 3->8
    # wN_ref: (9, 16, Cin) f32   tap t = ky*3+kx, rows = Cout, cols = Cin
    # bN_ref: (16, 1) f32
    # o_ref : (1, 16, 1024) bf16 conv3 output, CHW-flat (torch.flatten order)
    # scr   : (16, 1280) f32     flat activation with zero halo lanes

    # Zero only the halo lanes; interiors are fully rewritten before each read.
    scr[:, 0:_PAD] = jnp.zeros((16, _PAD), jnp.float32)
    scr[:, _PAD + _HW:] = jnp.zeros((16, _PAD), jnp.float32)

    # Column masks for the two taps that would read across a row boundary.
    w_idx = jax.lax.broadcasted_iota(jnp.int32, (1, _HW), 1) % _W
    left_ok = w_idx != 0          # kx == 0 tap is padding at w == 0
    right_ok = w_idx != (_W - 1)  # kx == 2 tap is padding at w == 31

    def conv3x3_relu(act, w_ref, b_ref):
        cin = act.shape[0]
        scr[0:cin, _PAD:_PAD + _HW] = act      # lane-aligned interior store
        acc = jnp.zeros((16, _HW), jnp.float32)
        for ky in range(3):
            for kx in range(3):
                off = _PAD + (ky - 1) * _W + (kx - 1)
                tap = scr[0:cin, off:off + _HW]          # shifted (cin, 1024)
                if kx == 0:
                    tap = jnp.where(left_ok, tap, 0.0)
                elif kx == 2:
                    tap = jnp.where(right_ok, tap, 0.0)
                acc = acc + jnp.dot(w_ref[ky * 3 + kx], tap,
                                    preferred_element_type=jnp.float32)
        return jnp.maximum(acc + b_ref[...], 0.0)

    y1 = conv3x3_relu(x_ref[0], w1_ref, b1_ref)
    y2 = conv3x3_relu(y1, w2_ref, b2_ref)
    y3 = conv3x3_relu(y2, w3_ref, b3_ref)
    o_ref[0] = y3.astype(o_ref.dtype)


def conv_stack(x_chw, p):
    N = x_chw.shape[0]
    return pl.pallas_call(
        _conv_stack_kernel,
        out_shape=jax.ShapeDtypeStruct((N, 16, _HW), jnp.bfloat16),
        grid_spec=pltpu.PrefetchScalarGridSpec(
            num_scalar_prefetch=0,
            grid=(N,),
            in_specs=[
                pl.BlockSpec((1, 8, _HW), lambda n: (n, 0, 0)),
                pl.BlockSpec((9, 16, 8), lambda n: (0, 0, 0)),
                pl.BlockSpec((16, 1), lambda n: (0, 0)),
                pl.BlockSpec((9, 16, 16), lambda n: (0, 0, 0)),
                pl.BlockSpec((16, 1), lambda n: (0, 0)),
                pl.BlockSpec((9, 16, 16), lambda n: (0, 0, 0)),
                pl.BlockSpec((16, 1), lambda n: (0, 0)),
            ],
            out_specs=pl.BlockSpec((1, 16, _HW), lambda n: (n, 0, 0)),
            scratch_shapes=[pltpu.VMEM((16, _SCR_W), jnp.float32)],
        ),
        compiler_params=pltpu.CompilerParams(
            dimension_semantics=("parallel",)),
    )(x_chw, p["w1"], p["b1"], p["w2"], p["b2"], p["w3"], p["b3"])


# ----------------------------------------------------------------------------
# fc1: bf16 weight streaming matmul with an f32 VMEM accumulator.
# Weight is pre-blocked (2, 16384, 512) so every (1, 4096, 512) block is one
# fully contiguous 4 MiB DMA; the 2-way Nout axis is "parallel" (v7x 2 TCs).
# ----------------------------------------------------------------------------
def _fc1_kernel(x_ref, w_ref, b_ref, o_ref, acc_ref):
    k = pl.program_id(1)

    @pl.when(k == 0)
    def _():
        acc_ref[...] = jnp.zeros_like(acc_ref)

    acc_ref[...] += jnp.dot(x_ref[...], w_ref[0],
                            preferred_element_type=jnp.float32)

    @pl.when(k == pl.num_programs(1) - 1)
    def _():
        o_ref[...] = jnp.maximum(acc_ref[...] + b_ref[...],
                                 0.0).astype(o_ref.dtype)


def fc1_streamed(x, w_blk, b, *, tk=4096):
    M, K = x.shape
    J, Kw, tn = w_blk.shape
    assert K == Kw and K % tk == 0
    Nout = J * tn
    return pl.pallas_call(
        _fc1_kernel,
        out_shape=jax.ShapeDtypeStruct((M, Nout), jnp.bfloat16),
        grid_spec=pltpu.PrefetchScalarGridSpec(
            num_scalar_prefetch=0,
            grid=(J, K // tk),                    # (parallel halves, reduction)
            in_specs=[
                pl.BlockSpec((M, tk), lambda j, k: (0, k)),
                pl.BlockSpec((1, tk, tn), lambda j, k: (j, k, 0)),
                pl.BlockSpec((1, tn), lambda j, k: (0, j)),
            ],
            out_specs=pl.BlockSpec((M, tn), lambda j, k: (0, j)),
            scratch_shapes=[pltpu.VMEM((M, tn), jnp.float32)],
        ),
        compiler_params=pltpu.CompilerParams(
            dimension_semantics=("parallel", "arbitrary")),
    )(x, w_blk, b)


# ----------------------------------------------------------------------------
# Fused fc2 (+ReLU) + fc3: single grid step, ~1.3 MiB of weights in VMEM.
# ----------------------------------------------------------------------------
def _fc23_kernel(x_ref, w2_ref, b2_ref, w3_ref, b3_ref, o_ref):
    h = jnp.dot(x_ref[...], w2_ref[...], preferred_element_type=jnp.float32)
    h = jnp.maximum(h + b2_ref[...], 0.0)
    y = jnp.dot(h, w3_ref[...], preferred_element_type=jnp.float32)
    o_ref[...] = y + b3_ref[...]


def fc2_fc3(x, w2, b2, w3, b3):
    M = x.shape[0]
    return pl.pallas_call(
        _fc23_kernel,
        out_shape=jax.ShapeDtypeStruct((M, w3.shape[1]), jnp.float32),
        grid_spec=pltpu.PrefetchScalarGridSpec(
            num_scalar_prefetch=0,
            grid=(1,),
            in_specs=[
                pl.BlockSpec(x.shape, lambda i: (0, 0)),
                pl.BlockSpec(w2.shape, lambda i: (0, 0)),
                pl.BlockSpec(b2.shape, lambda i: (0, 0)),
                pl.BlockSpec(w3.shape, lambda i: (0, 0)),
                pl.BlockSpec(b3.shape, lambda i: (0, 0)),
            ],
            out_specs=pl.BlockSpec((M, w3.shape[1]), lambda i: (0, 0)),
        ),
        compiler_params=pltpu.CompilerParams(
            dimension_semantics=("arbitrary",)),
    )(x, w2, b2, w3, b3)


# ----------------------------------------------------------------------------
# Parameters (deterministic, synthetic) and one-time kernel-layout prep.
# ----------------------------------------------------------------------------
def init_params():
    key = jax.random.PRNGKey(0)
    ks = jax.random.split(key, 12)

    def conv_w(k, cin, cout):
        return (jax.random.normal(k, (3, 3, cin, cout), jnp.float32)
                / np.sqrt(cin * 9))

    def fc_w(k, cin, cout):
        return jax.random.normal(k, (cin, cout), jnp.float32) / np.sqrt(cin)

    return {
        "w1": conv_w(ks[0], 3, 16),
        "b1": 0.01 * jax.random.normal(ks[1], (16,), jnp.float32),
        "w2": conv_w(ks[2], 16, 16),
        "b2": 0.01 * jax.random.normal(ks[3], (16,), jnp.float32),
        "w3": conv_w(ks[4], 16, 16),
        "b3": 0.01 * jax.random.normal(ks[5], (16,), jnp.float32),
        "fw1": fc_w(ks[6], 16384, 1000),
        "fb1": 0.01 * jax.random.normal(ks[7], (1000,), jnp.float32),
        "fw2": fc_w(ks[8], 1000, 500),
        "fb2": 0.01 * jax.random.normal(ks[9], (500,), jnp.float32),
        "fw3": fc_w(ks[10], 500, 10),
        "fb3": 0.01 * jax.random.normal(ks[11], (10,), jnp.float32),
    }


def prepare_params(params):
    """One-time conversion of math-layout params into kernel-ready layout."""
    def conv_w(w, cin_pad):
        # (3,3,Cin,Cout) HWIO -> (9, Cout, Cin_pad): row t = ky*3+kx holds W^T.
        cin = w.shape[2]
        wt = jnp.transpose(w, (0, 1, 3, 2)).reshape(9, 16, cin)
        if cin_pad > cin:
            wt = jnp.pad(wt, ((0, 0), (0, 0), (0, cin_pad - cin)))
        return wt

    kp = {
        "w1": conv_w(params["w1"], 8),
        "w2": conv_w(params["w2"], 16),
        "w3": conv_w(params["w3"], 16),
        "b1": params["b1"].reshape(16, 1),
        "b2": params["b2"].reshape(16, 1),
        "b3": params["b3"].reshape(16, 1),
    }
    # fc1: features are NCHW-flat (torch order) so no row permutation; pad
    # 1000->1024 cols, cast bf16, pre-block into two contiguous 512-col halves.
    fw1 = jnp.pad(params["fw1"], ((0, 0), (0, 24))).astype(jnp.bfloat16)
    kp["fw1"] = fw1.reshape(16384, 2, 512).transpose(1, 0, 2)   # (2,16384,512)
    kp["fb1"] = jnp.pad(params["fb1"], (0, 24)).reshape(1, 1024)
    # fc2: pad 1000->1024 rows (zero rows meet zero-padded fc1 cols), 500->512.
    kp["fw2"] = jnp.pad(params["fw2"], ((0, 24), (0, 12))).astype(jnp.bfloat16)
    kp["fb2"] = jnp.pad(params["fb2"], (0, 12)).reshape(1, 512)
    # fc3: pad 500->512 rows and 10->128 cols, keep f32 (tiny).
    kp["fw3"] = jnp.pad(params["fw3"], ((0, 12), (0, 118)))
    kp["fb3"] = jnp.pad(params["fb3"], (0, 118)).reshape(1, 128)
    return kp


# ----------------------------------------------------------------------------
# Full forward pass (Pallas) and a pure-JAX reference.
# ----------------------------------------------------------------------------
@jax.jit
def cifarnet4_forward(x_nchw, kparams):
    N = x_nchw.shape[0]
    # CHW-flat input, channels zero-padded 3 -> 8 (aligned conv K, provable no-op).
    x = jnp.pad(x_nchw.reshape(N, 3, _HW), ((0, 0), (0, 5), (0, 0)))
    feats = conv_stack(x, kparams).reshape(N, 16 * _HW)    # bf16, torch order
    h = fc1_streamed(feats, kparams["fw1"], kparams["fb1"])           # bf16
    y = fc2_fc3(h, kparams["fw2"], kparams["fb2"],
                kparams["fw3"], kparams["fb3"])                       # f32
    return y[:, :10]


def reference_forward(x_nchw, params):
    hi = jax.lax.Precision.HIGHEST
    x = jnp.transpose(x_nchw, (0, 2, 3, 1))

    def conv(x, w, b):
        y = jax.lax.conv_general_dilated(
            x, w, window_strides=(1, 1), padding="SAME",
            dimension_numbers=("NHWC", "HWIO", "NHWC"), precision=hi)
        return jax.nn.relu(y + b)

    x = conv(x, params["w1"], params["b1"])
    x = conv(x, params["w2"], params["b2"])
    x = conv(x, params["w3"], params["b3"])
    x = jnp.transpose(x, (0, 3, 1, 2)).reshape(x.shape[0], -1)   # torch flatten
    x = jax.nn.relu(jnp.dot(x, params["fw1"], precision=hi) + params["fb1"])
    x = jax.nn.relu(jnp.dot(x, params["fw2"], precision=hi) + params["fb2"])
    x = jnp.dot(x, params["fw3"], precision=hi) + params["fb3"]
    return x


if __name__ == "__main__":
    # fc1 expects 16*32*32 = 16384 features -> input must be (N, 3, 32, 32).
    x = jax.random.normal(jax.random.PRNGKey(0), (2, 3, 32, 32), jnp.float32)
    params = init_params()
    kparams = prepare_params(params)

    out = cifarnet4_forward(x, kparams)
    out = jax.block_until_ready(out)
    assert out.shape == (2, 10) and out.dtype == jnp.float32

    ref = reference_forward(x, params)
    np.testing.assert_allclose(np.asarray(out), np.asarray(ref),
                               rtol=5e-2, atol=5e-2)

    print("KERNEL_OK")
</pallas_src>

<mosaic_0001>
module attributes {stable_mosaic.version = 11 : i64} {
  func.func @_fc1_kernel(%arg0: i32, %arg1: i32, %arg2: memref<2x4096xbf16, #tpu.memory_space<vmem>>, %arg3: memref<1x4096x512xbf16, #tpu.memory_space<vmem>>, %arg4: memref<1x512xf32, #tpu.memory_space<vmem>>, %arg5: memref<2x512xbf16, #tpu.memory_space<vmem>>, %arg6: memref<2x512xf32, #tpu.memory_space<vmem>>) attributes {dimension_semantics = [#tpu.dimension_semantics<parallel>, #tpu.dimension_semantics<arbitrary>], iteration_bounds = array<i64: 2, 4>, scalar_prefetch = 0 : i64, scratch_operands = 1 : i64, tpu.core_type = #tpu.core_type<tc>, window_params = [{transform_indices = @transform_0, window_bounds = array<i64: 2, 4096>}, {transform_indices = @transform_1, window_bounds = array<i64: 1, 4096, 512>}, {transform_indices = @transform_2, window_bounds = array<i64: 1, 512>}, {transform_indices = @transform_3, window_bounds = array<i64: 2, 512>}]} {
    %c0_i32 = arith.constant 0 : i32
    %0 = arith.cmpi eq, %arg1, %c0_i32 : i32
    %1 = arith.extui %0 : i1 to i32
    %c0_i32_0 = arith.constant 0 : i32
    %2 = arith.cmpi ne, %1, %c0_i32_0 : i32
    scf.if %2 {
      %cst_10 = arith.constant 0.000000e+00 : f32
      %13 = vector.broadcast %cst_10 : f32 to vector<2x512xf32>
      %c0_11 = arith.constant 0 : index
      %c0_12 = arith.constant 0 : index
      %14 = vector.load %arg6[%c0_11, %c0_12] : memref<2x512xf32, #tpu.memory_space<vmem>>, vector<2x512xf32>
      tpu.vector_store %arg6[%c0_11, %c0_12], %13 {strides = array<i32>} : memref<2x512xf32, #tpu.memory_space<vmem>>, vector<2x512xf32>,
    } else {
    }
    %c0 = arith.constant 0 : index
    %c0_1 = arith.constant 0 : index
    %3 = vector.load %arg6[%c0, %c0_1] : memref<2x512xf32, #tpu.memory_space<vmem>>, vector<2x512xf32>
    %c0_2 = arith.constant 0 : index
    %c0_3 = arith.constant 0 : index
    %4 = vector.load %arg2[%c0_2, %c0_3] : memref<2x4096xbf16, #tpu.memory_space<vmem>>, vector<2x4096xbf16>
    %c0_4 = arith.constant 0 : index
    %c0_5 = arith.constant 0 : index
    %c0_6 = arith.constant 0 : index
    %5 = vector.load %arg3[%c0_4, %c0_5, %c0_6] : memref<1x4096x512xbf16, #tpu.memory_space<vmem>>, vector<1x4096x512xbf16>
    %6 = vector.shape_cast %5 : vector<1x4096x512xbf16> to vector<4096x512xbf16>
    %cst = arith.constant dense<0.000000e+00> : vector<2x512xf32>
    %7 = tpu.matmul %4, %6, %cst {dimension_numbers = #tpu.dot_dimension_numbers<[1], [0], [0], [1], [0, 0, 1, 1], [], []>} : vector<2x4096xbf16>, vector<4096x512xbf16>, vector<2x512xf32> -> vector<2x512xf32>
    %8 = arith.addf %3, %7 : vector<2x512xf32>
    %c0_7 = arith.constant 0 : index
    %c0_8 = arith.constant 0 : index
    %9 = vector.load %arg6[%c0_7, %c0_8] : memref<2x512xf32, #tpu.memory_space<vmem>>, vector<2x512xf32>
    tpu.vector_store %arg6[%c0_7, %c0_8], %8 {strides = array<i32>} : memref<2x512xf32, #tpu.memory_space<vmem>>, vector<2x512xf32>,
    %c3_i32 = arith.constant 3 : i32
    %10 = arith.cmpi eq, %arg1, %c3_i32 : i32
    %11 = arith.extui %10 : i1 to i32
    %c0_i32_9 = arith.constant 0 : i32
    %12 = arith.cmpi ne, %11, %c0_i32_9 : i32
    scf.if %12 {
      %c0_10 = arith.constant 0 : index
      %c0_11 = arith.constant 0 : index
      %13 = vector.load %arg6[%c0_10, %c0_11] : memref<2x512xf32, #tpu.memory_space<vmem>>, vector<2x512xf32>
      %c0_12 = arith.constant 0 : index
      %c0_13 = arith.constant 0 : index
      %14 = vector.load %arg4[%c0_12, %c0_13] : memref<1x512xf32, #tpu.memory_space<vmem>>, vector<1x512xf32>
      %15 = vector.broadcast %14 : vector<1x512xf32> to vector<2x512xf32>
      %16 = arith.addf %13, %15 : vector<2x512xf32>
      %cst_14 = arith.constant 0.000000e+00 : f32
      %17 = vector.broadcast %cst_14 : f32 to vector<2x512xf32>
      %18 = arith.maximumf %16, %17 : vector<2x512xf32>
      %19 = arith.truncf %18 : vector<2x512xf32> to vector<2x512xbf16>
      %c0_15 = arith.constant 0 : index
      %c0_16 = arith.constant 0 : index
      %20 = vector.load %arg5[%c0_15, %c0_16] : memref<2x512xbf16, #tpu.memory_space<vmem>>, vector<2x512xbf16>
      tpu.vector_store %arg5[%c0_15, %c0_16], %19 {strides = array<i32>} : memref<2x512xbf16, #tpu.memory_space<vmem>>, vector<2x512xbf16>,
    } else {
    }
    return
  }
  func.func @transform_0(%arg0: i32, %arg1: i32) -> (i32, i32) {
    %c0_i32 = arith.constant 0 : i32
    %c0_i32_0 = arith.constant 0 : i32
    return %c0_i32, %arg1 : i32, i32
  }
  func.func @transform_1(%arg0: i32, %arg1: i32) -> (i32, i32, i32) {
    %c0_i32 = arith.constant 0 : i32
    %c0_i32_0 = arith.constant 0 : i32
    return %arg0, %arg1, %c0_i32 : i32, i32, i32
  }
  func.func @transform_2(%arg0: i32, %arg1: i32) -> (i32, i32) {
    %c0_i32 = arith.constant 0 : i32
    %c0_i32_0 = arith.constant 0 : i32
    return %c0_i32, %arg0 : i32, i32
  }
  func.func @transform_3(%arg0: i32, %arg1: i32) -> (i32, i32) {
    %c0_i32 = arith.constant 0 : i32
    %c0_i32_0 = arith.constant 0 : i32
    return %c0_i32, %arg0 : i32, i32
  }
}

module attributes {stable_mosaic.version = 11 : i64} {
  func.func @_fc23_kernel(%arg0: i32, %arg1: memref<2x1024xbf16, #tpu.memory_space<vmem>>, %arg2: memref<1024x512xbf16, #tpu.memory_space<vmem>>, %arg3: memref<1x512xf32, #tpu.memory_space<vmem>>, %arg4: memref<512x128xf32, #tpu.memory_space<vmem>>, %arg5: memref<1x128xf32, #tpu.memory_space<vmem>>, %arg6: memref<2x128xf32, #tpu.memory_space<vmem>>) attributes {dimension_semantics = [#tpu.dimension_semantics<arbitrary>], iteration_bounds = array<i64: 1>, scalar_prefetch = 0 : i64, scratch_operands = 0 : i64, tpu.core_type = #tpu.core_type<tc>, window_params = [{pipeline_mode = #tpu.pipeline_mode<synchronous>, transform_indices = @transform_0, window_bounds = array<i64: 2, 1024>}, {pipeline_mode = #tpu.pipeline_mode<synchronous>, transform_indices = @transform_1, window_bounds = array<i64: 1024, 512>}, {pipeline_mode = #tpu.pipeline_mode<synchronous>, transform_indices = @transform_2, window_bounds = array<i64: 1, 512>}, {pipeline_mode = #tpu.pipeline_mode<synchronous>, transform_indices = @transform_3, window_bounds = array<i64: 512, 128>}, {pipeline_mode = #tpu.pipeline_mode<synchronous>, transform_indices = @transform_4, window_bounds = array<i64: 1, 128>}, {pipeline_mode = #tpu.pipeline_mode<synchronous>, transform_indices = @transform_5, window_bounds = array<i64: 2, 128>}]} {
    %c0 = arith.constant 0 : index
    %c0_0 = arith.constant 0 : index
    %0 = vector.load %arg1[%c0, %c0_0] : memref<2x1024xbf16, #tpu.memory_space<vmem>>, vector<2x1024xbf16>
    %c0_1 = arith.constant 0 : index
    %c0_2 = arith.constant 0 : index
    %1 = vector.load %arg2[%c0_1, %c0_2] : memref<1024x512xbf16, #tpu.memory_space<vmem>>, vector<1024x512xbf16>
    %cst = arith.constant dense<0.000000e+00> : vector<2x512xf32>
    %2 = tpu.matmul %0, %1, %cst {dimension_numbers = #tpu.dot_dimension_numbers<[1], [0], [0], [1], [0, 0, 1, 1], [], []>} : vector<2x1024xbf16>, vector<1024x512xbf16>, vector<2x512xf32> -> vector<2x512xf32>
    %c0_3 = arith.constant 0 : index
    %c0_4 = arith.constant 0 : index
    %3 = vector.load %arg3[%c0_3, %c0_4] : memref<1x512xf32, #tpu.memory_space<vmem>>, vector<1x512xf32>
    %4 = vector.broadcast %3 : vector<1x512xf32> to vector<2x512xf32>
    %5 = arith.addf %2, %4 : vector<2x512xf32>
    %cst_5 = arith.constant 0.000000e+00 : f32
    %6 = vector.broadcast %cst_5 : f32 to vector<2x512xf32>
    %7 = arith.maximumf %5, %6 : vector<2x512xf32>
    %c0_6 = arith.constant 0 : index
    %c0_7 = arith.constant 0 : index
    %8 = vector.load %arg4[%c0_6, %c0_7] : memref<512x128xf32, #tpu.memory_space<vmem>>, vector<512x128xf32>
    %cst_8 = arith.constant dense<0.000000e+00> : vector<2x128xf32>
    %9 = tpu.matmul %7, %8, %cst_8 {dimension_numbers = #tpu.dot_dimension_numbers<[1], [0], [0], [1], [0, 0, 1, 1], [], []>} : vector<2x512xf32>, vector<512x128xf32>, vector<2x128xf32> -> vector<2x128xf32>
    %c0_9 = arith.constant 0 : index
    %c0_10 = arith.constant 0 : index
    %10 = vector.load %arg5[%c0_9, %c0_10] : memref<1x128xf32, #tpu.memory_space<vmem>>, vector<1x128xf32>
    %11 = vector.broadcast %10 : vector<1x128xf32> to vector<2x128xf32>
    %12 = arith.addf %9, %11 : vector<2x128xf32>
    %c0_11 = arith.constant 0 : index
    %c0_12 = arith.constant 0 : index
    %13 = vector.load %arg6[%c0_11, %c0_12] : memref<2x128xf32, #tpu.memory_space<vmem>>, vector<2x128xf32>
    tpu.vector_store %arg6[%c0_11, %c0_12], %12 {strides = array<i32>} : memref<2x128xf32, #tpu.memory_space<vmem>>, vector<2x128xf32>,
    return
  }
  func.func @transform_0(%arg0: i32) -> (i32, i32) {
    %c0_i32 = arith.constant 0 : i32
    %c0_i32_0 = arith.constant 0 : i32
    %c0_i32_1 = arith.constant 0 : i32
    return %c0_i32, %c0_i32_0 : i32, i32
  }
  func.func @transform_1(%arg0: i32) -> (i32, i32) {
    %c0_i32 = arith.constant 0 : i32
    %c0_i32_0 = arith.constant 0 : i32
    %c0_i32_1 = arith.constant 0 : i32
    return %c0_i32, %c0_i32_0 : i32, i32
  }
  func.func @transform_2(%arg0: i32) -> (i32, i32) {
    %c0_i32 = arith.constant 0 : i32
    %c0_i32_0 = arith.constant 0 : i32
    %c0_i32_1 = arith.constant 0 : i32
    return %c0_i32, %c0_i32_0 : i32, i32
  }
  func.func @transform_3(%arg0: i32) -> (i32, i32) {
    %c0_i32 = arith.constant 0 : i32
    %c0_i32_0 = arith.constant 0 : i32
    %c0_i32_1 = arith.constant 0 : i32
    return %c0_i32, %c0_i32_0 : i32, i32
  }
  func.func @transform_4(%arg0: i32) -> (i32, i32) {
    %c0_i32 = arith.constant 0 : i32
    %c0_i32_0 = arith.constant 0 : i32
    %c0_i32_1 = arith.constant 0 : i32
    return %c0_i32, %c0_i32_0 : i32, i32
  }
  func.func @transform_5(%arg0: i32) -> (i32, i32) {
    %c0_i32 = arith.constant 0 : i32
    %c0_i32_0 = arith.constant 0 : i32
    %c0_i32_1 = arith.constant 0 : i32
    return %c0_i32, %c0_i32_0 : i32, i32
  }
}

module attributes {stable_mosaic.version = 11 : i64} {
  func.func @_conv_stack_kernel(%arg0: i32, %arg1: memref<1x8x1024xf32, #tpu.memory_space<vmem>>, %arg2: memref<9x16x8xf32, #tpu.memory_space<vmem>>, %arg3: memref<16x1xf32, #tpu.memory_space<vmem>>, %arg4: memref<9x16x16xf32, #tpu.memory_space<vmem>>, %arg5: memref<16x1xf32, #tpu.memory_space<vmem>>, %arg6: memref<9x16x16xf32, #tpu.memory_space<vmem>>, %arg7: memref<16x1xf32, #tpu.memory_space<vmem>>, %arg8: memref<1x16x1024xbf16, #tpu.memory_space<vmem>>, %arg9: memref<16x1280xf32, #tpu.memory_space<vmem>>) attributes {dimension_semantics = [#tpu.dimension_semantics<parallel>], iteration_bounds = array<i64: 2>, scalar_prefetch = 0 : i64, scratch_operands = 1 : i64, tpu.core_type = #tpu.core_type<tc>, window_params = [{transform_indices = @transform_0, window_bounds = array<i64: 1, 8, 1024>}, {pipeline_mode = #tpu.pipeline_mode<synchronous>, transform_indices = @transform_1, window_bounds = array<i64: 9, 16, 8>}, {pipeline_mode = #tpu.pipeline_mode<synchronous>, transform_indices = @transform_2, window_bounds = array<i64: 16, 1>}, {pipeline_mode = #tpu.pipeline_mode<synchronous>, transform_indices = @transform_3, window_bounds = array<i64: 9, 16, 16>}, {pipeline_mode = #tpu.pipeline_mode<synchronous>, transform_indices = @transform_4, window_bounds = array<i64: 16, 1>}, {pipeline_mode = #tpu.pipeline_mode<synchronous>, transform_indices = @transform_5, window_bounds = array<i64: 9, 16, 16>}, {pipeline_mode = #tpu.pipeline_mode<synchronous>, transform_indices = @transform_6, window_bounds = array<i64: 16, 1>}, {transform_indices = @transform_7, window_bounds = array<i64: 1, 16, 1024>}]} {
    %cst = arith.constant 0.000000e+00 : f32
    %0 = vector.broadcast %cst : f32 to vector<16x128xf32>
    %c0 = arith.constant 0 : index
    %c0_0 = arith.constant 0 : index
    %1 = vector.load %arg9[%c0, %c0_0] : memref<16x1280xf32, #tpu.memory_space<vmem>>, vector<16x128xf32>
    tpu.vector_store %arg9[%c0, %c0_0], %0 {strides = array<i32>} : memref<16x1280xf32, #tpu.memory_space<vmem>>, vector<16x128xf32>,
    %cst_1 = arith.constant 0.000000e+00 : f32
    %2 = vector.broadcast %cst_1 : f32 to vector<16x128xf32>
    %c0_2 = arith.constant 0 : index
    %c1152 = arith.constant 1152 : index
    %3 = vector.load %arg9[%c0_2, %c1152] : memref<16x1280xf32, #tpu.memory_space<vmem>>, vector<16x128xf32>
    tpu.vector_store %arg9[%c0_2, %c1152], %2 {strides = array<i32>} : memref<16x1280xf32, #tpu.memory_space<vmem>>, vector<16x128xf32>,
    %4 = tpu.iota {dimensions = array<i32: 1>} : vector<1x1024xi32>
    %c32_i32 = arith.constant 32 : i32
    %c0_i32 = arith.constant 0 : i32
    %5 = arith.cmpi eq, %c32_i32, %c0_i32 : i32
    %c1_i32 = arith.constant 1 : i32
    %6 = arith.select %5, %c1_i32, %c32_i32 : i32
    %7 = vector.broadcast %6 : i32 to vector<1x1024xi32>
    %8 = arith.remsi %4, %7 : vector<1x1024xi32>
    %c0_i32_3 = arith.constant 0 : i32
    %9 = vector.broadcast %c0_i32_3 : i32 to vector<1x1024xi32>
    %10 = arith.cmpi ne, %8, %9 : vector<1x1024xi32>
    %c0_i32_4 = arith.constant 0 : i32
    %11 = vector.broadcast %c0_i32_4 : i32 to vector<1x1024xi32>
    %12 = arith.cmpi slt, %8, %11 : vector<1x1024xi32>
    %c0_i32_5 = arith.constant 0 : i32
    %13 = arith.cmpi slt, %6, %c0_i32_5 : i32
    %14 = vector.broadcast %13 : i1 to vector<1x1024xi1>
    %15 = vector.broadcast %14 : vector<1x1024xi1> to vector<1x1024xi1>
    %16 = arith.xori %12, %15 : vector<1x1024xi1>
    %17 = arith.andi %16, %10 : vector<1x1024xi1>
    %18 = vector.broadcast %6 : i32 to vector<1x1024xi32>
    %19 = arith.addi %8, %18 : vector<1x1024xi32>
    %20 = arith.select %17, %19, %8 : vector<1x1024xi1>, vector<1x1024xi32>
    %c0_i32_6 = arith.constant 0 : i32
    %21 = vector.broadcast %c0_i32_6 : i32 to vector<1x1024xi32>
    %22 = arith.cmpi ne, %20, %21 : vector<1x1024xi32>
    %c31_i32 = arith.constant 31 : i32
    %23 = vector.broadcast %c31_i32 : i32 to vector<1x1024xi32>
    %24 = arith.cmpi ne, %20, %23 : vector<1x1024xi32>
    %c0_7 = arith.constant 0 : index
    %c0_8 = arith.constant 0 : index
    %c0_9 = arith.constant 0 : index
    %25 = vector.load %arg1[%c0_7, %c0_8, %c0_9] : memref<1x8x1024xf32, #tpu.memory_space<vmem>>, vector<1x8x1024xf32>
    %26 = vector.shape_cast %25 : vector<1x8x1024xf32> to vector<8x1024xf32>
    %c0_10 = arith.constant 0 : index
    %c128 = arith.constant 128 : index
    %27 = vector.load %arg9[%c0_10, %c128] : memref<16x1280xf32, #tpu.memory_space<vmem>>, vector<8x1024xf32>
    tpu.vector_store %arg9[%c0_10, %c128], %26 {strides = array<i32>} : memref<16x1280xf32, #tpu.memory_space<vmem>>, vector<8x1024xf32>,
    %cst_11 = arith.constant 0.000000e+00 : f32
    %28 = vector.broadcast %cst_11 : f32 to vector<16x1024xf32>
    %c0_12 = arith.constant 0 : index
    %c95 = arith.constant 95 : index
    %29 = vector.load %arg9[%c0_12, %c95] : memref<16x1280xf32, #tpu.memory_space<vmem>>, vector<8x1024xf32>
    %cst_13 = arith.constant 0.000000e+00 : f32
    %30 = vector.shape_cast %22 : vector<1x1024xi1> to vector<1x1024xi1>
    %31 = vector.broadcast %30 : vector<1x1024xi1> to vector<8x1024xi1>
    %32 = vector.broadcast %cst_13 : f32 to vector<8x1024xf32>
    %33 = arith.select %31, %29, %32 : vector<8x1024xi1>, vector<8x1024xf32>
    %c0_14 = arith.constant 0 : index
    %c0_15 = arith.constant 0 : index
    %c0_16 = arith.constant 0 : index
    %34 = vector.load %arg2[%c0_14, %c0_15, %c0_16] : memref<9x16x8xf32, #tpu.memory_space<vmem>>, vector<1x16x8xf32>
    %35 = vector.shape_cast %34 : vector<1x16x8xf32> to vector<16x8xf32>
    %cst_17 = arith.constant dense<0.000000e+00> : vector<16x1024xf32>
    %36 = tpu.matmul %35, %33, %cst_17 {dimension_numbers = #tpu.dot_dimension_numbers<[1], [0], [0], [1], [0, 0, 1, 1], [], []>} : vector<16x8xf32>, vector<8x1024xf32>, vector<16x1024xf32> -> vector<16x1024xf32>
    %37 = arith.addf %28, %36 : vector<16x1024xf32>
    %c0_18 = arith.constant 0 : index
    %c96 = arith.constant 96 : index
    %38 = vector.load %arg9[%c0_18, %c96] : memref<16x1280xf32, #tpu.memory_space<vmem>>, vector<8x1024xf32>
    %c1 = arith.constant 1 : index
    %c0_19 = arith.constant 0 : index
    %c0_20 = arith.constant 0 : index
    %39 = vector.load %arg2[%c1, %c0_19, %c0_20] : memref<9x16x8xf32, #tpu.memory_space<vmem>>, vector<1x16x8xf32>
    %40 = vector.shape_cast %39 : vector<1x16x8xf32> to vector<16x8xf32>
    %cst_21 = arith.constant dense<0.000000e+00> : vector<16x1024xf32>
    %41 = tpu.matmul %40, %38, %cst_21 {dimension_numbers = #tpu.dot_dimension_numbers<[1], [0], [0], [1], [0, 0, 1, 1], [], []>} : vector<16x8xf32>, vector<8x1024xf32>, vector<16x1024xf32> -> vector<16x1024xf32>
    %42 = arith.addf %37, %41 : vector<16x1024xf32>
    %c0_22 = arith.constant 0 : index
    %c97 = arith.constant 97 : index
    %43 = vector.load %arg9[%c0_22, %c97] : memref<16x1280xf32, #tpu.memory_space<vmem>>, vector<8x1024xf32>
    %cst_23 = arith.constant 0.000000e+00 : f32
    %44 = vector.shape_cast %24 : vector<1x1024xi1> to vector<1x1024xi1>
    %45 = vector.broadcast %44 : vector<1x1024xi1> to vector<8x1024xi1>
    %46 = vector.broadcast %cst_23 : f32 to vector<8x1024xf32>
    %47 = arith.select %45, %43, %46 : vector<8x1024xi1>, vector<8x1024xf32>
    %c2 = arith.constant 2 : index
    %c0_24 = arith.constant 0 : index
    %c0_25 = arith.constant 0 : index
    %48 = vector.load %arg2[%c2, %c0_24, %c0_25] : memref<9x16x8xf32, #tpu.memory_space<vmem>>, vector<1x16x8xf32>
    %49 = vector.shape_cast %48 : vector<1x16x8xf32> to vector<16x8xf32>
    %cst_26 = arith.constant dense<0.000000e+00> : vector<16x1024xf32>
    %50 = tpu.matmul %49, %47, %cst_26 {dimension_numbers = #tpu.dot_dimension_numbers<[1], [0], [0], [1], [0, 0, 1, 1], [], []>} : vector<16x8xf32>, vector<8x1024xf32>, vector<16x1024xf32> -> vector<16x1024xf32>
    %51 = arith.addf %42, %50 : vector<16x1024xf32>
    %c0_27 = arith.constant 0 : index
    %c127 = arith.constant 127 : index
    %52 = vector.load %arg9[%c0_27, %c127] : memref<16x1280xf32, #tpu.memory_space<vmem>>, vector<8x1024xf32>
    %cst_28 = arith.constant 0.000000e+00 : f32
    %53 = vector.shape_cast %22 : vector<1x1024xi1> to vector<1x1024xi1>
    %54 = vector.broadcast %53 : vector<1x1024xi1> to vector<8x1024xi1>
    %55 = vector.broadcast %cst_28 : f32 to vector<8x1024xf32>
    %56 = arith.select %54, %52, %55 : vector<8x1024xi1>, vector<8x1024xf32>
    %c3 = arith.constant 3 : index
    %c0_29 = arith.constant 0 : index
    %c0_30 = arith.constant 0 : index
    %57 = vector.load %arg2[%c3, %c0_29, %c0_30] : memref<9x16x8xf32, #tpu.memory_space<vmem>>, vector<1x16x8xf32>
    %58 = vector.shape_cast %57 : vector<1x16x8xf32> to vector<16x8xf32>
    %cst_31 = arith.constant dense<0.000000e+00> : vector<16x1024xf32>
    %59 = tpu.matmul %58, %56, %cst_31 {dimension_numbers = #tpu.dot_dimension_numbers<[1], [0], [0], [1], [0, 0, 1, 1], [], []>} : vector<16x8xf32>, vector<8x1024xf32>, vector<16x1024xf32> -> vector<16x1024xf32>
    %60 = arith.addf %51, %59 : vector<16x1024xf32>
    %c0_32 = arith.constant 0 : index
    %c128_33 = arith.constant 128 : index
    %61 = vector.load %arg9[%c0_32, %c128_33] : memref<16x1280xf32, #tpu.memory_space<vmem>>, vector<8x1024xf32>
    %c4 = arith.constant 4 : index
    %c0_34 = arith.constant 0 : index
    %c0_35 = arith.constant 0 : index
    %62 = vector.load %arg2[%c4, %c0_34, %c0_35] : memref<9x16x8xf32, #tpu.memory_space<vmem>>, vector<1x16x8xf32>
    %63 = vector.shape_cast %62 : vector<1x16x8xf32> to vector<16x8xf32>
    %cst_36 = arith.constant dense<0.000000e+00> : vector<16x1024xf32>
    %64 = tpu.matmul %63, %61, %cst_36 {dimension_numbers = #tpu.dot_dimension_numbers<[1], [0], [0], [1], [0, 0, 1, 1], [], []>} : vector<16x8xf32>, vector<8x1024xf32>, vector<16x1024xf32> -> vector<16x1024xf32>
    %65 = arith.addf %60, %64 : vector<16x1024xf32>
    %c0_37 = arith.constant 0 : index
    %c129 = arith.constant 129 : index
    %66 = vector.load %arg9[%c0_37, %c129] : memref<16x1280xf32, #tpu.memory_space<vmem>>, vector<8x1024xf32>
    %cst_38 = arith.constant 0.000000e+00 : f32
    %67 = vector.shape_cast %24 : vector<1x1024xi1> to vector<1x1024xi1>
    %68 = vector.broadcast %67 : vector<1x1024xi1> to vector<8x1024xi1>
    %69 = vector.broadcast %cst_38 : f32 to vector<8x1024xf32>
    %70 = arith.select %68, %66, %69 : vector<8x1024xi1>, vector<8x1024xf32>
    %c5 = arith.constant 5 : index
    %c0_39 = arith.constant 0 : index
    %c0_40 = arith.constant 0 : index
    %71 = vector.load %arg2[%c5, %c0_39, %c0_40] : memref<9x16x8xf32, #tpu.memory_space<vmem>>, vector<1x16x8xf32>
    %72 = vector.shape_cast %71 : vector<1x16x8xf32> to vector<16x8xf32>
    %cst_41 = arith.constant dense<0.000000e+00> : vector<16x1024xf32>
    %73 = tpu.matmul %72, %70, %cst_41 {dimension_numbers = #tpu.dot_dimension_numbers<[1], [0], [0], [1], [0, 0, 1, 1], [], []>} : vector<16x8xf32>, vector<8x1024xf32>, vector<16x1024xf32> -> vector<16x1024xf32>
    %74 = arith.addf %65, %73 : vector<16x1024xf32>
    %c0_42 = arith.constant 0 : index
    %c159 = arith.constant 159 : index
    %75 = vector.load %arg9[%c0_42, %c159] : memref<16x1280xf32, #tpu.memory_space<vmem>>, vector<8x1024xf32>
    %cst_43 = arith.constant 0.000000e+00 : f32
    %76 = vector.shape_cast %22 : vector<1x1024xi1> to vector<1x1024xi1>
    %77 = vector.broadcast %76 : vector<1x1024xi1> to vector<8x1024xi1>
    %78 = vector.broadcast %cst_43 : f32 to vector<8x1024xf32>
    %79 = arith.select %77, %75, %78 : vector<8x1024xi1>, vector<8x1024xf32>
    %c6 = arith.constant 6 : index
    %c0_44 = arith.constant 0 : index
    %c0_45 = arith.constant 0 : index
    %80 = vector.load %arg2[%c6, %c0_44, %c0_45] : memref<9x16x8xf32, #tpu.memory_space<vmem>>, vector<1x16x8xf32>
    %81 = vector.shape_cast %80 : vector<1x16x8xf32> to vector<16x8xf32>
    %cst_46 = arith.constant dense<0.000000e+00> : vector<16x1024xf32>
    %82 = tpu.matmul %81, %79, %cst_46 {dimension_numbers = #tpu.dot_dimension_numbers<[1], [0], [0], [1], [0, 0, 1, 1], [], []>} : vector<16x8xf32>, vector<8x1024xf32>, vector<16x1024xf32> -> vector<16x1024xf32>
    %83 = arith.addf %74, %82 : vector<16x1024xf32>
    %c0_47 = arith.constant 0 : index
    %c160 = arith.constant 160 : index
    %84 = vector.load %arg9[%c0_47, %c160] : memref<16x1280xf32, #tpu.memory_space<vmem>>, vector<8x1024xf32>
    %c7 = arith.constant 7 : index
    %c0_48 = arith.constant 0 : index
    %c0_49 = arith.constant 0 : index
    %85 = vector.load %arg2[%c7, %c0_48, %c0_49] : memref<9x16x8xf32, #tpu.memory_space<vmem>>, vector<1x16x8xf32>
    %86 = vector.shape_cast %85 : vector<1x16x8xf32> to vector<16x8xf32>
    %cst_50 = arith.constant dense<0.000000e+00> : vector<16x1024xf32>
    %87 = tpu.matmul %86, %84, %cst_50 {dimension_numbers = #tpu.dot_dimension_numbers<[1], [0], [0], [1], [0, 0, 1, 1], [], []>} : vector<16x8xf32>, vector<8x1024xf32>, vector<16x1024xf32> -> vector<16x1024xf32>
    %88 = arith.addf %83, %87 : vector<16x1024xf32>
    %c0_51 = arith.constant 0 : index
    %c161 = arith.constant 161 : index
    %89 = vector.load %arg9[%c0_51, %c161] : memref<16x1280xf32, #tpu.memory_space<vmem>>, vector<8x1024xf32>
    %cst_52 = arith.constant 0.000000e+00 : f32
    %90 = vector.shape_cast %24 : vector<1x1024xi1> to vector<1x1024xi1>
    %91 = vector.broadcast %90 : vector<1x1024xi1> to vector<8x1024xi1>
    %92 = vector.broadcast %cst_52 : f32 to vector<8x1024xf32>
    %93 = arith.select %91, %89, %92 : vector<8x1024xi1>, vector<8x1024xf32>
    %c8 = arith.constant 8 : index
    %c0_53 = arith.constant 0 : index
    %c0_54 = arith.constant 0 : index
    %94 = vector.load %arg2[%c8, %c0_53, %c0_54] : memref<9x16x8xf32, #tpu.memory_space<vmem>>, vector<1x16x8xf32>
    %95 = vector.shape_cast %94 : vector<1x16x8xf32> to vector<16x8xf32>
    %cst_55 = arith.constant dense<0.000000e+00> : vector<16x1024xf32>
    %96 = tpu.matmul %95, %93, %cst_55 {dimension_numbers = #tpu.dot_dimension_numbers<[1], [0], [0], [1], [0, 0, 1, 1], [], []>} : vector<16x8xf32>, vector<8x1024xf32>, vector<16x1024xf32> -> vector<16x1024xf32>
    %97 = arith.addf %88, %96 : vector<16x1024xf32>
    %c0_56 = arith.constant 0 : index
    %c0_57 = arith.constant 0 : index
    %98 = vector.load %arg3[%c0_56, %c0_57] : memref<16x1xf32, #tpu.memory_space<vmem>>, vector<16x1xf32>
    %99 = vector.broadcast %98 : vector<16x1xf32> to vector<16x1024xf32>
    %100 = arith.addf %97, %99 : vector<16x1024xf32>
    %cst_58 = arith.constant 0.000000e+00 : f32
    %101 = vector.broadcast %cst_58 : f32 to vector<16x1024xf32>
    %102 = arith.maximumf %100, %101 : vector<16x1024xf32>
    %c0_59 = arith.constant 0 : index
    %c128_60 = arith.constant 128 : index
    %103 = vector.load %arg9[%c0_59, %c128_60] : memref<16x1280xf32, #tpu.memory_space<vmem>>, vector<16x1024xf32>
    tpu.vector_store %arg9[%c0_59, %c128_60], %102 {strides = array<i32>} : memref<16x1280xf32, #tpu.memory_space<vmem>>, vector<16x1024xf32>,
    %cst_61 = arith.constant 0.000000e+00 : f32
    %104 = vector.broadcast %cst_61 : f32 to vector<16x1024xf32>
    %c0_62 = arith.constant 0 : index
    %c95_63 = arith.constant 95 : index
    %105 = vector.load %arg9[%c0_62, %c95_63] : memref<16x1280xf32, #tpu.memory_space<vmem>>, vector<16x1024xf32>
    %cst_64 = arith.constant 0.000000e+00 : f32
    %106 = vector.shape_cast %22 : vector<1x1024xi1> to vector<1x1024xi1>
    %107 = vector.broadcast %106 : vector<1x1024xi1> to vector<16x1024xi1>
    %108 = vector.broadcast %cst_64 : f32 to vector<16x1024xf32>
    %109 = arith.select %107, %105, %108 : vector<16x1024xi1>, vector<16x1024xf32>
    %c0_65 = arith.constant 0 : index
    %c0_66 = arith.constant 0 : index
    %c0_67 = arith.constant 0 : index
    %110 = vector.load %arg4[%c0_65, %c0_66, %c0_67] : memref<9x16x16xf32, #tpu.memory_space<vmem>>, vector<1x16x16xf32>
    %111 = vector.shape_cast %110 : vector<1x16x16xf32> to vector<16x16xf32>
    %cst_68 = arith.constant dense<0.000000e+00> : vector<16x1024xf32>
    %112 = tpu.matmul %111, %109, %cst_68 {dimension_numbers = #tpu.dot_dimension_numbers<[1], [0], [0], [1], [0, 0, 1, 1], [], []>} : vector<16x16xf32>, vector<16x1024xf32>, vector<16x1024xf32> -> vector<16x1024xf32>
    %113 = arith.addf %104, %112 : vector<16x1024xf32>
    %c0_69 = arith.constant 0 : index
    %c96_70 = arith.constant 96 : index
    %114 = vector.load %arg9[%c0_69, %c96_70] : memref<16x1280xf32, #tpu.memory_space<vmem>>, vector<16x1024xf32>
    %c1_71 = arith.constant 1 : index
    %c0_72 = arith.constant 0 : index
    %c0_73 = arith.constant 0 : index
    %115 = vector.load %arg4[%c1_71, %c0_72, %c0_73] : memref<9x16x16xf32, #tpu.memory_space<vmem>>, vector<1x16x16xf32>
    %116 = vector.shape_cast %115 : vector<1x16x16xf32> to vector<16x16xf32>
    %cst_74 = arith.constant dense<0.000000e+00> : vector<16x1024xf32>
    %117 = tpu.matmul %116, %114, %cst_74 {dimension_numbers = #tpu.dot_dimension_numbers<[1], [0], [0], [1], [0, 0, 1, 1], [], []>} : vector<16x16xf32>, vector<16x1024xf32>, vector<16x1024xf32> -> vector<16x1024xf32>
    %118 = arith.addf %113, %117 : vector<16x1024xf32>
    %c0_75 = arith.constant 0 : index
    %c97_76 = arith.constant 97 : index
    %119 = vector.load %arg9[%c0_75, %c97_76] : memref<16x1280xf32, #tpu.memory_space<vmem>>, vector<16x1024xf32>
    %cst_77 = arith.constant 0.000000e+00 : f32
    %120 = vector.shape_cast %24 : vector<1x1024xi1> to vector<1x1024xi1>
    %121 = vector.broadcast %120 : vector<1x1024xi1> to vector<16x1024xi1>
    %122 = vector.broadcast %cst_77 : f32 to vector<16x1024xf32>
    %123 = arith.select %121, %119, %122 : vector<16x1024xi1>, vector<16x1024xf32>
    %c2_78 = arith.constant 2 : index
    %c0_79 = arith.constant 0 : index
    %c0_80 = arith.constant 0 : index
    %124 = vector.load %arg4[%c2_78, %c0_79, %c0_80] : memref<9x16x16xf32, #tpu.memory_space<vmem>>, vector<1x16x16xf32>
    %125 = vector.shape_cast %124 : vector<1x16x16xf32> to vector<16x16xf32>
    %cst_81 = arith.constant dense<0.000000e+00> : vector<16x1024xf32>
    %126 = tpu.matmul %125, %123, %cst_81 {dimension_numbers = #tpu.dot_dimension_numbers<[1], [0], [0], [1], [0, 0, 1, 1], [], []>} : vector<16x16xf32>, vector<16x1024xf32>, vector<16x1024xf32> -> vector<16x1024xf32>
    %127 = arith.addf %118, %126 : vector<16x1024xf32>
    %c0_82 = arith.constant 0 : index
    %c127_83 = arith.constant 127 : index
    %128 = vector.load %arg9[%c0_82, %c127_83] : memref<16x1280xf32, #tpu.memory_space<vmem>>, vector<16x1024xf32>
    %cst_84 = arith.constant 0.000000e+00 : f32
    %129 = vector.shape_cast %22 : vector<1x1024xi1> to vector<1x1024xi1>
    %130 = vector.broadcast %129 : vector<1x1024xi1> to vector<16x1024xi1>
    %131 = vector.broadcast %cst_84 : f32 to vector<16x1024xf32>
    %132 = arith.select %130, %128, %131 : vector<16x1024xi1>, vector<16x1024xf32>
    %c3_85 = arith.constant 3 : index
    %c0_86 = arith.constant 0 : index
    %c0_87 = arith.constant 0 : index
    %133 = vector.load %arg4[%c3_85, %c0_86, %c0_87] : memref<9x16x16xf32, #tpu.memory_space<vmem>>, vector<1x16x16xf32>
    %134 = vector.shape_cast %133 : vector<1x16x16xf32> to vector<16x16xf32>
    %cst_88 = arith.constant dense<0.000000e+00> : vector<16x1024xf32>
    %135 = tpu.matmul %134, %132, %cst_88 {dimension_numbers = #tpu.dot_dimension_numbers<[1], [0], [0], [1], [0, 0, 1, 1], [], []>} : vector<16x16xf32>, vector<16x1024xf32>, vector<16x1024xf32> -> vector<16x1024xf32>
    %136 = arith.addf %127, %135 : vector<16x1024xf32>
    %c0_89 = arith.constant 0 : index
    %c128_90 = arith.constant 128 : index
    %137 = vector.load %arg9[%c0_89, %c128_90] : memref<16x1280xf32, #tpu.memory_space<vmem>>, vector<16x1024xf32>
    %c4_91 = arith.constant 4 : index
    %c0_92 = arith.constant 0 : index
    %c0_93 = arith.constant 0 : index
    %138 = vector.load %arg4[%c4_91, %c0_92, %c0_93] : memref<9x16x16xf32, #tpu.memory_space<vmem>>, vector<1x16x16xf32>
    %139 = vector.shape_cast %138 : vector<1x16x16xf32> to vector<16x16xf32>
    %cst_94 = arith.constant dense<0.000000e+00> : vector<16x1024xf32>
    %140 = tpu.matmul %139, %137, %cst_94 {dimension_numbers = #tpu.dot_dimension_numbers<[1], [0], [0], [1], [0, 0, 1, 1], [], []>} : vector<16x16xf32>, vector<16x1024xf32>, vector<16x1024xf32> -> vector<16x1024xf32>
    %141 = arith.addf %136, %140 : vector<16x1024xf32>
    %c0_95 = arith.constant 0 : index
    %c129_96 = arith.constant 129 : index
    %142 = vector.load %arg9[%c0_95, %c129_96] : memref<16x1280xf32, #tpu.memory_space<vmem>>, vector<16x1024xf32>
    %cst_97 = arith.constant 0.000000e+00 : f32
    %143 = vector.shape_cast %24 : vector<1x1024xi1> to vector<1x1024xi1>
    %144 = vector.broadcast %143 : vector<1x1024xi1> to vector<16x1024xi1>
    %145 = vector.broadcast %cst_97 : f32 to vector<16x1024xf32>
    %146 = arith.select %144, %142, %145 : vector<16x1024xi1>, vector<16x1024xf32>
    %c5_98 = arith.constant 5 : index
    %c0_99 = arith.constant 0 : index
    %c0_100 = arith.constant 0 : index
    %147 = vector.load %arg4[%c5_98, %c0_99, %c0_100] : memref<9x16x16xf32, #tpu.memory_space<vmem>>, vector<1x16x16xf32>
    %148 = vector.shape_cast %147 : vector<1x16x16xf32> to vector<16x16xf32>
    %cst_101 = arith.constant dense<0.000000e+00> : vector<16x1024xf32>
    %149 = tpu.matmul %148, %146, %cst_101 {dimension_numbers = #tpu.dot_dimension_numbers<[1], [0], [0], [1], [0, 0, 1, 1], [], []>} : vector<16x16xf32>, vector<16x1024xf32>, vector<16x1024xf32> -> vector<16x1024xf32>
    %150 = arith.addf %141, %149 : vector<16x1024xf32>
    %c0_102 = arith.constant 0 : index
    %c159_103 = arith.constant 159 : index
    %151 = vector.load %arg9[%c0_102, %c159_103] : memref<16x1280xf32, #tpu.memory_space<vmem>>, vector<16x1024xf32>
    %cst_104 = arith.constant 0.000000e+00 : f32
    %152 = vector.shape_cast %22 : vector<1x1024xi1> to vector<1x1024xi1>
    %153 = vector.broadcast %152 : vector<1x1024xi1> to vector<16x1024xi1>
    %154 = vector.broadcast %cst_104 : f32 to vector<16x1024xf32>
    %155 = arith.select %153, %151, %154 : vector<16x1024xi1>, vector<16x1024xf32>
    %c6_105 = arith.constant 6 : index
    %c0_106 = arith.constant 0 : index
    %c0_107 = arith.constant 0 : index
    %156 = vector.load %arg4[%c6_105, %c0_106, %c0_107] : memref<9x16x16xf32, #tpu.memory_space<vmem>>, vector<1x16x16xf32>
    %157 = vector.shape_cast %156 : vector<1x16x16xf32> to vector<16x16xf32>
    %cst_108 = arith.constant dense<0.000000e+00> : vector<16x1024xf32>
    %158 = tpu.matmul %157, %155, %cst_108 {dimension_numbers = #tpu.dot_dimension_numbers<[1], [0], [0], [1], [0, 0, 1, 1], [], []>} : vector<16x16xf32>, vector<16x1024xf32>, vector<16x1024xf32> -> vector<16x1024xf32>
    %159 = arith.addf %150, %158 : vector<16x1024xf32>
    %c0_109 = arith.constant 0 : index
    %c160_110 = arith.constant 160 : index
    %160 = vector.load %arg9[%c0_109, %c160_110] : memref<16x1280xf32, #tpu.memory_space<vmem>>, vector<16x1024xf32>
    %c7_111 = arith.constant 7 : index
    %c0_112 = arith.constant 0 : index
    %c0_113 = arith.constant 0 : index
    %161 = vector.load %arg4[%c7_111, %c0_112, %c0_113] : memref<9x16x16xf32, #tpu.memory_space<vmem>>, vector<1x16x16xf32>
    %162 = vector.shape_cast %161 : vector<1x16x16xf32> to vector<16x16xf32>
    %cst_114 = arith.constant dense<0.000000e+00> : vector<16x1024xf32>
    %163 = tpu.matmul %162, %160, %cst_114 {dimension_numbers = #tpu.dot_dimension_numbers<[1], [0], [0], [1], [0, 0, 1, 1], [], []>} : vector<16x16xf32>, vector<16x1024xf32>, vector<16x1024xf32> -> vector<16x1024xf32>
    %164 = arith.addf %159, %163 : vector<16x1024xf32>
    %c0_115 = arith.constant 0 : index
    %c161_116 = arith.constant 161 : index
    %165 = vector.load %arg9[%c0_115, %c161_116] : memref<16x1280xf32, #tpu.memory_space<vmem>>, vector<16x1024xf32>
    %cst_117 = arith.constant 0.000000e+00 : f32
    %166 = vector.shape_cast %24 : vector<1x1024xi1> to vector<1x1024xi1>
    %167 = vector.broadcast %166 : vector<1x1024xi1> to vector<16x1024xi1>
    %168 = vector.broadcast %cst_117 : f32 to vector<16x1024xf32>
    %169 = arith.select %167, %165, %168 : vector<16x1024xi1>, vector<16x1024xf32>
    %c8_118 = arith.constant 8 : index
    %c0_119 = arith.constant 0 : index
    %c0_120 = arith.constant 0 : index
    %170 = vector.load %arg4[%c8_118, %c0_119, %c0_120] : memref<9x16x16xf32, #tpu.memory_space<vmem>>, vector<1x16x16xf32>
    %171 = vector.shape_cast %170 : vector<1x16x16xf32> to vector<16x16xf32>
    %cst_121 = arith.constant dense<0.000000e+00> : vector<16x1024xf32>
    %172 = tpu.matmul %171, %169, %cst_121 {dimension_numbers = #tpu.dot_dimension_numbers<[1], [0], [0], [1], [0, 0, 1, 1], [], []>} : vector<16x16xf32>, vector<16x1024xf32>, vector<16x1024xf32> -> vector<16x1024xf32>
    %173 = arith.addf %164, %172 : vector<16x1024xf32>
    %c0_122 = arith.constant 0 : index
    %c0_123 = arith.constant 0 : index
    %174 = vector.load %arg5[%c0_122, %c0_123] : memref<16x1xf32, #tpu.memory_space<vmem>>, vector<16x1xf32>
    %175 = vector.broadcast %174 : vector<16x1xf32> to vector<16x1024xf32>
    %176 = arith.addf %173, %175 : vector<16x1024xf32>
    %cst_124 = arith.constant 0.000000e+00 : f32
    %177 = vector.broadcast %cst_124 : f32 to vector<16x1024xf32>
    %178 = arith.maximumf %176, %177 : vector<16x1024xf32>
    %c0_125 = arith.constant 0 : index
    %c128_126 = arith.constant 128 : index
    %179 = vector.load %arg9[%c0_125, %c128_126] : memref<16x1280xf32, #tpu.memory_space<vmem>>, vector<16x1024xf32>
    tpu.vector_store %arg9[%c0_125, %c128_126], %178 {strides = array<i32>} : memref<16x1280xf32, #tpu.memory_space<vmem>>, vector<16x1024xf32>,
    %cst_127 = arith.constant 0.000000e+00 : f32
    %180 = vector.broadcast %cst_127 : f32 to vector<16x1024xf32>
    %c0_128 = arith.constant 0 : index
    %c95_129 = arith.constant 95 : index
    %181 = vector.load %arg9[%c0_128, %c95_129] : memref<16x1280xf32, #tpu.memory_space<vmem>>, vector<16x1024xf32>
    %cst_130 = arith.constant 0.000000e+00 : f32
    %182 = vector.shape_cast %22 : vector<1x1024xi1> to vector<1x1024xi1>
    %183 = vector.broadcast %182 : vector<1x1024xi1> to vector<16x1024xi1>
    %184 = vector.broadcast %cst_130 : f32 to vector<16x1024xf32>
    %185 = arith.select %183, %181, %184 : vector<16x1024xi1>, vector<16x1024xf32>
    %c0_131 = arith.constant 0 : index
    %c0_132 = arith.constant 0 : index
    %c0_133 = arith.constant 0 : index
    %186 = vector.load %arg6[%c0_131, %c0_132, %c0_133] : memref<9x16x16xf32, #tpu.memory_space<vmem>>, vector<1x16x16xf32>
    %187 = vector.shape_cast %186 : vector<1x16x16xf32> to vector<16x16xf32>
    %cst_134 = arith.constant dense<0.000000e+00> : vector<16x1024xf32>
    %188 = tpu.matmul %187, %185, %cst_134 {dimension_numbers = #tpu.dot_dimension_numbers<[1], [0], [0], [1], [0, 0, 1, 1], [], []>} : vector<16x16xf32>, vector<16x1024xf32>, vector<16x1024xf32> -> vector<16x1024xf32>
    %189 = arith.addf %180, %188 : vector<16x1024xf32>
    %c0_135 = arith.constant 0 : index
    %c96_136 = arith.constant 96 : index
    %190 = vector.load %arg9[%c0_135, %c96_136] : memref<16x1280xf32, #tpu.memory_space<vmem>>, vector<16x1024xf32>
    %c1_137 = arith.constant 1 : index
    %c0_138 = arith.constant 0 : index
    %c0_139 = arith.constant 0 : index
    %191 = vector.load %arg6[%c1_137, %c0_138, %c0_139] : memref<9x16x16xf32, #tpu.memory_space<vmem>>, vector<1x16x16xf32>
    %192 = vector.shape_cast %191 : vector<1x16x16xf32> to vector<16x16xf32>
    %cst_140 = arith.constant dense<0.000000e+00> : vector<16x1024xf32>
    %193 = tpu.matmul %192, %190, %cst_140 {dimension_numbers = #tpu.dot_dimension_numbers<[1], [0], [0], [1], [0, 0, 1, 1], [], []>} : vector<16x16xf32>, vector<16x1024xf32>, vector<16x1024xf32> -> vector<16x1024xf32>
    %194 = arith.addf %189, %193 : vector<16x1024xf32>
    %c0_141 = arith.constant 0 : index
    %c97_142 = arith.constant 97 : index
    %195 = vector.load %arg9[%c0_141, %c97_142] : memref<16x1280xf32, #tpu.memory_space<vmem>>, vector<16x1024xf32>
    %cst_143 = arith.constant 0.000000e+00 : f32
    %196 = vector.shape_cast %24 : vector<1x1024xi1> to vector<1x1024xi1>
    %197 = vector.broadcast %196 : vector<1x1024xi1> to vector<16x1024xi1>
    %198 = vector.broadcast %cst_143 : f32 to vector<16x1024xf32>
    %199 = arith.select %197, %195, %198 : vector<16x1024xi1>, vector<16x1024xf32>
    %c2_144 = arith.constant 2 : index
    %c0_145 = arith.constant 0 : index
    %c0_146 = arith.constant 0 : index
    %200 = vector.load %arg6[%c2_144, %c0_145, %c0_146] : memref<9x16x16xf32, #tpu.memory_space<vmem>>, vector<1x16x16xf32>
    %201 = vector.shape_cast %200 : vector<1x16x16xf32> to vector<16x16xf32>
    %cst_147 = arith.constant dense<0.000000e+00> : vector<16x1024xf32>
    %202 = tpu.matmul %201, %199, %cst_147 {dimension_numbers = #tpu.dot_dimension_numbers<[1], [0], [0], [1], [0, 0, 1, 1], [], []>} : vector<16x16xf32>, vector<16x1024xf32>, vector<16x1024xf32> -> vector<16x1024xf32>
    %203 = arith.addf %194, %202 : vector<16x1024xf32>
    %c0_148 = arith.constant 0 : index
    %c127_149 = arith.constant 127 : index
    %204 = vector.load %arg9[%c0_148, %c127_149] : memref<16x1280xf32, #tpu.memory_space<vmem>>, vector<16x1024xf32>
    %cst_150 = arith.constant 0.000000e+00 : f32
    %205 = vector.shape_cast %22 : vector<1x1024xi1> to vector<1x1024xi1>
    %206 = vector.broadcast %205 : vector<1x1024xi1> to vector<16x1024xi1>
    %207 = vector.broadcast %cst_150 : f32 to vector<16x1024xf32>
    %208 = arith.select %206, %204, %207 : vector<16x1024xi1>, vector<16x1024xf32>
    %c3_151 = arith.constant 3 : index
    %c0_152 = arith.constant 0 : index
    %c0_153 = arith.constant 0 : index
    %209 = vector.load %arg6[%c3_151, %c0_152, %c0_153] : memref<9x16x16xf32, #tpu.memory_space<vmem>>, vector<1x16x16xf32>
    %210 = vector.shape_cast %209 : vector<1x16x16xf32> to vector<16x16xf32>
    %cst_154 = arith.constant dense<0.000000e+00> : vector<16x1024xf32>
    %211 = tpu.matmul %210, %208, %cst_154 {dimension_numbers = #tpu.dot_dimension_numbers<[1], [0], [0], [1], [0, 0, 1, 1], [], []>} : vector<16x16xf32>, vector<16x1024xf32>, vector<16x1024xf32> -> vector<16x1024xf32>
    %212 = arith.addf %203, %211 : vector<16x1024xf32>
    %c0_155 = arith.constant 0 : index
    %c128_156 = arith.constant 128 : index
    %213 = vector.load %arg9[%c0_155, %c128_156] : memref<16x1280xf32, #tpu.memory_space<vmem>>, vector<16x1024xf32>
    %c4_157 = arith.constant 4 : index
    %c0_158 = arith.constant 0 : index
    %c0_159 = arith.constant 0 : index
    %214 = vector.load %arg6[%c4_157, %c0_158, %c0_159] : memref<9x16x16xf32, #tpu.memory_space<vmem>>, vector<1x16x16xf32>
    %215 = vector.shape_cast %214 : vector<1x16x16xf32> to vector<16x16xf32>
    %cst_160 = arith.constant dense<0.000000e+00> : vector<16x1024xf32>
    %216 = tpu.matmul %215, %213, %cst_160 {dimension_numbers = #tpu.dot_dimension_numbers<[1], [0], [0], [1], [0, 0, 1, 1], [], []>} : vector<16x16xf32>, vector<16x1024xf32>, vector<16x1024xf32> -> vector<16x1024xf32>
    %217 = arith.addf %212, %216 : vector<16x1024xf32>
    %c0_161 = arith.constant 0 : index
    %c129_162 = arith.constant 129 : index
    %218 = vector.load %arg9[%c0_161, %c129_162] : memref<16x1280xf32, #tpu.memory_space<vmem>>, vector<16x1024xf32>
    %cst_163 = arith.constant 0.000000e+00 : f32
    %219 = vector.shape_cast %24 : vector<1x1024xi1> to vector<1x1024xi1>
    %220 = vector.broadcast %219 : vector<1x1024xi1> to vector<16x1024xi1>
    %221 = vector.broadcast %cst_163 : f32 to vector<16x1024xf32>
    %222 = arith.select %220, %218, %221 : vector<16x1024xi1>, vector<16x1024xf32>
    %c5_164 = arith.constant 5 : index
    %c0_165 = arith.constant 0 : index
    %c0_166 = arith.constant 0 : index
    %223 = vector.load %arg6[%c5_164, %c0_165, %c0_166] : memref<9x16x16xf32, #tpu.memory_space<vmem>>, vector<1x16x16xf32>
    %224 = vector.shape_cast %223 : vector<1x16x16xf32> to vector<16x16xf32>
    %cst_167 = arith.constant dense<0.000000e+00> : vector<16x1024xf32>
    %225 = tpu.matmul %224, %222, %cst_167 {dimension_numbers = #tpu.dot_dimension_numbers<[1], [0], [0], [1], [0, 0, 1, 1], [], []>} : vector<16x16xf32>, vector<16x1024xf32>, vector<16x1024xf32> -> vector<16x1024xf32>
    %226 = arith.addf %217, %225 : vector<16x1024xf32>
    %c0_168 = arith.constant 0 : index
    %c159_169 = arith.constant 159 : index
    %227 = vector.load %arg9[%c0_168, %c159_169] : memref<16x1280xf32, #tpu.memory_space<vmem>>, vector<16x1024xf32>
    %cst_170 = arith.constant 0.000000e+00 : f32
    %228 = vector.shape_cast %22 : vector<1x1024xi1> to vector<1x1024xi1>
    %229 = vector.broadcast %228 : vector<1x1024xi1> to vector<16x1024xi1>
    %230 = vector.broadcast %cst_170 : f32 to vector<16x1024xf32>
    %231 = arith.select %229, %227, %230 : vector<16x1024xi1>, vector<16x1024xf32>
    %c6_171 = arith.constant 6 : index
    %c0_172 = arith.constant 0 : index
    %c0_173 = arith.constant 0 : index
    %232 = vector.load %arg6[%c6_171, %c0_172, %c0_173] : memref<9x16x16xf32, #tpu.memory_space<vmem>>, vector<1x16x16xf32>
    %233 = vector.shape_cast %232 : vector<1x16x16xf32> to vector<16x16xf32>
    %cst_174 = arith.constant dense<0.000000e+00> : vector<16x1024xf32>
    %234 = tpu.matmul %233, %231, %cst_174 {dimension_numbers = #tpu.dot_dimension_numbers<[1], [0], [0], [1], [0, 0, 1, 1], [], []>} : vector<16x16xf32>, vector<16x1024xf32>, vector<16x1024xf32> -> vector<16x1024xf32>
    %235 = arith.addf %226, %234 : vector<16x1024xf32>
    %c0_175 = arith.constant 0 : index
    %c160_176 = arith.constant 160 : index
    %236 = vector.load %arg9[%c0_175, %c160_176] : memref<16x1280xf32, #tpu.memory_space<vmem>>, vector<16x1024xf32>
    %c7_177 = arith.constant 7 : index
    %c0_178 = arith.constant 0 : index
    %c0_179 = arith.constant 0 : index
    %237 = vector.load %arg6[%c7_177, %c0_178, %c0_179] : memref<9x16x16xf32, #tpu.memory_space<vmem>>, vector<1x16x16xf32>
    %238 = vector.shape_cast %237 : vector<1x16x16xf32> to vector<16x16xf32>
    %cst_180 = arith.constant dense<0.000000e+00> : vector<16x1024xf32>
    %239 = tpu.matmul %238, %236, %cst_180 {dimension_numbers = #tpu.dot_dimension_numbers<[1], [0], [0], [1], [0, 0, 1, 1], [], []>} : vector<16x16xf32>, vector<16x1024xf32>, vector<16x1024xf32> -> vector<16x1024xf32>
    %240 = arith.addf %235, %239 : vector<16x1024xf32>
    %c0_181 = arith.constant 0 : index
    %c161_182 = arith.constant 161 : index
    %241 = vector.load %arg9[%c0_181, %c161_182] : memref<16x1280xf32, #tpu.memory_space<vmem>>, vector<16x1024xf32>
    %cst_183 = arith.constant 0.000000e+00 : f32
    %242 = vector.shape_cast %24 : vector<1x1024xi1> to vector<1x1024xi1>
    %243 = vector.broadcast %242 : vector<1x1024xi1> to vector<16x1024xi1>
    %244 = vector.broadcast %cst_183 : f32 to vector<16x1024xf32>
    %245 = arith.select %243, %241, %244 : vector<16x1024xi1>, vector<16x1024xf32>
    %c8_184 = arith.constant 8 : index
    %c0_185 = arith.constant 0 : index
    %c0_186 = arith.constant 0 : index
    %246 = vector.load %arg6[%c8_184, %c0_185, %c0_186] : memref<9x16x16xf32, #tpu.memory_space<vmem>>, vector<1x16x16xf32>
    %247 = vector.shape_cast %246 : vector<1x16x16xf32> to vector<16x16xf32>
    %cst_187 = arith.constant dense<0.000000e+00> : vector<16x1024xf32>
    %248 = tpu.matmul %247, %245, %cst_187 {dimension_numbers = #tpu.dot_dimension_numbers<[1], [0], [0], [1], [0, 0, 1, 1], [], []>} : vector<16x16xf32>, vector<16x1024xf32>, vector<16x1024xf32> -> vector<16x1024xf32>
    %249 = arith.addf %240, %248 : vector<16x1024xf32>
    %c0_188 = arith.constant 0 : index
    %c0_189 = arith.constant 0 : index
    %250 = vector.load %arg7[%c0_188, %c0_189] : memref<16x1xf32, #tpu.memory_space<vmem>>, vector<16x1xf32>
    %251 = vector.broadcast %250 : vector<16x1xf32> to vector<16x1024xf32>
    %252 = arith.addf %249, %251 : vector<16x1024xf32>
    %cst_190 = arith.constant 0.000000e+00 : f32
    %253 = vector.broadcast %cst_190 : f32 to vector<16x1024xf32>
    %254 = arith.maximumf %252, %253 : vector<16x1024xf32>
    %255 = arith.truncf %254 : vector<16x1024xf32> to vector<16x1024xbf16>
    %c0_191 = arith.constant 0 : index
    %c0_192 = arith.constant 0 : index
    %c0_193 = arith.constant 0 : index
    %256 = vector.load %arg8[%c0_191, %c0_192, %c0_193] : memref<1x16x1024xbf16, #tpu.memory_space<vmem>>, vector<1x16x1024xbf16>
    %257 = vector.shape_cast %256 : vector<1x16x1024xbf16> to vector<16x1024xbf16>
    %258 = vector.shape_cast %255 : vector<16x1024xbf16> to vector<1x16x1024xbf16>
    tpu.vector_store %arg8[%c0_191, %c0_192, %c0_193], %258 {strides = array<i32>} : memref<1x16x1024xbf16, #tpu.memory_space<vmem>>, vector<1x16x1024xbf16>,
    return
  }
  func.func @transform_0(%arg0: i32) -> (i32, i32, i32) {
    %c0_i32 = arith.constant 0 : i32
    %c0_i32_0 = arith.constant 0 : i32
    %c0_i32_1 = arith.constant 0 : i32
    return %arg0, %c0_i32, %c0_i32_0 : i32, i32, i32
  }
  func.func @transform_1(%arg0: i32) -> (i32, i32, i32) {
    %c0_i32 = arith.constant 0 : i32
    %c0_i32_0 = arith.constant 0 : i32
    %c0_i32_1 = arith.constant 0 : i32
    %c0_i32_2 = arith.constant 0 : i32
    return %c0_i32, %c0_i32_0, %c0_i32_1 : i32, i32, i32
  }
  func.func @transform_2(%arg0: i32) -> (i32, i32) {
    %c0_i32 = arith.constant 0 : i32
    %c0_i32_0 = arith.constant 0 : i32
    %c0_i32_1 = arith.constant 0 : i32
    return %c0_i32, %c0_i32_0 : i32, i32
  }
  func.func @transform_3(%arg0: i32) -> (i32, i32, i32) {
    %c0_i32 = arith.constant 0 : i32
    %c0_i32_0 = arith.constant 0 : i32
    %c0_i32_1 = arith.constant 0 : i32
    %c0_i32_2 = arith.constant 0 : i32
    return %c0_i32, %c0_i32_0, %c0_i32_1 : i32, i32, i32
  }
  func.func @transform_4(%arg0: i32) -> (i32, i32) {
    %c0_i32 = arith.constant 0 : i32
    %c0_i32_0 = arith.constant 0 : i32
    %c0_i32_1 = arith.constant 0 : i32
    return %c0_i32, %c0_i32_0 : i32, i32
  }
  func.func @transform_5(%arg0: i32) -> (i32, i32, i32) {
    %c0_i32 = arith.constant 0 : i32
    %c0_i32_0 = arith.constant 0 : i32
    %c0_i32_1 = arith.constant 0 : i32
    %c0_i32_2 = arith.constant 0 : i32
    return %c0_i32, %c0_i32_0, %c0_i32_1 : i32, i32, i32
  }
  func.func @transform_6(%arg0: i32) -> (i32, i32) {
    %c0_i32 = arith.constant 0 : i32
    %c0_i32_0 = arith.constant 0 : i32
    %c0_i32_1 = arith.constant 0 : i32
    return %c0_i32, %c0_i32_0 : i32, i32
  }
  func.func @transform_7(%arg0: i32) -> (i32, i32, i32) {
    %c0_i32 = arith.constant 0 : i32
    %c0_i32_0 = arith.constant 0 : i32
    %c0_i32_1 = arith.constant 0 : i32
    return %arg0, %c0_i32, %c0_i32_0 : i32, i32, i32
  }
}

</mosaic_0001>

<bundles_post_ra>
// kernel: cifarnet4_forward.5
= control target key start
LH: loop header
LB: loop body
LE: loop exit
PB: predicated region body
PF: predicated region fallthrough
CT: control target
= control target key end

     0   :  { %v280_v36 = vlaneseq  ;;  %v3026_v37 = vmov 1966171168   ;;  %s4072_s0 = inlined_call_operand.vmem [shape: bf16[2,1024], index: 0, kind: input, shape index: {}]   ;;  %s4073_s1 = inlined_call_operand.vmem [shape: bf16[1024,512], index: 1, kind: input, shape index: {}]   ;;  %s4074_s2 = inlined_call_operand.vmem [shape: f32[1,512], index: 2, kind: input, shape index: {}]   ;;  %s4075_s3 = inlined_call_operand.vmem [shape: f32[512,128], index: 3, kind: input, shape index: {}]   ;;  %s4076_s4 = inlined_call_operand.vmem [shape: f32[1,128], index: 4, kind: input, shape index: {}]   ;;  %s4077_s5 = inlined_call_operand.hbm [shape: f32[2,128], index: 5, kind: output, shape index: {}]  }
   0x1   :  { %v2617_v0 = vld [vmem:[%s4073_s1 + $0x4] ss:$16 sps:$4 sm:$0xff]   ;;  %v2619_v1 = vld [vmem:[%s4073_s1 + $0xc] ss:$16 sps:$4 sm:$0xff]   ;;  %v2621_v2 = vld [vmem:[%s4073_s1] ss:$16 sps:$4 sm:$0xff]   ;;  %v303_v38 = vunpack.c.l.s4 %v3026_v37 }
   0x2   :  { %1638 = vmatprep.subr.bf16.mxu0 %v2617_v0  ;;  %v2622_v3 = vld [vmem:[%s4073_s1 + $0x8] ss:$16 sps:$4 sm:$0xff]   ;;  %1802 = vmatprep.subr.bf16.mxu1 %v2619_v1  ;;  %v2623_v4 = vld [vmem:[%s4073_s1 + $0x24] ss:$16 sps:$4 sm:$0xff]   ;;  %v2625_v5 = vld [vmem:[%s4073_s1 + $0x2c] ss:$16 sps:$4 sm:$0xff]  }
   0x3   :  { %1639 = vmatpush1.bf16.msra.mxu0 %v2621_v2  ;;  %1803 = vmatpush1.bf16.msra.mxu1 %v2622_v3  ;;  %v2627_v6 = vld [vmem:[%s4073_s1 + $0x20] ss:$16 sps:$4 sm:$0xff]   ;;  %v2628_v7 = vld [vmem:[%s4073_s1 + $0x28] ss:$16 sps:$4 sm:$0xff]   ;;  %v2629_v8 = vld [vmem:[%s4073_s1 + $0x44] ss:$16 sps:$4 sm:$0xff]   ;;  %v304_v43 = vunpack.c.0.s8 %v303_v38 }
   0x4   :  { %1640 = vmatprep.subr.bf16.mxu0 %v2623_v4  ;;  %1804 = vmatprep.subr.bf16.mxu1 %v2625_v5  ;;  %v2631_v9 = vld [vmem:[%s4073_s1 + $0x4c] ss:$16 sps:$4 sm:$0xff]   ;;  %v2633_v10 = vld [vmem:[%s4073_s1 + $0x40] ss:$16 sps:$4 sm:$0xff]   ;;  %v2634_v11 = vld [vmem:[%s4073_s1 + $0x48] ss:$16 sps:$4 sm:$0xff]  }
   0x5   :  { %v2635_v12 = vld [vmem:[%s4073_s1 + $0x64] ss:$16 sps:$4 sm:$0xff]   ;;  %v2637_v13 = vld [vmem:[%s4073_s1 + $0x6c] ss:$16 sps:$4 sm:$0xff]   ;;  %v2639_v14 = vld [vmem:[%s4073_s1 + $0x60] ss:$16 sps:$4 sm:$0xff]  }
   0x6   :  { %v2640_v15 = vld [vmem:[%s4073_s1 + $0x68] ss:$16 sps:$4 sm:$0xff]   ;;  %v2641_v16 = vld [vmem:[%s4073_s1 + $0x84] ss:$16 sps:$4 sm:$0xff]   ;;  %v2643_v17 = vld [vmem:[%s4073_s1 + $0x8c] ss:$16 sps:$4 sm:$0xff]  }
   0x7   :  { %1641 = vmatpush1.bf16.msra.mxu0 %v2627_v6  ;;  %1805 = vmatpush1.bf16.msra.mxu1 %v2628_v7  ;;  %v2645_v18 = vld [vmem:[%s4073_s1 + $0x80] ss:$16 sps:$4 sm:$0xff]   ;;  %v2646_v19 = vld [vmem:[%s4073_s1 + $0x88] ss:$16 sps:$4 sm:$0xff]   ;;  %v2647_v20 = vld [vmem:[%s4073_s1 + $0xa4] ss:$16 sps:$4 sm:$0xff]  }
   0x8   :  { %1642 = vmatprep.subr.bf16.mxu0 %v2629_v8  ;;  %1806 = vmatprep.subr.bf16.mxu1 %v2631_v9  ;;  %v2649_v21 = vld [vmem:[%s4073_s1 + $0xac] ss:$16 sps:$4 sm:$0xff]   ;;  %v2651_v22 = vld [vmem:[%s4073_s1 + $0xa0] ss:$16 sps:$4 sm:$0xff]   ;;  %v2652_v23 = vld [vmem:[%s4073_s1 + $0xa8] ss:$16 sps:$4 sm:$0xff]  }
   0x9   :  { %v2653_v24 = vld [vmem:[%s4073_s1 + $0xc4] ss:$16 sps:$4 sm:$0xff]   ;;  %v2655_v25 = vld [vmem:[%s4073_s1 + $0xcc] ss:$16 sps:$4 sm:$0xff]   ;;  %v2657_v26 = vld [vmem:[%s4073_s1 + $0xc0] ss:$16 sps:$4 sm:$0xff]  }
   0xa   :  { %v2658_v27 = vld [vmem:[%s4073_s1 + $0xc8] ss:$16 sps:$4 sm:$0xff]   ;;  %v2659_v28 = vld [vmem:[%s4073_s1 + $0xe4] ss:$16 sps:$4 sm:$0xff]   ;;  %v2661_v29 = vld [vmem:[%s4073_s1 + $0xec] ss:$16 sps:$4 sm:$0xff]  }
   0xb   :  { %1643 = vmatpush1.bf16.msra.mxu0 %v2633_v10  ;;  %1807 = vmatpush1.bf16.msra.mxu1 %v2634_v11  ;;  %v2663_v30 = vld [vmem:[%s4073_s1 + $0xe0] ss:$16 sps:$4 sm:$0xff]   ;;  %v2664_v31 = vld [vmem:[%s4073_s1 + $0xe8] ss:$16 sps:$4 sm:$0xff]   ;;  %v2665_v32 = vld [vmem:[%s4073_s1 + $0x104] ss:$16 sps:$4 sm:$0xff]  }
   0xc   :  { %1644 = vmatprep.subr.bf16.mxu0 %v2635_v12  ;;  %1808 = vmatprep.subr.bf16.mxu1 %v2637_v13  ;;  %v2667_v33 = vld [vmem:[%s4073_s1 + $0x10c] ss:$16 sps:$4 sm:$0xff]   ;;  %v2669_v34 = vld [vmem:[%s4073_s1 + $0x100] ss:$16 sps:$4 sm:$0xff]   ;;  %v2670_v35 = vld [vmem:[%s4073_s1 + $0x108] ss:$16 sps:$4 sm:$0xff]  }
   0xd   :  { %v2671_v39 = vld [vmem:[%s4073_s1 + $0x124] ss:$16 sps:$4 sm:$0xff]   ;;  %v2673_v40 = vld [vmem:[%s4073_s1 + $0x12c] ss:$16 sps:$4 sm:$0xff]   ;;  %v2675_v41 = vld [vmem:[%s4073_s1 + $0x120] ss:$16 sps:$4 sm:$0xff]  }
   0xe   :  { %v3175_v42 = vshrl.u32 %v280_v36, 7  ;;  %v2676_v44 = vld [vmem:[%s4073_s1 + $0x128] ss:$16 sps:$4 sm:$0xff]   ;;  %v2677_v45 = vld [vmem:[%s4073_s1 + $0x144] ss:$16 sps:$4 sm:$0xff]  }
   0xf   :  { %1645 = vmatpush1.bf16.msra.mxu0 %v2639_v14  ;;  %1809 = vmatpush1.bf16.msra.mxu1 %v2640_v15  ;;  %v2679_v46 = vld [vmem:[%s4073_s1 + $0x14c] ss:$16 sps:$4 sm:$0xff]   ;;  %v2681_v47 = vld [vmem:[%s4073_s1 + $0x140] ss:$16 sps:$4 sm:$0xff]   ;;  %v2682_v48 = vld [vmem:[%s4073_s1 + $0x148] ss:$16 sps:$4 sm:$0xff]  }
  0x10   :  { %1646 = vmatprep.subr.bf16.mxu0 %v2641_v16  ;;  %1810 = vmatprep.subr.bf16.mxu1 %v2643_v17  ;;  %v3193_v49 = vsub.s32 %v304_v43, %v3175_v42  ;;  %v2683_v50 = vld [vmem:[%s4073_s1 + $0x164] ss:$16 sps:$4 sm:$0xff]   ;;  %v2685_v51 = vld [vmem:[%s4073_s1 + $0x16c] ss:$16 sps:$4 sm:$0xff]   ;;  %v2687_v53 = vld [vmem:[%s4073_s1 + $0x160] ss:$16 sps:$4 sm:$0xff]  }
  0x11   :  { %v21_v52 = vld [vmem:[%s4072_s0] sm:$0xff]  ;;  %v2688_v55 = vld [vmem:[%s4073_s1 + $0x168] ss:$16 sps:$4 sm:$0xff]   ;;  %v2691_v57 = vld [vmem:[%s4073_s1 + $0x18c] ss:$16 sps:$4 sm:$0xff]  }
  0x12   :  { %v308_v54 = vrot.slane %v21_v52, %v3193_v49  ;;  %v2689_v56 = vld [vmem:[%s4073_s1 + $0x184] ss:$16 sps:$4 sm:$0xff]   ;;  %v2693_v59 = vld [vmem:[%s4073_s1 + $0x180] ss:$16 sps:$4 sm:$0xff]   ;;  %v2694_v61 = vld [vmem:[%s4073_s1 + $0x188] ss:$16 sps:$4 sm:$0xff]   ;;  %v301_v9 = vcombine.high %v21_v52, %v21_v52 }
  0x13   :  { %1647 = vmatpush1.bf16.msra.mxu0 %v2645_v18  ;;  %1811 = vmatpush1.bf16.msra.mxu1 %v2646_v19  ;;  %v2695_v62 = vld [vmem:[%s4073_s1 + $0x1a4] ss:$16 sps:$4 sm:$0xff]   ;;  %v2697_v63 = vld [vmem:[%s4073_s1 + $0x1ac] ss:$16 sps:$4 sm:$0xff]   ;;  %v2699_v0 = vld [vmem:[%s4073_s1 + $0x1a0] ss:$16 sps:$4 sm:$0xff]  }
  0x14   :  { %1648 = vmatprep.subr.bf16.mxu0 %v2647_v20  ;;  %1812 = vmatprep.subr.bf16.mxu1 %v2649_v21  ;;  %v316_v58 = vcombine.high %v308_v54, %v308_v54  ;;  %v2700_v1 = vld [vmem:[%s4073_s1 + $0x1a8] ss:$16 sps:$4 sm:$0xff]   ;;  %v2701_v2 = vld [vmem:[%s4073_s1 + $0x1c4] ss:$16 sps:$4 sm:$0xff]   ;;  %v2703_v3 = vld [vmem:[%s4073_s1 + $0x1cc] ss:$16 sps:$4 sm:$0xff]   ;;  %v315_v13 = vrot.slane %v301_v9, %v3193_v49  ;;  %v3271_v15 = vrot.slane %v308_v54, %v3193_v49 }
  0x15   :  { %v2705_v4 = vld [vmem:[%s4073_s1 + $0x1c0] ss:$16 sps:$4 sm:$0xff]   ;;  %v2706_v5 = vld [vmem:[%s4073_s1 + $0x1c8] ss:$16 sps:$4 sm:$0xff]   ;;  %v2707_v6 = vld [vmem:[%s4073_s1 + $0x1e4] ss:$16 sps:$4 sm:$0xff]  }
  0x16   :  { %v338_v60 = vrot.slane %v316_v58, %v3193_v49  ;;  %v2709_v7 = vld [vmem:[%s4073_s1 + $0x1ec] ss:$16 sps:$4 sm:$0xff]   ;;  %v2711_v8 = vld [vmem:[%s4073_s1 + $0x1e0] ss:$16 sps:$4 sm:$0xff]   ;;  %v2712_v10 = vld [vmem:[%s4073_s1 + $0x1e8] ss:$16 sps:$4 sm:$0xff]   ;;  %v317_v16 = vcombine.high %v315_v13, %v315_v13  ;;  %v3286_v21 = vrot.slane %v315_v13, %v3193_v49 }
  0x17   :  { %1649 = vmatpush1.bf16.msra.mxu0 %v2651_v22  ;;  %1813 = vmatpush1.bf16.msra.mxu1 %v2652_v23  ;;  %v2715_v11 = vld [vmem:[%s4073_s1 + $0x204] ss:$16 sps:$4 sm:$0xff]   ;;  %v2718_v12 = vld [vmem:[%s4073_s1 + $0x20c] ss:$16 sps:$4 sm:$0xff]   ;;  %v2713_v14 = vld [vmem:[%s4073_s1 + $0x200] ss:$16 sps:$4 sm:$0xff]  }
  0x18   :  { %1650 = vmatprep.subr.bf16.mxu0 %v2653_v24  ;;  %1814 = vmatprep.subr.bf16.mxu1 %v2655_v25  ;;  %v2716_v17 = vld [vmem:[%s4073_s1 + $0x208] ss:$16 sps:$4 sm:$0xff]   ;;  %v2721_v18 = vld [vmem:[%s4073_s1 + $0x224] ss:$16 sps:$4 sm:$0xff]   ;;  %v2724_v19 = vld [vmem:[%s4073_s1 + $0x22c] ss:$16 sps:$4 sm:$0xff]   ;;  %v3283_v20 = vrot.slane %v317_v16, %v3193_v49  ;;  %v348_v22 = vcombine.high %v338_v60, %v338_v60 }
  0x19   :  { %1670 = vmatprep.mubr.bf16.mxu0 %v338_v60  ;;  %1834 = vmatprep.mubr.bf16.mxu1 %v338_v60  ;;  %v2719_v23 = vld [vmem:[%s4073_s1 + $0x220] ss:$16 sps:$4 sm:$0xff]   ;;  %v2722_v24 = vld [vmem:[%s4073_s1 + $0x228] ss:$16 sps:$4 sm:$0xff]   ;;  %v2727_v25 = vld [vmem:[%s4073_s1 + $0x244] ss:$16 sps:$4 sm:$0xff]  }
  0x1a   :  { %v2740_v36 = vld [vmem:[%s4073_s1 + $0x288] ss:$16 sps:$4 sm:$0xff]   ;;  %v2745_v37 = vld [vmem:[%s4073_s1 + $0x2a4] ss:$16 sps:$4 sm:$0xff]   ;;  %v2748_v38 = vld [vmem:[%s4073_s1 + $0x2ac] ss:$16 sps:$4 sm:$0xff]  }
  0x1b   :  { %1651 = vmatpush1.bf16.msra.mxu0 %v2657_v26  ;;  %1815 = vmatpush1.bf16.msra.mxu1 %v2658_v27  ;;  %v2730_v26 = vld [vmem:[%s4073_s1 + $0x24c] ss:$16 sps:$4 sm:$0xff]   ;;  %v2725_v27 = vld [vmem:[%s4073_s1 + $0x240] ss:$16 sps:$4 sm:$0xff]   ;;  %v2758_v49 = vld [vmem:[%s4073_s1 + $0x2e8] ss:$16 sps:$4 sm:$0xff]  }
  0x1c   :  { %1652 = vmatprep.subr.bf16.mxu0 %v2659_v28  ;;  %1816 = vmatprep.subr.bf16.mxu1 %v2661_v29  ;;  %v2728_v28 = vld [vmem:[%s4073_s1 + $0x248] ss:$16 sps:$4 sm:$0xff]   ;;  %v2733_v29 = vld [vmem:[%s4073_s1 + $0x264] ss:$16 sps:$4 sm:$0xff]   ;;  %v2754_v43 = vld [vmem:[%s4073_s1 + $0x2cc] ss:$16 sps:$4 sm:$0xff]  }
  0x1d   :  { %v2761_v52 = vld [vmem:[%s4073_s1 + $0x300] ss:$16 sps:$4 sm:$0xff]   ;;  %v2769_v54 = vld [vmem:[%s4073_s1 + $0x324] ss:$16 sps:$4 sm:$0xff]   ;;  %v2794_v9 = vld [vmem:[%s4073_s1 + $0x3a8] ss:$16 sps:$4 sm:$0xff]  }
  0x1e   :  { %v2775_v58 = vld [vmem:[%s4073_s1 + $0x344] ss:$16 sps:$4 sm:$0xff]   ;;  %v2773_v60 = vld [vmem:[%s4073_s1 + $0x340] ss:$16 sps:$4 sm:$0xff]   ;;  %v2800_v13 = vld [vmem:[%s4073_s1 + $0x3c8] ss:$16 sps:$4 sm:$0xff]  }
  0x1f   :  { %1653 = vmatpush1.bf16.msra.mxu0 %v2663_v30  ;;  %1817 = vmatpush1.bf16.msra.mxu1 %v2664_v31  ;;  %v2736_v30 = vld [vmem:[%s4073_s1 + $0x26c] ss:$16 sps:$4 sm:$0xff]   ;;  %v2731_v31 = vld [vmem:[%s4073_s1 + $0x260] ss:$16 sps:$4 sm:$0xff]  }
  0x20   :  { %1654 = vmatprep.subr.bf16.mxu0 %v2665_v32  ;;  %1818 = vmatprep.subr.bf16.mxu1 %v2667_v33  ;;  %v2734_v32 = vld [vmem:[%s4073_s1 + $0x268] ss:$16 sps:$4 sm:$0xff]   ;;  %v2739_v33 = vld [vmem:[%s4073_s1 + $0x284] ss:$16 sps:$4 sm:$0xff]   ;;  %v2808_v16 = vld [vmem:[%s4073_s1 + $0x3ec] ss:$16 sps:$4 sm:$0xff]  }
  0x23   :  { %1655 = vmatpush1.bf16.msra.mxu0 %v2669_v34  ;;  %1819 = vmatpush1.bf16.msra.mxu1 %v2670_v35  ;;  %v2742_v34 = vld [vmem:[%s4073_s1 + $0x28c] ss:$16 sps:$4 sm:$0xff]   ;;  %v2737_v35 = vld [vmem:[%s4073_s1 + $0x280] ss:$16 sps:$4 sm:$0xff]  }
  0x24   :  { %1656 = vmatprep.subr.bf16.mxu0 %v2671_v39  ;;  %1820 = vmatprep.subr.bf16.mxu1 %v2673_v40  ;;  %v2743_v39 = vld [vmem:[%s4073_s1 + $0x2a0] ss:$16 sps:$4 sm:$0xff]   ;;  %v2746_v40 = vld [vmem:[%s4073_s1 + $0x2a8] ss:$16 sps:$4 sm:$0xff]  }
  0x27   :  { %1657 = vmatpush1.bf16.msra.mxu0 %v2675_v41  ;;  %1821 = vmatpush1.bf16.msra.mxu1 %v2676_v44  ;;  %v2751_v41 = vld [vmem:[%s4073_s1 + $0x2c4] ss:$16 sps:$4 sm:$0xff]   ;;  %v2749_v44 = vld [vmem:[%s4073_s1 + $0x2c0] ss:$16 sps:$4 sm:$0xff]  }
  0x28   :  { %1658 = vmatprep.subr.bf16.mxu0 %v2677_v45  ;;  %1822 = vmatprep.subr.bf16.mxu1 %v2679_v46  ;;  %v2752_v45 = vld [vmem:[%s4073_s1 + $0x2c8] ss:$16 sps:$4 sm:$0xff]   ;;  %v2757_v46 = vld [vmem:[%s4073_s1 + $0x2e4] ss:$16 sps:$4 sm:$0xff]  }
  0x2b   :  { %1659 = vmatpush1.bf16.msra.mxu0 %v2681_v47  ;;  %1823 = vmatpush1.bf16.msra.mxu1 %v2682_v48  ;;  %v2760_v47 = vld [vmem:[%s4073_s1 + $0x2ec] ss:$16 sps:$4 sm:$0xff]   ;;  %v2755_v48 = vld [vmem:[%s4073_s1 + $0x2e0] ss:$16 sps:$4 sm:$0xff]  }
  0x2c   :  { %1660 = vmatprep.subr.bf16.mxu0 %v2683_v50  ;;  %1824 = vmatprep.subr.bf16.mxu1 %v2685_v51  ;;  %v2763_v50 = vld [vmem:[%s4073_s1 + $0x304] ss:$16 sps:$4 sm:$0xff]   ;;  %v2766_v51 = vld [vmem:[%s4073_s1 + $0x30c] ss:$16 sps:$4 sm:$0xff]  }
  0x2f   :  { %1661 = vmatpush1.bf16.msra.mxu0 %v2687_v53  ;;  %1825 = vmatpush1.bf16.msra.mxu1 %v2688_v55  ;;  %v2764_v53 = vld [vmem:[%s4073_s1 + $0x308] ss:$16 sps:$4 sm:$0xff]   ;;  %v2772_v55 = vld [vmem:[%s4073_s1 + $0x32c] ss:$16 sps:$4 sm:$0xff]  }
  0x30   :  { %1662 = vmatprep.subr.bf16.mxu0 %v2689_v56  ;;  %1826 = vmatprep.subr.bf16.mxu1 %v2691_v57  ;;  %v2767_v56 = vld [vmem:[%s4073_s1 + $0x320] ss:$16 sps:$4 sm:$0xff]   ;;  %v2770_v57 = vld [vmem:[%s4073_s1 + $0x328] ss:$16 sps:$4 sm:$0xff]  }
  0x33   :  { %1663 = vmatpush1.bf16.msra.mxu0 %v2693_v59  ;;  %1827 = vmatpush1.bf16.msra.mxu1 %v2694_v61  ;;  %v2778_v59 = vld [vmem:[%s4073_s1 + $0x34c] ss:$16 sps:$4 sm:$0xff]   ;;  %v2776_v61 = vld [vmem:[%s4073_s1 + $0x348] ss:$16 sps:$4 sm:$0xff]  }
  0x34   :  { %1664 = vmatprep.subr.bf16.mxu0 %v2695_v62  ;;  %1828 = vmatprep.subr.bf16.mxu1 %v2697_v63  ;;  %v2781_v62 = vld [vmem:[%s4073_s1 + $0x364] ss:$16 sps:$4 sm:$0xff]   ;;  %v2784_v63 = vld [vmem:[%s4073_s1 + $0x36c] ss:$16 sps:$4 sm:$0xff]  }
  0x37   :  { %1665 = vmatpush1.bf16.msra.mxu0 %v2699_v0  ;;  %1829 = vmatpush1.bf16.msra.mxu1 %v2700_v1  ;;  %v2779_v0 = vld [vmem:[%s4073_s1 + $0x360] ss:$16 sps:$4 sm:$0xff]   ;;  %v2782_v1 = vld [vmem:[%s4073_s1 + $0x368] ss:$16 sps:$4 sm:$0xff]  }
  0x38   :  { %1666 = vmatprep.subr.bf16.mxu0 %v2701_v2  ;;  %1830 = vmatprep.subr.bf16.mxu1 %v2703_v3  ;;  %v2787_v2 = vld [vmem:[%s4073_s1 + $0x384] ss:$16 sps:$4 sm:$0xff]   ;;  %v2790_v3 = vld [vmem:[%s4073_s1 + $0x38c] ss:$16 sps:$4 sm:$0xff]  }
  0x3b   :  { %1667 = vmatpush1.bf16.msra.mxu0 %v2705_v4  ;;  %1831 = vmatpush1.bf16.msra.mxu1 %v2706_v5  ;;  %v2785_v4 = vld [vmem:[%s4073_s1 + $0x380] ss:$16 sps:$4 sm:$0xff]   ;;  %v2788_v5 = vld [vmem:[%s4073_s1 + $0x388] ss:$16 sps:$4 sm:$0xff]  }
  0x3c   :  { %1668 = vmatprep.subr.bf16.mxu0 %v2707_v6  ;;  %1832 = vmatprep.subr.bf16.mxu1 %v2709_v7  ;;  %v2793_v6 = vld [vmem:[%s4073_s1 + $0x3a4] ss:$16 sps:$4 sm:$0xff]   ;;  %v2796_v7 = vld [vmem:[%s4073_s1 + $0x3ac] ss:$16 sps:$4 sm:$0xff]  }
  0x3f   :  { %1669 = vmatpush1.bf16.msra.mxu0 %v2711_v8  ;;  %1833 = vmatpush1.bf16.msra.mxu1 %v2712_v10  ;;  %v2791_v8 = vld [vmem:[%s4073_s1 + $0x3a0] ss:$16 sps:$4 sm:$0xff]   ;;  %v2799_v10 = vld [vmem:[%s4073_s1 + $0x3c4] ss:$16 sps:$4 sm:$0xff]  }
  0x40   :  { %1679 = vmatprep.subr.bf16.mxu0 %v2715_v11  ;;  %1843 = vmatprep.subr.bf16.mxu1 %v2718_v12  ;;  %v2802_v11 = vld [vmem:[%s4073_s1 + $0x3cc] ss:$16 sps:$4 sm:$0xff]   ;;  %v2797_v12 = vld [vmem:[%s4073_s1 + $0x3c0] ss:$16 sps:$4 sm:$0xff]  }
  0x42   :  { %1671 = vmatmul.mubr.bf16.vlgmr.msra.gmra.mrb[0].mxu0 %v3271_v15  ;;  %1835 = vmatmul.mubr.bf16.vlgmr.msra.gmra.mrb[0].mxu1 %v3271_v15 }
  0x43   :  { %1680 = vmatpush1.bf16.msra.mxu0 %v2713_v14  ;;  %1844 = vmatpush1.bf16.msra.mxu1 %v2716_v17  ;;  %v2805_v14 = vld [vmem:[%s4073_s1 + $0x3e4] ss:$16 sps:$4 sm:$0xff]   ;;  %v2803_v17 = vld [vmem:[%s4073_s1 + $0x3e0] ss:$16 sps:$4 sm:$0xff]  }
  0x44   :  { %1681 = vmatprep.subr.bf16.mxu0 %v2721_v18  ;;  %1845 = vmatprep.subr.bf16.mxu1 %v2724_v19  ;;  %v2806_v18 = vld [vmem:[%s4073_s1 + $0x3e8] ss:$16 sps:$4 sm:$0xff]   ;;  %v2811_v19 = vld [vmem:[%s4073_s1 + $0x404] ss:$16 sps:$4 sm:$0xff]  }
  0x45   :  { %1711 = vmatprep.mubr.bf16.mxu0 %v348_v22  ;;  %1875 = vmatprep.mubr.bf16.mxu1 %v348_v22  ;;  %v2814_v22 = vld [vmem:[%s4073_s1 + $0x40c] ss:$16 sps:$4 sm:$0xff]  }
  0x47   :  { %1682 = vmatpush1.bf16.msra.mxu0 %v2719_v23  ;;  %1846 = vmatpush1.bf16.msra.mxu1 %v2722_v24  ;;  %v2809_v23 = vld [vmem:[%s4073_s1 + $0x400] ss:$16 sps:$4 sm:$0xff]   ;;  %v346_v24 = vcombine.high %v3271_v15, %v3271_v15 }
  0x48   :  { %1683 = vmatprep.subr.bf16.mxu0 %v2727_v25  ;;  %1847 = vmatprep.subr.bf16.mxu1 %v2730_v26  ;;  %v2812_v25 = vld [vmem:[%s4073_s1 + $0x408] ss:$16 sps:$4 sm:$0xff]   ;;  %v2817_v26 = vld [vmem:[%s4073_s1 + $0x424] ss:$16 sps:$4 sm:$0xff]   ;;  %v2815_v15 = vld [vmem:[%s4073_s1 + $0x420] ss:$16 sps:$4 sm:$0xff]  }
  0x4b   :  { %1684 = vmatpush1.bf16.msra.mxu0 %v2725_v27  ;;  %1848 = vmatpush1.bf16.msra.mxu1 %v2728_v28  ;;  %v2820_v27 = vld [vmem:[%s4073_s1 + $0x42c] ss:$16 sps:$4 sm:$0xff]   ;;  %v2818_v28 = vld [vmem:[%s4073_s1 + $0x428] ss:$16 sps:$4 sm:$0xff]  }
  0x4c   :  { %1685 = vmatprep.subr.bf16.mxu0 %v2733_v29  ;;  %1849 = vmatprep.subr.bf16.mxu1 %v2736_v30  ;;  %v2823_v29 = vld [vmem:[%s4073_s1 + $0x444] ss:$16 sps:$4 sm:$0xff]   ;;  %v2826_v30 = vld [vmem:[%s4073_s1 + $0x44c] ss:$16 sps:$4 sm:$0xff]  }
  0x4f   :  { %1686 = vmatpush1.bf16.msra.mxu0 %v2731_v31  ;;  %1850 = vmatpush1.bf16.msra.mxu1 %v2734_v32  ;;  %v2821_v31 = vld [vmem:[%s4073_s1 + $0x440] ss:$16 sps:$4 sm:$0xff]   ;;  %v2824_v32 = vld [vmem:[%s4073_s1 + $0x448] ss:$16 sps:$4 sm:$0xff]  }
  0x50   :  { %1687 = vmatprep.subr.bf16.mxu0 %v2739_v33  ;;  %1851 = vmatprep.subr.bf16.mxu1 %v2742_v34  ;;  %v2829_v33 = vld [vmem:[%s4073_s1 + $0x464] ss:$16 sps:$4 sm:$0xff]   ;;  %v2832_v34 = vld [vmem:[%s4073_s1 + $0x46c] ss:$16 sps:$4 sm:$0xff]  }
  0x53   :  { %1688 = vmatpush1.bf16.msra.mxu0 %v2737_v35  ;;  %1852 = vmatpush1.bf16.msra.mxu1 %v2740_v36  ;;  %v2827_v35 = vld [vmem:[%s4073_s1 + $0x460] ss:$16 sps:$4 sm:$0xff]   ;;  %v2830_v36 = vld [vmem:[%s4073_s1 + $0x468] ss:$16 sps:$4 sm:$0xff]  }
  0x54   :  { %1689 = vmatprep.subr.bf16.mxu0 %v2745_v37  ;;  %1853 = vmatprep.subr.bf16.mxu1 %v2748_v38  ;;  %v2835_v37 = vld [vmem:[%s4073_s1 + $0x484] ss:$16 sps:$4 sm:$0xff]   ;;  %v2838_v38 = vld [vmem:[%s4073_s1 + $0x48c] ss:$16 sps:$4 sm:$0xff]  }
  0x57   :  { %1690 = vmatpush1.bf16.msra.mxu0 %v2743_v39  ;;  %1854 = vmatpush1.bf16.msra.mxu1 %v2746_v40  ;;  %v2833_v39 = vld [vmem:[%s4073_s1 + $0x480] ss:$16 sps:$4 sm:$0xff]   ;;  %v2836_v40 = vld [vmem:[%s4073_s1 + $0x488] ss:$16 sps:$4 sm:$0xff]  }
  0x58   :  { %1691 = vmatprep.subr.bf16.mxu0 %v2751_v41  ;;  %1855 = vmatprep.subr.bf16.mxu1 %v2754_v43  ;;  %v2841_v41 = vld [vmem:[%s4073_s1 + $0x4a4] ss:$16 sps:$4 sm:$0xff]   ;;  %v2844_v43 = vld [vmem:[%s4073_s1 + $0x4ac] ss:$16 sps:$4 sm:$0xff]  }
  0x5b   :  { %1692 = vmatpush1.bf16.msra.mxu0 %v2749_v44  ;;  %1856 = vmatpush1.bf16.msra.mxu1 %v2752_v45  ;;  %v2839_v44 = vld [vmem:[%s4073_s1 + $0x4a0] ss:$16 sps:$4 sm:$0xff]   ;;  %v2842_v45 = vld [vmem:[%s4073_s1 + $0x4a8] ss:$16 sps:$4 sm:$0xff]  }
  0x5c   :  { %1693 = vmatprep.subr.bf16.mxu0 %v2757_v46  ;;  %1857 = vmatprep.subr.bf16.mxu1 %v2760_v47  ;;  %v2847_v46 = vld [vmem:[%s4073_s1 + $0x4c4] ss:$16 sps:$4 sm:$0xff]   ;;  %v2850_v47 = vld [vmem:[%s4073_s1 + $0x4cc] ss:$16 sps:$4 sm:$0xff]  }
  0x5f   :  { %1694 = vmatpush1.bf16.msra.mxu0 %v2755_v48  ;;  %1858 = vmatpush1.bf16.msra.mxu1 %v2758_v49  ;;  %v2845_v48 = vld [vmem:[%s4073_s1 + $0x4c0] ss:$16 sps:$4 sm:$0xff]   ;;  %v2848_v49 = vld [vmem:[%s4073_s1 + $0x4c8] ss:$16 sps:$4 sm:$0xff]  }
  0x60   :  { %1695 = vmatprep.subr.bf16.mxu0 %v2763_v50  ;;  %1859 = vmatprep.subr.bf16.mxu1 %v2766_v51  ;;  %v2853_v50 = vld [vmem:[%s4073_s1 + $0x4e4] ss:$16 sps:$4 sm:$0xff]   ;;  %v2856_v51 = vld [vmem:[%s4073_s1 + $0x4ec] ss:$16 sps:$4 sm:$0xff]  }
  0x63   :  { %1696 = vmatpush1.bf16.msra.mxu0 %v2761_v52  ;;  %1860 = vmatpush1.bf16.msra.mxu1 %v2764_v53  ;;  %v2851_v52 = vld [vmem:[%s4073_s1 + $0x4e0] ss:$16 sps:$4 sm:$0xff]   ;;  %v2854_v53 = vld [vmem:[%s4073_s1 + $0x4e8] ss:$16 sps:$4 sm:$0xff]  }
  0x64   :  { %1697 = vmatprep.subr.bf16.mxu0 %v2769_v54  ;;  %1861 = vmatprep.subr.bf16.mxu1 %v2772_v55  ;;  %v2859_v54 = vld [vmem:[%s4073_s1 + $0x504] ss:$16 sps:$4 sm:$0xff]   ;;  %v2862_v55 = vld [vmem:[%s4073_s1 + $0x50c] ss:$16 sps:$4 sm:$0xff]  }
  0x67   :  { %1698 = vmatpush1.bf16.msra.mxu0 %v2767_v56  ;;  %1862 = vmatpush1.bf16.msra.mxu1 %v2770_v57  ;;  %v2857_v56 = vld [vmem:[%s4073_s1 + $0x500] ss:$16 sps:$4 sm:$0xff]   ;;  %v2860_v57 = vld [vmem:[%s4073_s1 + $0x508] ss:$16 sps:$4 sm:$0xff]  }
  0x68   :  { %1699 = vmatprep.subr.bf16.mxu0 %v2775_v58  ;;  %1863 = vmatprep.subr.bf16.mxu1 %v2778_v59  ;;  %v2865_v58 = vld [vmem:[%s4073_s1 + $0x524] ss:$16 sps:$4 sm:$0xff]   ;;  %v2868_v59 = vld [vmem:[%s4073_s1 + $0x52c] ss:$16 sps:$4 sm:$0xff]  }
  0x6b   :  { %1700 = vmatpush1.bf16.msra.mxu0 %v2773_v60  ;;  %1864 = vmatpush1.bf16.msra.mxu1 %v2776_v61  ;;  %v2863_v60 = vld [vmem:[%s4073_s1 + $0x520] ss:$16 sps:$4 sm:$0xff]   ;;  %v2866_v61 = vld [vmem:[%s4073_s1 + $0x528] ss:$16 sps:$4 sm:$0xff]  }
  0x6c   :  { %1701 = vmatprep.subr.bf16.mxu0 %v2781_v62  ;;  %1865 = vmatprep.subr.bf16.mxu1 %v2784_v63  ;;  %v2871_v62 = vld [vmem:[%s4073_s1 + $0x544] ss:$16 sps:$4 sm:$0xff]   ;;  %v2874_v63 = vld [vmem:[%s4073_s1 + $0x54c] ss:$16 sps:$4 sm:$0xff]  }
  0x6f   :  { %1702 = vmatpush1.bf16.msra.mxu0 %v2779_v0  ;;  %1866 = vmatpush1.bf16.msra.mxu1 %v2782_v1  ;;  %v2869_v0 = vld [vmem:[%s4073_s1 + $0x540] ss:$16 sps:$4 sm:$0xff]   ;;  %v2872_v1 = vld [vmem:[%s4073_s1 + $0x548] ss:$16 sps:$4 sm:$0xff]  }
  0x70   :  { %1703 = vmatprep.subr.bf16.mxu0 %v2787_v2  ;;  %1867 = vmatprep.subr.bf16.mxu1 %v2790_v3  ;;  %v2877_v2 = vld [vmem:[%s4073_s1 + $0x564] ss:$16 sps:$4 sm:$0xff]   ;;  %v2880_v3 = vld [vmem:[%s4073_s1 + $0x56c] ss:$16 sps:$4 sm:$0xff]  }
  0x73   :  { %1704 = vmatpush1.bf16.msra.mxu0 %v2785_v4  ;;  %1868 = vmatpush1.bf16.msra.mxu1 %v2788_v5  ;;  %v2875_v4 = vld [vmem:[%s4073_s1 + $0x560] ss:$16 sps:$4 sm:$0xff]   ;;  %v2878_v5 = vld [vmem:[%s4073_s1 + $0x568] ss:$16 sps:$4 sm:$0xff]  }
  0x74   :  { %1705 = vmatprep.subr.bf16.mxu0 %v2793_v6  ;;  %1869 = vmatprep.subr.bf16.mxu1 %v2796_v7  ;;  %v2883_v6 = vld [vmem:[%s4073_s1 + $0x584] ss:$16 sps:$4 sm:$0xff]   ;;  %v2886_v7 = vld [vmem:[%s4073_s1 + $0x58c] ss:$16 sps:$4 sm:$0xff]  }
  0x77   :  { %1706 = vmatpush1.bf16.msra.mxu0 %v2791_v8  ;;  %1870 = vmatpush1.bf16.msra.mxu1 %v2794_v9  ;;  %v2881_v8 = vld [vmem:[%s4073_s1 + $0x580] ss:$16 sps:$4 sm:$0xff]   ;;  %v2884_v9 = vld [vmem:[%s4073_s1 + $0x588] ss:$16 sps:$4 sm:$0xff]  }
  0x78   :  { %1707 = vmatprep.subr.bf16.mxu0 %v2799_v10  ;;  %1871 = vmatprep.subr.bf16.mxu1 %v2802_v11  ;;  %v2889_v10 = vld [vmem:[%s4073_s1 + $0x5a4] ss:$16 sps:$4 sm:$0xff]   ;;  %v2892_v11 = vld [vmem:[%s4073_s1 + $0x5ac] ss:$16 sps:$4 sm:$0xff]  }
  0x7b   :  { %1708 = vmatpush1.bf16.msra.mxu0 %v2797_v12  ;;  %1872 = vmatpush1.bf16.msra.mxu1 %v2800_v13  ;;  %v2887_v12 = vld [vmem:[%s4073_s1 + $0x5a0] ss:$16 sps:$4 sm:$0xff]   ;;  %v2890_v13 = vld [vmem:[%s4073_s1 + $0x5a8] ss:$16 sps:$4 sm:$0xff]  }
  0x7c   :  { %1709 = vmatprep.subr.bf16.mxu0 %v2805_v14  ;;  %1873 = vmatprep.subr.bf16.mxu1 %v2808_v16  ;;  %v2895_v14 = vld [vmem:[%s4073_s1 + $0x5c4] ss:$16 sps:$4 sm:$0xff]   ;;  %v2898_v16 = vld [vmem:[%s4073_s1 + $0x5cc] ss:$16 sps:$4 sm:$0xff]  }
  0x7f   :  { %1710 = vmatpush1.bf16.msra.mxu0 %v2803_v17  ;;  %1874 = vmatpush1.bf16.msra.mxu1 %v2806_v18  ;;  %v2893_v17 = vld [vmem:[%s4073_s1 + $0x5c0] ss:$16 sps:$4 sm:$0xff]   ;;  %v2896_v18 = vld [vmem:[%s4073_s1 + $0x5c8] ss:$16 sps:$4 sm:$0xff]  }
  0x80   :  { %1720 = vmatprep.subr.bf16.mxu0 %v2811_v19  ;;  %1884 = vmatprep.subr.bf16.mxu1 %v2814_v22  ;;  %v2901_v19 = vld [vmem:[%s4073_s1 + $0x5e4] ss:$16 sps:$4 sm:$0xff]   ;;  %v2904_v22 = vld [vmem:[%s4073_s1 + $0x5ec] ss:$16 sps:$4 sm:$0xff]  }
  0x82   :  { %1712 = vmatmul.mubr.bf16.vlgmr.msra.gmra.mrb[0].mxu0 %v346_v24  ;;  %1876 = vmatmul.mubr.bf16.vlgmr.msra.gmra.mrb[0].mxu1 %v346_v24  ;;  %v2902_v24 = vld [vmem:[%s4073_s1 + $0x5e8] ss:$16 sps:$4 sm:$0xff]  }
  0x83   :  { %1721 = vmatpush1.bf16.msra.mxu0 %v2809_v23  ;;  %1885 = vmatpush1.bf16.msra.mxu1 %v2812_v25  ;;  %v2899_v23 = vld [vmem:[%s4073_s1 + $0x5e0] ss:$16 sps:$4 sm:$0xff]  }
  0x84   :  { %1722 = vmatprep.subr.bf16.mxu0 %v2817_v26  ;;  %1886 = vmatprep.subr.bf16.mxu1 %v2820_v27 }
  0x85   :  { %1752 = vmatprep.mubr.bf16.mxu0 %v3283_v20  ;;  %1916 = vmatprep.mubr.bf16.mxu1 %v3283_v20 }
  0x87   :  { %1723 = vmatpush1.bf16.msra.mxu0 %v2815_v15  ;;  %1887 = vmatpush1.bf16.msra.mxu1 %v2818_v28 }
  0x88   :  { %1724 = vmatprep.subr.bf16.mxu0 %v2823_v29  ;;  %1888 = vmatprep.subr.bf16.mxu1 %v2826_v30 }
  0x8b   :  { %1725 = vmatpush1.bf16.msra.mxu0 %v2821_v31  ;;  %1889 = vmatpush1.bf16.msra.mxu1 %v2824_v32 }
  0x8c   :  { %1726 = vmatprep.subr.bf16.mxu0 %v2829_v33  ;;  %1890 = vmatprep.subr.bf16.mxu1 %v2832_v34 }
  0x8f   :  { %1727 = vmatpush1.bf16.msra.mxu0 %v2827_v35  ;;  %1891 = vmatpush1.bf16.msra.mxu1 %v2830_v36 }
  0x90   :  { %1728 = vmatprep.subr.bf16.mxu0 %v2835_v37  ;;  %1892 = vmatprep.subr.bf16.mxu1 %v2838_v38 }
  0x93   :  { %1729 = vmatpush1.bf16.msra.mxu0 %v2833_v39  ;;  %1893 = vmatpush1.bf16.msra.mxu1 %v2836_v40 }
  0x94   :  { %1730 = vmatprep.subr.bf16.mxu0 %v2841_v41  ;;  %1894 = vmatprep.subr.bf16.mxu1 %v2844_v43 }
  0x97   :  { %1731 = vmatpush1.bf16.msra.mxu0 %v2839_v44  ;;  %1895 = vmatpush1.bf16.msra.mxu1 %v2842_v45 }
  0x98   :  { %1732 = vmatprep.subr.bf16.mxu0 %v2847_v46  ;;  %1896 = vmatprep.subr.bf16.mxu1 %v2850_v47 }
  0x9b   :  { %1733 = vmatpush1.bf16.msra.mxu0 %v2845_v48  ;;  %1897 = vmatpush1.bf16.msra.mxu1 %v2848_v49 }
  0x9c   :  { %1734 = vmatprep.subr.bf16.mxu0 %v2853_v50  ;;  %1898 = vmatprep.subr.bf16.mxu1 %v2856_v51 }
  0x9f   :  { %1735 = vmatpush1.bf16.msra.mxu0 %v2851_v52  ;;  %1899 = vmatpush1.bf16.msra.mxu1 %v2854_v53 }
  0xa0   :  { %1736 = vmatprep.subr.bf16.mxu0 %v2859_v54  ;;  %1900 = vmatprep.subr.bf16.mxu1 %v2862_v55 }
  0xa3   :  { %1737 = vmatpush1.bf16.msra.mxu0 %v2857_v56  ;;  %1901 = vmatpush1.bf16.msra.mxu1 %v2860_v57 }
  0xa4   :  { %1738 = vmatprep.subr.bf16.mxu0 %v2865_v58  ;;  %1902 = vmatprep.subr.bf16.mxu1 %v2868_v59 }
  0xa7   :  { %1739 = vmatpush1.bf16.msra.mxu0 %v2863_v60  ;;  %1903 = vmatpush1.bf16.msra.mxu1 %v2866_v61 }
  0xa8   :  { %1740 = vmatprep.subr.bf16.mxu0 %v2871_v62  ;;  %1904 = vmatprep.subr.bf16.mxu1 %v2874_v63 }
  0xab   :  { %1741 = vmatpush1.bf16.msra.mxu0 %v2869_v0  ;;  %1905 = vmatpush1.bf16.msra.mxu1 %v2872_v1 }
  0xac   :  { %1742 = vmatprep.subr.bf16.mxu0 %v2877_v2  ;;  %1906 = vmatprep.subr.bf16.mxu1 %v2880_v3 }
  0xaf   :  { %1743 = vmatpush1.bf16.msra.mxu0 %v2875_v4  ;;  %1907 = vmatpush1.bf16.msra.mxu1 %v2878_v5 }
  0xb0   :  { %1744 = vmatprep.subr.bf16.mxu0 %v2883_v6  ;;  %1908 = vmatprep.subr.bf16.mxu1 %v2886_v7 }
  0xb3   :  { %1745 = vmatpush1.bf16.msra.mxu0 %v2881_v8  ;;  %1909 = vmatpush1.bf16.msra.mxu1 %v2884_v9 }
  0xb4   :  { %1746 = vmatprep.subr.bf16.mxu0 %v2889_v10  ;;  %1910 = vmatprep.subr.bf16.mxu1 %v2892_v11 }
  0xb7   :  { %1747 = vmatpush1.bf16.msra.mxu0 %v2887_v12  ;;  %1911 = vmatpush1.bf16.msra.mxu1 %v2890_v13 }
  0xb8   :  { %1748 = vmatprep.subr.bf16.mxu0 %v2895_v14  ;;  %1912 = vmatprep.subr.bf16.mxu1 %v2898_v16 }
  0xbb   :  { %1749 = vmatpush1.bf16.msra.mxu0 %v2893_v17  ;;  %1913 = vmatpush1.bf16.msra.mxu1 %v2896_v18 }
  0xbc   :  { %10 = vsyncpa [#allocation3], 0  ;;  %1750 = vmatprep.subr.bf16.mxu0 %v2901_v19  ;;  %1914 = vmatprep.subr.bf16.mxu1 %v2904_v22  ;;  %v2908_v25 = vld [vmem:[%s4073_s1 + $0x604] ss:$16 sps:$4 sm:$0xff]   ;;  %v2911_v26 = vld [vmem:[%s4073_s1 + $0x60c] ss:$16 sps:$4 sm:$0xff]   ;;  %v349_v30 = vcombine.high %v3283_v20, %v3283_v20 }
  0xbd   :  { %v2906_v27 = vld [vmem:[%s4073_s1 + $0x600] ss:$16 sps:$4 sm:$0xff]   ;;  %v2909_v15 = vld [vmem:[%s4073_s1 + $0x608] ss:$16 sps:$4 sm:$0xff]   ;;  %v2914_v28 = vld [vmem:[%s4073_s1 + $0x624] ss:$16 sps:$4 sm:$0xff]  }
  0xbe   :  { %v2917_v29 = vld [vmem:[%s4073_s1 + $0x62c] ss:$16 sps:$4 sm:$0xff]   ;;  %v2912_v31 = vld [vmem:[%s4073_s1 + $0x620] ss:$16 sps:$4 sm:$0xff]   ;;  %v2915_v32 = vld [vmem:[%s4073_s1 + $0x628] ss:$16 sps:$4 sm:$0xff]  }
  0xbf   :  { %1751 = vmatpush1.bf16.msra.mxu0 %v2899_v23  ;;  %1915 = vmatpush1.bf16.msra.mxu1 %v2902_v24  ;;  %v2920_v20 = vld [vmem:[%s4073_s1 + $0x644] ss:$16 sps:$4 sm:$0xff]   ;;  %v2923_v33 = vld [vmem:[%s4073_s1 + $0x64c] ss:$16 sps:$4 sm:$0xff]   ;;  %v2918_v34 = vld [vmem:[%s4073_s1 + $0x640] ss:$16 sps:$4 sm:$0xff]  }
  0xc0   :  { %1761 = vmatprep.subr.bf16.mxu0 %v2908_v25  ;;  %1925 = vmatprep.subr.bf16.mxu1 %v2911_v26  ;;  %v2921_v35 = vld [vmem:[%s4073_s1 + $0x648] ss:$16 sps:$4 sm:$0xff]   ;;  %v2926_v36 = vld [vmem:[%s4073_s1 + $0x664] ss:$16 sps:$4 sm:$0xff]   ;;  %v2929_v37 = vld [vmem:[%s4073_s1 + $0x66c] ss:$16 sps:$4 sm:$0xff]  }
  0xc1   :  { %v2924_v38 = vld [vmem:[%s4073_s1 + $0x660] ss:$16 sps:$4 sm:$0xff]   ;;  %v2927_v39 = vld [vmem:[%s4073_s1 + $0x668] ss:$16 sps:$4 sm:$0xff]   ;;  %v2932_v40 = vld [vmem:[%s4073_s1 + $0x684] ss:$16 sps:$4 sm:$0xff]  }
  0xc2   :  { %1753 = vmatmul.mubr.bf16.vlgmr.msra.gmra.mrb[0].mxu0 %v3286_v21  ;;  %1917 = vmatmul.mubr.bf16.vlgmr.msra.gmra.mrb[0].mxu1 %v3286_v21  ;;  %v2935_v41 = vld [vmem:[%s4073_s1 + $0x68c] ss:$16 sps:$4 sm:$0xff]   ;;  %v2930_v43 = vld [vmem:[%s4073_s1 + $0x680] ss:$16 sps:$4 sm:$0xff]   ;;  %v2933_v44 = vld [vmem:[%s4073_s1 + $0x688] ss:$16 sps:$4 sm:$0xff]  }
  0xc3   :  { %1762 = vmatpush1.bf16.msra.mxu0 %v2906_v27  ;;  %1926 = vmatpush1.bf16.msra.mxu1 %v2909_v15  ;;  %v2938_v45 = vld [vmem:[%s4073_s1 + $0x6a4] ss:$16 sps:$4 sm:$0xff]   ;;  %v2941_v46 = vld [vmem:[%s4073_s1 + $0x6ac] ss:$16 sps:$4 sm:$0xff]   ;;  %v2936_v47 = vld [vmem:[%s4073_s1 + $0x6a0] ss:$16 sps:$4 sm:$0xff]  }
  0xc4   :  { %1763 = vmatprep.subr.bf16.mxu0 %v2914_v28  ;;  %1927 = vmatprep.subr.bf16.mxu1 %v2917_v29  ;;  %v2939_v48 = vld [vmem:[%s4073_s1 + $0x6a8] ss:$16 sps:$4 sm:$0xff]   ;;  %v2944_v49 = vld [vmem:[%s4073_s1 + $0x6c4] ss:$16 sps:$4 sm:$0xff]   ;;  %v2947_v50 = vld [vmem:[%s4073_s1 + $0x6cc] ss:$16 sps:$4 sm:$0xff]  }
  0xc5   :  { %1793 = vmatprep.mubr.bf16.mxu0 %v349_v30  ;;  %1957 = vmatprep.mubr.bf16.mxu1 %v349_v30  ;;  %v2942_v51 = vld [vmem:[%s4073_s1 + $0x6c0] ss:$16 sps:$4 sm:$0xff]   ;;  %v2945_v52 = vld [vmem:[%s4073_s1 + $0x6c8] ss:$16 sps:$4 sm:$0xff]   ;;  %v2950_v53 = vld [vmem:[%s4073_s1 + $0x6e4] ss:$16 sps:$4 sm:$0xff]  }
  0xc6   :  { %v2953_v54 = vld [vmem:[%s4073_s1 + $0x6ec] ss:$16 sps:$4 sm:$0xff]   ;;  %v2948_v55 = vld [vmem:[%s4073_s1 + $0x6e0] ss:$16 sps:$4 sm:$0xff]   ;;  %v2951_v56 = vld [vmem:[%s4073_s1 + $0x6e8] ss:$16 sps:$4 sm:$0xff]  }
  0xc7   :  { %1764 = vmatpush1.bf16.msra.mxu0 %v2912_v31  ;;  %1928 = vmatpush1.bf16.msra.mxu1 %v2915_v32  ;;  %v2956_v57 = vld [vmem:[%s4073_s1 + $0x704] ss:$16 sps:$4 sm:$0xff]   ;;  %v2959_v58 = vld [vmem:[%s4073_s1 + $0x70c] ss:$16 sps:$4 sm:$0xff]   ;;  %v2954_v59 = vld [vmem:[%s4073_s1 + $0x700] ss:$16 sps:$4 sm:$0xff]  }
  0xc8   :  { %1765 = vmatprep.subr.bf16.mxu0 %v2920_v20  ;;  %1929 = vmatprep.subr.bf16.mxu1 %v2923_v33  ;;  %v2957_v60 = vld [vmem:[%s4073_s1 + $0x708] ss:$16 sps:$4 sm:$0xff]   ;;  %v2962_v61 = vld [vmem:[%s4073_s1 + $0x724] ss:$16 sps:$4 sm:$0xff]   ;;  %v2965_v62 = vld [vmem:[%s4073_s1 + $0x72c] ss:$16 sps:$4 sm:$0xff]  }
  0xc9   :  { %v2960_v63 = vld [vmem:[%s4073_s1 + $0x720] ss:$16 sps:$4 sm:$0xff]   ;;  %v2963_v0 = vld [vmem:[%s4073_s1 + $0x728] ss:$16 sps:$4 sm:$0xff]   ;;  %v2968_v1 = vld [vmem:[%s4073_s1 + $0x744] ss:$16 sps:$4 sm:$0xff]  }
  0xca   :  { %v2971_v2 = vld [vmem:[%s4073_s1 + $0x74c] ss:$16 sps:$4 sm:$0xff]   ;;  %v2966_v3 = vld [vmem:[%s4073_s1 + $0x740] ss:$16 sps:$4 sm:$0xff]   ;;  %v2969_v4 = vld [vmem:[%s4073_s1 + $0x748] ss:$16 sps:$4 sm:$0xff]  }
  0xcb   :  { %1766 = vmatpush1.bf16.msra.mxu0 %v2918_v34  ;;  %1930 = vmatpush1.bf16.msra.mxu1 %v2921_v35  ;;  %v2974_v5 = vld [vmem:[%s4073_s1 + $0x764] ss:$16 sps:$4 sm:$0xff]   ;;  %v2977_v6 = vld [vmem:[%s4073_s1 + $0x76c] ss:$16 sps:$4 sm:$0xff]   ;;  %v2972_v7 = vld [vmem:[%s4073_s1 + $0x760] ss:$16 sps:$4 sm:$0xff]  }
  0xcc   :  { %1767 = vmatprep.subr.bf16.mxu0 %v2926_v36  ;;  %1931 = vmatprep.subr.bf16.mxu1 %v2929_v37  ;;  %v2975_v8 = vld [vmem:[%s4073_s1 + $0x768] ss:$16 sps:$4 sm:$0xff]   ;;  %v2980_v9 = vld [vmem:[%s4073_s1 + $0x784] ss:$16 sps:$4 sm:$0xff]   ;;  %v2983_v10 = vld [vmem:[%s4073_s1 + $0x78c] ss:$16 sps:$4 sm:$0xff]  }
  0xcd   :  { %v2978_v11 = vld [vmem:[%s4073_s1 + $0x780] ss:$16 sps:$4 sm:$0xff]   ;;  %v2981_v12 = vld [vmem:[%s4073_s1 + $0x788] ss:$16 sps:$4 sm:$0xff]   ;;  %v2986_v13 = vld [vmem:[%s4073_s1 + $0x7a4] ss:$16 sps:$4 sm:$0xff]  }
  0xce   :  { %v2989_v14 = vld [vmem:[%s4073_s1 + $0x7ac] ss:$16 sps:$4 sm:$0xff]   ;;  %v2984_v16 = vld [vmem:[%s4073_s1 + $0x7a0] ss:$16 sps:$4 sm:$0xff]   ;;  %v2987_v17 = vld [vmem:[%s4073_s1 + $0x7a8] ss:$16 sps:$4 sm:$0xff]  }
  0xcf   :  { %1768 = vmatpush1.bf16.msra.mxu0 %v2924_v38  ;;  %1932 = vmatpush1.bf16.msra.mxu1 %v2927_v39  ;;  %v2992_v18 = vld [vmem:[%s4073_s1 + $0x7c4] ss:$16 sps:$4 sm:$0xff]   ;;  %v2995_v19 = vld [vmem:[%s4073_s1 + $0x7cc] ss:$16 sps:$4 sm:$0xff]   ;;  %v2990_v22 = vld [vmem:[%s4073_s1 + $0x7c0] ss:$16 sps:$4 sm:$0xff]  }
  0xd0   :  { %1769 = vmatprep.subr.bf16.mxu0 %v2932_v40  ;;  %1933 = vmatprep.subr.bf16.mxu1 %v2935_v41  ;;  %v2993_v23 = vld [vmem:[%s4073_s1 + $0x7c8] ss:$16 sps:$4 sm:$0xff]   ;;  %v2998_v24 = vld [vmem:[%s4073_s1 + $0x7e4] ss:$16 sps:$4 sm:$0xff]   ;;  %v3001_v25 = vld [vmem:[%s4073_s1 + $0x7ec] ss:$16 sps:$4 sm:$0xff]   ;;  %v347_v40 = vcombine.high %v3286_v21, %v3286_v21 }
  0xd1   :  { %v1986_v26 = vld [vmem:[%s4075_s3 + $0x80] sm:$0xff]  ;;  %v1987_v27 = vld [vmem:[%s4075_s3 + $0x88] sm:$0xff]  ;;  %v1988_v36 = vld [vmem:[%s4075_s3 + $0x90] sm:$0xff]  ;;  %s3027_s11 = smov [#allocation2]  }
  0xd2   :  { %v2018_v15 = vld [vmem:[%s4075_s3 + $0x180] sm:$0xff]  ;;  %v2019_v28 = vld [vmem:[%s4075_s3 + $0x188] sm:$0xff]  ;;  %v2523_v20 = vpack.c.bf16 %v1987_v27, %v1986_v26  ;;  %v1989_v37 = vld [vmem:[%s4075_s3 + $0x98] sm:$0xff]  ;;  %s2188_s12 = sshll.u32 %s3027_s11, 4  ;;  %s2189_s12 = int_to_ptr.vmem [resolvable:$true] %s2188_s12 }
  0xd3   :  { %1770 = vmatpush1.bf16.msra.mxu0 %v2930_v43  ;;  %1934 = vmatpush1.bf16.msra.mxu1 %v2933_v44  ;;  %v2996_v29 = vld [vmem:[%s4073_s1 + $0x7e0] ss:$16 sps:$4 sm:$0xff]   ;;  %v2999_v30 = vld [vmem:[%s4073_s1 + $0x7e8] ss:$16 sps:$4 sm:$0xff]   ;;  %v2555_v33 = vpack.c.bf16 %v2019_v28, %v2018_v15  ;;  %s3002_s13 = scalar_lea.vmem %s2189_s12, 32  ;;  %p3007_p1 = scmp.lt.s32.totalorder %s2189_s12, %s2189_s12 }
  0xd4   :  { %1771 = vmatprep.subr.bf16.mxu0 %v2938_v45  ;;  %1935 = vmatprep.subr.bf16.mxu1 %v2941_v46  ;;  %v1970_v31 = vld [vmem:[%s4075_s3] sm:$0xff]  ;;  %v1971_v32 = vld [vmem:[%s4075_s3 + $0x8] sm:$0xff]  ;;  %v2020_v38 = vld [vmem:[%s4075_s3 + $0x190] sm:$0xff]  ;;  %v2527_v46 = vpack.c.bf16 %v1989_v37, %v1988_v36  ;;  %p3003_p0 = scmp.ne.s32.totalorder %s2189_s12, %s3002_s13  ;;  %p3008_p2 = scmp.lt.s32.totalorder %s3002_s13, %s3002_s13 }
  0xd5   :  { %v2002_v34 = vld [vmem:[%s4075_s3 + $0x100] sm:$0xff]  ;;  %v2003_v35 = vld [vmem:[%s4075_s3 + $0x108] sm:$0xff]  ;;  %v2021_v39 = vld [vmem:[%s4075_s3 + $0x198] sm:$0xff]  ;;  %v2525_v41 = vpack.c.bf16 %v1971_v32, %v1970_v31 }
  0xd6   :  { %v2557_v43 = vpack.c.bf16 %v2003_v35, %v2002_v34  ;;  %v1972_v44 = vld [vmem:[%s4075_s3 + $0x10] sm:$0xff]  ;;  %v1973_v45 = vld [vmem:[%s4075_s3 + $0x18] sm:$0xff]  ;;  %v1998_v34 = vld [vmem:[%s4075_s3 + $0xe0] sm:$0xff]  ;;  %p3009_p3 = por %p3008_p2, %p3007_p1 }
  0xd7   :  { %1772 = vmatpush1.bf16.msra.mxu0 %v2936_v47  ;;  %1936 = vmatpush1.bf16.msra.mxu1 %v2939_v48  ;;  %v2559_v47 = vpack.c.bf16 %v2021_v39, %v2020_v38  ;;  %v2004_v21 = vld [vmem:[%s4075_s3 + $0x110] sm:$0xff]  ;;  %v2005_v48 = vld [vmem:[%s4075_s3 + $0x118] sm:$0xff]  ;;  %v1999_v35 = vld [vmem:[%s4075_s3 + $0xe8] sm:$0xff] }
  0xd8   :  { %1773 = vmatprep.subr.bf16.mxu0 %v2944_v49  ;;  %1937 = vmatprep.subr.bf16.mxu1 %v2947_v50  ;;  %v1990_v49 = vld [vmem:[%s4075_s3 + $0xa0] sm:$0xff]  ;;  %v1991_v50 = vld [vmem:[%s4075_s3 + $0xa8] sm:$0xff]  ;;  %v2028_v26 = vld [vmem:[%s4075_s3 + $0x1d0] sm:$0xff]  ;;  %p3010_p4 = pnand %p3009_p3, %p3003_p0 }
  0xd9   :  { %v2029_v27 = vld [vmem:[%s4075_s3 + $0x1d8] sm:$0xff]  ;;  %v2030_v36 = vld [vmem:[%s4075_s3 + $0x1e0] sm:$0xff]  ;;  %v2031_v37 = vld [vmem:[%s4075_s3 + $0x1e8] sm:$0xff] }
  0xda   :  { %v2575_v32 = vpack.c.bf16 %v2029_v27, %v2028_v26 }
  0xdb   :  { %1774 = vmatpush1.bf16.msra.mxu0 %v2942_v51  ;;  %1938 = vmatpush1.bf16.msra.mxu1 %v2945_v52  ;;  %v2022_v51 = vld [vmem:[%s4075_s3 + $0x1a0] sm:$0xff]  ;;  %v2023_v52 = vld [vmem:[%s4075_s3 + $0x1a8] sm:$0xff] }
  0xdc   :  { %1775 = vmatprep.subr.bf16.mxu0 %v2950_v53  ;;  %1939 = vmatprep.subr.bf16.mxu1 %v2953_v54  ;;  %v2529_v53 = vpack.c.bf16 %v1973_v45, %v1972_v44  ;;  %v2561_v54 = vpack.c.bf16 %v2005_v48, %v2004_v21  ;;  %v1983_v44 = vld [vmem:[%s4075_s3 + $0x68] sm:$0xff]  ;;  %v2014_v45 = vld [vmem:[%s4075_s3 + $0x160] sm:$0xff]  ;;  %v2000_v48 = vld [vmem:[%s4075_s3 + $0xf0] sm:$0xff] }
  0xdf   :  { %1776 = vmatpush1.bf16.msra.mxu0 %v2948_v55  ;;  %1940 = vmatpush1.bf16.msra.mxu1 %v2951_v56  ;;  %v1974_v55 = vld [vmem:[%s4075_s3 + $0x20] sm:$0xff]  ;;  %v1975_v56 = vld [vmem:[%s4075_s3 + $0x28] sm:$0xff] }
  0xe0   :  { %1777 = vmatprep.subr.bf16.mxu0 %v2956_v57  ;;  %1941 = vmatprep.subr.bf16.mxu1 %v2959_v58  ;;  %v2531_v57 = vpack.c.bf16 %v1991_v50, %v1990_v49  ;;  %v2563_v58 = vpack.c.bf16 %v2023_v52, %v2022_v51  ;;  %v2001_v49 = vld [vmem:[%s4075_s3 + $0xf8] sm:$0xff]  ;;  %v2032_v50 = vld [vmem:[%s4075_s3 + $0x1f0] sm:$0xff] }
  0xe1   :  { %v2551_v51 = vpack.c.bf16 %v2001_v49, %v2000_v48  ;;  %v2033_v52 = vld [vmem:[%s4075_s3 + $0x1f8] sm:$0xff] }
  0xe3   :  { %1778 = vmatpush1.bf16.msra.mxu0 %v2954_v59  ;;  %1942 = vmatpush1.bf16.msra.mxu1 %v2957_v60  ;;  %v2006_v59 = vld [vmem:[%s4075_s3 + $0x120] sm:$0xff]  ;;  %v2007_v60 = vld [vmem:[%s4075_s3 + $0x128] sm:$0xff] }
  0xe4   :  { %1779 = vmatprep.subr.bf16.mxu0 %v2962_v61  ;;  %1943 = vmatprep.subr.bf16.mxu1 %v2965_v62  ;;  %v1992_v61 = vld [vmem:[%s4075_s3 + $0xb0] sm:$0xff]  ;;  %v1993_v62 = vld [vmem:[%s4075_s3 + $0xb8] sm:$0xff] }
  0xe7   :  { %1780 = vmatpush1.bf16.msra.mxu0 %v2960_v63  ;;  %1944 = vmatpush1.bf16.msra.mxu1 %v2963_v0  ;;  %v2024_v63 = vld [vmem:[%s4075_s3 + $0x1b0] sm:$0xff]  ;;  %v2025_v0 = vld [vmem:[%s4075_s3 + $0x1b8] sm:$0xff] }
  0xe8   :  { %1781 = vmatprep.subr.bf16.mxu0 %v2968_v1  ;;  %1945 = vmatprep.subr.bf16.mxu1 %v2971_v2  ;;  %v2533_v1 = vpack.c.bf16 %v1975_v56, %v1974_v55  ;;  %v2565_v2 = vpack.c.bf16 %v2007_v60, %v2006_v59  ;;  %v2583_v55 = vpack.c.bf16 %v2033_v52, %v2032_v50  ;;  %v282_v60 = vsub.s32 0, %v3175_v42 }
  0xeb   :  { %1782 = vmatpush1.bf16.msra.mxu0 %v2966_v3  ;;  %1946 = vmatpush1.bf16.msra.mxu1 %v2969_v4  ;;  %v1976_v3 = vld [vmem:[%s4075_s3 + $0x30] sm:$0xff]  ;;  %v1977_v4 = vld [vmem:[%s4075_s3 + $0x38] sm:$0xff] }
  0xec   :  { %1783 = vmatprep.subr.bf16.mxu0 %v2974_v5  ;;  %1947 = vmatprep.subr.bf16.mxu1 %v2977_v6  ;;  %v2535_v5 = vpack.c.bf16 %v1993_v62, %v1992_v61  ;;  %v2567_v6 = vpack.c.bf16 %v2025_v0, %v2024_v63  ;;  %v290_v61 = vsub.s32 2, %v3175_v42  ;;  %v278_v62 = vld [vmem:[%s4074_s2] sm:$0xf]  ;;  %v286_v63 = vsub.s32 1, %v3175_v42 }
  0xed   :  { %v294_v0 = vsub.s32 3, %v3175_v42 }
  0xef   :  { %1784 = vmatpush1.bf16.msra.mxu0 %v2972_v7  ;;  %1948 = vmatpush1.bf16.msra.mxu1 %v2975_v8  ;;  %v2008_v7 = vld [vmem:[%s4075_s3 + $0x130] sm:$0xff]  ;;  %v2009_v8 = vld [vmem:[%s4075_s3 + $0x138] sm:$0xff] }
  0xf0   :  { %1785 = vmatprep.subr.bf16.mxu0 %v2980_v9  ;;  %1949 = vmatprep.subr.bf16.mxu1 %v2983_v10  ;;  %v1994_v9 = vld [vmem:[%s4075_s3 + $0xc0] sm:$0xff]  ;;  %v1995_v10 = vld [vmem:[%s4075_s3 + $0xc8] sm:$0xff] }
  0xf3   :  { %1786 = vmatpush1.bf16.msra.mxu0 %v2978_v11  ;;  %1950 = vmatpush1.bf16.msra.mxu1 %v2981_v12  ;;  %v2026_v11 = vld [vmem:[%s4075_s3 + $0x1c0] sm:$0xff]  ;;  %v2027_v12 = vld [vmem:[%s4075_s3 + $0x1c8] sm:$0xff] }
  0xf4   :  { %1787 = vmatprep.subr.bf16.mxu0 %v2986_v13  ;;  %1951 = vmatprep.subr.bf16.mxu1 %v2989_v14  ;;  %v2537_v13 = vpack.c.bf16 %v1977_v4, %v1976_v3  ;;  %v2569_v14 = vpack.c.bf16 %v2009_v8, %v2008_v7  ;;  %v287_v3 = vrot.slane %v278_v62, %v286_v63 }
  0xf5   :  { %v295_v4 = vrot.slane %v278_v62, %v294_v0 }
  0xf7   :  { %1788 = vmatpush1.bf16.msra.mxu0 %v2984_v16  ;;  %1952 = vmatpush1.bf16.msra.mxu1 %v2987_v17  ;;  %v1978_v16 = vld [vmem:[%s4075_s3 + $0x40] sm:$0xff]  ;;  %v1979_v17 = vld [vmem:[%s4075_s3 + $0x48] sm:$0xff] }
  0xf8   :  { %1789 = vmatprep.subr.bf16.mxu0 %v2992_v18  ;;  %1953 = vmatprep.subr.bf16.mxu1 %v2995_v19  ;;  %v2539_v18 = vpack.c.bf16 %v1995_v10, %v1994_v9  ;;  %v2571_v19 = vpack.c.bf16 %v2027_v12, %v2026_v11  ;;  %v2541_v15 = vpack.c.bf16 %v1979_v17, %v1978_v16 }
  0xfb   :  { %1790 = vmatpush1.bf16.msra.mxu0 %v2990_v22  ;;  %1954 = vmatpush1.bf16.msra.mxu1 %v2993_v23  ;;  %v2010_v22 = vld [vmem:[%s4075_s3 + $0x140] sm:$0xff]  ;;  %v2011_v23 = vld [vmem:[%s4075_s3 + $0x148] sm:$0xff] }
  0xfc   :  { %1791 = vmatprep.subr.bf16.mxu0 %v2998_v24  ;;  %1955 = vmatprep.subr.bf16.mxu1 %v3001_v25  ;;  %v1996_v24 = vld [vmem:[%s4075_s3 + $0xd0] sm:$0xff]  ;;  %v1997_v25 = vld [vmem:[%s4075_s3 + $0xd8] sm:$0xff]  ;;  %v2573_v28 = vpack.c.bf16 %v2011_v23, %v2010_v22 }
  0xfd   :  { %v2543_v31 = vpack.c.bf16 %v1997_v25, %v1996_v24  ;;  %v2452_v25 = vld [vmem:[%s4076_s4] ss:$0 sm:$0xff] }
  0xff   :  { %1792 = vmatpush1.bf16.msra.mxu0 %v2996_v29  ;;  %1956 = vmatpush1.bf16.msra.mxu1 %v2999_v30  ;;  %v1980_v29 = vld [vmem:[%s4075_s3 + $0x50] sm:$0xff]  ;;  %v1981_v30 = vld [vmem:[%s4075_s3 + $0x58] sm:$0xff] }
 0x100   :  { %2524 = vmatprep.subr.bf16.mxu0 %v2523_v20  ;;  %2556 = vmatprep.subr.bf16.mxu1 %v2555_v33  ;;  %v2012_v20 = vld [vmem:[%s4075_s3 + $0x150] sm:$0xff]  ;;  %v2013_v33 = vld [vmem:[%s4075_s3 + $0x158] sm:$0xff]  ;;  %v2545_v38 = vpack.c.bf16 %v1981_v30, %v1980_v29 }
 0x101   :  { %v2577_v39 = vpack.c.bf16 %v2013_v33, %v2012_v20 }
 0x102   :  { %1794 = vmatmul.mubr.bf16.vlgmr.msra.gmra.mrb[0].mxu0 %v347_v40  ;;  %1958 = vmatmul.mubr.bf16.vlgmr.msra.gmra.mrb[0].mxu1 %v347_v40  ;;  %v2547_v40 = vpack.c.bf16 %v1999_v35, %v1998_v34 }
 0x103   :  { %2526 = vmatpush3.bf16.msra.mxu0 %v2525_v41  ;;  %2558 = vmatpush3.bf16.msra.mxu1 %v2557_v43  ;;  %v2579_v41 = vpack.c.bf16 %v2031_v37, %v2030_v36  ;;  %v1982_v43 = vld [vmem:[%s4075_s3 + $0x60] sm:$0xff] }
 0x104   :  { %2528 = vmatprep.subr.bf16.mxu0 %v2527_v46  ;;  %2560 = vmatprep.subr.bf16.mxu1 %v2559_v47  ;;  %v2549_v46 = vpack.c.bf16 %v1983_v44, %v1982_v43  ;;  %v2015_v47 = vld [vmem:[%s4075_s3 + $0x168] sm:$0xff] }
 0x105   :  { %v2581_v21 = vpack.c.bf16 %v2015_v47, %v2014_v45 }
 0x107   :  { %2530 = vmatpush3.bf16.msra.mxu0 %v2529_v53  ;;  %2562 = vmatpush3.bf16.msra.mxu1 %v2561_v54  ;;  %v1984_v53 = vld [vmem:[%s4075_s3 + $0x70] sm:$0xff]  ;;  %v1985_v54 = vld [vmem:[%s4075_s3 + $0x78] sm:$0xff] }
 0x108   :  { %2532 = vmatprep.subr.bf16.mxu0 %v2531_v57  ;;  %2564 = vmatprep.subr.bf16.mxu1 %v2563_v58  ;;  %v2553_v56 = vpack.c.bf16 %v1985_v54, %v1984_v53  ;;  %v2016_v57 = vld [vmem:[%s4075_s3 + $0x170] sm:$0xff]  ;;  %v2017_v58 = vld [vmem:[%s4075_s3 + $0x178] sm:$0xff] }
 0x109   :  { %v2585_v59 = vpack.c.bf16 %v2017_v58, %v2016_v57 }
 0x10b   :  { %2534 = vmatpush3.bf16.msra.mxu0 %v2533_v1  ;;  %2566 = vmatpush3.bf16.msra.mxu1 %v2565_v2  ;;  %v283_v1 = vrot.slane %v278_v62, %v282_v60  ;;  %v291_v2 = vrot.slane %v278_v62, %v290_v61 }
 0x10c   :  { %2536 = vmatprep.subr.bf16.mxu0 %v2535_v5  ;;  %2568 = vmatprep.subr.bf16.mxu1 %v2567_v6 }
 0x10f   :  { %2538 = vmatpush3.bf16.msra.mxu0 %v2537_v13  ;;  %2570 = vmatpush3.bf16.msra.mxu1 %v2569_v14 }
 0x110   :  { %2540 = vmatprep.subr.bf16.mxu0 %v2539_v18  ;;  %2572 = vmatprep.subr.bf16.mxu1 %v2571_v19 }
 0x113   :  { %2542 = vmatpush3.bf16.msra.mxu0 %v2541_v15  ;;  %2574 = vmatpush3.bf16.msra.mxu1 %v2573_v28 }
 0x114   :  { %2544 = vmatprep.subr.bf16.mxu0 %v2543_v31  ;;  %2576 = vmatprep.subr.bf16.mxu1 %v2575_v32 }
 0x117   :  { %2546 = vmatpush3.bf16.msra.mxu0 %v2545_v38  ;;  %2578 = vmatpush3.bf16.msra.mxu1 %v2577_v39 }
 0x118   :  { %2548 = vmatprep.subr.bf16.mxu0 %v2547_v40  ;;  %2580 = vmatprep.subr.bf16.mxu1 %v2579_v41 }
 0x11b   :  { %2550 = vmatpush3.bf16.msra.mxu0 %v2549_v46  ;;  %2582 = vmatpush3.bf16.msra.mxu1 %v2581_v21 }
 0x11c   :  { %2552 = vmatprep.subr.bf16.mxu0 %v2551_v51  ;;  %2584 = vmatprep.subr.bf16.mxu1 %v2583_v55 }
 0x11f   :  { %2554 = vmatpush3.bf16.msra.mxu0 %v2553_v56  ;;  %2586 = vmatpush3.bf16.msra.mxu1 %v2585_v59 }
 0x1d5   :  { %v1795_v5 = vpop.f32.mrb[0].mxu0  ;;  %v1959_v6 = vpop.f32.mrb[0].mxu1 }
 0x1d6   :  { %v2587_v7 = vadd.f32 %v1795_v5, %v283_v1  ;;  %v2589_v8 = vadd.f32 %v1959_v6, %v291_v2  ;;  %v1797_v9 = vpop.f32.mrb[1].mxu0  ;;  %v1961_v10 = vpop.f32.mrb[1].mxu1 }
 0x1d7   :  { %v2588_v11 = vadd.f32 %v1797_v9, %v287_v3  ;;  %v2590_v12 = vadd.f32 %v1961_v10, %v295_v4  ;;  %v1799_v13 = vpop.f32.mrb[2].mxu0  ;;  %v1963_v14 = vpop.f32.mrb[2].mxu1 }
 0x1d8   :  { %v1800_v16 = vpop.f32.mrb[3].mxu0  ;;  %v1964_v17 = vpop.f32.mrb[3].mxu1  ;;  %v1966_v22 = vmax.f32 %v2587_v7, 0.0  ;;  %v1968_v42 = vmax.f32 %v2589_v8, 0.0 }
 0x1d9   :  { %v1967_v18 = vmax.f32 %v2588_v11, 0.0  ;;  %v1969_v19 = vmax.f32 %v2590_v12, 0.0 }
 0x1db   :  { %2105 = vmatprep.mubr.f32.mxu0 %v1967_v18  ;;  %2175 = vmatprep.mubr.f32.mxu1 %v1969_v19 }
 0x1dc   :  { %2106 = vmatmul.mubr.f32.vlgmr.msra.gmra.mrb[4].mxu0 %v1966_v22  ;;  %2176 = vmatmul.mubr.f32.vlgmr.msra.gmra.mrb[4].mxu1 %v1968_v42 }
 0x2af   :  { %v2485_v23 = vpop.f32.mrb[4].mxu0  ;;  %v2520_v24 = vpop.f32.mrb[4].mxu1 }
 0x2b0   :  { %v2486_v26 = vpop.f32.mrb[5].mxu0  ;;  %v2521_v27 = vpop.f32.mrb[5].mxu1 }
 0x2b1   :  { %v2487_v15 = vadd.f32 %v2486_v26, %v2485_v23  ;;  %v2522_v28 = vadd.f32 %v2521_v27, %v2520_v24 }
 0x2b3   :  { %v2108_v29 = vadd.f32 %v2487_v15, %v2452_v25 }
 0x2b5   :  { %v2178_v30 = vadd.f32 %v2522_v28, %v2108_v29 }
 0x2b7   :  { %2181 = vst [vmem:[#allocation2] sm:$0x3] %v2178_v30 }
 0x2b8   :  { %3013 = shalt.err (!%p3010_p4)
}
 0x2b9   :  { %s3014_s4 = scalar_lea.hbm %s4077_s5, 32 }
 0x2ba   :  { %p3015_p5 = scmp.ne.s32.totalorder %s4077_s5, %s3014_s4  ;;  %p3018_p6 = scmp.lt.u32.totalorder %s3014_s4, %s4077_s5 }
 0x2bc   :  { %p3020_p7 = pnand %p3018_p6, %p3015_p5 }
 0x2be   :  { %3023 = shalt.err (!%p3020_p7)
}
 0x2bf   :  { %2191 = dma.vmem_to_hbm [thread:$0]  %s2189_s12, 32, %s4077_s5, [#allocation3]  }
 0x2c0   :  { %3024 = dma.done.wait [#allocation3], 32  }
 0x2c1   :  { %3025 = vsyncadd [#allocation3], 4294967264 }
 0x2c2   :  { %2195 = vsyncpa [#allocation3], 1 }

// kernel: cifarnet4_forward.4
= control target key start
LH: loop header
LB: loop body
LE: loop exit
PB: predicated region body
PF: predicated region fallthrough
CT: control target
= control target key end

     0   :  { %8 = vsyncpa [#allocation4], 0  ;;  %s12671_s0 = inlined_call_operand.vmem [shape: bf16[2,16384], index: 0, kind: input, shape index: {}]   ;;  %s12672_s1 = inlined_call_operand.hbm [shape: bf16[2,16384,512], index: 1, kind: input, shape index: {}]   ;;  %s12673_s2 = inlined_call_operand.hbm [shape: f32[1,1024], index: 2, kind: input, shape index: {}]   ;;  %s12674_s3 = inlined_call_operand.vmem [shape: bf16[2,1024], index: 3, kind: output, shape index: {}]  }
   0x1   :  { %10 = vsyncpa [#allocation4 + $0x1], 0 }
   0x2   :  { %11 = vsyncpa [#allocation6], 0 }
   0x3   :  { %13 = vsyncpa [#allocation6 + $0x1], 0  ;;  %s11195_s12 = smov 0   ;;  %s11197_s13 = smov 0  }
   0x4   :  { %s11199_s14 = smov 0   ;;  %s11201_s15 = smov 0  }
   0x5   :  { %s11203_s16 = smov 0   ;;  %s11205_s17 = smov 0  }
   0x6   :  { %s11207_s18 = smov 0   ;;  %s11209_s19 = smov 0  }
   0x7   :  { %s11211_s20 = smov 0   ;;  %s11213_s21 = smov 0  }
   0x8   :  { %s11215_s22 = smov 0  }
   0x9 LB: > { %12682 = sst [smem:[#allocation9_spill]] %s11158_s20  ;;  %s28_s23 = sadd.s32 1, %s11158_s20  ;;  %s11166_s22 = sphi %s11215_s22, %s19_s22   ;;  %s11162_s21 = sphi %s11213_s21, %s12705_s21   ;;  %s11158_s20 = sphi %s11211_s20, %s12696_s20   ;;  %s11154_s19 = sphi %s11209_s19, %s12704_s19   ;;  %s11150_s18 = sphi %s11207_s18, %s12695_s18   ;;  %s11146_s17 = sphi %s11205_s17, %s12703_s17   ;;  %s11142_s16 = sphi %s11203_s16, %s12702_s16   ;;  %s11138_s15 = sphi %s11201_s15, %s12701_s15   ;;  %s11134_s14 = sphi %s11199_s14, %s12700_s14   ;;  %s11130_s13 = sphi %s11197_s13, %s12699_s13   ;;  %s11126_s12 = sphi %s11195_s12, %s12698_s12  }
   0xa   : > { %s31_s24 = sadd.s32 1, %s11162_s21  ;;  %p29_p0 = scmp.ge.s32.totalorder %s28_s23, 4 }
   0xb   : > { %s66_s25 = sadd.s32 1, %s11146_s17  ;;  %p73_p1 = scmp.ne.s32.totalorder %s11146_s17, %s11142_s16 }
   0xc   : > { %p12679_p2 = scmp.eq.s32.totalorder %s11166_s22, 0  ;;  %s12707_s23 = smov (%p29_p0, %s28_s23), 0 }
   0xd   : > { %12683 = sst [smem:[#allocation10_spill]] %s12707_s23  ;;  %s12709_s24 = smov (!%p29_p0, %s31_s24), %s11162_s21 }
   0xe   : > { %s62_s26 = ssub.s32 %s11158_s20, %s12707_s23  ;;  %p11263_p3 = por %p12679_p2, %p73_p1 }
   0xf   : > { %p33_p4 = scmp.ge.s32.totalorder %s12709_s24, 2  ;;  %p79_p5 = scmp.ne.s32.totalorder %s11142_s16, %s11138_s15 }
  0x10   : > { %p12678_p6 = scmp.lt.s32.totalorder %s11166_s22, 8  ;;  %s163_s28 = sand.u32 1, %s11146_s17  }
  0x11   : > { %s12711_s24 = smov (%p33_p4, %s12709_s24), 0  ;;  %s9243_s29 = sshll.u32 %s11158_s20, 11 }
  0x12   : > { %12685 = sst [smem:[#allocation11_spill]] %s12711_s24  ;;  %s11276_s30 = ssub.s32 %s11162_s21, %s12711_s24 }
  0x13   : > { %s63_s4 = sor.u32 %s62_s26, %s11276_s30  ;;  %s8199_s5 = sshll.u32 %s163_s28, 13 }
  0x14   : > { %p64_p7 = scmp.eq.s32.totalorder %s63_s4, 0  ;;  %s8202_s6 = sshll.u32 %s11162_s21, 13 }
  0x15   : > { %s167_s7 = scalar_lea.vmem [#allocation3], %s8199_s5  ;;  %s174_s10 = sadd.s32 %s9243_s29, %s8202_s6 }
  0x16   : > { %s177_s8 = sshll.u32 %s167_s7, 4  ;;  %s8203_s11 = sshll.u32 %s174_s10, 6  ;;  %s11283_s8 = int_to_ptr.vmem [resolvable:$true] %s177_s8 }
  0x17   : > { %s11281_s9 = scalar_select %p64_p7, %s11146_s17, %s66_s25  }
  0x18   : > { %p11289_p8 = pnand %p12678_p6, %p11263_p3  ;;  %s11296_s26 = scalar_lea.hbm %s12672_s1, %s8203_s11 }
  0x19   : > { %s11298_s25 = scalar_lea.sflag [#allocation4], %s163_s28  ;;  %s11012_s29 = scalar_lea.hbm %s11296_s26, 131072 }
  0x1a   : > { %p11013_p9 = scmp.ne.s32.totalorder %s11296_s26, %s11012_s29  ;;  %p11014_p10 = pneg %p11289_p8 }
  0x1b   : > { %s11017_s24 = scalar_lea.hbm %s12672_s1, 1048576  ;;  %p11018_p13 = scmp.lt.u32.totalorder %s11296_s26, %s12672_s1 }
  0x1c   : > { %p11015_p11 = pnand %p11014_p10, %p11013_p9  ;;  %p11019_p0 = scmp.lt.u32.totalorder %s11017_s24, %s11012_s29 }
  0x1d   : > { %p11021_p3 = scmp.lt.u32.totalorder %s11012_s29, %s11296_s26 }
  0x1e   : > { %p11016_p12 = pneg %p11015_p11  ;;  %p11020_p1 = por %p11019_p0, %p11018_p13 }
  0x20   : > { %p11022_p4 = por %p11021_p3, %p11020_p1 }
  0x22   : > { %p11023_p7 = pnand %p11022_p4, %p11016_p12 }
  0x24   : > { %11026 = shalt.err (!%p11023_p7)
}
  0x25   : > { %s11027_s28 = scalar_lea.vmem %s11283_s8, 131072  ;;  %s11168_s6 = smov [#allocation3]  }
  0x26   : > { %p11028_p9 = scmp.ne.s32.totalorder %s11283_s8, %s11027_s28  ;;  %s11032_s7 = sshll.u32 %s11168_s6, 4  ;;  %s11033_s7 = int_to_ptr.vmem [resolvable:$false] %s11032_s7 }
  0x27   : > { %s11034_s10 = scalar_lea.vmem %s11033_s7, 262144  ;;  %p11035_p2 = scmp.lt.s32.totalorder %s11283_s8, %s11033_s7 }
  0x28   : > { %p11030_p11 = pnand %p11028_p9, %p11014_p10  ;;  %p11036_p13 = scmp.lt.s32.totalorder %s11034_s10, %s11027_s28 }
  0x2a   : > { %p11031_p6 = pneg %p11030_p11  ;;  %p11037_p0 = por %p11036_p13, %p11035_p2 }
  0x2c   : > { %p11038_p1 = pnand %p11037_p0, %p11031_p6 }
  0x2e   : > { %11041 = shalt.err (!%p11038_p1)
}
  0x2f   : > { %s11169_s11 = smov 256   ;;  %s11170_s29 = smov 16  }
  0x30   : > { %9372 = dma.hbm_to_vmem [thread:$0]  (!%p11289_p8), %s11296_s26, 131072, %s11283_s8, %s11298_s25, %s11169_s11, %s11169_s11, %s11170_s29  }
  0x31   : > { %p8207_p2 = scmp.ge.s32.totalorder %s11166_s22, 1  ;;  %p204_p6 = scmp.lt.s32.totalorder %s11166_s22, 9 }
  0x32   : > { %s8195_s20 = sadd.s32 4294967295, %s11166_s22   ;;  %p90_p3 = scmp.eq.s32.totalorder %s11276_s30, 0 }
  0x33   : > { %p11328_p10 = pnand %p8207_p2, %p204_p6  ;;  %p80_p12 = scmp.eq.s32.totalorder %s8195_s20, 0 }
  0x34   : > { %s92_s24 = sadd.s32 1, %s11134_s14  ;;  %p99_p4 = scmp.ne.s32.totalorder %s11134_s14, %s11130_s13 }
  0x35   : > { %p11340_p7 = por %p80_p12, %p79_p5  ;;  %p105_p9 = scmp.ne.s32.totalorder %s11130_s13, %s11126_s12 }
  0x36   : > { %s11347_s23 = scalar_select %p90_p3, %s11134_s14, %s92_s24  }
  0x37   : > { %s12688_s4 = scalar_select %p11340_p7, 1, 0 }
  0x38   : > { %p12689_p8 = scmp.eq.s32.totalorder %s11166_s22, 0  ;;  %p11351_p13 = por %p105_p9, %p80_p12 }
  0x39   : > { %s187_s26 = sand.u32 1, %s11134_s14   ;;  %s9244_s25 = sshll.u32 %s11162_s21, 6 }
  0x3a   : > { %p101_p11 = por %p99_p4, %p12689_p8  ;;  %s8204_s5 = sshll.u32 %s187_s26, 2 }
  0x3b   : > { %s12690_s8 = scalar_select %p11351_p13, 1, 0 }
  0x3c   : > { %s11360_s15 = scalar_lea.hbm %s12673_s2, %s9244_s25  ;;  %s191_s12 = scalar_lea.vmem [#allocation5], %s8204_s5 }
  0x3d   : > { %s199_s6 = sshll.u32 %s191_s12, 4  ;;  %p12691_p5 = scmp.lt.s32.totalorder %s11166_s22, 8  ;;  %s11368_s6 = int_to_ptr.vmem [resolvable:$true] %s199_s6 }
  0x3e   : > { %s188_s10 = scalar_lea.sflag [#allocation6], %s187_s26  ;;  %s11042_s11 = scalar_lea.hbm %s11360_s15, 64 }
  0x3f   : > { %p11364_p0 = pnand %p12691_p5, %p101_p11  ;;  %p11043_p1 = scmp.ne.s32.totalorder %s11360_s15, %s11042_s11 }
  0x40   : > { %s11047_s24 = scalar_lea.hbm %s12673_s2, 128  ;;  %p11048_p3 = scmp.lt.u32.totalorder %s11360_s15, %s12673_s2 }
  0x41   : > { %p11044_p2 = pneg %p11364_p0  ;;  %p11049_p4 = scmp.lt.u32.totalorder %s11047_s24, %s11042_s11 }
  0x42   : > { %p11051_p8 = scmp.lt.u32.totalorder %s11042_s11, %s11360_s15 }
  0x43   : > { %p11045_p6 = pnand %p11044_p2, %p11043_p1  ;;  %p11050_p9 = por %p11049_p4, %p11048_p3 }
  0x45   : > { %p11046_p12 = pneg %p11045_p6  ;;  %p11052_p11 = por %p11051_p8, %p11050_p9 }
  0x47   : > { %p11053_p5 = pnand %p11052_p11, %p11046_p12 }
  0x49   : > { %11056 = shalt.err (!%p11053_p5)
}
  0x4a   : > { %s11057_s26 = scalar_lea.vmem %s11368_s6, 64  ;;  %s11171_s30 = smov [#allocation5]  }
  0x4b   : > { %p11058_p1 = scmp.ne.s32.totalorder %s11368_s6, %s11057_s26  ;;  %s11062_s28 = sshll.u32 %s11171_s30, 4  ;;  %s11063_s28 = int_to_ptr.vmem [resolvable:$false] %s11062_s28 }
  0x4c   : > { %s11064_s12 = scalar_lea.vmem %s11063_s28, 128  ;;  %p11065_p7 = scmp.lt.s32.totalorder %s11368_s6, %s11063_s28 }
  0x4d   : > { %p11060_p6 = pnand %p11058_p1, %p11044_p2  ;;  %p11066_p3 = scmp.lt.s32.totalorder %s11064_s12, %s11057_s26 }
  0x4f   : > { %p11061_p13 = pneg %p11060_p6  ;;  %p11067_p4 = por %p11066_p3, %p11065_p7 }
  0x51   : > { %p11068_p9 = pnand %p11067_p4, %p11061_p13 }
  0x53   : > { %11071 = shalt.err (!%p11068_p9)
}
  0x54   : > { %9375 = dma.hbm_to_vmem [thread:$0]  (!%p11364_p0), %s11360_s15, 64, %s11368_s6, %s188_s10  }
  0x55   : > { %208 = sbr.rel (%p11328_p10) target bundleno = 1380 (0x564), region = 32  ;;  %s210_s11 = sand.u32 (!%p11328_p10), 1, %s11142_s16  }
  0x56   : > { %s8208_s29 = sshll.u32 (!%p11328_p10), %s210_s11, 13  ;;  %s211_s20 = scalar_lea.sflag (!%p11328_p10), [#allocation4], %s210_s11 }
  0x57   : > { %s11398_s24 = scalar_lea.vmem (!%p11328_p10), [#allocation3], %s8208_s29  ;;  %p12693_p2 = scmp.ne.s32.totalorder (!%p11328_p10), %s12688_s4, 0 }
  0x5c   : > { %11117 = dma.done.wait (%p12693_p2), %s211_s20, 131072  }
  0x5d   : > { %11119 = vsyncadd (%p12693_p2), %s211_s20, 4294836224  ;;  %s219_s7 = sand.u32 1, %s11130_s13   ;;  %p12694_p10 = scmp.ne.s32.totalorder %s12690_s8, 0 }
  0x5e   : > { %s11405_s25 = sshll.u32 %s219_s7, 2  ;;  %s220_s27 = scalar_lea.sflag [#allocation6], %s219_s7 }
  0x5f   : > { %s223_s15 = scalar_lea.vmem [#allocation5], %s11405_s25 }
  0x60   : > { %11121 = dma.done.wait (%p12694_p10), %s220_s27, 64  }
  0x61   : > { %11123 = vsyncadd (%p12694_p10), %s220_s27, 4294967232  ;;  %s8210_s6 = sshll.u32 %s11150_s18, 5  ;;  %s8211_s10 = sshll.u32 %s11154_s19, 2 }
  0x62   : > { %p255_p7 = scmp.lt.s32.totalorder %s8210_s6, 127  ;;  %p262_p13 = scmp.lt.s32.totalorder %s8211_s10, 7 }
  0x63   : > { %p8212_p0 = scmp.ne.s32.totalorder %s11150_s18, 0 }
  0x64   : > { %s12713_s6 = smov (!%p255_p7, %s8210_s6), 127  ;;  %s12715_s10 = smov (!%p262_p13, %s8211_s10), 7 }
  0x65   : > { %s11419_s26 = scalar_lea.vmem %s12671_s0, %s12713_s6  ;;  %s264_s8 = scalar_lea.vmem %s12674_s3, %s12715_s10  ;;  %v11172_v0 = vmov (!%p8212_p0), 0.0  }
  0x66   : > { %269 = sbr.rel (%p8212_p0) target bundleno = 109 (0x6d), region = 44  ;;  %270 = vst [vmem:[#allocation2] sm:$0xff] (!%p8212_p0), %v11172_v0 }
  0x6d PF: > { %v9470_v1 = vld [vmem:[%s11398_s24 + $0x4] ss:$16 sps:$4 sm:$0xff]   ;;  %v9472_v2 = vld [vmem:[%s11398_s24 + $0xc] ss:$16 sps:$4 sm:$0xff]   ;;  %v9474_v3 = vld [vmem:[%s11398_s24] ss:$16 sps:$4 sm:$0xff]   ;;  %v1308_v39 = vlaneseq }
  0x6e   : > { %6652 = vmatprep.subr.bf16.mxu0 %v9470_v1  ;;  %v9475_v4 = vld [vmem:[%s11398_s24 + $0x8] ss:$16 sps:$4 sm:$0xff]   ;;  %7308 = vmatprep.subr.bf16.mxu1 %v9472_v2  ;;  %v9476_v5 = vld [vmem:[%s11398_s24 + $0x24] ss:$16 sps:$4 sm:$0xff]   ;;  %v9478_v6 = vld [vmem:[%s11398_s24 + $0x2c] ss:$16 sps:$4 sm:$0xff]  }
  0x6f   : > { %6653 = vmatpush1.bf16.msra.mxu0 %v9474_v3  ;;  %7309 = vmatpush1.bf16.msra.mxu1 %v9475_v4  ;;  %v9480_v7 = vld [vmem:[%s11398_s24 + $0x20] ss:$16 sps:$4 sm:$0xff]   ;;  %v9481_v8 = vld [vmem:[%s11398_s24 + $0x28] ss:$16 sps:$4 sm:$0xff]   ;;  %v9482_v9 = vld [vmem:[%s11398_s24 + $0x44] ss:$16 sps:$4 sm:$0xff]  }
  0x70   : > { %6654 = vmatprep.subr.bf16.mxu0 %v9476_v5  ;;  %7310 = vmatprep.subr.bf16.mxu1 %v9478_v6  ;;  %v9484_v10 = vld [vmem:[%s11398_s24 + $0x4c] ss:$16 sps:$4 sm:$0xff]   ;;  %v9486_v11 = vld [vmem:[%s11398_s24 + $0x40] ss:$16 sps:$4 sm:$0xff]   ;;  %v9487_v12 = vld [vmem:[%s11398_s24 + $0x48] ss:$16 sps:$4 sm:$0xff]  }
  0x71   : > { %v9488_v13 = vld [vmem:[%s11398_s24 + $0x64] ss:$16 sps:$4 sm:$0xff]   ;;  %v9490_v14 = vld [vmem:[%s11398_s24 + $0x6c] ss:$16 sps:$4 sm:$0xff]   ;;  %v9492_v15 = vld [vmem:[%s11398_s24 + $0x60] ss:$16 sps:$4 sm:$0xff]  }
  0x72   : > { %v9493_v16 = vld [vmem:[%s11398_s24 + $0x68] ss:$16 sps:$4 sm:$0xff]   ;;  %v9494_v17 = vld [vmem:[%s11398_s24 + $0x84] ss:$16 sps:$4 sm:$0xff]   ;;  %v9496_v18 = vld [vmem:[%s11398_s24 + $0x8c] ss:$16 sps:$4 sm:$0xff]  }
  0x73   : > { %6655 = vmatpush1.bf16.msra.mxu0 %v9480_v7  ;;  %7311 = vmatpush1.bf16.msra.mxu1 %v9481_v8  ;;  %v9498_v19 = vld [vmem:[%s11398_s24 + $0x80] ss:$16 sps:$4 sm:$0xff]   ;;  %v9499_v20 = vld [vmem:[%s11398_s24 + $0x88] ss:$16 sps:$4 sm:$0xff]   ;;  %v9500_v21 = vld [vmem:[%s11398_s24 + $0xa4] ss:$16 sps:$4 sm:$0xff]  }
  0x74   : > { %6656 = vmatprep.subr.bf16.mxu0 %v9482_v9  ;;  %7312 = vmatprep.subr.bf16.mxu1 %v9484_v10  ;;  %v9502_v22 = vld [vmem:[%s11398_s24 + $0xac] ss:$16 sps:$4 sm:$0xff]   ;;  %v9504_v23 = vld [vmem:[%s11398_s24 + $0xa0] ss:$16 sps:$4 sm:$0xff]   ;;  %v9505_v24 = vld [vmem:[%s11398_s24 + $0xa8] ss:$16 sps:$4 sm:$0xff]  }
  0x75   : > { %v9506_v25 = vld [vmem:[%s11398_s24 + $0xc4] ss:$16 sps:$4 sm:$0xff]   ;;  %v9508_v26 = vld [vmem:[%s11398_s24 + $0xcc] ss:$16 sps:$4 sm:$0xff]   ;;  %v9510_v27 = vld [vmem:[%s11398_s24 + $0xc0] ss:$16 sps:$4 sm:$0xff]  }
  0x76   : > { %v9511_v28 = vld [vmem:[%s11398_s24 + $0xc8] ss:$16 sps:$4 sm:$0xff]   ;;  %v9512_v29 = vld [vmem:[%s11398_s24 + $0xe4] ss:$16 sps:$4 sm:$0xff]   ;;  %v9514_v30 = vld [vmem:[%s11398_s24 + $0xec] ss:$16 sps:$4 sm:$0xff]  }
  0x77   : > { %6657 = vmatpush1.bf16.msra.mxu0 %v9486_v11  ;;  %7313 = vmatpush1.bf16.msra.mxu1 %v9487_v12  ;;  %v9516_v31 = vld [vmem:[%s11398_s24 + $0xe0] ss:$16 sps:$4 sm:$0xff]   ;;  %v9517_v32 = vld [vmem:[%s11398_s24 + $0xe8] ss:$16 sps:$4 sm:$0xff]   ;;  %v9518_v33 = vld [vmem:[%s11398_s24 + $0x104] ss:$16 sps:$4 sm:$0xff]  }
  0x78   : > { %6658 = vmatprep.subr.bf16.mxu0 %v9488_v13  ;;  %7314 = vmatprep.subr.bf16.mxu1 %v9490_v14  ;;  %v9520_v34 = vld [vmem:[%s11398_s24 + $0x10c] ss:$16 sps:$4 sm:$0xff]   ;;  %v9522_v35 = vld [vmem:[%s11398_s24 + $0x100] ss:$16 sps:$4 sm:$0xff]   ;;  %v9523_v36 = vld [vmem:[%s11398_s24 + $0x108] ss:$16 sps:$4 sm:$0xff]  }
  0x79   : > { %v11173_v37 = vmov 1966171168   ;;  %v9524_v40 = vld [vmem:[%s11398_s24 + $0x124] ss:$16 sps:$4 sm:$0xff]   ;;  %v9526_v41 = vld [vmem:[%s11398_s24 + $0x12c] ss:$16 sps:$4 sm:$0xff]  }
  0x7a   : > { %v1306_v38 = vunpack.c.l.s4 %v11173_v37  ;;  %v9528_v42 = vld [vmem:[%s11398_s24 + $0x120] ss:$16 sps:$4 sm:$0xff]   ;;  %v11465_v44 = vshrl.u32 %v1308_v39, 7  ;;  %v9529_v45 = vld [vmem:[%s11398_s24 + $0x128] ss:$16 sps:$4 sm:$0xff]   ;;  %p9237_p12 = scmp.ne.s32.totalorder %s11150_s18, 3 }
  0x7b   : > { %6659 = vmatpush1.bf16.msra.mxu0 %v9492_v15  ;;  %7315 = vmatpush1.bf16.msra.mxu1 %v9493_v16  ;;  %v9530_v46 = vld [vmem:[%s11398_s24 + $0x144] ss:$16 sps:$4 sm:$0xff]   ;;  %v9532_v47 = vld [vmem:[%s11398_s24 + $0x14c] ss:$16 sps:$4 sm:$0xff]   ;;  %v9534_v48 = vld [vmem:[%s11398_s24 + $0x140] ss:$16 sps:$4 sm:$0xff]  }
  0x7c   : > { %6660 = vmatprep.subr.bf16.mxu0 %v9494_v17  ;;  %7316 = vmatprep.subr.bf16.mxu1 %v9496_v18  ;;  %v1307_v43 = vunpack.c.0.s8 %v1306_v38  ;;  %v9535_v49 = vld [vmem:[%s11398_s24 + $0x148] ss:$16 sps:$4 sm:$0xff]   ;;  %v9536_v51 = vld [vmem:[%s11398_s24 + $0x164] ss:$16 sps:$4 sm:$0xff]   ;;  %v9538_v52 = vld [vmem:[%s11398_s24 + $0x16c] ss:$16 sps:$4 sm:$0xff]  }
  0x7d   : > { %v11478_v53 = vld [vmem:[%s11419_s26] sm:$0xff]  ;;  %v9540_v54 = vld [vmem:[%s11398_s24 + $0x160] ss:$16 sps:$4 sm:$0xff]   ;;  %v9542_v57 = vld [vmem:[%s11398_s24 + $0x184] ss:$16 sps:$4 sm:$0xff]  }
  0x7e   : > { %v11473_v50 = vsub.s32 %v1307_v43, %v11465_v44  ;;  %v9541_v56 = vld [vmem:[%s11398_s24 + $0x168] ss:$16 sps:$4 sm:$0xff]   ;;  %v9544_v58 = vld [vmem:[%s11398_s24 + $0x18c] ss:$16 sps:$4 sm:$0xff]   ;;  %v9546_v60 = vld [vmem:[%s11398_s24 + $0x180] ss:$16 sps:$4 sm:$0xff]  }
  0x7f   : > { %6661 = vmatpush1.bf16.msra.mxu0 %v9498_v19  ;;  %7317 = vmatpush1.bf16.msra.mxu1 %v9499_v20  ;;  %v9547_v62 = vld [vmem:[%s11398_s24 + $0x188] ss:$16 sps:$4 sm:$0xff]   ;;  %v9548_v63 = vld [vmem:[%s11398_s24 + $0x1a4] ss:$16 sps:$4 sm:$0xff]   ;;  %v9550_v0 = vld [vmem:[%s11398_s24 + $0x1ac] ss:$16 sps:$4 sm:$0xff]  }
  0x80   : > { %6662 = vmatprep.subr.bf16.mxu0 %v9500_v21  ;;  %7318 = vmatprep.subr.bf16.mxu1 %v9502_v22  ;;  %v1311_v55 = vrot.slane %v11478_v53, %v11473_v50  ;;  %v9552_v1 = vld [vmem:[%s11398_s24 + $0x1a0] ss:$16 sps:$4 sm:$0xff]   ;;  %v9553_v2 = vld [vmem:[%s11398_s24 + $0x1a8] ss:$16 sps:$4 sm:$0xff]   ;;  %v9554_v3 = vld [vmem:[%s11398_s24 + $0x1c4] ss:$16 sps:$4 sm:$0xff]  }
  0x81   : > { %v9556_v4 = vld [vmem:[%s11398_s24 + $0x1cc] ss:$16 sps:$4 sm:$0xff]   ;;  %v9558_v5 = vld [vmem:[%s11398_s24 + $0x1c0] ss:$16 sps:$4 sm:$0xff]   ;;  %v9559_v6 = vld [vmem:[%s11398_s24 + $0x1c8] ss:$16 sps:$4 sm:$0xff]  }
  0x82   : > { %v1319_v59 = vcombine.high %v1311_v55, %v1311_v55  ;;  %v9560_v7 = vld [vmem:[%s11398_s24 + $0x1e4] ss:$16 sps:$4 sm:$0xff]   ;;  %v9562_v8 = vld [vmem:[%s11398_s24 + $0x1ec] ss:$16 sps:$4 sm:$0xff]   ;;  %v9564_v9 = vld [vmem:[%s11398_s24 + $0x1e0] ss:$16 sps:$4 sm:$0xff]   ;;  %v11505_v14 = vrot.slane %v1311_v55, %v11473_v50 }
  0x83   : > { %6663 = vmatpush1.bf16.msra.mxu0 %v9504_v23  ;;  %7319 = vmatpush1.bf16.msra.mxu1 %v9505_v24  ;;  %v9565_v10 = vld [vmem:[%s11398_s24 + $0x1e8] ss:$16 sps:$4 sm:$0xff]   ;;  %v9568_v11 = vld [vmem:[%s11398_s24 + $0x204] ss:$16 sps:$4 sm:$0xff]   ;;  %v9571_v12 = vld [vmem:[%s11398_s24 + $0x20c] ss:$16 sps:$4 sm:$0xff]  }
  0x84   : > { %6664 = vmatprep.subr.bf16.mxu0 %v9506_v25  ;;  %7320 = vmatprep.subr.bf16.mxu1 %v9508_v26  ;;  %v1341_v61 = vrot.slane %v1319_v59, %v11473_v50  ;;  %v9566_v13 = vld [vmem:[%s11398_s24 + $0x200] ss:$16 sps:$4 sm:$0xff]   ;;  %v9569_v15 = vld [vmem:[%s11398_s24 + $0x208] ss:$16 sps:$4 sm:$0xff]   ;;  %v9574_v16 = vld [vmem:[%s11398_s24 + $0x224] ss:$16 sps:$4 sm:$0xff]  }
  0x85   : > { %v9577_v17 = vld [vmem:[%s11398_s24 + $0x22c] ss:$16 sps:$4 sm:$0xff]   ;;  %v9572_v19 = vld [vmem:[%s11398_s24 + $0x220] ss:$16 sps:$4 sm:$0xff]   ;;  %v9575_v20 = vld [vmem:[%s11398_s24 + $0x228] ss:$16 sps:$4 sm:$0xff]  }
  0x86   : > { %6684 = vmatprep.mubr.bf16.mxu0 %v1341_v61  ;;  %7340 = vmatprep.mubr.bf16.mxu1 %v1341_v61  ;;  %v1351_v18 = vcombine.high %v1341_v61, %v1341_v61  ;;  %v9580_v21 = vld [vmem:[%s11398_s24 + $0x244] ss:$16 sps:$4 sm:$0xff]   ;;  %v9583_v22 = vld [vmem:[%s11398_s24 + $0x24c] ss:$16 sps:$4 sm:$0xff]   ;;  %v9578_v23 = vld [vmem:[%s11398_s24 + $0x240] ss:$16 sps:$4 sm:$0xff]  }
  0x87   : > { %6665 = vmatpush1.bf16.msra.mxu0 %v9510_v27  ;;  %7321 = vmatpush1.bf16.msra.mxu1 %v9511_v28  ;;  %v9581_v24 = vld [vmem:[%s11398_s24 + $0x248] ss:$16 sps:$4 sm:$0xff]   ;;  %v9586_v25 = vld [vmem:[%s11398_s24 + $0x264] ss:$16 sps:$4 sm:$0xff]   ;;  %v9589_v26 = vld [vmem:[%s11398_s24 + $0x26c] ss:$16 sps:$4 sm:$0xff]  }
  0x88   : > { %6666 = vmatprep.subr.bf16.mxu0 %v9512_v29  ;;  %7322 = vmatprep.subr.bf16.mxu1 %v9514_v30  ;;  %v9584_v27 = vld [vmem:[%s11398_s24 + $0x260] ss:$16 sps:$4 sm:$0xff]   ;;  %v9587_v28 = vld [vmem:[%s11398_s24 + $0x268] ss:$16 sps:$4 sm:$0xff]   ;;  %v9592_v29 = vld [vmem:[%s11398_s24 + $0x284] ss:$16 sps:$4 sm:$0xff]  }
  0x89   : > { %v9595_v30 = vld [vmem:[%s11398_s24 + $0x28c] ss:$16 sps:$4 sm:$0xff]   ;;  %v9604_v37 = vld [vmem:[%s11398_s24 + $0x2c4] ss:$16 sps:$4 sm:$0xff]   ;;  %v9602_v39 = vld [vmem:[%s11398_s24 + $0x2c0] ss:$16 sps:$4 sm:$0xff]  }
  0x8a   : > { %v9607_v38 = vld [vmem:[%s11398_s24 + $0x2cc] ss:$16 sps:$4 sm:$0xff]   ;;  %v9608_v43 = vld [vmem:[%s11398_s24 + $0x2e0] ss:$16 sps:$4 sm:$0xff]   ;;  %v9623_v55 = vld [vmem:[%s11398_s24 + $0x328] ss:$16 sps:$4 sm:$0xff]  }
  0x8b   : > { %6667 = vmatpush1.bf16.msra.mxu0 %v9516_v31  ;;  %7323 = vmatpush1.bf16.msra.mxu1 %v9517_v32  ;;  %v9590_v31 = vld [vmem:[%s11398_s24 + $0x280] ss:$16 sps:$4 sm:$0xff]   ;;  %v9593_v32 = vld [vmem:[%s11398_s24 + $0x288] ss:$16 sps:$4 sm:$0xff]   ;;  %v9637_v61 = vld [vmem:[%s11398_s24 + $0x36c] ss:$16 sps:$4 sm:$0xff]  }
  0x8c   : > { %6668 = vmatprep.subr.bf16.mxu0 %v9518_v33  ;;  %7324 = vmatprep.subr.bf16.mxu1 %v9520_v34  ;;  %v9598_v33 = vld [vmem:[%s11398_s24 + $0x2a4] ss:$16 sps:$4 sm:$0xff]   ;;  %v9601_v34 = vld [vmem:[%s11398_s24 + $0x2ac] ss:$16 sps:$4 sm:$0xff]   ;;  %v9629_v59 = vld [vmem:[%s11398_s24 + $0x348] ss:$16 sps:$4 sm:$0xff]  }
  0x8f   : > { %6669 = vmatpush1.bf16.msra.mxu0 %v9522_v35  ;;  %7325 = vmatpush1.bf16.msra.mxu1 %v9523_v36  ;;  %v9596_v35 = vld [vmem:[%s11398_s24 + $0x2a0] ss:$16 sps:$4 sm:$0xff]   ;;  %v9599_v36 = vld [vmem:[%s11398_s24 + $0x2a8] ss:$16 sps:$4 sm:$0xff]  }
  0x90   : > { %6670 = vmatprep.subr.bf16.mxu0 %v9524_v40  ;;  %7326 = vmatprep.subr.bf16.mxu1 %v9526_v41  ;;  %v9605_v40 = vld [vmem:[%s11398_s24 + $0x2c8] ss:$16 sps:$4 sm:$0xff]   ;;  %v9610_v41 = vld [vmem:[%s11398_s24 + $0x2e4] ss:$16 sps:$4 sm:$0xff]  }
  0x93   : > { %6671 = vmatpush1.bf16.msra.mxu0 %v9528_v42  ;;  %7327 = vmatpush1.bf16.msra.mxu1 %v9529_v45  ;;  %v9613_v42 = vld [vmem:[%s11398_s24 + $0x2ec] ss:$16 sps:$4 sm:$0xff]   ;;  %v9611_v45 = vld [vmem:[%s11398_s24 + $0x2e8] ss:$16 sps:$4 sm:$0xff]  }
  0x94   : > { %6672 = vmatprep.subr.bf16.mxu0 %v9530_v46  ;;  %7328 = vmatprep.subr.bf16.mxu1 %v9532_v47  ;;  %v9616_v46 = vld [vmem:[%s11398_s24 + $0x304] ss:$16 sps:$4 sm:$0xff]   ;;  %v9619_v47 = vld [vmem:[%s11398_s24 + $0x30c] ss:$16 sps:$4 sm:$0xff]  }
  0x97   : > { %6673 = vmatpush1.bf16.msra.mxu0 %v9534_v48  ;;  %7329 = vmatpush1.bf16.msra.mxu1 %v9535_v49  ;;  %v9614_v48 = vld [vmem:[%s11398_s24 + $0x300] ss:$16 sps:$4 sm:$0xff]   ;;  %v9617_v49 = vld [vmem:[%s11398_s24 + $0x308] ss:$16 sps:$4 sm:$0xff]  }
  0x98   : > { %6674 = vmatprep.subr.bf16.mxu0 %v9536_v51  ;;  %7330 = vmatprep.subr.bf16.mxu1 %v9538_v52  ;;  %v9622_v51 = vld [vmem:[%s11398_s24 + $0x324] ss:$16 sps:$4 sm:$0xff]   ;;  %v9625_v52 = vld [vmem:[%s11398_s24 + $0x32c] ss:$16 sps:$4 sm:$0xff]  }
  0x9b   : > { %6675 = vmatpush1.bf16.msra.mxu0 %v9540_v54  ;;  %7331 = vmatpush1.bf16.msra.mxu1 %v9541_v56  ;;  %v9620_v54 = vld [vmem:[%s11398_s24 + $0x320] ss:$16 sps:$4 sm:$0xff]   ;;  %v9628_v56 = vld [vmem:[%s11398_s24 + $0x344] ss:$16 sps:$4 sm:$0xff]  }
  0x9c   : > { %6676 = vmatprep.subr.bf16.mxu0 %v9542_v57  ;;  %7332 = vmatprep.subr.bf16.mxu1 %v9544_v58  ;;  %v9631_v57 = vld [vmem:[%s11398_s24 + $0x34c] ss:$16 sps:$4 sm:$0xff]   ;;  %v9626_v58 = vld [vmem:[%s11398_s24 + $0x340] ss:$16 sps:$4 sm:$0xff]  }
  0x9f   : > { %6677 = vmatpush1.bf16.msra.mxu0 %v9546_v60  ;;  %7333 = vmatpush1.bf16.msra.mxu1 %v9547_v62  ;;  %v9634_v60 = vld [vmem:[%s11398_s24 + $0x364] ss:$16 sps:$4 sm:$0xff]   ;;  %v9632_v62 = vld [vmem:[%s11398_s24 + $0x360] ss:$16 sps:$4 sm:$0xff]  }
  0xa0   : > { %6678 = vmatprep.subr.bf16.mxu0 %v9548_v63  ;;  %7334 = vmatprep.subr.bf16.mxu1 %v9550_v0  ;;  %v9635_v63 = vld [vmem:[%s11398_s24 + $0x368] ss:$16 sps:$4 sm:$0xff]   ;;  %v9640_v0 = vld [vmem:[%s11398_s24 + $0x384] ss:$16 sps:$4 sm:$0xff]  }
  0xa3   : > { %6679 = vmatpush1.bf16.msra.mxu0 %v9552_v1  ;;  %7335 = vmatpush1.bf16.msra.mxu1 %v9553_v2  ;;  %v9643_v1 = vld [vmem:[%s11398_s24 + $0x38c] ss:$16 sps:$4 sm:$0xff]   ;;  %v9638_v2 = vld [vmem:[%s11398_s24 + $0x380] ss:$16 sps:$4 sm:$0xff]  }
  0xa4   : > { %6680 = vmatprep.subr.bf16.mxu0 %v9554_v3  ;;  %7336 = vmatprep.subr.bf16.mxu1 %v9556_v4  ;;  %v9641_v3 = vld [vmem:[%s11398_s24 + $0x388] ss:$16 sps:$4 sm:$0xff]   ;;  %v9646_v4 = vld [vmem:[%s11398_s24 + $0x3a4] ss:$16 sps:$4 sm:$0xff]  }
  0xa7   : > { %6681 = vmatpush1.bf16.msra.mxu0 %v9558_v5  ;;  %7337 = vmatpush1.bf16.msra.mxu1 %v9559_v6  ;;  %v9649_v5 = vld [vmem:[%s11398_s24 + $0x3ac] ss:$16 sps:$4 sm:$0xff]   ;;  %v9644_v6 = vld [vmem:[%s11398_s24 + $0x3a0] ss:$16 sps:$4 sm:$0xff]  }
  0xa8   : > { %6682 = vmatprep.subr.bf16.mxu0 %v9560_v7  ;;  %7338 = vmatprep.subr.bf16.mxu1 %v9562_v8  ;;  %v9647_v7 = vld [vmem:[%s11398_s24 + $0x3a8] ss:$16 sps:$4 sm:$0xff]   ;;  %v9652_v8 = vld [vmem:[%s11398_s24 + $0x3c4] ss:$16 sps:$4 sm:$0xff]  }
  0xab   : > { %6683 = vmatpush1.bf16.msra.mxu0 %v9564_v9  ;;  %7339 = vmatpush1.bf16.msra.mxu1 %v9565_v10  ;;  %v9655_v9 = vld [vmem:[%s11398_s24 + $0x3cc] ss:$16 sps:$4 sm:$0xff]   ;;  %v1304_v10 = vcombine.high %v11478_v53, %v11478_v53  ;;  %v9659_v53 = vld [vmem:[%s11398_s24 + $0x3e8] ss:$16 sps:$4 sm:$0xff]  }
  0xac   : > { %6693 = vmatprep.subr.bf16.mxu0 %v9568_v11  ;;  %7349 = vmatprep.subr.bf16.mxu1 %v9571_v12  ;;  %v9650_v11 = vld [vmem:[%s11398_s24 + $0x3c0] ss:$16 sps:$4 sm:$0xff]   ;;  %v9653_v12 = vld [vmem:[%s11398_s24 + $0x3c8] ss:$16 sps:$4 sm:$0xff]  }
  0xae   : > { %6685 = vmatmul.mubr.bf16.vlgmr.msra.gmra.mrb[0].mxu0 %v11505_v14  ;;  %7341 = vmatmul.mubr.bf16.vlgmr.msra.gmra.mrb[0].mxu1 %v11505_v14 }
  0xaf   : > { %6694 = vmatpush1.bf16.msra.mxu0 %v9566_v13  ;;  %7350 = vmatpush1.bf16.msra.mxu1 %v9569_v15  ;;  %v9658_v13 = vld [vmem:[%s11398_s24 + $0x3e4] ss:$16 sps:$4 sm:$0xff]   ;;  %v9661_v15 = vld [vmem:[%s11398_s24 + $0x3ec] ss:$16 sps:$4 sm:$0xff]  }
  0xb0   : > { %6695 = vmatprep.subr.bf16.mxu0 %v9574_v16  ;;  %7351 = vmatprep.subr.bf16.mxu1 %v9577_v17  ;;  %v11571_v16 = vrot.slane %v1304_v10, %v11473_v50  ;;  %v9656_v17 = vld [vmem:[%s11398_s24 + $0x3e0] ss:$16 sps:$4 sm:$0xff]   ;;  %v9737_v10 = vld [vmem:[%s11398_s24 + $0x588] ss:$16 sps:$4 sm:$0xff]  }
  0xb1   : > { %6725 = vmatprep.mubr.bf16.mxu0 %v1351_v18  ;;  %7381 = vmatprep.mubr.bf16.mxu1 %v1351_v18  ;;  %v9664_v18 = vld [vmem:[%s11398_s24 + $0x404] ss:$16 sps:$4 sm:$0xff]  }
  0xb3   : > { %6696 = vmatpush1.bf16.msra.mxu0 %v9572_v19  ;;  %7352 = vmatpush1.bf16.msra.mxu1 %v9575_v20  ;;  %v9667_v19 = vld [vmem:[%s11398_s24 + $0x40c] ss:$16 sps:$4 sm:$0xff]   ;;  %v1320_v20 = vcombine.high %v11571_v16, %v11571_v16 }
  0xb4   : > { %6697 = vmatprep.subr.bf16.mxu0 %v9580_v21  ;;  %7353 = vmatprep.subr.bf16.mxu1 %v9583_v22  ;;  %v9662_v21 = vld [vmem:[%s11398_s24 + $0x400] ss:$16 sps:$4 sm:$0xff]   ;;  %v1349_v22 = vcombine.high %v11505_v14, %v11505_v14  ;;  %v9671_v14 = vld [vmem:[%s11398_s24 + $0x428] ss:$16 sps:$4 sm:$0xff]  }
  0xb7   : > { %6698 = vmatpush1.bf16.msra.mxu0 %v9578_v23  ;;  %7354 = vmatpush1.bf16.msra.mxu1 %v9581_v24  ;;  %v9665_v23 = vld [vmem:[%s11398_s24 + $0x408] ss:$16 sps:$4 sm:$0xff]   ;;  %v9670_v24 = vld [vmem:[%s11398_s24 + $0x424] ss:$16 sps:$4 sm:$0xff]  }
  0xb8   : > { %6699 = vmatprep.subr.bf16.mxu0 %v9586_v25  ;;  %7355 = vmatprep.subr.bf16.mxu1 %v9589_v26  ;;  %v9673_v25 = vld [vmem:[%s11398_s24 + $0x42c] ss:$16 sps:$4 sm:$0xff]   ;;  %v11586_v26 = vrot.slane %v1320_v20, %v11473_v50  ;;  %v9754_v20 = vld [vmem:[%s11398_s24 + $0x5e4] ss:$16 sps:$4 sm:$0xff]  }
  0xbb   : > { %6700 = vmatpush1.bf16.msra.mxu0 %v9584_v27  ;;  %7356 = vmatpush1.bf16.msra.mxu1 %v9587_v28  ;;  %v9668_v27 = vld [vmem:[%s11398_s24 + $0x420] ss:$16 sps:$4 sm:$0xff]   ;;  %v9676_v28 = vld [vmem:[%s11398_s24 + $0x444] ss:$16 sps:$4 sm:$0xff]  }
  0xbc   : > { %6701 = vmatprep.subr.bf16.mxu0 %v9592_v29  ;;  %7357 = vmatprep.subr.bf16.mxu1 %v9595_v30  ;;  %v9679_v29 = vld [vmem:[%s11398_s24 + $0x44c] ss:$16 sps:$4 sm:$0xff]   ;;  %v9674_v30 = vld [vmem:[%s11398_s24 + $0x440] ss:$16 sps:$4 sm:$0xff]  }
  0xbf   : > { %6702 = vmatpush1.bf16.msra.mxu0 %v9590_v31  ;;  %7358 = vmatpush1.bf16.msra.mxu1 %v9593_v32  ;;  %v9677_v31 = vld [vmem:[%s11398_s24 + $0x448] ss:$16 sps:$4 sm:$0xff]   ;;  %v9682_v32 = vld [vmem:[%s11398_s24 + $0x464] ss:$16 sps:$4 sm:$0xff]  }
  0xc0   : > { %6703 = vmatprep.subr.bf16.mxu0 %v9598_v33  ;;  %7359 = vmatprep.subr.bf16.mxu1 %v9601_v34  ;;  %v9685_v33 = vld [vmem:[%s11398_s24 + $0x46c] ss:$16 sps:$4 sm:$0xff]   ;;  %v9680_v34 = vld [vmem:[%s11398_s24 + $0x460] ss:$16 sps:$4 sm:$0xff]  }
  0xc3   : > { %6704 = vmatpush1.bf16.msra.mxu0 %v9596_v35  ;;  %7360 = vmatpush1.bf16.msra.mxu1 %v9599_v36  ;;  %v9683_v35 = vld [vmem:[%s11398_s24 + $0x468] ss:$16 sps:$4 sm:$0xff]   ;;  %v9688_v36 = vld [vmem:[%s11398_s24 + $0x484] ss:$16 sps:$4 sm:$0xff]  }
  0xc4   : > { %6705 = vmatprep.subr.bf16.mxu0 %v9604_v37  ;;  %7361 = vmatprep.subr.bf16.mxu1 %v9607_v38  ;;  %v9691_v37 = vld [vmem:[%s11398_s24 + $0x48c] ss:$16 sps:$4 sm:$0xff]   ;;  %v9686_v38 = vld [vmem:[%s11398_s24 + $0x480] ss:$16 sps:$4 sm:$0xff]  }
  0xc7   : > { %6706 = vmatpush1.bf16.msra.mxu0 %v9602_v39  ;;  %7362 = vmatpush1.bf16.msra.mxu1 %v9605_v40  ;;  %v9689_v39 = vld [vmem:[%s11398_s24 + $0x488] ss:$16 sps:$4 sm:$0xff]   ;;  %v9694_v40 = vld [vmem:[%s11398_s24 + $0x4a4] ss:$16 sps:$4 sm:$0xff]  }
  0xc8   : > { %6707 = vmatprep.subr.bf16.mxu0 %v9610_v41  ;;  %7363 = vmatprep.subr.bf16.mxu1 %v9613_v42  ;;  %v9697_v41 = vld [vmem:[%s11398_s24 + $0x4ac] ss:$16 sps:$4 sm:$0xff]   ;;  %v9692_v42 = vld [vmem:[%s11398_s24 + $0x4a0] ss:$16 sps:$4 sm:$0xff]  }
  0xcb   : > { %6708 = vmatpush1.bf16.msra.mxu0 %v9608_v43  ;;  %7364 = vmatpush1.bf16.msra.mxu1 %v9611_v45  ;;  %v9695_v43 = vld [vmem:[%s11398_s24 + $0x4a8] ss:$16 sps:$4 sm:$0xff]   ;;  %v9700_v45 = vld [vmem:[%s11398_s24 + $0x4c4] ss:$16 sps:$4 sm:$0xff]  }
  0xcc   : > { %6709 = vmatprep.subr.bf16.mxu0 %v9616_v46  ;;  %7365 = vmatprep.subr.bf16.mxu1 %v9619_v47  ;;  %v9703_v46 = vld [vmem:[%s11398_s24 + $0x4cc] ss:$16 sps:$4 sm:$0xff]   ;;  %v9698_v47 = vld [vmem:[%s11398_s24 + $0x4c0] ss:$16 sps:$4 sm:$0xff]  }
  0xcf   : > { %6710 = vmatpush1.bf16.msra.mxu0 %v9614_v48  ;;  %7366 = vmatpush1.bf16.msra.mxu1 %v9617_v49  ;;  %v9701_v48 = vld [vmem:[%s11398_s24 + $0x4c8] ss:$16 sps:$4 sm:$0xff]   ;;  %v9706_v49 = vld [vmem:[%s11398_s24 + $0x4e4] ss:$16 sps:$4 sm:$0xff]  }
  0xd0   : > { %6711 = vmatprep.subr.bf16.mxu0 %v9622_v51  ;;  %7367 = vmatprep.subr.bf16.mxu1 %v9625_v52  ;;  %v9709_v51 = vld [vmem:[%s11398_s24 + $0x4ec] ss:$16 sps:$4 sm:$0xff]   ;;  %v9704_v52 = vld [vmem:[%s11398_s24 + $0x4e0] ss:$16 sps:$4 sm:$0xff]  }
  0xd3   : > { %6712 = vmatpush1.bf16.msra.mxu0 %v9620_v54  ;;  %7368 = vmatpush1.bf16.msra.mxu1 %v9623_v55  ;;  %v9707_v54 = vld [vmem:[%s11398_s24 + $0x4e8] ss:$16 sps:$4 sm:$0xff]   ;;  %v9712_v55 = vld [vmem:[%s11398_s24 + $0x504] ss:$16 sps:$4 sm:$0xff]  }
  0xd4   : > { %6713 = vmatprep.subr.bf16.mxu0 %v9628_v56  ;;  %7369 = vmatprep.subr.bf16.mxu1 %v9631_v57  ;;  %v9715_v56 = vld [vmem:[%s11398_s24 + $0x50c] ss:$16 sps:$4 sm:$0xff]   ;;  %v9710_v57 = vld [vmem:[%s11398_s24 + $0x500] ss:$16 sps:$4 sm:$0xff]  }
  0xd7   : > { %6714 = vmatpush1.bf16.msra.mxu0 %v9626_v58  ;;  %7370 = vmatpush1.bf16.msra.mxu1 %v9629_v59  ;;  %v9713_v58 = vld [vmem:[%s11398_s24 + $0x508] ss:$16 sps:$4 sm:$0xff]   ;;  %v9718_v59 = vld [vmem:[%s11398_s24 + $0x524] ss:$16 sps:$4 sm:$0xff]  }
  0xd8   : > { %6715 = vmatprep.subr.bf16.mxu0 %v9634_v60  ;;  %7371 = vmatprep.subr.bf16.mxu1 %v9637_v61  ;;  %v9721_v60 = vld [vmem:[%s11398_s24 + $0x52c] ss:$16 sps:$4 sm:$0xff]   ;;  %v9716_v61 = vld [vmem:[%s11398_s24 + $0x520] ss:$16 sps:$4 sm:$0xff]  }
  0xdb   : > { %6716 = vmatpush1.bf16.msra.mxu0 %v9632_v62  ;;  %7372 = vmatpush1.bf16.msra.mxu1 %v9635_v63  ;;  %v9719_v62 = vld [vmem:[%s11398_s24 + $0x528] ss:$16 sps:$4 sm:$0xff]   ;;  %v9724_v63 = vld [vmem:[%s11398_s24 + $0x544] ss:$16 sps:$4 sm:$0xff]  }
  0xdc   : > { %6717 = vmatprep.subr.bf16.mxu0 %v9640_v0  ;;  %7373 = vmatprep.subr.bf16.mxu1 %v9643_v1  ;;  %v9727_v0 = vld [vmem:[%s11398_s24 + $0x54c] ss:$16 sps:$4 sm:$0xff]   ;;  %v9722_v1 = vld [vmem:[%s11398_s24 + $0x540] ss:$16 sps:$4 sm:$0xff]  }
  0xdf   : > { %6718 = vmatpush1.bf16.msra.mxu0 %v9638_v2  ;;  %7374 = vmatpush1.bf16.msra.mxu1 %v9641_v3  ;;  %v9725_v2 = vld [vmem:[%s11398_s24 + $0x548] ss:$16 sps:$4 sm:$0xff]   ;;  %v9730_v3 = vld [vmem:[%s11398_s24 + $0x564] ss:$16 sps:$4 sm:$0xff]  }
  0xe0   : > { %6719 = vmatprep.subr.bf16.mxu0 %v9646_v4  ;;  %7375 = vmatprep.subr.bf16.mxu1 %v9649_v5  ;;  %v9733_v4 = vld [vmem:[%s11398_s24 + $0x56c] ss:$16 sps:$4 sm:$0xff]   ;;  %v9728_v5 = vld [vmem:[%s11398_s24 + $0x560] ss:$16 sps:$4 sm:$0xff]  }
  0xe3   : > { %6720 = vmatpush1.bf16.msra.mxu0 %v9644_v6  ;;  %7376 = vmatpush1.bf16.msra.mxu1 %v9647_v7  ;;  %v9731_v6 = vld [vmem:[%s11398_s24 + $0x568] ss:$16 sps:$4 sm:$0xff]   ;;  %v9736_v7 = vld [vmem:[%s11398_s24 + $0x584] ss:$16 sps:$4 sm:$0xff]  }
  0xe4   : > { %6721 = vmatprep.subr.bf16.mxu0 %v9652_v8  ;;  %7377 = vmatprep.subr.bf16.mxu1 %v9655_v9  ;;  %v9739_v8 = vld [vmem:[%s11398_s24 + $0x58c] ss:$16 sps:$4 sm:$0xff]   ;;  %v9734_v9 = vld [vmem:[%s11398_s24 + $0x580] ss:$16 sps:$4 sm:$0xff]  }
  0xe7   : > { %6722 = vmatpush1.bf16.msra.mxu0 %v9650_v11  ;;  %7378 = vmatpush1.bf16.msra.mxu1 %v9653_v12  ;;  %v9742_v11 = vld [vmem:[%s11398_s24 + $0x5a4] ss:$16 sps:$4 sm:$0xff]   ;;  %v9745_v12 = vld [vmem:[%s11398_s24 + $0x5ac] ss:$16 sps:$4 sm:$0xff]  }
  0xe8   : > { %6723 = vmatprep.subr.bf16.mxu0 %v9658_v13  ;;  %7379 = vmatprep.subr.bf16.mxu1 %v9661_v15  ;;  %v9740_v13 = vld [vmem:[%s11398_s24 + $0x5a0] ss:$16 sps:$4 sm:$0xff]   ;;  %v9743_v15 = vld [vmem:[%s11398_s24 + $0x5a8] ss:$16 sps:$4 sm:$0xff]  }
  0xeb   : > { %6724 = vmatpush1.bf16.msra.mxu0 %v9656_v17  ;;  %7380 = vmatpush1.bf16.msra.mxu1 %v9659_v53  ;;  %v9748_v17 = vld [vmem:[%s11398_s24 + $0x5c4] ss:$16 sps:$4 sm:$0xff]   ;;  %v9751_v53 = vld [vmem:[%s11398_s24 + $0x5cc] ss:$16 sps:$4 sm:$0xff]  }
  0xec   : > { %6734 = vmatprep.subr.bf16.mxu0 %v9664_v18  ;;  %7390 = vmatprep.subr.bf16.mxu1 %v9667_v19  ;;  %v9746_v18 = vld [vmem:[%s11398_s24 + $0x5c0] ss:$16 sps:$4 sm:$0xff]   ;;  %v9749_v19 = vld [vmem:[%s11398_s24 + $0x5c8] ss:$16 sps:$4 sm:$0xff]  }
  0xee   : > { %6726 = vmatmul.mubr.bf16.vlgmr.msra.gmra.mrb[0].mxu0 %v1349_v22  ;;  %7382 = vmatmul.mubr.bf16.vlgmr.msra.gmra.mrb[0].mxu1 %v1349_v22  ;;  %v9752_v22 = vld [vmem:[%s11398_s24 + $0x5e0] ss:$16 sps:$4 sm:$0xff]  }
  0xef   : > { %6735 = vmatpush1.bf16.msra.mxu0 %v9662_v21  ;;  %7391 = vmatpush1.bf16.msra.mxu1 %v9665_v23  ;;  %v9757_v21 = vld [vmem:[%s11398_s24 + $0x5ec] ss:$16 sps:$4 sm:$0xff]   ;;  %v9755_v23 = vld [vmem:[%s11398_s24 + $0x5e8] ss:$16 sps:$4 sm:$0xff]  }
  0xf0   : > { %6736 = vmatprep.subr.bf16.mxu0 %v9670_v24  ;;  %7392 = vmatprep.subr.bf16.mxu1 %v9673_v25  ;;  %v9761_v24 = vld [vmem:[%s11398_s24 + $0x604] ss:$16 sps:$4 sm:$0xff]   ;;  %v9764_v25 = vld [vmem:[%s11398_s24 + $0x60c] ss:$16 sps:$4 sm:$0xff]  }
  0xf1   : > { %6766 = vmatprep.mubr.bf16.mxu0 %v11586_v26  ;;  %7422 = vmatprep.mubr.bf16.mxu1 %v11586_v26 }
  0xf3   : > { %6737 = vmatpush1.bf16.msra.mxu0 %v9668_v27  ;;  %7393 = vmatpush1.bf16.msra.mxu1 %v9671_v14  ;;  %v9759_v27 = vld [vmem:[%s11398_s24 + $0x600] ss:$16 sps:$4 sm:$0xff]   ;;  %v11653_v14 = vrot.slane %v11571_v16, %v11473_v50 }
  0xf4   : > { %6738 = vmatprep.subr.bf16.mxu0 %v9676_v28  ;;  %7394 = vmatprep.subr.bf16.mxu1 %v9679_v29  ;;  %v9762_v28 = vld [vmem:[%s11398_s24 + $0x608] ss:$16 sps:$4 sm:$0xff]   ;;  %v9767_v29 = vld [vmem:[%s11398_s24 + $0x624] ss:$16 sps:$4 sm:$0xff]   ;;  %v9765_v16 = vld [vmem:[%s11398_s24 + $0x620] ss:$16 sps:$4 sm:$0xff]  }
  0xf7   : > { %6739 = vmatpush1.bf16.msra.mxu0 %v9674_v30  ;;  %7395 = vmatpush1.bf16.msra.mxu1 %v9677_v31  ;;  %v9770_v30 = vld [vmem:[%s11398_s24 + $0x62c] ss:$16 sps:$4 sm:$0xff]   ;;  %v1352_v31 = vcombine.high %v11586_v26, %v11586_v26  ;;  %v9771_v26 = vld [vmem:[%s11398_s24 + $0x640] ss:$16 sps:$4 sm:$0xff]  }
  0xf8   : > { %6740 = vmatprep.subr.bf16.mxu0 %v9682_v32  ;;  %7396 = vmatprep.subr.bf16.mxu1 %v9685_v33  ;;  %v9768_v32 = vld [vmem:[%s11398_s24 + $0x628] ss:$16 sps:$4 sm:$0xff]   ;;  %v9773_v33 = vld [vmem:[%s11398_s24 + $0x644] ss:$16 sps:$4 sm:$0xff]  }
  0xfb   : > { %6741 = vmatpush1.bf16.msra.mxu0 %v9680_v34  ;;  %7397 = vmatpush1.bf16.msra.mxu1 %v9683_v35  ;;  %v9776_v34 = vld [vmem:[%s11398_s24 + $0x64c] ss:$16 sps:$4 sm:$0xff]   ;;  %v9774_v35 = vld [vmem:[%s11398_s24 + $0x648] ss:$16 sps:$4 sm:$0xff]  }
  0xfc   : > { %6742 = vmatprep.subr.bf16.mxu0 %v9688_v36  ;;  %7398 = vmatprep.subr.bf16.mxu1 %v9691_v37  ;;  %v9779_v36 = vld [vmem:[%s11398_s24 + $0x664] ss:$16 sps:$4 sm:$0xff]   ;;  %v9782_v37 = vld [vmem:[%s11398_s24 + $0x66c] ss:$16 sps:$4 sm:$0xff]  }
  0xff   : > { %6743 = vmatpush1.bf16.msra.mxu0 %v9686_v38  ;;  %7399 = vmatpush1.bf16.msra.mxu1 %v9689_v39  ;;  %v9777_v38 = vld [vmem:[%s11398_s24 + $0x660] ss:$16 sps:$4 sm:$0xff]   ;;  %v9780_v39 = vld [vmem:[%s11398_s24 + $0x668] ss:$16 sps:$4 sm:$0xff]  }
 0x100   : > { %6744 = vmatprep.subr.bf16.mxu0 %v9694_v40  ;;  %7400 = vmatprep.subr.bf16.mxu1 %v9697_v41  ;;  %v9785_v40 = vld [vmem:[%s11398_s24 + $0x684] ss:$16 sps:$4 sm:$0xff]   ;;  %v9788_v41 = vld [vmem:[%s11398_s24 + $0x68c] ss:$16 sps:$4 sm:$0xff]  }
 0x103   : > { %6745 = vmatpush1.bf16.msra.mxu0 %v9692_v42  ;;  %7401 = vmatpush1.bf16.msra.mxu1 %v9695_v43  ;;  %v9783_v42 = vld [vmem:[%s11398_s24 + $0x680] ss:$16 sps:$4 sm:$0xff]   ;;  %v9786_v43 = vld [vmem:[%s11398_s24 + $0x688] ss:$16 sps:$4 sm:$0xff]  }
 0x104   : > { %6746 = vmatprep.subr.bf16.mxu0 %v9700_v45  ;;  %7402 = vmatprep.subr.bf16.mxu1 %v9703_v46  ;;  %v9791_v45 = vld [vmem:[%s11398_s24 + $0x6a4] ss:$16 sps:$4 sm:$0xff]   ;;  %v9794_v46 = vld [vmem:[%s11398_s24 + $0x6ac] ss:$16 sps:$4 sm:$0xff]  }
 0x107   : > { %6747 = vmatpush1.bf16.msra.mxu0 %v9698_v47  ;;  %7403 = vmatpush1.bf16.msra.mxu1 %v9701_v48  ;;  %v9789_v47 = vld [vmem:[%s11398_s24 + $0x6a0] ss:$16 sps:$4 sm:$0xff]   ;;  %v9792_v48 = vld [vmem:[%s11398_s24 + $0x6a8] ss:$16 sps:$4 sm:$0xff]  }
 0x108   : > { %6748 = vmatprep.subr.bf16.mxu0 %v9706_v49  ;;  %7404 = vmatprep.subr.bf16.mxu1 %v9709_v51  ;;  %v9797_v49 = vld [vmem:[%s11398_s24 + $0x6c4] ss:$16 sps:$4 sm:$0xff]   ;;  %v9800_v51 = vld [vmem:[%s11398_s24 + $0x6cc] ss:$16 sps:$4 sm:$0xff]  }
 0x10b   : > { %6749 = vmatpush1.bf16.msra.mxu0 %v9704_v52  ;;  %7405 = vmatpush1.bf16.msra.mxu1 %v9707_v54  ;;  %v9795_v52 = vld [vmem:[%s11398_s24 + $0x6c0] ss:$16 sps:$4 sm:$0xff]   ;;  %v9798_v54 = vld [vmem:[%s11398_s24 + $0x6c8] ss:$16 sps:$4 sm:$0xff]  }
 0x10c   : > { %6750 = vmatprep.subr.bf16.mxu0 %v9712_v55  ;;  %7406 = vmatprep.subr.bf16.mxu1 %v9715_v56  ;;  %v9803_v55 = vld [vmem:[%s11398_s24 + $0x6e4] ss:$16 sps:$4 sm:$0xff]   ;;  %v9806_v56 = vld [vmem:[%s11398_s24 + $0x6ec] ss:$16 sps:$4 sm:$0xff]  }
 0x10f   : > { %6751 = vmatpush1.bf16.msra.mxu0 %v9710_v57  ;;  %7407 = vmatpush1.bf16.msra.mxu1 %v9713_v58  ;;  %v9801_v57 = vld [vmem:[%s11398_s24 + $0x6e0] ss:$16 sps:$4 sm:$0xff]   ;;  %v9804_v58 = vld [vmem:[%s11398_s24 + $0x6e8] ss:$16 sps:$4 sm:$0xff]  }
 0x110   : > { %6752 = vmatprep.subr.bf16.mxu0 %v9718_v59  ;;  %7408 = vmatprep.subr.bf16.mxu1 %v9721_v60  ;;  %v9809_v59 = vld [vmem:[%s11398_s24 + $0x704] ss:$16 sps:$4 sm:$0xff]   ;;  %v9812_v60 = vld [vmem:[%s11398_s24 + $0x70c] ss:$16 sps:$4 sm:$0xff]  }
 0x113   : > { %6753 = vmatpush1.bf16.msra.mxu0 %v9716_v61  ;;  %7409 = vmatpush1.bf16.msra.mxu1 %v9719_v62  ;;  %v9807_v61 = vld [vmem:[%s11398_s24 + $0x700] ss:$16 sps:$4 sm:$0xff]   ;;  %v9810_v62 = vld [vmem:[%s11398_s24 + $0x708] ss:$16 sps:$4 sm:$0xff]  }
 0x114   : > { %6754 = vmatprep.subr.bf16.mxu0 %v9724_v63  ;;  %7410 = vmatprep.subr.bf16.mxu1 %v9727_v0  ;;  %v9815_v63 = vld [vmem:[%s11398_s24 + $0x724] ss:$16 sps:$4 sm:$0xff]   ;;  %v9818_v0 = vld [vmem:[%s11398_s24 + $0x72c] ss:$16 sps:$4 sm:$0xff]  }
 0x117   : > { %6755 = vmatpush1.bf16.msra.mxu0 %v9722_v1  ;;  %7411 = vmatpush1.bf16.msra.mxu1 %v9725_v2  ;;  %v9813_v1 = vld [vmem:[%s11398_s24 + $0x720] ss:$16 sps:$4 sm:$0xff]   ;;  %v9816_v2 = vld [vmem:[%s11398_s24 + $0x728] ss:$16 sps:$4 sm:$0xff]  }
 0x118   : > { %6756 = vmatprep.subr.bf16.mxu0 %v9730_v3  ;;  %7412 = vmatprep.subr.bf16.mxu1 %v9733_v4  ;;  %v9821_v3 = vld [vmem:[%s11398_s24 + $0x744] ss:$16 sps:$4 sm:$0xff]   ;;  %v9824_v4 = vld [vmem:[%s11398_s24 + $0x74c] ss:$16 sps:$4 sm:$0xff]  }
 0x11b   : > { %6757 = vmatpush1.bf16.msra.mxu0 %v9728_v5  ;;  %7413 = vmatpush1.bf16.msra.mxu1 %v9731_v6  ;;  %v9819_v5 = vld [vmem:[%s11398_s24 + $0x740] ss:$16 sps:$4 sm:$0xff]   ;;  %v9822_v6 = vld [vmem:[%s11398_s24 + $0x748] ss:$16 sps:$4 sm:$0xff]  }
 0x11c   : > { %6758 = vmatprep.subr.bf16.mxu0 %v9736_v7  ;;  %7414 = vmatprep.subr.bf16.mxu1 %v9739_v8  ;;  %v9827_v7 = vld [vmem:[%s11398_s24 + $0x764] ss:$16 sps:$4 sm:$0xff]   ;;  %v9830_v8 = vld [vmem:[%s11398_s24 + $0x76c] ss:$16 sps:$4 sm:$0xff]  }
 0x11f   : > { %6759 = vmatpush1.bf16.msra.mxu0 %v9734_v9  ;;  %7415 = vmatpush1.bf16.msra.mxu1 %v9737_v10  ;;  %v9825_v9 = vld [vmem:[%s11398_s24 + $0x760] ss:$16 sps:$4 sm:$0xff]   ;;  %v9828_v10 = vld [vmem:[%s11398_s24 + $0x768] ss:$16 sps:$4 sm:$0xff]  }
 0x120   : > { %6760 = vmatprep.subr.bf16.mxu0 %v9742_v11  ;;  %7416 = vmatprep.subr.bf16.mxu1 %v9745_v12  ;;  %v9833_v11 = vld [vmem:[%s11398_s24 + $0x784] ss:$16 sps:$4 sm:$0xff]   ;;  %v9836_v12 = vld [vmem:[%s11398_s24 + $0x78c] ss:$16 sps:$4 sm:$0xff]  }
 0x123   : > { %6761 = vmatpush1.bf16.msra.mxu0 %v9740_v13  ;;  %7417 = vmatpush1.bf16.msra.mxu1 %v9743_v15  ;;  %v9831_v13 = vld [vmem:[%s11398_s24 + $0x780] ss:$16 sps:$4 sm:$0xff]   ;;  %v9834_v15 = vld [vmem:[%s11398_s24 + $0x788] ss:$16 sps:$4 sm:$0xff]  }
 0x124   : > { %6762 = vmatprep.subr.bf16.mxu0 %v9748_v17  ;;  %7418 = vmatprep.subr.bf16.mxu1 %v9751_v53  ;;  %v9839_v17 = vld [vmem:[%s11398_s24 + $0x7a4] ss:$16 sps:$4 sm:$0xff]   ;;  %v9842_v53 = vld [vmem:[%s11398_s24 + $0x7ac] ss:$16 sps:$4 sm:$0xff]  }
 0x127   : > { %6763 = vmatpush1.bf16.msra.mxu0 %v9746_v18  ;;  %7419 = vmatpush1.bf16.msra.mxu1 %v9749_v19  ;;  %v9837_v18 = vld [vmem:[%s11398_s24 + $0x7a0] ss:$16 sps:$4 sm:$0xff]   ;;  %v9840_v19 = vld [vmem:[%s11398_s24 + $0x7a8] ss:$16 sps:$4 sm:$0xff]  }
 0x128   : > { %6764 = vmatprep.subr.bf16.mxu0 %v9754_v20  ;;  %7420 = vmatprep.subr.bf16.mxu1 %v9757_v21  ;;  %v9845_v20 = vld [vmem:[%s11398_s24 + $0x7c4] ss:$16 sps:$4 sm:$0xff]   ;;  %v9848_v21 = vld [vmem:[%s11398_s24 + $0x7cc] ss:$16 sps:$4 sm:$0xff]  }
 0x12b   : > { %6765 = vmatpush1.bf16.msra.mxu0 %v9752_v22  ;;  %7421 = vmatpush1.bf16.msra.mxu1 %v9755_v23  ;;  %v11715_v22 = vld.sshfl [vmem:[%s11419_s26 + $0x8] sm:$0xff pattern:$0x75316420] }
 0x12c   : > { %6775 = vmatprep.subr.bf16.mxu0 %v9761_v24  ;;  %7431 = vmatprep.subr.bf16.mxu1 %v9764_v25  ;;  %v9843_v23 = vld [vmem:[%s11398_s24 + $0x7c0] ss:$16 sps:$4 sm:$0xff]   ;;  %v9846_v24 = vld [vmem:[%s11398_s24 + $0x7c8] ss:$16 sps:$4 sm:$0xff]   ;;  %v9851_v25 = vld [vmem:[%s11398_s24 + $0x7e4] ss:$16 sps:$4 sm:$0xff]  }
 0x12e   : > { %6767 = vmatmul.mubr.bf16.vlgmr.msra.gmra.mrb[0].mxu0 %v11653_v14  ;;  %7423 = vmatmul.mubr.bf16.vlgmr.msra.gmra.mrb[0].mxu1 %v11653_v14 }
 0x12f   : > { %6776 = vmatpush1.bf16.msra.mxu0 %v9759_v27  ;;  %7432 = vmatpush1.bf16.msra.mxu1 %v9762_v28  ;;  %v9854_v27 = vld [vmem:[%s11398_s24 + $0x7ec] ss:$16 sps:$4 sm:$0xff]   ;;  %v9849_v28 = vld [vmem:[%s11398_s24 + $0x7e0] ss:$16 sps:$4 sm:$0xff]  }
 0x130   : > { %6777 = vmatprep.subr.bf16.mxu0 %v9767_v29  ;;  %7433 = vmatprep.subr.bf16.mxu1 %v9770_v30  ;;  %v9852_v29 = vld [vmem:[%s11398_s24 + $0x7e8] ss:$16 sps:$4 sm:$0xff]   ;;  %v9857_v30 = vld [vmem:[%s11398_s24 + $0x804] ss:$16 sps:$4 sm:$0xff]  }
 0x131   : > { %6807 = vmatprep.mubr.bf16.mxu0 %v1352_v31  ;;  %7463 = vmatprep.mubr.bf16.mxu1 %v1352_v31  ;;  %v9860_v31 = vld [vmem:[%s11398_s24 + $0x80c] ss:$16 sps:$4 sm:$0xff]  }
 0x133   : > { %6778 = vmatpush1.bf16.msra.mxu0 %v9765_v16  ;;  %7434 = vmatpush1.bf16.msra.mxu1 %v9768_v32  ;;  %v1368_v16 = vcombine.high %v11715_v22, %v11715_v22  ;;  %v1350_v32 = vcombine.high %v11653_v14, %v11653_v14  ;;  %v9861_v14 = vld [vmem:[%s11398_s24 + $0x820] ss:$16 sps:$4 sm:$0xff]  }
 0x134   : > { %6779 = vmatprep.subr.bf16.mxu0 %v9773_v33  ;;  %7435 = vmatprep.subr.bf16.mxu1 %v9776_v34  ;;  %v9855_v33 = vld [vmem:[%s11398_s24 + $0x800] ss:$16 sps:$4 sm:$0xff]   ;;  %v9858_v34 = vld [vmem:[%s11398_s24 + $0x808] ss:$16 sps:$4 sm:$0xff]  }
 0x137   : > { %6780 = vmatpush1.bf16.msra.mxu0 %v9771_v26  ;;  %7436 = vmatpush1.bf16.msra.mxu1 %v9774_v35  ;;  %v9863_v26 = vld [vmem:[%s11398_s24 + $0x824] ss:$16 sps:$4 sm:$0xff]   ;;  %v9866_v35 = vld [vmem:[%s11398_s24 + $0x82c] ss:$16 sps:$4 sm:$0xff]  }
 0x138   : > { %6781 = vmatprep.subr.bf16.mxu0 %v9779_v36  ;;  %7437 = vmatprep.subr.bf16.mxu1 %v9782_v37  ;;  %v11734_v36 = vrot.slane %v1368_v16, %v11473_v50  ;;  %v9864_v37 = vld [vmem:[%s11398_s24 + $0x828] ss:$16 sps:$4 sm:$0xff]   ;;  %v9947_v16 = vld [vmem:[%s11398_s24 + $0x9e4] ss:$16 sps:$4 sm:$0xff]  }
 0x13b   : > { %6782 = vmatpush1.bf16.msra.mxu0 %v9777_v38  ;;  %7438 = vmatpush1.bf16.msra.mxu1 %v9780_v39  ;;  %v9869_v38 = vld [vmem:[%s11398_s24 + $0x844] ss:$16 sps:$4 sm:$0xff]   ;;  %v9872_v39 = vld [vmem:[%s11398_s24 + $0x84c] ss:$16 sps:$4 sm:$0xff]  }
 0x13c   : > { %6783 = vmatprep.subr.bf16.mxu0 %v9785_v40  ;;  %7439 = vmatprep.subr.bf16.mxu1 %v9788_v41  ;;  %v9867_v40 = vld [vmem:[%s11398_s24 + $0x840] ss:$16 sps:$4 sm:$0xff]   ;;  %v9870_v41 = vld [vmem:[%s11398_s24 + $0x848] ss:$16 sps:$4 sm:$0xff]  }
 0x13f   : > { %6784 = vmatpush1.bf16.msra.mxu0 %v9783_v42  ;;  %7440 = vmatpush1.bf16.msra.mxu1 %v9786_v43  ;;  %v9875_v42 = vld [vmem:[%s11398_s24 + $0x864] ss:$16 sps:$4 sm:$0xff]   ;;  %v9878_v43 = vld [vmem:[%s11398_s24 + $0x86c] ss:$16 sps:$4 sm:$0xff]  }
 0x140   : > { %6785 = vmatprep.subr.bf16.mxu0 %v9791_v45  ;;  %7441 = vmatprep.subr.bf16.mxu1 %v9794_v46  ;;  %v9873_v45 = vld [vmem:[%s11398_s24 + $0x860] ss:$16 sps:$4 sm:$0xff]   ;;  %v9876_v46 = vld [vmem:[%s11398_s24 + $0x868] ss:$16 sps:$4 sm:$0xff]  }
 0x143   : > { %6786 = vmatpush1.bf16.msra.mxu0 %v9789_v47  ;;  %7442 = vmatpush1.bf16.msra.mxu1 %v9792_v48  ;;  %v9881_v47 = vld [vmem:[%s11398_s24 + $0x884] ss:$16 sps:$4 sm:$0xff]   ;;  %v9884_v48 = vld [vmem:[%s11398_s24 + $0x88c] ss:$16 sps:$4 sm:$0xff]  }
 0x144   : > { %6787 = vmatprep.subr.bf16.mxu0 %v9797_v49  ;;  %7443 = vmatprep.subr.bf16.mxu1 %v9800_v51  ;;  %v9879_v49 = vld [vmem:[%s11398_s24 + $0x880] ss:$16 sps:$4 sm:$0xff]   ;;  %v9882_v51 = vld [vmem:[%s11398_s24 + $0x888] ss:$16 sps:$4 sm:$0xff]  }
 0x147   : > { %6788 = vmatpush1.bf16.msra.mxu0 %v9795_v52  ;;  %7444 = vmatpush1.bf16.msra.mxu1 %v9798_v54  ;;  %v9887_v52 = vld [vmem:[%s11398_s24 + $0x8a4] ss:$16 sps:$4 sm:$0xff]   ;;  %v9890_v54 = vld [vmem:[%s11398_s24 + $0x8ac] ss:$16 sps:$4 sm:$0xff]  }
 0x148   : > { %6789 = vmatprep.subr.bf16.mxu0 %v9803_v55  ;;  %7445 = vmatprep.subr.bf16.mxu1 %v9806_v56  ;;  %v9885_v55 = vld [vmem:[%s11398_s24 + $0x8a0] ss:$16 sps:$4 sm:$0xff]   ;;  %v9888_v56 = vld [vmem:[%s11398_s24 + $0x8a8] ss:$16 sps:$4 sm:$0xff]  }
 0x14b   : > { %6790 = vmatpush1.bf16.msra.mxu0 %v9801_v57  ;;  %7446 = vmatpush1.bf16.msra.mxu1 %v9804_v58  ;;  %v9893_v57 = vld [vmem:[%s11398_s24 + $0x8c4] ss:$16 sps:$4 sm:$0xff]   ;;  %v9896_v58 = vld [vmem:[%s11398_s24 + $0x8cc] ss:$16 sps:$4 sm:$0xff]  }
 0x14c   : > { %6791 = vmatprep.subr.bf16.mxu0 %v9809_v59  ;;  %7447 = vmatprep.subr.bf16.mxu1 %v9812_v60  ;;  %v9891_v59 = vld [vmem:[%s11398_s24 + $0x8c0] ss:$16 sps:$4 sm:$0xff]   ;;  %v9894_v60 = vld [vmem:[%s11398_s24 + $0x8c8] ss:$16 sps:$4 sm:$0xff]  }
 0x14f   : > { %6792 = vmatpush1.bf16.msra.mxu0 %v9807_v61  ;;  %7448 = vmatpush1.bf16.msra.mxu1 %v9810_v62  ;;  %v9899_v61 = vld [vmem:[%s11398_s24 + $0x8e4] ss:$16 sps:$4 sm:$0xff]   ;;  %v9902_v62 = vld [vmem:[%s11398_s24 + $0x8ec] ss:$16 sps:$4 sm:$0xff]  }
 0x150   : > { %6793 = vmatprep.subr.bf16.mxu0 %v9815_v63  ;;  %7449 = vmatprep.subr.bf16.mxu1 %v9818_v0  ;;  %v9897_v63 = vld [vmem:[%s11398_s24 + $0x8e0] ss:$16 sps:$4 sm:$0xff]   ;;  %v9900_v0 = vld [vmem:[%s11398_s24 + $0x8e8] ss:$16 sps:$4 sm:$0xff]  }
 0x153   : > { %6794 = vmatpush1.bf16.msra.mxu0 %v9813_v1  ;;  %7450 = vmatpush1.bf16.msra.mxu1 %v9816_v2  ;;  %v9905_v1 = vld [vmem:[%s11398_s24 + $0x904] ss:$16 sps:$4 sm:$0xff]   ;;  %v9908_v2 = vld [vmem:[%s11398_s24 + $0x90c] ss:$16 sps:$4 sm:$0xff]  }
 0x154   : > { %6795 = vmatprep.subr.bf16.mxu0 %v9821_v3  ;;  %7451 = vmatprep.subr.bf16.mxu1 %v9824_v4  ;;  %v9903_v3 = vld [vmem:[%s11398_s24 + $0x900] ss:$16 sps:$4 sm:$0xff]   ;;  %v9906_v4 = vld [vmem:[%s11398_s24 + $0x908] ss:$16 sps:$4 sm:$0xff]  }
 0x157   : > { %6796 = vmatpush1.bf16.msra.mxu0 %v9819_v5  ;;  %7452 = vmatpush1.bf16.msra.mxu1 %v9822_v6  ;;  %v9911_v5 = vld [vmem:[%s11398_s24 + $0x924] ss:$16 sps:$4 sm:$0xff]   ;;  %v9914_v6 = vld [vmem:[%s11398_s24 + $0x92c] ss:$16 sps:$4 sm:$0xff]  }
 0x158   : > { %6797 = vmatprep.subr.bf16.mxu0 %v9827_v7  ;;  %7453 = vmatprep.subr.bf16.mxu1 %v9830_v8  ;;  %v9909_v7 = vld [vmem:[%s11398_s24 + $0x920] ss:$16 sps:$4 sm:$0xff]   ;;  %v9912_v8 = vld [vmem:[%s11398_s24 + $0x928] ss:$16 sps:$4 sm:$0xff]  }
 0x15b   : > { %6798 = vmatpush1.bf16.msra.mxu0 %v9825_v9  ;;  %7454 = vmatpush1.bf16.msra.mxu1 %v9828_v10  ;;  %v9917_v9 = vld [vmem:[%s11398_s24 + $0x944] ss:$16 sps:$4 sm:$0xff]   ;;  %v9920_v10 = vld [vmem:[%s11398_s24 + $0x94c] ss:$16 sps:$4 sm:$0xff]  }
 0x15c   : > { %6799 = vmatprep.subr.bf16.mxu0 %v9833_v11  ;;  %7455 = vmatprep.subr.bf16.mxu1 %v9836_v12  ;;  %v9915_v11 = vld [vmem:[%s11398_s24 + $0x940] ss:$16 sps:$4 sm:$0xff]   ;;  %v9918_v12 = vld [vmem:[%s11398_s24 + $0x948] ss:$16 sps:$4 sm:$0xff]  }
 0x15f   : > { %6800 = vmatpush1.bf16.msra.mxu0 %v9831_v13  ;;  %7456 = vmatpush1.bf16.msra.mxu1 %v9834_v15  ;;  %v9923_v13 = vld [vmem:[%s11398_s24 + $0x964] ss:$16 sps:$4 sm:$0xff]   ;;  %v9926_v15 = vld [vmem:[%s11398_s24 + $0x96c] ss:$16 sps:$4 sm:$0xff]  }
 0x160   : > { %6801 = vmatprep.subr.bf16.mxu0 %v9839_v17  ;;  %7457 = vmatprep.subr.bf16.mxu1 %v9842_v53  ;;  %v9921_v17 = vld [vmem:[%s11398_s24 + $0x960] ss:$16 sps:$4 sm:$0xff]   ;;  %v9924_v53 = vld [vmem:[%s11398_s24 + $0x968] ss:$16 sps:$4 sm:$0xff]  }
 0x163   : > { %6802 = vmatpush1.bf16.msra.mxu0 %v9837_v18  ;;  %7458 = vmatpush1.bf16.msra.mxu1 %v9840_v19  ;;  %v9929_v18 = vld [vmem:[%s11398_s24 + $0x984] ss:$16 sps:$4 sm:$0xff]   ;;  %v9932_v19 = vld [vmem:[%s11398_s24 + $0x98c] ss:$16 sps:$4 sm:$0xff]  }
 0x164   : > { %6803 = vmatprep.subr.bf16.mxu0 %v9845_v20  ;;  %7459 = vmatprep.subr.bf16.mxu1 %v9848_v21  ;;  %v9927_v20 = vld [vmem:[%s11398_s24 + $0x980] ss:$16 sps:$4 sm:$0xff]   ;;  %v9930_v21 = vld [vmem:[%s11398_s24 + $0x988] ss:$16 sps:$4 sm:$0xff]  }
 0x167   : > { %6804 = vmatpush1.bf16.msra.mxu0 %v9843_v23  ;;  %7460 = vmatpush1.bf16.msra.mxu1 %v9846_v24  ;;  %v9935_v23 = vld [vmem:[%s11398_s24 + $0x9a4] ss:$16 sps:$4 sm:$0xff]   ;;  %v9938_v24 = vld [vmem:[%s11398_s24 + $0x9ac] ss:$16 sps:$4 sm:$0xff]  }
 0x168   : > { %6805 = vmatprep.subr.bf16.mxu0 %v9851_v25  ;;  %7461 = vmatprep.subr.bf16.mxu1 %v9854_v27  ;;  %v9933_v25 = vld [vmem:[%s11398_s24 + $0x9a0] ss:$16 sps:$4 sm:$0xff]   ;;  %v9936_v27 = vld [vmem:[%s11398_s24 + $0x9a8] ss:$16 sps:$4 sm:$0xff]  }
 0x16b   : > { %6806 = vmatpush1.bf16.msra.mxu0 %v9849_v28  ;;  %7462 = vmatpush1.bf16.msra.mxu1 %v9852_v29  ;;  %v9941_v28 = vld [vmem:[%s11398_s24 + $0x9c4] ss:$16 sps:$4 sm:$0xff]   ;;  %v9944_v29 = vld [vmem:[%s11398_s24 + $0x9cc] ss:$16 sps:$4 sm:$0xff]  }
 0x16c   : > { %6816 = vmatprep.subr.bf16.mxu0 %v9857_v30  ;;  %7472 = vmatprep.subr.bf16.mxu1 %v9860_v31  ;;  %v9939_v30 = vld [vmem:[%s11398_s24 + $0x9c0] ss:$16 sps:$4 sm:$0xff]   ;;  %v9942_v31 = vld [vmem:[%s11398_s24 + $0x9c8] ss:$16 sps:$4 sm:$0xff]  }
 0x16e   : > { %6808 = vmatmul.mubr.bf16.vlgmr.msra.gmra.mrb[0].mxu0 %v1350_v32  ;;  %7464 = vmatmul.mubr.bf16.vlgmr.msra.gmra.mrb[0].mxu1 %v1350_v32  ;;  %v9950_v32 = vld [vmem:[%s11398_s24 + $0x9ec] ss:$16 sps:$4 sm:$0xff]  }
 0x16f   : > { %6817 = vmatpush1.bf16.msra.mxu0 %v9855_v33  ;;  %7473 = vmatpush1.bf16.msra.mxu1 %v9858_v34  ;;  %v9945_v33 = vld [vmem:[%s11398_s24 + $0x9e0] ss:$16 sps:$4 sm:$0xff]   ;;  %v9948_v34 = vld [vmem:[%s11398_s24 + $0x9e8] ss:$16 sps:$4 sm:$0xff]  }
 0x170   : > { %6818 = vmatprep.subr.bf16.mxu0 %v9863_v26  ;;  %7474 = vmatprep.subr.bf16.mxu1 %v9866_v35  ;;  %v9953_v26 = vld [vmem:[%s11398_s24 + $0xa04] ss:$16 sps:$4 sm:$0xff]   ;;  %v9956_v35 = vld [vmem:[%s11398_s24 + $0xa0c] ss:$16 sps:$4 sm:$0xff]  }
 0x171   : > { %6848 = vmatprep.mubr.bf16.mxu0 %v11734_v36  ;;  %7504 = vmatprep.mubr.bf16.mxu1 %v11734_v36 }
 0x173   : > { %6819 = vmatpush1.bf16.msra.mxu0 %v9861_v14  ;;  %7475 = vmatpush1.bf16.msra.mxu1 %v9864_v37  ;;  %v11800_v14 = vrot.slane %v11715_v22, %v11473_v50  ;;  %v9951_v37 = vld [vmem:[%s11398_s24 + $0xa00] ss:$16 sps:$4 sm:$0xff]  }
 0x174   : > { %6820 = vmatprep.subr.bf16.mxu0 %v9869_v38  ;;  %7476 = vmatprep.subr.bf16.mxu1 %v9872_v39  ;;  %v9954_v38 = vld [vmem:[%s11398_s24 + $0xa08] ss:$16 sps:$4 sm:$0xff]   ;;  %v9959_v39 = vld [vmem:[%s11398_s24 + $0xa24] ss:$16 sps:$4 sm:$0xff]   ;;  %v9957_v22 = vld [vmem:[%s11398_s24 + $0xa20] ss:$16 sps:$4 sm:$0xff]  }
 0x177   : > { %6821 = vmatpush1.bf16.msra.mxu0 %v9867_v40  ;;  %7477 = vmatpush1.bf16.msra.mxu1 %v9870_v41  ;;  %v9962_v40 = vld [vmem:[%s11398_s24 + $0xa2c] ss:$16 sps:$4 sm:$0xff]   ;;  %v1400_v41 = vcombine.high %v11734_v36, %v11734_v36  ;;  %v9963_v36 = vld [vmem:[%s11398_s24 + $0xa40] ss:$16 sps:$4 sm:$0xff]  }
 0x178   : > { %6822 = vmatprep.subr.bf16.mxu0 %v9875_v42  ;;  %7478 = vmatprep.subr.bf16.mxu1 %v9878_v43  ;;  %v9960_v42 = vld [vmem:[%s11398_s24 + $0xa28] ss:$16 sps:$4 sm:$0xff]   ;;  %v9965_v43 = vld [vmem:[%s11398_s24 + $0xa44] ss:$16 sps:$4 sm:$0xff]  }
 0x17b   : > { %6823 = vmatpush1.bf16.msra.mxu0 %v9873_v45  ;;  %7479 = vmatpush1.bf16.msra.mxu1 %v9876_v46  ;;  %v9968_v45 = vld [vmem:[%s11398_s24 + $0xa4c] ss:$16 sps:$4 sm:$0xff]   ;;  %v9966_v46 = vld [vmem:[%s11398_s24 + $0xa48] ss:$16 sps:$4 sm:$0xff]  }
 0x17c   : > { %6824 = vmatprep.subr.bf16.mxu0 %v9881_v47  ;;  %7480 = vmatprep.subr.bf16.mxu1 %v9884_v48  ;;  %v9971_v47 = vld [vmem:[%s11398_s24 + $0xa64] ss:$16 sps:$4 sm:$0xff]   ;;  %v9974_v48 = vld [vmem:[%s11398_s24 + $0xa6c] ss:$16 sps:$4 sm:$0xff]  }
 0x17f   : > { %6825 = vmatpush1.bf16.msra.mxu0 %v9879_v49  ;;  %7481 = vmatpush1.bf16.msra.mxu1 %v9882_v51  ;;  %v9969_v49 = vld [vmem:[%s11398_s24 + $0xa60] ss:$16 sps:$4 sm:$0xff]   ;;  %v9972_v51 = vld [vmem:[%s11398_s24 + $0xa68] ss:$16 sps:$4 sm:$0xff]  }
 0x180   : > { %6826 = vmatprep.subr.bf16.mxu0 %v9887_v52  ;;  %7482 = vmatprep.subr.bf16.mxu1 %v9890_v54  ;;  %v9977_v52 = vld [vmem:[%s11398_s24 + $0xa84] ss:$16 sps:$4 sm:$0xff]   ;;  %v9980_v54 = vld [vmem:[%s11398_s24 + $0xa8c] ss:$16 sps:$4 sm:$0xff]  }
 0x183   : > { %6827 = vmatpush1.bf16.msra.mxu0 %v9885_v55  ;;  %7483 = vmatpush1.bf16.msra.mxu1 %v9888_v56  ;;  %v9975_v55 = vld [vmem:[%s11398_s24 + $0xa80] ss:$16 sps:$4 sm:$0xff]   ;;  %v9978_v56 = vld [vmem:[%s11398_s24 + $0xa88] ss:$16 sps:$4 sm:$0xff]  }
 0x184   : > { %6828 = vmatprep.subr.bf16.mxu0 %v9893_v57  ;;  %7484 = vmatprep.subr.bf16.mxu1 %v9896_v58  ;;  %v9983_v57 = vld [vmem:[%s11398_s24 + $0xaa4] ss:$16 sps:$4 sm:$0xff]   ;;  %v9986_v58 = vld [vmem:[%s11398_s24 + $0xaac] ss:$16 sps:$4 sm:$0xff]  }
 0x187   : > { %6829 = vmatpush1.bf16.msra.mxu0 %v9891_v59  ;;  %7485 = vmatpush1.bf16.msra.mxu1 %v9894_v60  ;;  %v9981_v59 = vld [vmem:[%s11398_s24 + $0xaa0] ss:$16 sps:$4 sm:$0xff]   ;;  %v9984_v60 = vld [vmem:[%s11398_s24 + $0xaa8] ss:$16 sps:$4 sm:$0xff]  }
 0x188   : > { %6830 = vmatprep.subr.bf16.mxu0 %v9899_v61  ;;  %7486 = vmatprep.subr.bf16.mxu1 %v9902_v62  ;;  %v9989_v61 = vld [vmem:[%s11398_s24 + $0xac4] ss:$16 sps:$4 sm:$0xff]   ;;  %v9992_v62 = vld [vmem:[%s11398_s24 + $0xacc] ss:$16 sps:$4 sm:$0xff]  }
 0x18b   : > { %6831 = vmatpush1.bf16.msra.mxu0 %v9897_v63  ;;  %7487 = vmatpush1.bf16.msra.mxu1 %v9900_v0  ;;  %v9987_v63 = vld [vmem:[%s11398_s24 + $0xac0] ss:$16 sps:$4 sm:$0xff]   ;;  %v9990_v0 = vld [vmem:[%s11398_s24 + $0xac8] ss:$16 sps:$4 sm:$0xff]  }
 0x18c   : > { %6832 = vmatprep.subr.bf16.mxu0 %v9905_v1  ;;  %7488 = vmatprep.subr.bf16.mxu1 %v9908_v2  ;;  %v9995_v1 = vld [vmem:[%s11398_s24 + $0xae4] ss:$16 sps:$4 sm:$0xff]   ;;  %v9998_v2 = vld [vmem:[%s11398_s24 + $0xaec] ss:$16 sps:$4 sm:$0xff]  }
 0x18f   : > { %6833 = vmatpush1.bf16.msra.mxu0 %v9903_v3  ;;  %7489 = vmatpush1.bf16.msra.mxu1 %v9906_v4  ;;  %v9993_v3 = vld [vmem:[%s11398_s24 + $0xae0] ss:$16 sps:$4 sm:$0xff]   ;;  %v9996_v4 = vld [vmem:[%s11398_s24 + $0xae8] ss:$16 sps:$4 sm:$0xff]  }
 0x190   : > { %6834 = vmatprep.subr.bf16.mxu0 %v9911_v5  ;;  %7490 = vmatprep.subr.bf16.mxu1 %v9914_v6  ;;  %v10001_v5 = vld [vmem:[%s11398_s24 + $0xb04] ss:$16 sps:$4 sm:$0xff]   ;;  %v10004_v6 = vld [vmem:[%s11398_s24 + $0xb0c] ss:$16 sps:$4 sm:$0xff]  }
 0x193   : > { %6835 = vmatpush1.bf16.msra.mxu0 %v9909_v7  ;;  %7491 = vmatpush1.bf16.msra.mxu1 %v9912_v8  ;;  %v9999_v7 = vld [vmem:[%s11398_s24 + $0xb00] ss:$16 sps:$4 sm:$0xff]   ;;  %v10002_v8 = vld [vmem:[%s11398_s24 + $0xb08] ss:$16 sps:$4 sm:$0xff]  }
 0x194   : > { %6836 = vmatprep.subr.bf16.mxu0 %v9917_v9  ;;  %7492 = vmatprep.subr.bf16.mxu1 %v9920_v10  ;;  %v10007_v9 = vld [vmem:[%s11398_s24 + $0xb24] ss:$16 sps:$4 sm:$0xff]   ;;  %v10010_v10 = vld [vmem:[%s11398_s24 + $0xb2c] ss:$16 sps:$4 sm:$0xff]  }
 0x197   : > { %6837 = vmatpush1.bf16.msra.mxu0 %v9915_v11  ;;  %7493 = vmatpush1.bf16.msra.mxu1 %v9918_v12  ;;  %v10005_v11 = vld [vmem:[%s11398_s24 + $0xb20] ss:$16 sps:$4 sm:$0xff]   ;;  %v10008_v12 = vld [vmem:[%s11398_s24 + $0xb28] ss:$16 sps:$4 sm:$0xff]  }
 0x198   : > { %6838 = vmatprep.subr.bf16.mxu0 %v9923_v13  ;;  %7494 = vmatprep.subr.bf16.mxu1 %v9926_v15  ;;  %v10013_v13 = vld [vmem:[%s11398_s24 + $0xb44] ss:$16 sps:$4 sm:$0xff]   ;;  %v10016_v15 = vld [vmem:[%s11398_s24 + $0xb4c] ss:$16 sps:$4 sm:$0xff]  }
 0x19b   : > { %6839 = vmatpush1.bf16.msra.mxu0 %v9921_v17  ;;  %7495 = vmatpush1.bf16.msra.mxu1 %v9924_v53  ;;  %v10011_v17 = vld [vmem:[%s11398_s24 + $0xb40] ss:$16 sps:$4 sm:$0xff]   ;;  %v10014_v53 = vld [vmem:[%s11398_s24 + $0xb48] ss:$16 sps:$4 sm:$0xff]  }
 0x19c   : > { %6840 = vmatprep.subr.bf16.mxu0 %v9929_v18  ;;  %7496 = vmatprep.subr.bf16.mxu1 %v9932_v19  ;;  %v10019_v18 = vld [vmem:[%s11398_s24 + $0xb64] ss:$16 sps:$4 sm:$0xff]   ;;  %v10022_v19 = vld [vmem:[%s11398_s24 + $0xb6c] ss:$16 sps:$4 sm:$0xff]  }
 0x19f   : > { %6841 = vmatpush1.bf16.msra.mxu0 %v9927_v20  ;;  %7497 = vmatpush1.bf16.msra.mxu1 %v9930_v21  ;;  %v10017_v20 = vld [vmem:[%s11398_s24 + $0xb60] ss:$16 sps:$4 sm:$0xff]   ;;  %v10020_v21 = vld [vmem:[%s11398_s24 + $0xb68] ss:$16 sps:$4 sm:$0xff]  }
 0x1a0   : > { %6842 = vmatprep.subr.bf16.mxu0 %v9935_v23  ;;  %7498 = vmatprep.subr.bf16.mxu1 %v9938_v24  ;;  %v10025_v23 = vld [vmem:[%s11398_s24 + $0xb84] ss:$16 sps:$4 sm:$0xff]   ;;  %v10028_v24 = vld [vmem:[%s11398_s24 + $0xb8c] ss:$16 sps:$4 sm:$0xff]  }
 0x1a3   : > { %6843 = vmatpush1.bf16.msra.mxu0 %v9933_v25  ;;  %7499 = vmatpush1.bf16.msra.mxu1 %v9936_v27  ;;  %v10023_v25 = vld [vmem:[%s11398_s24 + $0xb80] ss:$16 sps:$4 sm:$0xff]   ;;  %v10026_v27 = vld [vmem:[%s11398_s24 + $0xb88] ss:$16 sps:$4 sm:$0xff]  }
 0x1a4   : > { %6844 = vmatprep.subr.bf16.mxu0 %v9941_v28  ;;  %7500 = vmatprep.subr.bf16.mxu1 %v9944_v29  ;;  %v10031_v28 = vld [vmem:[%s11398_s24 + $0xba4] ss:$16 sps:$4 sm:$0xff]   ;;  %v10034_v29 = vld [vmem:[%s11398_s24 + $0xbac] ss:$16 sps:$4 sm:$0xff]  }
 0x1a7   : > { %6845 = vmatpush1.bf16.msra.mxu0 %v9939_v30  ;;  %7501 = vmatpush1.bf16.msra.mxu1 %v9942_v31  ;;  %v10029_v30 = vld [vmem:[%s11398_s24 + $0xba0] ss:$16 sps:$4 sm:$0xff]   ;;  %v10032_v31 = vld [vmem:[%s11398_s24 + $0xba8] ss:$16 sps:$4 sm:$0xff]  }
 0x1a8   : > { %6846 = vmatprep.subr.bf16.mxu0 %v9947_v16  ;;  %7502 = vmatprep.subr.bf16.mxu1 %v9950_v32  ;;  %v10037_v16 = vld [vmem:[%s11398_s24 + $0xbc4] ss:$16 sps:$4 sm:$0xff]   ;;  %v10040_v32 = vld [vmem:[%s11398_s24 + $0xbcc] ss:$16 sps:$4 sm:$0xff]  }
 0x1ab   : > { %6847 = vmatpush1.bf16.msra.mxu0 %v9945_v33  ;;  %7503 = vmatpush1.bf16.msra.mxu1 %v9948_v34  ;;  %v11010_v33 = vld [vmem:[%s11419_s26 + $0x8] sm:$0xff] }
 0x1ac   : > { %6857 = vmatprep.subr.bf16.mxu0 %v9953_v26  ;;  %7513 = vmatprep.subr.bf16.mxu1 %v9956_v35  ;;  %v1353_v34 = vcombine.high %v11010_v33, %v11010_v33  ;;  %v10035_v26 = vld [vmem:[%s11398_s24 + $0xbc0] ss:$16 sps:$4 sm:$0xff]   ;;  %v10038_v35 = vld [vmem:[%s11398_s24 + $0xbc8] ss:$16 sps:$4 sm:$0xff]  }
 0x1ad   : > { %v10119_v33 = vld [vmem:[%s11398_s24 + $0xd80] ss:$16 sps:$4 sm:$0xff]  }
 0x1ae   : > { %6849 = vmatmul.mubr.bf16.vlgmr.msra.gmra.mrb[0].mxu0 %v11800_v14  ;;  %7505 = vmatmul.mubr.bf16.vlgmr.msra.gmra.mrb[0].mxu1 %v11800_v14 }
 0x1af   : > { %6858 = vmatpush1.bf16.msra.mxu0 %v9951_v37  ;;  %7514 = vmatpush1.bf16.msra.mxu1 %v9954_v38  ;;  %v10043_v37 = vld [vmem:[%s11398_s24 + $0xbe4] ss:$16 sps:$4 sm:$0xff]   ;;  %v10046_v38 = vld [vmem:[%s11398_s24 + $0xbec] ss:$16 sps:$4 sm:$0xff]  }
 0x1b0   : > { %6859 = vmatprep.subr.bf16.mxu0 %v9959_v39  ;;  %7515 = vmatprep.subr.bf16.mxu1 %v9962_v40  ;;  %v11868_v39 = vrot.slane %v1353_v34, %v11473_v50  ;;  %v10041_v40 = vld [vmem:[%s11398_s24 + $0xbe0] ss:$16 sps:$4 sm:$0xff]   ;;  %v10122_v34 = vld [vmem:[%s11398_s24 + $0xd88] ss:$16 sps:$4 sm:$0xff]  }
 0x1b1   : > { %6889 = vmatprep.mubr.bf16.mxu0 %v1400_v41  ;;  %7545 = vmatprep.mubr.bf16.mxu1 %v1400_v41  ;;  %v10044_v41 = vld [vmem:[%s11398_s24 + $0xbe8] ss:$16 sps:$4 sm:$0xff]  }
 0x1b3   : > { %6860 = vmatpush1.bf16.msra.mxu0 %v9957_v22  ;;  %7516 = vmatpush1.bf16.msra.mxu1 %v9960_v42  ;;  %v10049_v22 = vld [vmem:[%s11398_s24 + $0xc04] ss:$16 sps:$4 sm:$0xff]   ;;  %v10052_v42 = vld [vmem:[%s11398_s24 + $0xc0c] ss:$16 sps:$4 sm:$0xff]  }
 0x1b4   : > { %6861 = vmatprep.subr.bf16.mxu0 %v9965_v43  ;;  %7517 = vmatprep.subr.bf16.mxu1 %v9968_v45  ;;  %v1369_v43 = vcombine.high %v11868_v39, %v11868_v39  ;;  %v1398_v45 = vcombine.high %v11800_v14, %v11800_v14  ;;  %v10053_v14 = vld [vmem:[%s11398_s24 + $0xc20] ss:$16 sps:$4 sm:$0xff]  }
 0x1b7   : > { %6862 = vmatpush1.bf16.msra.mxu0 %v9963_v36  ;;  %7518 = vmatpush1.bf16.msra.mxu1 %v9966_v46  ;;  %v10047_v36 = vld [vmem:[%s11398_s24 + $0xc00] ss:$16 sps:$4 sm:$0xff]   ;;  %v10050_v46 = vld [vmem:[%s11398_s24 + $0xc08] ss:$16 sps:$4 sm:$0xff]  }
 0x1b8   : > { %6863 = vmatprep.subr.bf16.mxu0 %v9971_v47  ;;  %7519 = vmatprep.subr.bf16.mxu1 %v9974_v48  ;;  %v10055_v47 = vld [vmem:[%s11398_s24 + $0xc24] ss:$16 sps:$4 sm:$0xff]   ;;  %v10058_v48 = vld [vmem:[%s11398_s24 + $0xc2c] ss:$16 sps:$4 sm:$0xff]  }
 0x1bb   : > { %6864 = vmatpush1.bf16.msra.mxu0 %v9969_v49  ;;  %7520 = vmatpush1.bf16.msra.mxu1 %v9972_v51  ;;  %v11883_v49 = vrot.slane %v1369_v43, %v11473_v50  ;;  %v10056_v51 = vld [vmem:[%s11398_s24 + $0xc28] ss:$16 sps:$4 sm:$0xff]   ;;  %v10139_v43 = vld [vmem:[%s11398_s24 + $0xde4] ss:$16 sps:$4 sm:$0xff]  }
 0x1bc   : > { %6865 = vmatprep.subr.bf16.mxu0 %v9977_v52  ;;  %7521 = vmatprep.subr.bf16.mxu1 %v9980_v54  ;;  %v10061_v52 = vld [vmem:[%s11398_s24 + $0xc44] ss:$16 sps:$4 sm:$0xff]   ;;  %v10064_v54 = vld [vmem:[%s11398_s24 + $0xc4c] ss:$16 sps:$4 sm:$0xff]  }
 0x1bf   : > { %6866 = vmatpush1.bf16.msra.mxu0 %v9975_v55  ;;  %7522 = vmatpush1.bf16.msra.mxu1 %v9978_v56  ;;  %v10059_v55 = vld [vmem:[%s11398_s24 + $0xc40] ss:$16 sps:$4 sm:$0xff]   ;;  %v10062_v56 = vld [vmem:[%s11398_s24 + $0xc48] ss:$16 sps:$4 sm:$0xff]  }
 0x1c0   : > { %6867 = vmatprep.subr.bf16.mxu0 %v9983_v57  ;;  %7523 = vmatprep.subr.bf16.mxu1 %v9986_v58  ;;  %v10067_v57 = vld [vmem:[%s11398_s24 + $0xc64] ss:$16 sps:$4 sm:$0xff]   ;;  %v10070_v58 = vld [vmem:[%s11398_s24 + $0xc6c] ss:$16 sps:$4 sm:$0xff]  }
 0x1c3   : > { %6868 = vmatpush1.bf16.msra.mxu0 %v9981_v59  ;;  %7524 = vmatpush1.bf16.msra.mxu1 %v9984_v60  ;;  %v10065_v59 = vld [vmem:[%s11398_s24 + $0xc60] ss:$16 sps:$4 sm:$0xff]   ;;  %v10068_v60 = vld [vmem:[%s11398_s24 + $0xc68] ss:$16 sps:$4 sm:$0xff]  }
 0x1c4   : > { %6869 = vmatprep.subr.bf16.mxu0 %v9989_v61  ;;  %7525 = vmatprep.subr.bf16.mxu1 %v9992_v62  ;;  %v10073_v61 = vld [vmem:[%s11398_s24 + $0xc84] ss:$16 sps:$4 sm:$0xff]   ;;  %v10076_v62 = vld [vmem:[%s11398_s24 + $0xc8c] ss:$16 sps:$4 sm:$0xff]  }
 0x1c7   : > { %6870 = vmatpush1.bf16.msra.mxu0 %v9987_v63  ;;  %7526 = vmatpush1.bf16.msra.mxu1 %v9990_v0  ;;  %v10071_v63 = vld [vmem:[%s11398_s24 + $0xc80] ss:$16 sps:$4 sm:$0xff]   ;;  %v10074_v0 = vld [vmem:[%s11398_s24 + $0xc88] ss:$16 sps:$4 sm:$0xff]  }
 0x1c8   : > { %6871 = vmatprep.subr.bf16.mxu0 %v9995_v1  ;;  %7527 = vmatprep.subr.bf16.mxu1 %v9998_v2  ;;  %v10079_v1 = vld [vmem:[%s11398_s24 + $0xca4] ss:$16 sps:$4 sm:$0xff]   ;;  %v10082_v2 = vld [vmem:[%s11398_s24 + $0xcac] ss:$16 sps:$4 sm:$0xff]  }
 0x1cb   : > { %6872 = vmatpush1.bf16.msra.mxu0 %v9993_v3  ;;  %7528 = vmatpush1.bf16.msra.mxu1 %v9996_v4  ;;  %v10077_v3 = vld [vmem:[%s11398_s24 + $0xca0] ss:$16 sps:$4 sm:$0xff]   ;;  %v10080_v4 = vld [vmem:[%s11398_s24 + $0xca8] ss:$16 sps:$4 sm:$0xff]  }
 0x1cc   : > { %6873 = vmatprep.subr.bf16.mxu0 %v10001_v5  ;;  %7529 = vmatprep.subr.bf16.mxu1 %v10004_v6  ;;  %v10085_v5 = vld [vmem:[%s11398_s24 + $0xcc4] ss:$16 sps:$4 sm:$0xff]   ;;  %v10088_v6 = vld [vmem:[%s11398_s24 + $0xccc] ss:$16 sps:$4 sm:$0xff]  }
 0x1cf   : > { %6874 = vmatpush1.bf16.msra.mxu0 %v9999_v7  ;;  %7530 = vmatpush1.bf16.msra.mxu1 %v10002_v8  ;;  %v10083_v7 = vld [vmem:[%s11398_s24 + $0xcc0] ss:$16 sps:$4 sm:$0xff]   ;;  %v10086_v8 = vld [vmem:[%s11398_s24 + $0xcc8] ss:$16 sps:$4 sm:$0xff]  }
 0x1d0   : > { %6875 = vmatprep.subr.bf16.mxu0 %v10007_v9  ;;  %7531 = vmatprep.subr.bf16.mxu1 %v10010_v10  ;;  %v10091_v9 = vld [vmem:[%s11398_s24 + $0xce4] ss:$16 sps:$4 sm:$0xff]   ;;  %v10094_v10 = vld [vmem:[%s11398_s24 + $0xcec] ss:$16 sps:$4 sm:$0xff]  }
 0x1d3   : > { %6876 = vmatpush1.bf16.msra.mxu0 %v10005_v11  ;;  %7532 = vmatpush1.bf16.msra.mxu1 %v10008_v12  ;;  %v10089_v11 = vld [vmem:[%s11398_s24 + $0xce0] ss:$16 sps:$4 sm:$0xff]   ;;  %v10092_v12 = vld [vmem:[%s11398_s24 + $0xce8] ss:$16 sps:$4 sm:$0xff]  }
 0x1d4   : > { %6877 = vmatprep.subr.bf16.mxu0 %v10013_v13  ;;  %7533 = vmatprep.subr.bf16.mxu1 %v10016_v15  ;;  %v10097_v13 = vld [vmem:[%s11398_s24 + $0xd04] ss:$16 sps:$4 sm:$0xff]   ;;  %v10100_v15 = vld [vmem:[%s11398_s24 + $0xd0c] ss:$16 sps:$4 sm:$0xff]  }
 0x1d7   : > { %6878 = vmatpush1.bf16.msra.mxu0 %v10011_v17  ;;  %7534 = vmatpush1.bf16.msra.mxu1 %v10014_v53  ;;  %v10095_v17 = vld [vmem:[%s11398_s24 + $0xd00] ss:$16 sps:$4 sm:$0xff]   ;;  %v10098_v53 = vld [vmem:[%s11398_s24 + $0xd08] ss:$16 sps:$4 sm:$0xff]  }
 0x1d8   : > { %6879 = vmatprep.subr.bf16.mxu0 %v10019_v18  ;;  %7535 = vmatprep.subr.bf16.mxu1 %v10022_v19  ;;  %v10103_v18 = vld [vmem:[%s11398_s24 + $0xd24] ss:$16 sps:$4 sm:$0xff]   ;;  %v10106_v19 = vld [vmem:[%s11398_s24 + $0xd2c] ss:$16 sps:$4 sm:$0xff]  }
 0x1db   : > { %6880 = vmatpush1.bf16.msra.mxu0 %v10017_v20  ;;  %7536 = vmatpush1.bf16.msra.mxu1 %v10020_v21  ;;  %v10101_v20 = vld [vmem:[%s11398_s24 + $0xd20] ss:$16 sps:$4 sm:$0xff]   ;;  %v10104_v21 = vld [vmem:[%s11398_s24 + $0xd28] ss:$16 sps:$4 sm:$0xff]  }
 0x1dc   : > { %6881 = vmatprep.subr.bf16.mxu0 %v10025_v23  ;;  %7537 = vmatprep.subr.bf16.mxu1 %v10028_v24  ;;  %v10109_v23 = vld [vmem:[%s11398_s24 + $0xd44] ss:$16 sps:$4 sm:$0xff]   ;;  %v10112_v24 = vld [vmem:[%s11398_s24 + $0xd4c] ss:$16 sps:$4 sm:$0xff]  }
 0x1df   : > { %6882 = vmatpush1.bf16.msra.mxu0 %v10023_v25  ;;  %7538 = vmatpush1.bf16.msra.mxu1 %v10026_v27  ;;  %v10107_v25 = vld [vmem:[%s11398_s24 + $0xd40] ss:$16 sps:$4 sm:$0xff]   ;;  %v10110_v27 = vld [vmem:[%s11398_s24 + $0xd48] ss:$16 sps:$4 sm:$0xff]  }
 0x1e0   : > { %6883 = vmatprep.subr.bf16.mxu0 %v10031_v28  ;;  %7539 = vmatprep.subr.bf16.mxu1 %v10034_v29  ;;  %v10115_v28 = vld [vmem:[%s11398_s24 + $0xd64] ss:$16 sps:$4 sm:$0xff]   ;;  %v10118_v29 = vld [vmem:[%s11398_s24 + $0xd6c] ss:$16 sps:$4 sm:$0xff]  }
 0x1e3   : > { %6884 = vmatpush1.bf16.msra.mxu0 %v10029_v30  ;;  %7540 = vmatpush1.bf16.msra.mxu1 %v10032_v31  ;;  %v10113_v30 = vld [vmem:[%s11398_s24 + $0xd60] ss:$16 sps:$4 sm:$0xff]   ;;  %v10116_v31 = vld [vmem:[%s11398_s24 + $0xd68] ss:$16 sps:$4 sm:$0xff]  }
 0x1e4   : > { %6885 = vmatprep.subr.bf16.mxu0 %v10037_v16  ;;  %7541 = vmatprep.subr.bf16.mxu1 %v10040_v32  ;;  %v10121_v16 = vld [vmem:[%s11398_s24 + $0xd84] ss:$16 sps:$4 sm:$0xff]   ;;  %v10124_v32 = vld [vmem:[%s11398_s24 + $0xd8c] ss:$16 sps:$4 sm:$0xff]  }
 0x1e7   : > { %6886 = vmatpush1.bf16.msra.mxu0 %v10035_v26  ;;  %7542 = vmatpush1.bf16.msra.mxu1 %v10038_v35  ;;  %v10127_v26 = vld [vmem:[%s11398_s24 + $0xda4] ss:$16 sps:$4 sm:$0xff]   ;;  %v10130_v35 = vld [vmem:[%s11398_s24 + $0xdac] ss:$16 sps:$4 sm:$0xff]  }
 0x1e8   : > { %6887 = vmatprep.subr.bf16.mxu0 %v10043_v37  ;;  %7543 = vmatprep.subr.bf16.mxu1 %v10046_v38  ;;  %v10125_v37 = vld [vmem:[%s11398_s24 + $0xda0] ss:$16 sps:$4 sm:$0xff]   ;;  %v10128_v38 = vld [vmem:[%s11398_s24 + $0xda8] ss:$16 sps:$4 sm:$0xff]  }
 0x1eb   : > { %6888 = vmatpush1.bf16.msra.mxu0 %v10041_v40  ;;  %7544 = vmatpush1.bf16.msra.mxu1 %v10044_v41  ;;  %v10133_v40 = vld [vmem:[%s11398_s24 + $0xdc4] ss:$16 sps:$4 sm:$0xff]   ;;  %v10136_v41 = vld [vmem:[%s11398_s24 + $0xdcc] ss:$16 sps:$4 sm:$0xff]  }
 0x1ec   : > { %6898 = vmatprep.subr.bf16.mxu0 %v10049_v22  ;;  %7554 = vmatprep.subr.bf16.mxu1 %v10052_v42  ;;  %v10131_v22 = vld [vmem:[%s11398_s24 + $0xdc0] ss:$16 sps:$4 sm:$0xff]   ;;  %v10134_v42 = vld [vmem:[%s11398_s24 + $0xdc8] ss:$16 sps:$4 sm:$0xff]  }
 0x1ee   : > { %6890 = vmatmul.mubr.bf16.vlgmr.msra.gmra.mrb[0].mxu0 %v1398_v45  ;;  %7546 = vmatmul.mubr.bf16.vlgmr.msra.gmra.mrb[0].mxu1 %v1398_v45  ;;  %v10142_v45 = vld [vmem:[%s11398_s24 + $0xdec] ss:$16 sps:$4 sm:$0xff]  }
 0x1ef   : > { %6899 = vmatpush1.bf16.msra.mxu0 %v10047_v36  ;;  %7555 = vmatpush1.bf16.msra.mxu1 %v10050_v46  ;;  %v10137_v36 = vld [vmem:[%s11398_s24 + $0xde0] ss:$16 sps:$4 sm:$0xff]   ;;  %v10140_v46 = vld [vmem:[%s11398_s24 + $0xde8] ss:$16 sps:$4 sm:$0xff]  }
 0x1f0   : > { %6900 = vmatprep.subr.bf16.mxu0 %v10055_v47  ;;  %7556 = vmatprep.subr.bf16.mxu1 %v10058_v48  ;;  %v10146_v47 = vld [vmem:[%s11398_s24 + $0xe04] ss:$16 sps:$4 sm:$0xff]   ;;  %v10149_v48 = vld [vmem:[%s11398_s24 + $0xe0c] ss:$16 sps:$4 sm:$0xff]  }
 0x1f1   : > { %6930 = vmatprep.mubr.bf16.mxu0 %v11883_v49  ;;  %7586 = vmatprep.mubr.bf16.mxu1 %v11883_v49 }
 0x1f3   : > { %6901 = vmatpush1.bf16.msra.mxu0 %v10053_v14  ;;  %7557 = vmatpush1.bf16.msra.mxu1 %v10056_v51  ;;  %v11949_v14 = vrot.slane %v11868_v39, %v11473_v50  ;;  %v10144_v51 = vld [vmem:[%s11398_s24 + $0xe00] ss:$16 sps:$4 sm:$0xff]  }
 0x1f4   : > { %6902 = vmatprep.subr.bf16.mxu0 %v10061_v52  ;;  %7558 = vmatprep.subr.bf16.mxu1 %v10064_v54  ;;  %v10147_v52 = vld [vmem:[%s11398_s24 + $0xe08] ss:$16 sps:$4 sm:$0xff]   ;;  %v10152_v54 = vld [vmem:[%s11398_s24 + $0xe24] ss:$16 sps:$4 sm:$0xff]   ;;  %v10150_v39 = vld [vmem:[%s11398_s24 + $0xe20] ss:$16 sps:$4 sm:$0xff]  }
 0x1f7   : > { %6903 = vmatpush1.bf16.msra.mxu0 %v10059_v55  ;;  %7559 = vmatpush1.bf16.msra.mxu1 %v10062_v56  ;;  %v10155_v55 = vld [vmem:[%s11398_s24 + $0xe2c] ss:$16 sps:$4 sm:$0xff]   ;;  %v1401_v56 = vcombine.high %v11883_v49, %v11883_v49  ;;  %v10156_v49 = vld [vmem:[%s11398_s24 + $0xe40] ss:$16 sps:$4 sm:$0xff]  }
 0x1f8   : > { %6904 = vmatprep.subr.bf16.mxu0 %v10067_v57  ;;  %7560 = vmatprep.subr.bf16.mxu1 %v10070_v58  ;;  %v10153_v57 = vld [vmem:[%s11398_s24 + $0xe28] ss:$16 sps:$4 sm:$0xff]   ;;  %v10158_v58 = vld [vmem:[%s11398_s24 + $0xe44] ss:$16 sps:$4 sm:$0xff]  }
 0x1fb   : > { %6905 = vmatpush1.bf16.msra.mxu0 %v10065_v59  ;;  %7561 = vmatpush1.bf16.msra.mxu1 %v10068_v60  ;;  %v10161_v59 = vld [vmem:[%s11398_s24 + $0xe4c] ss:$16 sps:$4 sm:$0xff]   ;;  %v10159_v60 = vld [vmem:[%s11398_s24 + $0xe48] ss:$16 sps:$4 sm:$0xff]  }
 0x1fc   : > { %6906 = vmatprep.subr.bf16.mxu0 %v10073_v61  ;;  %7562 = vmatprep.subr.bf16.mxu1 %v10076_v62  ;;  %v10164_v61 = vld [vmem:[%s11398_s24 + $0xe64] ss:$16 sps:$4 sm:$0xff]   ;;  %v10167_v62 = vld [vmem:[%s11398_s24 + $0xe6c] ss:$16 sps:$4 sm:$0xff]  }
 0x1ff   : > { %6907 = vmatpush1.bf16.msra.mxu0 %v10071_v63  ;;  %7563 = vmatpush1.bf16.msra.mxu1 %v10074_v0  ;;  %v10162_v63 = vld [vmem:[%s11398_s24 + $0xe60] ss:$16 sps:$4 sm:$0xff]   ;;  %v10165_v0 = vld [vmem:[%s11398_s24 + $0xe68] ss:$16 sps:$4 sm:$0xff]  }
 0x200   : > { %6908 = vmatprep.subr.bf16.mxu0 %v10079_v1  ;;  %7564 = vmatprep.subr.bf16.mxu1 %v10082_v2  ;;  %v10170_v1 = vld [vmem:[%s11398_s24 + $0xe84] ss:$16 sps:$4 sm:$0xff]   ;;  %v10173_v2 = vld [vmem:[%s11398_s24 + $0xe8c] ss:$16 sps:$4 sm:$0xff]  }
 0x203   : > { %6909 = vmatpush1.bf16.msra.mxu0 %v10077_v3  ;;  %7565 = vmatpush1.bf16.msra.mxu1 %v10080_v4  ;;  %v10168_v3 = vld [vmem:[%s11398_s24 + $0xe80] ss:$16 sps:$4 sm:$0xff]   ;;  %v10171_v4 = vld [vmem:[%s11398_s24 + $0xe88] ss:$16 sps:$4 sm:$0xff]  }
 0x204   : > { %6910 = vmatprep.subr.bf16.mxu0 %v10085_v5  ;;  %7566 = vmatprep.subr.bf16.mxu1 %v10088_v6  ;;  %v10176_v5 = vld [vmem:[%s11398_s24 + $0xea4] ss:$16 sps:$4 sm:$0xff]   ;;  %v10179_v6 = vld [vmem:[%s11398_s24 + $0xeac] ss:$16 sps:$4 sm:$0xff]  }
 0x207   : > { %6911 = vmatpush1.bf16.msra.mxu0 %v10083_v7  ;;  %7567 = vmatpush1.bf16.msra.mxu1 %v10086_v8  ;;  %v10174_v7 = vld [vmem:[%s11398_s24 + $0xea0] ss:$16 sps:$4 sm:$0xff]   ;;  %v10177_v8 = vld [vmem:[%s11398_s24 + $0xea8] ss:$16 sps:$4 sm:$0xff]  }
 0x208   : > { %6912 = vmatprep.subr.bf16.mxu0 %v10091_v9  ;;  %7568 = vmatprep.subr.bf16.mxu1 %v10094_v10  ;;  %v10182_v9 = vld [vmem:[%s11398_s24 + $0xec4] ss:$16 sps:$4 sm:$0xff]   ;;  %v10185_v10 = vld [vmem:[%s11398_s24 + $0xecc] ss:$16 sps:$4 sm:$0xff]  }
 0x20b   : > { %6913 = vmatpush1.bf16.msra.mxu0 %v10089_v11  ;;  %7569 = vmatpush1.bf16.msra.mxu1 %v10092_v12  ;;  %v10180_v11 = vld [vmem:[%s11398_s24 + $0xec0] ss:$16 sps:$4 sm:$0xff]   ;;  %v10183_v12 = vld [vmem:[%s11398_s24 + $0xec8] ss:$16 sps:$4 sm:$0xff]  }
 0x20c   : > { %6914 = vmatprep.subr.bf16.mxu0 %v10097_v13  ;;  %7570 = vmatprep.subr.bf16.mxu1 %v10100_v15  ;;  %v10188_v13 = vld [vmem:[%s11398_s24 + $0xee4] ss:$16 sps:$4 sm:$0xff]   ;;  %v10191_v15 = vld [vmem:[%s11398_s24 + $0xeec] ss:$16 sps:$4 sm:$0xff]  }
 0x20f   : > { %6915 = vmatpush1.bf16.msra.mxu0 %v10095_v17  ;;  %7571 = vmatpush1.bf16.msra.mxu1 %v10098_v53  ;;  %v10186_v17 = vld [vmem:[%s11398_s24 + $0xee0] ss:$16 sps:$4 sm:$0xff]   ;;  %v10189_v53 = vld [vmem:[%s11398_s24 + $0xee8] ss:$16 sps:$4 sm:$0xff]  }
 0x210   : > { %6916 = vmatprep.subr.bf16.mxu0 %v10103_v18  ;;  %7572 = vmatprep.subr.bf16.mxu1 %v10106_v19  ;;  %v10194_v18 = vld [vmem:[%s11398_s24 + $0xf04] ss:$16 sps:$4 sm:$0xff]   ;;  %v10197_v19 = vld [vmem:[%s11398_s24 + $0xf0c] ss:$16 sps:$4 sm:$0xff]  }
 0x213   : > { %6917 = vmatpush1.bf16.msra.mxu0 %v10101_v20  ;;  %7573 = vmatpush1.bf16.msra.mxu1 %v10104_v21  ;;  %v10192_v20 = vld [vmem:[%s11398_s24 + $0xf00] ss:$16 sps:$4 sm:$0xff]   ;;  %v10195_v21 = vld [vmem:[%s11398_s24 + $0xf08] ss:$16 sps:$4 sm:$0xff]  }
 0x214   : > { %6918 = vmatprep.subr.bf16.mxu0 %v10109_v23  ;;  %7574 = vmatprep.subr.bf16.mxu1 %v10112_v24  ;;  %v10200_v23 = vld [vmem:[%s11398_s24 + $0xf24] ss:$16 sps:$4 sm:$0xff]   ;;  %v10203_v24 = vld [vmem:[%s11398_s24 + $0xf2c] ss:$16 sps:$4 sm:$0xff]  }
 0x217   : > { %6919 = vmatpush1.bf16.msra.mxu0 %v10107_v25  ;;  %7575 = vmatpush1.bf16.msra.mxu1 %v10110_v27  ;;  %v10198_v25 = vld [vmem:[%s11398_s24 + $0xf20] ss:$16 sps:$4 sm:$0xff]   ;;  %v10201_v27 = vld [vmem:[%s11398_s24 + $0xf28] ss:$16 sps:$4 sm:$0xff]  }
 0x218   : > { %6920 = vmatprep.subr.bf16.mxu0 %v10115_v28  ;;  %7576 = vmatprep.subr.bf16.mxu1 %v10118_v29  ;;  %v10206_v28 = vld [vmem:[%s11398_s24 + $0xf44] ss:$16 sps:$4 sm:$0xff]   ;;  %v10209_v29 = vld [vmem:[%s11398_s24 + $0xf4c] ss:$16 sps:$4 sm:$0xff]  }
 0x21b   : > { %6921 = vmatpush1.bf16.msra.mxu0 %v10113_v30  ;;  %7577 = vmatpush1.bf16.msra.mxu1 %v10116_v31  ;;  %v10204_v30 = vld [vmem:[%s11398_s24 + $0xf40] ss:$16 sps:$4 sm:$0xff]   ;;  %v10207_v31 = vld [vmem:[%s11398_s24 + $0xf48] ss:$16 sps:$4 sm:$0xff]  }
 0x21c   : > { %6922 = vmatprep.subr.bf16.mxu0 %v10121_v16  ;;  %7578 = vmatprep.subr.bf16.mxu1 %v10124_v32  ;;  %v10212_v16 = vld [vmem:[%s11398_s24 + $0xf64] ss:$16 sps:$4 sm:$0xff]   ;;  %v10215_v32 = vld [vmem:[%s11398_s24 + $0xf6c] ss:$16 sps:$4 sm:$0xff]  }
 0x21f   : > { %6923 = vmatpush1.bf16.msra.mxu0 %v10119_v33  ;;  %7579 = vmatpush1.bf16.msra.mxu1 %v10122_v34  ;;  %v10210_v33 = vld [vmem:[%s11398_s24 + $0xf60] ss:$16 sps:$4 sm:$0xff]   ;;  %v10213_v34 = vld [vmem:[%s11398_s24 + $0xf68] ss:$16 sps:$4 sm:$0xff]  }
 0x220   : > { %6924 = vmatprep.subr.bf16.mxu0 %v10127_v26  ;;  %7580 = vmatprep.subr.bf16.mxu1 %v10130_v35  ;;  %v10218_v26 = vld [vmem:[%s11398_s24 + $0xf84] ss:$16 sps:$4 sm:$0xff]   ;;  %v10221_v35 = vld [vmem:[%s11398_s24 + $0xf8c] ss:$16 sps:$4 sm:$0xff]  }
 0x223   : > { %6925 = vmatpush1.bf16.msra.mxu0 %v10125_v37  ;;  %7581 = vmatpush1.bf16.msra.mxu1 %v10128_v38  ;;  %v10216_v37 = vld [vmem:[%s11398_s24 + $0xf80] ss:$16 sps:$4 sm:$0xff]   ;;  %v10219_v38 = vld [vmem:[%s11398_s24 + $0xf88] ss:$16 sps:$4 sm:$0xff]  }
 0x224   : > { %6926 = vmatprep.subr.bf16.mxu0 %v10133_v40  ;;  %7582 = vmatprep.subr.bf16.mxu1 %v10136_v41  ;;  %v10224_v40 = vld [vmem:[%s11398_s24 + $0xfa4] ss:$16 sps:$4 sm:$0xff]   ;;  %v10227_v41 = vld [vmem:[%s11398_s24 + $0xfac] ss:$16 sps:$4 sm:$0xff]  }
 0x227   : > { %6927 = vmatpush1.bf16.msra.mxu0 %v10131_v22  ;;  %7583 = vmatpush1.bf16.msra.mxu1 %v10134_v42  ;;  %v10222_v22 = vld [vmem:[%s11398_s24 + $0xfa0] ss:$16 sps:$4 sm:$0xff]   ;;  %v10225_v42 = vld [vmem:[%s11398_s24 + $0xfa8] ss:$16 sps:$4 sm:$0xff]  }
 0x228   : > { %6928 = vmatprep.subr.bf16.mxu0 %v10139_v43  ;;  %7584 = vmatprep.subr.bf16.mxu1 %v10142_v45  ;;  %v10230_v43 = vld [vmem:[%s11398_s24 + $0xfc4] ss:$16 sps:$4 sm:$0xff]   ;;  %v10233_v45 = vld [vmem:[%s11398_s24 + $0xfcc] ss:$16 sps:$4 sm:$0xff]  }
 0x22b   : > { %6929 = vmatpush1.bf16.msra.mxu0 %v10137_v36  ;;  %7585 = vmatpush1.bf16.msra.mxu1 %v10140_v46  ;;  %v12012_v36 = vld [vmem:[%s11419_s26 + $0x10] sm:$0xff]  ;;  %v10228_v46 = vld [vmem:[%s11398_s24 + $0xfc0] ss:$16 sps:$4 sm:$0xff]  }
 0x22c   : > { %6939 = vmatprep.subr.bf16.mxu0 %v10146_v47  ;;  %7595 = vmatprep.subr.bf16.mxu1 %v10149_v48  ;;  %v10231_v47 = vld [vmem:[%s11398_s24 + $0xfc8] ss:$16 sps:$4 sm:$0xff]   ;;  %v10236_v48 = vld [vmem:[%s11398_s24 + $0xfe4] ss:$16 sps:$4 sm:$0xff]  }
 0x22e   : > { %6931 = vmatmul.mubr.bf16.vlgmr.msra.gmra.mrb[0].mxu0 %v11949_v14  ;;  %7587 = vmatmul.mubr.bf16.vlgmr.msra.gmra.mrb[0].mxu1 %v11949_v14 }
 0x22f   : > { %6940 = vmatpush1.bf16.msra.mxu0 %v10144_v51  ;;  %7596 = vmatpush1.bf16.msra.mxu1 %v10147_v52  ;;  %v10239_v51 = vld [vmem:[%s11398_s24 + $0xfec] ss:$16 sps:$4 sm:$0xff]   ;;  %v12020_v52 = vrot.slane %v12012_v36, %v11473_v50 }
 0x230   : > { %6941 = vmatprep.subr.bf16.mxu0 %v10152_v54  ;;  %7597 = vmatprep.subr.bf16.mxu1 %v10155_v55  ;;  %v10234_v54 = vld [vmem:[%s11398_s24 + $0xfe0] ss:$16 sps:$4 sm:$0xff]   ;;  %v10237_v55 = vld [vmem:[%s11398_s24 + $0xfe8] ss:$16 sps:$4 sm:$0xff]  }
 0x231   : > { %6971 = vmatprep.mubr.bf16.mxu0 %v1401_v56  ;;  %7627 = vmatprep.mubr.bf16.mxu1 %v1401_v56  ;;  %v10242_v56 = vld [vmem:[%s11398_s24 + $0x1004] ss:$16 sps:$4 sm:$0xff]  }
 0x233   : > { %6942 = vmatpush1.bf16.msra.mxu0 %v10150_v39  ;;  %7598 = vmatpush1.bf16.msra.mxu1 %v10153_v57  ;;  %v10245_v39 = vld [vmem:[%s11398_s24 + $0x100c] ss:$16 sps:$4 sm:$0xff]   ;;  %v1417_v57 = vcombine.high %v12020_v52, %v12020_v52 }
 0x234   : > { %6943 = vmatprep.subr.bf16.mxu0 %v10158_v58  ;;  %7599 = vmatprep.subr.bf16.mxu1 %v10161_v59  ;;  %v1399_v58 = vcombine.high %v11949_v14, %v11949_v14  ;;  %v10240_v59 = vld [vmem:[%s11398_s24 + $0x1000] ss:$16 sps:$4 sm:$0xff]  }
 0x235   : > { %v10246_v14 = vld [vmem:[%s11398_s24 + $0x1020] ss:$16 sps:$4 sm:$0xff]  }
 0x237   : > { %6944 = vmatpush1.bf16.msra.mxu0 %v10156_v49  ;;  %7600 = vmatpush1.bf16.msra.mxu1 %v10159_v60  ;;  %v10243_v49 = vld [vmem:[%s11398_s24 + $0x1008] ss:$16 sps:$4 sm:$0xff]   ;;  %v10248_v60 = vld [vmem:[%s11398_s24 + $0x1024] ss:$16 sps:$4 sm:$0xff]  }
 0x238   : > { %6945 = vmatprep.subr.bf16.mxu0 %v10164_v61  ;;  %7601 = vmatprep.subr.bf16.mxu1 %v10167_v62  ;;  %v10251_v61 = vld [vmem:[%s11398_s24 + $0x102c] ss:$16 sps:$4 sm:$0xff]   ;;  %v12035_v62 = vrot.slane %v1417_v57, %v11473_v50  ;;  %v10327_v57 = vld [vmem:[%s11398_s24 + $0x11c8] ss:$16 sps:$4 sm:$0xff]  }
 0x23b   : > { %6946 = vmatpush1.bf16.msra.mxu0 %v10162_v63  ;;  %7602 = vmatpush1.bf16.msra.mxu1 %v10165_v0  ;;  %v10249_v63 = vld [vmem:[%s11398_s24 + $0x1028] ss:$16 sps:$4 sm:$0xff]   ;;  %v10254_v0 = vld [vmem:[%s11398_s24 + $0x1044] ss:$16 sps:$4 sm:$0xff]  }
 0x23c   : > { %6947 = vmatprep.subr.bf16.mxu0 %v10170_v1  ;;  %7603 = vmatprep.subr.bf16.mxu1 %v10173_v2  ;;  %v10257_v1 = vld [vmem:[%s11398_s24 + $0x104c] ss:$16 sps:$4 sm:$0xff]   ;;  %v10252_v2 = vld [vmem:[%s11398_s24 + $0x1040] ss:$16 sps:$4 sm:$0xff]  }
 0x23f   : > { %6948 = vmatpush1.bf16.msra.mxu0 %v10168_v3  ;;  %7604 = vmatpush1.bf16.msra.mxu1 %v10171_v4  ;;  %v10255_v3 = vld [vmem:[%s11398_s24 + $0x1048] ss:$16 sps:$4 sm:$0xff]   ;;  %v10260_v4 = vld [vmem:[%s11398_s24 + $0x1064] ss:$16 sps:$4 sm:$0xff]  }
 0x240   : > { %6949 = vmatprep.subr.bf16.mxu0 %v10176_v5  ;;  %7605 = vmatprep.subr.bf16.mxu1 %v10179_v6  ;;  %v10263_v5 = vld [vmem:[%s11398_s24 + $0x106c] ss:$16 sps:$4 sm:$0xff]   ;;  %v10258_v6 = vld [vmem:[%s11398_s24 + $0x1060] ss:$16 sps:$4 sm:$0xff]  }
 0x243   : > { %6950 = vmatpush1.bf16.msra.mxu0 %v10174_v7  ;;  %7606 = vmatpush1.bf16.msra.mxu1 %v10177_v8  ;;  %v10261_v7 = vld [vmem:[%s11398_s24 + $0x1068] ss:$16 sps:$4 sm:$0xff]   ;;  %v10266_v8 = vld [vmem:[%s11398_s24 + $0x1084] ss:$16 sps:$4 sm:$0xff]  }
 0x244   : > { %6951 = vmatprep.subr.bf16.mxu0 %v10182_v9  ;;  %7607 = vmatprep.subr.bf16.mxu1 %v10185_v10  ;;  %v10269_v9 = vld [vmem:[%s11398_s24 + $0x108c] ss:$16 sps:$4 sm:$0xff]   ;;  %v10264_v10 = vld [vmem:[%s11398_s24 + $0x1080] ss:$16 sps:$4 sm:$0xff]  }
 0x247   : > { %6952 = vmatpush1.bf16.msra.mxu0 %v10180_v11  ;;  %7608 = vmatpush1.bf16.msra.mxu1 %v10183_v12  ;;  %v10267_v11 = vld [vmem:[%s11398_s24 + $0x1088] ss:$16 sps:$4 sm:$0xff]   ;;  %v10272_v12 = vld [vmem:[%s11398_s24 + $0x10a4] ss:$16 sps:$4 sm:$0xff]  }
 0x248   : > { %6953 = vmatprep.subr.bf16.mxu0 %v10188_v13  ;;  %7609 = vmatprep.subr.bf16.mxu1 %v10191_v15  ;;  %v10275_v13 = vld [vmem:[%s11398_s24 + $0x10ac] ss:$16 sps:$4 sm:$0xff]   ;;  %v10270_v15 = vld [vmem:[%s11398_s24 + $0x10a0] ss:$16 sps:$4 sm:$0xff]  }
 0x24b   : > { %6954 = vmatpush1.bf16.msra.mxu0 %v10186_v17  ;;  %7610 = vmatpush1.bf16.msra.mxu1 %v10189_v53  ;;  %v10273_v17 = vld [vmem:[%s11398_s24 + $0x10a8] ss:$16 sps:$4 sm:$0xff]   ;;  %v10278_v53 = vld [vmem:[%s11398_s24 + $0x10c4] ss:$16 sps:$4 sm:$0xff]  }
 0x24c   : > { %6955 = vmatprep.subr.bf16.mxu0 %v10194_v18  ;;  %7611 = vmatprep.subr.bf16.mxu1 %v10197_v19  ;;  %v10281_v18 = vld [vmem:[%s11398_s24 + $0x10cc] ss:$16 sps:$4 sm:$0xff]   ;;  %v10276_v19 = vld [vmem:[%s11398_s24 + $0x10c0] ss:$16 sps:$4 sm:$0xff]  }
 0x24f   : > { %6956 = vmatpush1.bf16.msra.mxu0 %v10192_v20  ;;  %7612 = vmatpush1.bf16.msra.mxu1 %v10195_v21  ;;  %v10279_v20 = vld [vmem:[%s11398_s24 + $0x10c8] ss:$16 sps:$4 sm:$0xff]   ;;  %v10284_v21 = vld [vmem:[%s11398_s24 + $0x10e4] ss:$16 sps:$4 sm:$0xff]  }
 0x250   : > { %6957 = vmatprep.subr.bf16.mxu0 %v10200_v23  ;;  %7613 = vmatprep.subr.bf16.mxu1 %v10203_v24  ;;  %v10287_v23 = vld [vmem:[%s11398_s24 + $0x10ec] ss:$16 sps:$4 sm:$0xff]   ;;  %v10282_v24 = vld [vmem:[%s11398_s24 + $0x10e0] ss:$16 sps:$4 sm:$0xff]  }
 0x253   : > { %6958 = vmatpush1.bf16.msra.mxu0 %v10198_v25  ;;  %7614 = vmatpush1.bf16.msra.mxu1 %v10201_v27  ;;  %v10285_v25 = vld [vmem:[%s11398_s24 + $0x10e8] ss:$16 sps:$4 sm:$0xff]   ;;  %v10290_v27 = vld [vmem:[%s11398_s24 + $0x1104] ss:$16 sps:$4 sm:$0xff]  }
 0x254   : > { %6959 = vmatprep.subr.bf16.mxu0 %v10206_v28  ;;  %7615 = vmatprep.subr.bf16.mxu1 %v10209_v29  ;;  %v10293_v28 = vld [vmem:[%s11398_s24 + $0x110c] ss:$16 sps:$4 sm:$0xff]   ;;  %v10288_v29 = vld [vmem:[%s11398_s24 + $0x1100] ss:$16 sps:$4 sm:$0xff]  }
 0x257   : > { %6960 = vmatpush1.bf16.msra.mxu0 %v10204_v30  ;;  %7616 = vmatpush1.bf16.msra.mxu1 %v10207_v31  ;;  %v10291_v30 = vld [vmem:[%s11398_s24 + $0x1108] ss:$16 sps:$4 sm:$0xff]   ;;  %v10296_v31 = vld [vmem:[%s11398_s24 + $0x1124] ss:$16 sps:$4 sm:$0xff]  }
 0x258   : > { %6961 = vmatprep.subr.bf16.mxu0 %v10212_v16  ;;  %7617 = vmatprep.subr.bf16.mxu1 %v10215_v32  ;;  %v10299_v16 = vld [vmem:[%s11398_s24 + $0x112c] ss:$16 sps:$4 sm:$0xff]   ;;  %v10294_v32 = vld [vmem:[%s11398_s24 + $0x1120] ss:$16 sps:$4 sm:$0xff]  }
 0x25b   : > { %6962 = vmatpush1.bf16.msra.mxu0 %v10210_v33  ;;  %7618 = vmatpush1.bf16.msra.mxu1 %v10213_v34  ;;  %v10297_v33 = vld [vmem:[%s11398_s24 + $0x1128] ss:$16 sps:$4 sm:$0xff]   ;;  %v10302_v34 = vld [vmem:[%s11398_s24 + $0x1144] ss:$16 sps:$4 sm:$0xff]  }
 0x25c   : > { %6963 = vmatprep.subr.bf16.mxu0 %v10218_v26  ;;  %7619 = vmatprep.subr.bf16.mxu1 %v10221_v35  ;;  %v10305_v26 = vld [vmem:[%s11398_s24 + $0x114c] ss:$16 sps:$4 sm:$0xff]   ;;  %v10300_v35 = vld [vmem:[%s11398_s24 + $0x1140] ss:$16 sps:$4 sm:$0xff]  }
 0x25f   : > { %6964 = vmatpush1.bf16.msra.mxu0 %v10216_v37  ;;  %7620 = vmatpush1.bf16.msra.mxu1 %v10219_v38  ;;  %v10303_v37 = vld [vmem:[%s11398_s24 + $0x1148] ss:$16 sps:$4 sm:$0xff]   ;;  %v10308_v38 = vld [vmem:[%s11398_s24 + $0x1164] ss:$16 sps:$4 sm:$0xff]  }
 0x260   : > { %6965 = vmatprep.subr.bf16.mxu0 %v10224_v40  ;;  %7621 = vmatprep.subr.bf16.mxu1 %v10227_v41  ;;  %v10311_v40 = vld [vmem:[%s11398_s24 + $0x116c] ss:$16 sps:$4 sm:$0xff]   ;;  %v10306_v41 = vld [vmem:[%s11398_s24 + $0x1160] ss:$16 sps:$4 sm:$0xff]  }
 0x263   : > { %6966 = vmatpush1.bf16.msra.mxu0 %v10222_v22  ;;  %7622 = vmatpush1.bf16.msra.mxu1 %v10225_v42  ;;  %v10309_v22 = vld [vmem:[%s11398_s24 + $0x1168] ss:$16 sps:$4 sm:$0xff]   ;;  %v10314_v42 = vld [vmem:[%s11398_s24 + $0x1184] ss:$16 sps:$4 sm:$0xff]  }
 0x264   : > { %6967 = vmatprep.subr.bf16.mxu0 %v10230_v43  ;;  %7623 = vmatprep.subr.bf16.mxu1 %v10233_v45  ;;  %v10317_v43 = vld [vmem:[%s11398_s24 + $0x118c] ss:$16 sps:$4 sm:$0xff]   ;;  %v10312_v45 = vld [vmem:[%s11398_s24 + $0x1180] ss:$16 sps:$4 sm:$0xff]  }
 0x267   : > { %6968 = vmatpush1.bf16.msra.mxu0 %v10228_v46  ;;  %7624 = vmatpush1.bf16.msra.mxu1 %v10231_v47  ;;  %v10315_v46 = vld [vmem:[%s11398_s24 + $0x1188] ss:$16 sps:$4 sm:$0xff]   ;;  %v10320_v47 = vld [vmem:[%s11398_s24 + $0x11a4] ss:$16 sps:$4 sm:$0xff]  }
 0x268   : > { %6969 = vmatprep.subr.bf16.mxu0 %v10236_v48  ;;  %7625 = vmatprep.subr.bf16.mxu1 %v10239_v51  ;;  %v10323_v48 = vld [vmem:[%s11398_s24 + $0x11ac] ss:$16 sps:$4 sm:$0xff]   ;;  %v10318_v51 = vld [vmem:[%s11398_s24 + $0x11a0] ss:$16 sps:$4 sm:$0xff]  }
 0x26b   : > { %6970 = vmatpush1.bf16.msra.mxu0 %v10234_v54  ;;  %7626 = vmatpush1.bf16.msra.mxu1 %v10237_v55  ;;  %v10321_v54 = vld [vmem:[%s11398_s24 + $0x11a8] ss:$16 sps:$4 sm:$0xff]   ;;  %v10326_v55 = vld [vmem:[%s11398_s24 + $0x11c4] ss:$16 sps:$4 sm:$0xff]  }
 0x26c   : > { %6980 = vmatprep.subr.bf16.mxu0 %v10242_v56  ;;  %7636 = vmatprep.subr.bf16.mxu1 %v10245_v39  ;;  %v10329_v56 = vld [vmem:[%s11398_s24 + $0x11cc] ss:$16 sps:$4 sm:$0xff]   ;;  %v10324_v39 = vld [vmem:[%s11398_s24 + $0x11c0] ss:$16 sps:$4 sm:$0xff]  }
 0x26e   : > { %6972 = vmatmul.mubr.bf16.vlgmr.msra.gmra.mrb[0].mxu0 %v1399_v58  ;;  %7628 = vmatmul.mubr.bf16.vlgmr.msra.gmra.mrb[0].mxu1 %v1399_v58  ;;  %v10332_v58 = vld [vmem:[%s11398_s24 + $0x11e4] ss:$16 sps:$4 sm:$0xff]  }
 0x26f   : > { %6981 = vmatpush1.bf16.msra.mxu0 %v10240_v59  ;;  %7637 = vmatpush1.bf16.msra.mxu1 %v10243_v49  ;;  %v10335_v59 = vld [vmem:[%s11398_s24 + $0x11ec] ss:$16 sps:$4 sm:$0xff]   ;;  %v10330_v49 = vld [vmem:[%s11398_s24 + $0x11e0] ss:$16 sps:$4 sm:$0xff]  }
 0x270   : > { %6982 = vmatprep.subr.bf16.mxu0 %v10248_v60  ;;  %7638 = vmatprep.subr.bf16.mxu1 %v10251_v61  ;;  %v10333_v60 = vld [vmem:[%s11398_s24 + $0x11e8] ss:$16 sps:$4 sm:$0xff]   ;;  %v10338_v61 = vld [vmem:[%s11398_s24 + $0x1204] ss:$16 sps:$4 sm:$0xff]  }
 0x271   : > { %7012 = vmatprep.mubr.bf16.mxu0 %v12035_v62  ;;  %7668 = vmatprep.mubr.bf16.mxu1 %v12035_v62 }
 0x273   : > { %6983 = vmatpush1.bf16.msra.mxu0 %v10246_v14  ;;  %7639 = vmatpush1.bf16.msra.mxu1 %v10249_v63  ;;  %v10341_v14 = vld [vmem:[%s11398_s24 + $0x120c] ss:$16 sps:$4 sm:$0xff]   ;;  %v12101_v63 = vrot.slane %v12020_v52, %v11473_v50  ;;  %v10342_v52 = vld [vmem:[%s11398_s24 + $0x1220] ss:$16 sps:$4 sm:$0xff]  }
 0x274   : > { %6984 = vmatprep.subr.bf16.mxu0 %v10254_v0  ;;  %7640 = vmatprep.subr.bf16.mxu1 %v10257_v1  ;;  %v10336_v0 = vld [vmem:[%s11398_s24 + $0x1200] ss:$16 sps:$4 sm:$0xff]   ;;  %v10339_v1 = vld [vmem:[%s11398_s24 + $0x1208] ss:$16 sps:$4 sm:$0xff]  }
 0x277   : > { %6985 = vmatpush1.bf16.msra.mxu0 %v10252_v2  ;;  %7641 = vmatpush1.bf16.msra.mxu1 %v10255_v3  ;;  %v10344_v2 = vld [vmem:[%s11398_s24 + $0x1224] ss:$16 sps:$4 sm:$0xff]   ;;  %v10347_v3 = vld [vmem:[%s11398_s24 + $0x122c] ss:$16 sps:$4 sm:$0xff]  }
 0x278   : > { %6986 = vmatprep.subr.bf16.mxu0 %v10260_v4  ;;  %7642 = vmatprep.subr.bf16.mxu1 %v10263_v5  ;;  %v1449_v4 = vcombine.high %v12035_v62, %v12035_v62  ;;  %v10345_v5 = vld [vmem:[%s11398_s24 + $0x1228] ss:$16 sps:$4 sm:$0xff]   ;;  %v10348_v62 = vld [vmem:[%s11398_s24 + $0x1240] ss:$16 sps:$4 sm:$0xff]  }
 0x27b   : > { %6987 = vmatpush1.bf16.msra.mxu0 %v10258_v6  ;;  %7643 = vmatpush1.bf16.msra.mxu1 %v10261_v7  ;;  %v10350_v6 = vld [vmem:[%s11398_s24 + $0x1244] ss:$16 sps:$4 sm:$0xff]   ;;  %v10353_v7 = vld [vmem:[%s11398_s24 + $0x124c] ss:$16 sps:$4 sm:$0xff]  }
 0x27c   : > { %6988 = vmatprep.subr.bf16.mxu0 %v10266_v8  ;;  %7644 = vmatprep.subr.bf16.mxu1 %v10269_v9  ;;  %v10351_v8 = vld [vmem:[%s11398_s24 + $0x1248] ss:$16 sps:$4 sm:$0xff]   ;;  %v10356_v9 = vld [vmem:[%s11398_s24 + $0x1264] ss:$16 sps:$4 sm:$0xff]  }
 0x27f   : > { %6989 = vmatpush1.bf16.msra.mxu0 %v10264_v10  ;;  %7645 = vmatpush1.bf16.msra.mxu1 %v10267_v11  ;;  %v10359_v10 = vld [vmem:[%s11398_s24 + $0x126c] ss:$16 sps:$4 sm:$0xff]   ;;  %v10354_v11 = vld [vmem:[%s11398_s24 + $0x1260] ss:$16 sps:$4 sm:$0xff]  }
 0x280   : > { %6990 = vmatprep.subr.bf16.mxu0 %v10272_v12  ;;  %7646 = vmatprep.subr.bf16.mxu1 %v10275_v13  ;;  %v10357_v12 = vld [vmem:[%s11398_s24 + $0x1268] ss:$16 sps:$4 sm:$0xff]   ;;  %v10362_v13 = vld [vmem:[%s11398_s24 + $0x1284] ss:$16 sps:$4 sm:$0xff]  }
 0x283   : > { %6991 = vmatpush1.bf16.msra.mxu0 %v10270_v15  ;;  %7647 = vmatpush1.bf16.msra.mxu1 %v10273_v17  ;;  %v10365_v15 = vld [vmem:[%s11398_s24 + $0x128c] ss:$16 sps:$4 sm:$0xff]   ;;  %v10360_v17 = vld [vmem:[%s11398_s24 + $0x1280] ss:$16 sps:$4 sm:$0xff]  }
 0x284   : > { %6992 = vmatprep.subr.bf16.mxu0 %v10278_v53  ;;  %7648 = vmatprep.subr.bf16.mxu1 %v10281_v18  ;;  %v10363_v53 = vld [vmem:[%s11398_s24 + $0x1288] ss:$16 sps:$4 sm:$0xff]   ;;  %v10368_v18 = vld [vmem:[%s11398_s24 + $0x12a4] ss:$16 sps:$4 sm:$0xff]  }
 0x287   : > { %6993 = vmatpush1.bf16.msra.mxu0 %v10276_v19  ;;  %7649 = vmatpush1.bf16.msra.mxu1 %v10279_v20  ;;  %v10371_v19 = vld [vmem:[%s11398_s24 + $0x12ac] ss:$16 sps:$4 sm:$0xff]   ;;  %v10366_v20 = vld [vmem:[%s11398_s24 + $0x12a0] ss:$16 sps:$4 sm:$0xff]  }
 0x288   : > { %6994 = vmatprep.subr.bf16.mxu0 %v10284_v21  ;;  %7650 = vmatprep.subr.bf16.mxu1 %v10287_v23  ;;  %v10369_v21 = vld [vmem:[%s11398_s24 + $0x12a8] ss:$16 sps:$4 sm:$0xff]   ;;  %v10374_v23 = vld [vmem:[%s11398_s24 + $0x12c4] ss:$16 sps:$4 sm:$0xff]  }
 0x28b   : > { %6995 = vmatpush1.bf16.msra.mxu0 %v10282_v24  ;;  %7651 = vmatpush1.bf16.msra.mxu1 %v10285_v25  ;;  %v10377_v24 = vld [vmem:[%s11398_s24 + $0x12cc] ss:$16 sps:$4 sm:$0xff]   ;;  %v10372_v25 = vld [vmem:[%s11398_s24 + $0x12c0] ss:$16 sps:$4 sm:$0xff]  }
 0x28c   : > { %6996 = vmatprep.subr.bf16.mxu0 %v10290_v27  ;;  %7652 = vmatprep.subr.bf16.mxu1 %v10293_v28  ;;  %v10375_v27 = vld [vmem:[%s11398_s24 + $0x12c8] ss:$16 sps:$4 sm:$0xff]   ;;  %v10380_v28 = vld [vmem:[%s11398_s24 + $0x12e4] ss:$16 sps:$4 sm:$0xff]  }
 0x28f   : > { %6997 = vmatpush1.bf16.msra.mxu0 %v10288_v29  ;;  %7653 = vmatpush1.bf16.msra.mxu1 %v10291_v30  ;;  %v10383_v29 = vld [vmem:[%s11398_s24 + $0x12ec] ss:$16 sps:$4 sm:$0xff]   ;;  %v10378_v30 = vld [vmem:[%s11398_s24 + $0x12e0] ss:$16 sps:$4 sm:$0xff]  }
 0x290   : > { %6998 = vmatprep.subr.bf16.mxu0 %v10296_v31  ;;  %7654 = vmatprep.subr.bf16.mxu1 %v10299_v16  ;;  %v10381_v31 = vld [vmem:[%s11398_s24 + $0x12e8] ss:$16 sps:$4 sm:$0xff]   ;;  %v10386_v16 = vld [vmem:[%s11398_s24 + $0x1304] ss:$16 sps:$4 sm:$0xff]  }
 0x293   : > { %6999 = vmatpush1.bf16.msra.mxu0 %v10294_v32  ;;  %7655 = vmatpush1.bf16.msra.mxu1 %v10297_v33  ;;  %v10389_v32 = vld [vmem:[%s11398_s24 + $0x130c] ss:$16 sps:$4 sm:$0xff]   ;;  %v10384_v33 = vld [vmem:[%s11398_s24 + $0x1300] ss:$16 sps:$4 sm:$0xff]  }
 0x294   : > { %7000 = vmatprep.subr.bf16.mxu0 %v10302_v34  ;;  %7656 = vmatprep.subr.bf16.mxu1 %v10305_v26  ;;  %v10387_v34 = vld [vmem:[%s11398_s24 + $0x1308] ss:$16 sps:$4 sm:$0xff]   ;;  %v10392_v26 = vld [vmem:[%s11398_s24 + $0x1324] ss:$16 sps:$4 sm:$0xff]  }
 0x297   : > { %7001 = vmatpush1.bf16.msra.mxu0 %v10300_v35  ;;  %7657 = vmatpush1.bf16.msra.mxu1 %v10303_v37  ;;  %v10395_v35 = vld [vmem:[%s11398_s24 + $0x132c] ss:$16 sps:$4 sm:$0xff]   ;;  %v10390_v37 = vld [vmem:[%s11398_s24 + $0x1320] ss:$16 sps:$4 sm:$0xff]  }
 0x298   : > { %7002 = vmatprep.subr.bf16.mxu0 %v10308_v38  ;;  %7658 = vmatprep.subr.bf16.mxu1 %v10311_v40  ;;  %v10393_v38 = vld [vmem:[%s11398_s24 + $0x1328] ss:$16 sps:$4 sm:$0xff]   ;;  %v10398_v40 = vld [vmem:[%s11398_s24 + $0x1344] ss:$16 sps:$4 sm:$0xff]  }
 0x29b   : > { %7003 = vmatpush1.bf16.msra.mxu0 %v10306_v41  ;;  %7659 = vmatpush1.bf16.msra.mxu1 %v10309_v22  ;;  %v10401_v41 = vld [vmem:[%s11398_s24 + $0x134c] ss:$16 sps:$4 sm:$0xff]   ;;  %v10396_v22 = vld [vmem:[%s11398_s24 + $0x1340] ss:$16 sps:$4 sm:$0xff]  }
 0x29c   : > { %7004 = vmatprep.subr.bf16.mxu0 %v10314_v42  ;;  %7660 = vmatprep.subr.bf16.mxu1 %v10317_v43  ;;  %v10399_v42 = vld [vmem:[%s11398_s24 + $0x1348] ss:$16 sps:$4 sm:$0xff]   ;;  %v10404_v43 = vld [vmem:[%s11398_s24 + $0x1364] ss:$16 sps:$4 sm:$0xff]  }
 0x29f   : > { %7005 = vmatpush1.bf16.msra.mxu0 %v10312_v45  ;;  %7661 = vmatpush1.bf16.msra.mxu1 %v10315_v46  ;;  %v10407_v45 = vld [vmem:[%s11398_s24 + $0x136c] ss:$16 sps:$4 sm:$0xff]   ;;  %v10402_v46 = vld [vmem:[%s11398_s24 + $0x1360] ss:$16 sps:$4 sm:$0xff]  }
 0x2a0   : > { %7006 = vmatprep.subr.bf16.mxu0 %v10320_v47  ;;  %7662 = vmatprep.subr.bf16.mxu1 %v10323_v48  ;;  %v10405_v47 = vld [vmem:[%s11398_s24 + $0x1368] ss:$16 sps:$4 sm:$0xff]   ;;  %v10410_v48 = vld [vmem:[%s11398_s24 + $0x1384] ss:$16 sps:$4 sm:$0xff]  }
 0x2a3   : > { %7007 = vmatpush1.bf16.msra.mxu0 %v10318_v51  ;;  %7663 = vmatpush1.bf16.msra.mxu1 %v10321_v54  ;;  %v10413_v51 = vld [vmem:[%s11398_s24 + $0x138c] ss:$16 sps:$4 sm:$0xff]   ;;  %v10408_v54 = vld [vmem:[%s11398_s24 + $0x1380] ss:$16 sps:$4 sm:$0xff]  }
 0x2a4   : > { %7008 = vmatprep.subr.bf16.mxu0 %v10326_v55  ;;  %7664 = vmatprep.subr.bf16.mxu1 %v10329_v56  ;;  %v10411_v55 = vld [vmem:[%s11398_s24 + $0x1388] ss:$16 sps:$4 sm:$0xff]   ;;  %v10416_v56 = vld [vmem:[%s11398_s24 + $0x13a4] ss:$16 sps:$4 sm:$0xff]  }
 0x2a7   : > { %7009 = vmatpush1.bf16.msra.mxu0 %v10324_v39  ;;  %7665 = vmatpush1.bf16.msra.mxu1 %v10327_v57  ;;  %v10419_v39 = vld [vmem:[%s11398_s24 + $0x13ac] ss:$16 sps:$4 sm:$0xff]   ;;  %v10414_v57 = vld [vmem:[%s11398_s24 + $0x13a0] ss:$16 sps:$4 sm:$0xff]  }
 0x2a8   : > { %7010 = vmatprep.subr.bf16.mxu0 %v10332_v58  ;;  %7666 = vmatprep.subr.bf16.mxu1 %v10335_v59  ;;  %v10417_v58 = vld [vmem:[%s11398_s24 + $0x13a8] ss:$16 sps:$4 sm:$0xff]   ;;  %v10422_v59 = vld [vmem:[%s11398_s24 + $0x13c4] ss:$16 sps:$4 sm:$0xff]  }
 0x2ab   : > { %7011 = vmatpush1.bf16.msra.mxu0 %v10330_v49  ;;  %7667 = vmatpush1.bf16.msra.mxu1 %v10333_v60  ;;  %v10425_v49 = vld [vmem:[%s11398_s24 + $0x13cc] ss:$16 sps:$4 sm:$0xff]   ;;  %v1402_v60 = vcombine.high %v12012_v36, %v12012_v36  ;;  %v10426_v36 = vld [vmem:[%s11398_s24 + $0x13e0] ss:$16 sps:$4 sm:$0xff]  }
 0x2ac   : > { %7021 = vmatprep.subr.bf16.mxu0 %v10338_v61  ;;  %7677 = vmatprep.subr.bf16.mxu1 %v10341_v14  ;;  %v10420_v61 = vld [vmem:[%s11398_s24 + $0x13c0] ss:$16 sps:$4 sm:$0xff]   ;;  %v10423_v14 = vld [vmem:[%s11398_s24 + $0x13c8] ss:$16 sps:$4 sm:$0xff]  }
 0x2ae   : > { %7013 = vmatmul.mubr.bf16.vlgmr.msra.gmra.mrb[0].mxu0 %v12101_v63  ;;  %7669 = vmatmul.mubr.bf16.vlgmr.msra.gmra.mrb[0].mxu1 %v12101_v63 }
 0x2af   : > { %7022 = vmatpush1.bf16.msra.mxu0 %v10336_v0  ;;  %7678 = vmatpush1.bf16.msra.mxu1 %v10339_v1  ;;  %v10428_v0 = vld [vmem:[%s11398_s24 + $0x13e4] ss:$16 sps:$4 sm:$0xff]   ;;  %v10431_v1 = vld [vmem:[%s11398_s24 + $0x13ec] ss:$16 sps:$4 sm:$0xff]  }
 0x2b0   : > { %7023 = vmatprep.subr.bf16.mxu0 %v10344_v2  ;;  %7679 = vmatprep.subr.bf16.mxu1 %v10347_v3  ;;  %v12170_v2 = vrot.slane %v1402_v60, %v11473_v50  ;;  %v10429_v3 = vld [vmem:[%s11398_s24 + $0x13e8] ss:$16 sps:$4 sm:$0xff]  }
 0x2b1   : > { %7053 = vmatprep.mubr.bf16.mxu0 %v1449_v4  ;;  %7709 = vmatprep.mubr.bf16.mxu1 %v1449_v4  ;;  %v10434_v4 = vld [vmem:[%s11398_s24 + $0x1404] ss:$16 sps:$4 sm:$0xff]   ;;  %v10507_v60 = vld [vmem:[%s11398_s24 + $0x1588] ss:$16 sps:$4 sm:$0xff]  }
 0x2b3   : > { %7024 = vmatpush1.bf16.msra.mxu0 %v10342_v52  ;;  %7680 = vmatpush1.bf16.msra.mxu1 %v10345_v5  ;;  %v10437_v52 = vld [vmem:[%s11398_s24 + $0x140c] ss:$16 sps:$4 sm:$0xff]   ;;  %v1418_v5 = vcombine.high %v12170_v2, %v12170_v2 }
 0x2b4   : > { %7025 = vmatprep.subr.bf16.mxu0 %v10350_v6  ;;  %7681 = vmatprep.subr.bf16.mxu1 %v10353_v7  ;;  %v1447_v6 = vcombine.high %v12101_v63, %v12101_v63  ;;  %v10432_v7 = vld [vmem:[%s11398_s24 + $0x1400] ss:$16 sps:$4 sm:$0xff]  }
 0x2b5   : > { %v10438_v63 = vld [vmem:[%s11398_s24 + $0x1420] ss:$16 sps:$4 sm:$0xff]  }
 0x2b7   : > { %7026 = vmatpush1.bf16.msra.mxu0 %v10348_v62  ;;  %7682 = vmatpush1.bf16.msra.mxu1 %v10351_v8  ;;  %v10435_v62 = vld [vmem:[%s11398_s24 + $0x1408] ss:$16 sps:$4 sm:$0xff]   ;;  %v10440_v8 = vld [vmem:[%s11398_s24 + $0x1424] ss:$16 sps:$4 sm:$0xff]  }
 0x2b8   : > { %7027 = vmatprep.subr.bf16.mxu0 %v10356_v9  ;;  %7683 = vmatprep.subr.bf16.mxu1 %v10359_v10  ;;  %v10443_v9 = vld [vmem:[%s11398_s24 + $0x142c] ss:$16 sps:$4 sm:$0xff]   ;;  %v12185_v10 = vrot.slane %v1418_v5, %v11473_v50  ;;  %v10524_v5 = vld [vmem:[%s11398_s24 + $0x15e4] ss:$16 sps:$4 sm:$0xff]  }
 0x2bb   : > { %7028 = vmatpush1.bf16.msra.mxu0 %v10354_v11  ;;  %7684 = vmatpush1.bf16.msra.mxu1 %v10357_v12  ;;  %v10441_v11 = vld [vmem:[%s11398_s24 + $0x1428] ss:$16 sps:$4 sm:$0xff]   ;;  %v10446_v12 = vld [vmem:[%s11398_s24 + $0x1444] ss:$16 sps:$4 sm:$0xff]  }
 0x2bc   : > { %7029 = vmatprep.subr.bf16.mxu0 %v10362_v13  ;;  %7685 = vmatprep.subr.bf16.mxu1 %v10365_v15  ;;  %v10449_v13 = vld [vmem:[%s11398_s24 + $0x144c] ss:$16 sps:$4 sm:$0xff]   ;;  %v10444_v15 = vld [vmem:[%s11398_s24 + $0x1440] ss:$16 sps:$4 sm:$0xff]  }
 0x2bf   : > { %7030 = vmatpush1.bf16.msra.mxu0 %v10360_v17  ;;  %7686 = vmatpush1.bf16.msra.mxu1 %v10363_v53  ;;  %v10447_v17 = vld [vmem:[%s11398_s24 + $0x1448] ss:$16 sps:$4 sm:$0xff]   ;;  %v10452_v53 = vld [vmem:[%s11398_s24 + $0x1464] ss:$16 sps:$4 sm:$0xff]  }
 0x2c0   : > { %7031 = vmatprep.subr.bf16.mxu0 %v10368_v18  ;;  %7687 = vmatprep.subr.bf16.mxu1 %v10371_v19  ;;  %v10455_v18 = vld [vmem:[%s11398_s24 + $0x146c] ss:$16 sps:$4 sm:$0xff]   ;;  %v10450_v19 = vld [vmem:[%s11398_s24 + $0x1460] ss:$16 sps:$4 sm:$0xff]  }
 0x2c3   : > { %7032 = vmatpush1.bf16.msra.mxu0 %v10366_v20  ;;  %7688 = vmatpush1.bf16.msra.mxu1 %v10369_v21  ;;  %v10453_v20 = vld [vmem:[%s11398_s24 + $0x1468] ss:$16 sps:$4 sm:$0xff]   ;;  %v10458_v21 = vld [vmem:[%s11398_s24 + $0x1484] ss:$16 sps:$4 sm:$0xff]  }
 0x2c4   : > { %7033 = vmatprep.subr.bf16.mxu0 %v10374_v23  ;;  %7689 = vmatprep.subr.bf16.mxu1 %v10377_v24  ;;  %v10461_v23 = vld [vmem:[%s11398_s24 + $0x148c] ss:$16 sps:$4 sm:$0xff]   ;;  %v10456_v24 = vld [vmem:[%s11398_s24 + $0x1480] ss:$16 sps:$4 sm:$0xff]  }
 0x2c7   : > { %7034 = vmatpush1.bf16.msra.mxu0 %v10372_v25  ;;  %7690 = vmatpush1.bf16.msra.mxu1 %v10375_v27  ;;  %v10459_v25 = vld [vmem:[%s11398_s24 + $0x1488] ss:$16 sps:$4 sm:$0xff]   ;;  %v10464_v27 = vld [vmem:[%s11398_s24 + $0x14a4] ss:$16 sps:$4 sm:$0xff]  }
 0x2c8   : > { %7035 = vmatprep.subr.bf16.mxu0 %v10380_v28  ;;  %7691 = vmatprep.subr.bf16.mxu1 %v10383_v29  ;;  %v10467_v28 = vld [vmem:[%s11398_s24 + $0x14ac] ss:$16 sps:$4 sm:$0xff]   ;;  %v10462_v29 = vld [vmem:[%s11398_s24 + $0x14a0] ss:$16 sps:$4 sm:$0xff]  }
 0x2cb   : > { %7036 = vmatpush1.bf16.msra.mxu0 %v10378_v30  ;;  %7692 = vmatpush1.bf16.msra.mxu1 %v10381_v31  ;;  %v10465_v30 = vld [vmem:[%s11398_s24 + $0x14a8] ss:$16 sps:$4 sm:$0xff]   ;;  %v10470_v31 = vld [vmem:[%s11398_s24 + $0x14c4] ss:$16 sps:$4 sm:$0xff]  }
 0x2cc   : > { %7037 = vmatprep.subr.bf16.mxu0 %v10386_v16  ;;  %7693 = vmatprep.subr.bf16.mxu1 %v10389_v32  ;;  %v10473_v16 = vld [vmem:[%s11398_s24 + $0x14cc] ss:$16 sps:$4 sm:$0xff]   ;;  %v10468_v32 = vld [vmem:[%s11398_s24 + $0x14c0] ss:$16 sps:$4 sm:$0xff]  }
 0x2cf   : > { %7038 = vmatpush1.bf16.msra.mxu0 %v10384_v33  ;;  %7694 = vmatpush1.bf16.msra.mxu1 %v10387_v34  ;;  %v10471_v33 = vld [vmem:[%s11398_s24 + $0x14c8] ss:$16 sps:$4 sm:$0xff]   ;;  %v10476_v34 = vld [vmem:[%s11398_s24 + $0x14e4] ss:$16 sps:$4 sm:$0xff]  }
 0x2d0   : > { %7039 = vmatprep.subr.bf16.mxu0 %v10392_v26  ;;  %7695 = vmatprep.subr.bf16.mxu1 %v10395_v35  ;;  %v10479_v26 = vld [vmem:[%s11398_s24 + $0x14ec] ss:$16 sps:$4 sm:$0xff]   ;;  %v10474_v35 = vld [vmem:[%s11398_s24 + $0x14e0] ss:$16 sps:$4 sm:$0xff]  }
 0x2d3   : > { %7040 = vmatpush1.bf16.msra.mxu0 %v10390_v37  ;;  %7696 = vmatpush1.bf16.msra.mxu1 %v10393_v38  ;;  %v10477_v37 = vld [vmem:[%s11398_s24 + $0x14e8] ss:$16 sps:$4 sm:$0xff]   ;;  %v10482_v38 = vld [vmem:[%s11398_s24 + $0x1504] ss:$16 sps:$4 sm:$0xff]  }
 0x2d4   : > { %7041 = vmatprep.subr.bf16.mxu0 %v10398_v40  ;;  %7697 = vmatprep.subr.bf16.mxu1 %v10401_v41  ;;  %v10485_v40 = vld [vmem:[%s11398_s24 + $0x150c] ss:$16 sps:$4 sm:$0xff]   ;;  %v10480_v41 = vld [vmem:[%s11398_s24 + $0x1500] ss:$16 sps:$4 sm:$0xff]  }
 0x2d7   : > { %7042 = vmatpush1.bf16.msra.mxu0 %v10396_v22  ;;  %7698 = vmatpush1.bf16.msra.mxu1 %v10399_v42  ;;  %v10483_v22 = vld [vmem:[%s11398_s24 + $0x1508] ss:$16 sps:$4 sm:$0xff]   ;;  %v10488_v42 = vld [vmem:[%s11398_s24 + $0x1524] ss:$16 sps:$4 sm:$0xff]  }
 0x2d8   : > { %7043 = vmatprep.subr.bf16.mxu0 %v10404_v43  ;;  %7699 = vmatprep.subr.bf16.mxu1 %v10407_v45  ;;  %v10491_v43 = vld [vmem:[%s11398_s24 + $0x152c] ss:$16 sps:$4 sm:$0xff]   ;;  %v10486_v45 = vld [vmem:[%s11398_s24 + $0x1520] ss:$16 sps:$4 sm:$0xff]  }
 0x2db   : > { %7044 = vmatpush1.bf16.msra.mxu0 %v10402_v46  ;;  %7700 = vmatpush1.bf16.msra.mxu1 %v10405_v47  ;;  %v10489_v46 = vld [vmem:[%s11398_s24 + $0x1528] ss:$16 sps:$4 sm:$0xff]   ;;  %v10494_v47 = vld [vmem:[%s11398_s24 + $0x1544] ss:$16 sps:$4 sm:$0xff]  }
 0x2dc   : > { %7045 = vmatprep.subr.bf16.mxu0 %v10410_v48  ;;  %7701 = vmatprep.subr.bf16.mxu1 %v10413_v51  ;;  %v10497_v48 = vld [vmem:[%s11398_s24 + $0x154c] ss:$16 sps:$4 sm:$0xff]   ;;  %v10492_v51 = vld [vmem:[%s11398_s24 + $0x1540] ss:$16 sps:$4 sm:$0xff]  }
 0x2df   : > { %7046 = vmatpush1.bf16.msra.mxu0 %v10408_v54  ;;  %7702 = vmatpush1.bf16.msra.mxu1 %v10411_v55  ;;  %v10495_v54 = vld [vmem:[%s11398_s24 + $0x1548] ss:$16 sps:$4 sm:$0xff]   ;;  %v10500_v55 = vld [vmem:[%s11398_s24 + $0x1564] ss:$16 sps:$4 sm:$0xff]  }
 0x2e0   : > { %7047 = vmatprep.subr.bf16.mxu0 %v10416_v56  ;;  %7703 = vmatprep.subr.bf16.mxu1 %v10419_v39  ;;  %v10503_v56 = vld [vmem:[%s11398_s24 + $0x156c] ss:$16 sps:$4 sm:$0xff]   ;;  %v10498_v39 = vld [vmem:[%s11398_s24 + $0x1560] ss:$16 sps:$4 sm:$0xff]  }
 0x2e3   : > { %7048 = vmatpush1.bf16.msra.mxu0 %v10414_v57  ;;  %7704 = vmatpush1.bf16.msra.mxu1 %v10417_v58  ;;  %v10501_v57 = vld [vmem:[%s11398_s24 + $0x1568] ss:$16 sps:$4 sm:$0xff]   ;;  %v10506_v58 = vld [vmem:[%s11398_s24 + $0x1584] ss:$16 sps:$4 sm:$0xff]  }
 0x2e4   : > { %7049 = vmatprep.subr.bf16.mxu0 %v10422_v59  ;;  %7705 = vmatprep.subr.bf16.mxu1 %v10425_v49  ;;  %v10509_v59 = vld [vmem:[%s11398_s24 + $0x158c] ss:$16 sps:$4 sm:$0xff]   ;;  %v10504_v49 = vld [vmem:[%s11398_s24 + $0x1580] ss:$16 sps:$4 sm:$0xff]  }
 0x2e7   : > { %7050 = vmatpush1.bf16.msra.mxu0 %v10420_v61  ;;  %7706 = vmatpush1.bf16.msra.mxu1 %v10423_v14  ;;  %v10512_v61 = vld [vmem:[%s11398_s24 + $0x15a4] ss:$16 sps:$4 sm:$0xff]   ;;  %v10515_v14 = vld [vmem:[%s11398_s24 + $0x15ac] ss:$16 sps:$4 sm:$0xff]  }
 0x2e8   : > { %7051 = vmatprep.subr.bf16.mxu0 %v10428_v0  ;;  %7707 = vmatprep.subr.bf16.mxu1 %v10431_v1  ;;  %v10510_v0 = vld [vmem:[%s11398_s24 + $0x15a0] ss:$16 sps:$4 sm:$0xff]   ;;  %v10513_v1 = vld [vmem:[%s11398_s24 + $0x15a8] ss:$16 sps:$4 sm:$0xff]  }
 0x2eb   : > { %7052 = vmatpush1.bf16.msra.mxu0 %v10426_v36  ;;  %7708 = vmatpush1.bf16.msra.mxu1 %v10429_v3  ;;  %v10518_v36 = vld [vmem:[%s11398_s24 + $0x15c4] ss:$16 sps:$4 sm:$0xff]   ;;  %v10521_v3 = vld [vmem:[%s11398_s24 + $0x15cc] ss:$16 sps:$4 sm:$0xff]  }
 0x2ec   : > { %7062 = vmatprep.subr.bf16.mxu0 %v10434_v4  ;;  %7718 = vmatprep.subr.bf16.mxu1 %v10437_v52  ;;  %v10516_v4 = vld [vmem:[%s11398_s24 + $0x15c0] ss:$16 sps:$4 sm:$0xff]   ;;  %v10519_v52 = vld [vmem:[%s11398_s24 + $0x15c8] ss:$16 sps:$4 sm:$0xff]  }
 0x2ee   : > { %7054 = vmatmul.mubr.bf16.vlgmr.msra.gmra.mrb[0].mxu0 %v1447_v6  ;;  %7710 = vmatmul.mubr.bf16.vlgmr.msra.gmra.mrb[0].mxu1 %v1447_v6  ;;  %v10527_v6 = vld [vmem:[%s11398_s24 + $0x15ec] ss:$16 sps:$4 sm:$0xff]  }
 0x2ef   : > { %7063 = vmatpush1.bf16.msra.mxu0 %v10432_v7  ;;  %7719 = vmatpush1.bf16.msra.mxu1 %v10435_v62  ;;  %v10522_v7 = vld [vmem:[%s11398_s24 + $0x15e0] ss:$16 sps:$4 sm:$0xff]   ;;  %v10525_v62 = vld [vmem:[%s11398_s24 + $0x15e8] ss:$16 sps:$4 sm:$0xff]  }
 0x2f0   : > { %7064 = vmatprep.subr.bf16.mxu0 %v10440_v8  ;;  %7720 = vmatprep.subr.bf16.mxu1 %v10443_v9  ;;  %v10531_v8 = vld [vmem:[%s11398_s24 + $0x1604] ss:$16 sps:$4 sm:$0xff]   ;;  %v10534_v9 = vld [vmem:[%s11398_s24 + $0x160c] ss:$16 sps:$4 sm:$0xff]  }
 0x2f1   : > { %7094 = vmatprep.mubr.bf16.mxu0 %v12185_v10  ;;  %7750 = vmatprep.mubr.bf16.mxu1 %v12185_v10 }
 0x2f3   : > { %7065 = vmatpush1.bf16.msra.mxu0 %v10438_v63  ;;  %7721 = vmatpush1.bf16.msra.mxu1 %v10441_v11  ;;  %v12251_v63 = vrot.slane %v12170_v2, %v11473_v50  ;;  %v10529_v11 = vld [vmem:[%s11398_s24 + $0x1600] ss:$16 sps:$4 sm:$0xff]  }
 0x2f4   : > { %7066 = vmatprep.subr.bf16.mxu0 %v10446_v12  ;;  %7722 = vmatprep.subr.bf16.mxu1 %v10449_v13  ;;  %v10532_v12 = vld [vmem:[%s11398_s24 + $0x1608] ss:$16 sps:$4 sm:$0xff]   ;;  %v10537_v13 = vld [vmem:[%s11398_s24 + $0x1624] ss:$16 sps:$4 sm:$0xff]   ;;  %v10535_v2 = vld [vmem:[%s11398_s24 + $0x1620] ss:$16 sps:$4 sm:$0xff]  }
 0x2f7   : > { %7067 = vmatpush1.bf16.msra.mxu0 %v10444_v15  ;;  %7723 = vmatpush1.bf16.msra.mxu1 %v10447_v17  ;;  %v10540_v15 = vld [vmem:[%s11398_s24 + $0x162c] ss:$16 sps:$4 sm:$0xff]   ;;  %v1450_v17 = vcombine.high %v12185_v10, %v12185_v10  ;;  %v10541_v10 = vld [vmem:[%s11398_s24 + $0x1640] ss:$16 sps:$4 sm:$0xff]  }
 0x2f8   : > { %7068 = vmatprep.subr.bf16.mxu0 %v10452_v53  ;;  %7724 = vmatprep.subr.bf16.mxu1 %v10455_v18  ;;  %v10538_v53 = vld [vmem:[%s11398_s24 + $0x1628] ss:$16 sps:$4 sm:$0xff]   ;;  %v10543_v18 = vld [vmem:[%s11398_s24 + $0x1644] ss:$16 sps:$4 sm:$0xff]  }
 0x2fb   : > { %7069 = vmatpush1.bf16.msra.mxu0 %v10450_v19  ;;  %7725 = vmatpush1.bf16.msra.mxu1 %v10453_v20  ;;  %v10546_v19 = vld [vmem:[%s11398_s24 + $0x164c] ss:$16 sps:$4 sm:$0xff]   ;;  %v10544_v20 = vld [vmem:[%s11398_s24 + $0x1648] ss:$16 sps:$4 sm:$0xff]  }
 0x2fc   : > { %7070 = vmatprep.subr.bf16.mxu0 %v10458_v21  ;;  %7726 = vmatprep.subr.bf16.mxu1 %v10461_v23  ;;  %v10549_v21 = vld [vmem:[%s11398_s24 + $0x1664] ss:$16 sps:$4 sm:$0xff]   ;;  %v10552_v23 = vld [vmem:[%s11398_s24 + $0x166c] ss:$16 sps:$4 sm:$0xff]  }
 0x2ff   : > { %7071 = vmatpush1.bf16.msra.mxu0 %v10456_v24  ;;  %7727 = vmatpush1.bf16.msra.mxu1 %v10459_v25  ;;  %v10547_v24 = vld [vmem:[%s11398_s24 + $0x1660] ss:$16 sps:$4 sm:$0xff]   ;;  %v10550_v25 = vld [vmem:[%s11398_s24 + $0x1668] ss:$16 sps:$4 sm:$0xff]  }
 0x300   : > { %7072 = vmatprep.subr.bf16.mxu0 %v10464_v27  ;;  %7728 = vmatprep.subr.bf16.mxu1 %v10467_v28  ;;  %v10555_v27 = vld [vmem:[%s11398_s24 + $0x1684] ss:$16 sps:$4 sm:$0xff]   ;;  %v10558_v28 = vld [vmem:[%s11398_s24 + $0x168c] ss:$16 sps:$4 sm:$0xff]  }
 0x303   : > { %7073 = vmatpush1.bf16.msra.mxu0 %v10462_v29  ;;  %7729 = vmatpush1.bf16.msra.mxu1 %v10465_v30  ;;  %v10553_v29 = vld [vmem:[%s11398_s24 + $0x1680] ss:$16 sps:$4 sm:$0xff]   ;;  %v10556_v30 = vld [vmem:[%s11398_s24 + $0x1688] ss:$16 sps:$4 sm:$0xff]  }
 0x304   : > { %7074 = vmatprep.subr.bf16.mxu0 %v10470_v31  ;;  %7730 = vmatprep.subr.bf16.mxu1 %v10473_v16  ;;  %v10561_v31 = vld [vmem:[%s11398_s24 + $0x16a4] ss:$16 sps:$4 sm:$0xff]   ;;  %v10564_v16 = vld [vmem:[%s11398_s24 + $0x16ac] ss:$16 sps:$4 sm:$0xff]  }
 0x307   : > { %7075 = vmatpush1.bf16.msra.mxu0 %v10468_v32  ;;  %7731 = vmatpush1.bf16.msra.mxu1 %v10471_v33  ;;  %v10559_v32 = vld [vmem:[%s11398_s24 + $0x16a0] ss:$16 sps:$4 sm:$0xff]   ;;  %v10562_v33 = vld [vmem:[%s11398_s24 + $0x16a8] ss:$16 sps:$4 sm:$0xff]  }
 0x308   : > { %7076 = vmatprep.subr.bf16.mxu0 %v10476_v34  ;;  %7732 = vmatprep.subr.bf16.mxu1 %v10479_v26  ;;  %v10567_v34 = vld [vmem:[%s11398_s24 + $0x16c4] ss:$16 sps:$4 sm:$0xff]   ;;  %v10570_v26 = vld [vmem:[%s11398_s24 + $0x16cc] ss:$16 sps:$4 sm:$0xff]  }
 0x30b   : > { %7077 = vmatpush1.bf16.msra.mxu0 %v10474_v35  ;;  %7733 = vmatpush1.bf16.msra.mxu1 %v10477_v37  ;;  %v10565_v35 = vld [vmem:[%s11398_s24 + $0x16c0] ss:$16 sps:$4 sm:$0xff]   ;;  %v10568_v37 = vld [vmem:[%s11398_s24 + $0x16c8] ss:$16 sps:$4 sm:$0xff]  }
 0x30c   : > { %7078 = vmatprep.subr.bf16.mxu0 %v10482_v38  ;;  %7734 = vmatprep.subr.bf16.mxu1 %v10485_v40  ;;  %v10573_v38 = vld [vmem:[%s11398_s24 + $0x16e4] ss:$16 sps:$4 sm:$0xff]   ;;  %v10576_v40 = vld [vmem:[%s11398_s24 + $0x16ec] ss:$16 sps:$4 sm:$0xff]  }
 0x30f   : > { %7079 = vmatpush1.bf16.msra.mxu0 %v10480_v41  ;;  %7735 = vmatpush1.bf16.msra.mxu1 %v10483_v22  ;;  %v10571_v41 = vld [vmem:[%s11398_s24 + $0x16e0] ss:$16 sps:$4 sm:$0xff]   ;;  %v10574_v22 = vld [vmem:[%s11398_s24 + $0x16e8] ss:$16 sps:$4 sm:$0xff]  }
 0x310   : > { %7080 = vmatprep.subr.bf16.mxu0 %v10488_v42  ;;  %7736 = vmatprep.subr.bf16.mxu1 %v10491_v43  ;;  %v10579_v42 = vld [vmem:[%s11398_s24 + $0x1704] ss:$16 sps:$4 sm:$0xff]   ;;  %v10582_v43 = vld [vmem:[%s11398_s24 + $0x170c] ss:$16 sps:$4 sm:$0xff]  }
 0x313   : > { %7081 = vmatpush1.bf16.msra.mxu0 %v10486_v45  ;;  %7737 = vmatpush1.bf16.msra.mxu1 %v10489_v46  ;;  %v10577_v45 = vld [vmem:[%s11398_s24 + $0x1700] ss:$16 sps:$4 sm:$0xff]   ;;  %v10580_v46 = vld [vmem:[%s11398_s24 + $0x1708] ss:$16 sps:$4 sm:$0xff]  }
 0x314   : > { %7082 = vmatprep.subr.bf16.mxu0 %v10494_v47  ;;  %7738 = vmatprep.subr.bf16.mxu1 %v10497_v48  ;;  %v10585_v47 = vld [vmem:[%s11398_s24 + $0x1724] ss:$16 sps:$4 sm:$0xff]   ;;  %v10588_v48 = vld [vmem:[%s11398_s24 + $0x172c] ss:$16 sps:$4 sm:$0xff]  }
 0x317   : > { %7083 = vmatpush1.bf16.msra.mxu0 %v10492_v51  ;;  %7739 = vmatpush1.bf16.msra.mxu1 %v10495_v54  ;;  %v10583_v51 = vld [vmem:[%s11398_s24 + $0x1720] ss:$16 sps:$4 sm:$0xff]   ;;  %v10586_v54 = vld [vmem:[%s11398_s24 + $0x1728] ss:$16 sps:$4 sm:$0xff]  }
 0x318   : > { %7084 = vmatprep.subr.bf16.mxu0 %v10500_v55  ;;  %7740 = vmatprep.subr.bf16.mxu1 %v10503_v56  ;;  %v10591_v55 = vld [vmem:[%s11398_s24 + $0x1744] ss:$16 sps:$4 sm:$0xff]   ;;  %v10594_v56 = vld [vmem:[%s11398_s24 + $0x174c] ss:$16 sps:$4 sm:$0xff]  }
 0x31b   : > { %7085 = vmatpush1.bf16.msra.mxu0 %v10498_v39  ;;  %7741 = vmatpush1.bf16.msra.mxu1 %v10501_v57  ;;  %v10589_v39 = vld [vmem:[%s11398_s24 + $0x1740] ss:$16 sps:$4 sm:$0xff]   ;;  %v10592_v57 = vld [vmem:[%s11398_s24 + $0x1748] ss:$16 sps:$4 sm:$0xff]  }
 0x31c   : > { %7086 = vmatprep.subr.bf16.mxu0 %v10506_v58  ;;  %7742 = vmatprep.subr.bf16.mxu1 %v10509_v59  ;;  %v10597_v58 = vld [vmem:[%s11398_s24 + $0x1764] ss:$16 sps:$4 sm:$0xff]   ;;  %v10600_v59 = vld [vmem:[%s11398_s24 + $0x176c] ss:$16 sps:$4 sm:$0xff]  }
 0x31f   : > { %7087 = vmatpush1.bf16.msra.mxu0 %v10504_v49  ;;  %7743 = vmatpush1.bf16.msra.mxu1 %v10507_v60  ;;  %v10595_v49 = vld [vmem:[%s11398_s24 + $0x1760] ss:$16 sps:$4 sm:$0xff]   ;;  %v10598_v60 = vld [vmem:[%s11398_s24 + $0x1768] ss:$16 sps:$4 sm:$0xff]  }
 0x320   : > { %7088 = vmatprep.subr.bf16.mxu0 %v10512_v61  ;;  %7744 = vmatprep.subr.bf16.mxu1 %v10515_v14  ;;  %v10603_v61 = vld [vmem:[%s11398_s24 + $0x1784] ss:$16 sps:$4 sm:$0xff]   ;;  %v10606_v14 = vld [vmem:[%s11398_s24 + $0x178c] ss:$16 sps:$4 sm:$0xff]  }
 0x323   : > { %7089 = vmatpush1.bf16.msra.mxu0 %v10510_v0  ;;  %7745 = vmatpush1.bf16.msra.mxu1 %v10513_v1  ;;  %v10601_v0 = vld [vmem:[%s11398_s24 + $0x1780] ss:$16 sps:$4 sm:$0xff]   ;;  %v10604_v1 = vld [vmem:[%s11398_s24 + $0x1788] ss:$16 sps:$4 sm:$0xff]  }
 0x324   : > { %7090 = vmatprep.subr.bf16.mxu0 %v10518_v36  ;;  %7746 = vmatprep.subr.bf16.mxu1 %v10521_v3  ;;  %v10609_v36 = vld [vmem:[%s11398_s24 + $0x17a4] ss:$16 sps:$4 sm:$0xff]   ;;  %v10612_v3 = vld [vmem:[%s11398_s24 + $0x17ac] ss:$16 sps:$4 sm:$0xff]  }
 0x327   : > { %7091 = vmatpush1.bf16.msra.mxu0 %v10516_v4  ;;  %7747 = vmatpush1.bf16.msra.mxu1 %v10519_v52  ;;  %v10607_v4 = vld [vmem:[%s11398_s24 + $0x17a0] ss:$16 sps:$4 sm:$0xff]   ;;  %v10610_v52 = vld [vmem:[%s11398_s24 + $0x17a8] ss:$16 sps:$4 sm:$0xff]  }
 0x328   : > { %7092 = vmatprep.subr.bf16.mxu0 %v10524_v5  ;;  %7748 = vmatprep.subr.bf16.mxu1 %v10527_v6  ;;  %v10615_v5 = vld [vmem:[%s11398_s24 + $0x17c4] ss:$16 sps:$4 sm:$0xff]   ;;  %v10618_v6 = vld [vmem:[%s11398_s24 + $0x17cc] ss:$16 sps:$4 sm:$0xff]  }
 0x32b   : > { %7093 = vmatpush1.bf16.msra.mxu0 %v10522_v7  ;;  %7749 = vmatpush1.bf16.msra.mxu1 %v10525_v62  ;;  %v12314_v7 = vld [vmem:[%s11419_s26 + $0x18] sm:$0xff] }
 0x32c   : > { %7103 = vmatprep.subr.bf16.mxu0 %v10531_v8  ;;  %7759 = vmatprep.subr.bf16.mxu1 %v10534_v9  ;;  %v10613_v62 = vld [vmem:[%s11398_s24 + $0x17c0] ss:$16 sps:$4 sm:$0xff]   ;;  %v10616_v8 = vld [vmem:[%s11398_s24 + $0x17c8] ss:$16 sps:$4 sm:$0xff]   ;;  %v10621_v9 = vld [vmem:[%s11398_s24 + $0x17e4] ss:$16 sps:$4 sm:$0xff]  }
 0x32e   : > { %7095 = vmatmul.mubr.bf16.vlgmr.msra.gmra.mrb[0].mxu0 %v12251_v63  ;;  %7751 = vmatmul.mubr.bf16.vlgmr.msra.gmra.mrb[0].mxu1 %v12251_v63 }
 0x32f   : > { %7104 = vmatpush1.bf16.msra.mxu0 %v10529_v11  ;;  %7760 = vmatpush1.bf16.msra.mxu1 %v10532_v12  ;;  %v10624_v11 = vld [vmem:[%s11398_s24 + $0x17ec] ss:$16 sps:$4 sm:$0xff]   ;;  %v12322_v12 = vrot.slane %v12314_v7, %v11473_v50 }
 0x330   : > { %7105 = vmatprep.subr.bf16.mxu0 %v10537_v13  ;;  %7761 = vmatprep.subr.bf16.mxu1 %v10540_v15  ;;  %v10619_v13 = vld [vmem:[%s11398_s24 + $0x17e0] ss:$16 sps:$4 sm:$0xff]   ;;  %v10622_v15 = vld [vmem:[%s11398_s24 + $0x17e8] ss:$16 sps:$4 sm:$0xff]  }
 0x331   : > { %7135 = vmatprep.mubr.bf16.mxu0 %v1450_v17  ;;  %7791 = vmatprep.mubr.bf16.mxu1 %v1450_v17  ;;  %v10627_v17 = vld [vmem:[%s11398_s24 + $0x1804] ss:$16 sps:$4 sm:$0xff]  }
 0x333   : > { %7106 = vmatpush1.bf16.msra.mxu0 %v10535_v2  ;;  %7762 = vmatpush1.bf16.msra.mxu1 %v10538_v53  ;;  %v10630_v2 = vld [vmem:[%s11398_s24 + $0x180c] ss:$16 sps:$4 sm:$0xff]   ;;  %v1466_v53 = vcombine.high %v12322_v12, %v12322_v12 }
 0x334   : > { %7107 = vmatprep.subr.bf16.mxu0 %v10543_v18  ;;  %7763 = vmatprep.subr.bf16.mxu1 %v10546_v19  ;;  %v1448_v18 = vcombine.high %v12251_v63, %v12251_v63  ;;  %v10625_v19 = vld [vmem:[%s11398_s24 + $0x1800] ss:$16 sps:$4 sm:$0xff]  }
 0x335   : > { %v10631_v63 = vld [vmem:[%s11398_s24 + $0x1820] ss:$16 sps:$4 sm:$0xff]  }
 0x337   : > { %7108 = vmatpush1.bf16.msra.mxu0 %v10541_v10  ;;  %7764 = vmatpush1.bf16.msra.mxu1 %v10544_v20  ;;  %v10628_v10 = vld [vmem:[%s11398_s24 + $0x1808] ss:$16 sps:$4 sm:$0xff]   ;;  %v10633_v20 = vld [vmem:[%s11398_s24 + $0x1824] ss:$16 sps:$4 sm:$0xff]  }
 0x338   : > { %7109 = vmatprep.subr.bf16.mxu0 %v10549_v21  ;;  %7765 = vmatprep.subr.bf16.mxu1 %v10552_v23  ;;  %v10636_v21 = vld [vmem:[%s11398_s24 + $0x182c] ss:$16 sps:$4 sm:$0xff]   ;;  %v12337_v23 = vrot.slane %v1466_v53, %v11473_v50  ;;  %v10712_v53 = vld [vmem:[%s11398_s24 + $0x19c8] ss:$16 sps:$4 sm:$0xff]  }
 0x33b   : > { %7110 = vmatpush1.bf16.msra.mxu0 %v10547_v24  ;;  %7766 = vmatpush1.bf16.msra.mxu1 %v10550_v25  ;;  %v10634_v24 = vld [vmem:[%s11398_s24 + $0x1828] ss:$16 sps:$4 sm:$0xff]   ;;  %v10639_v25 = vld [vmem:[%s11398_s24 + $0x1844] ss:$16 sps:$4 sm:$0xff]  }
 0x33c   : > { %7111 = vmatprep.subr.bf16.mxu0 %v10555_v27  ;;  %7767 = vmatprep.subr.bf16.mxu1 %v10558_v28  ;;  %v10642_v27 = vld [vmem:[%s11398_s24 + $0x184c] ss:$16 sps:$4 sm:$0xff]   ;;  %v10637_v28 = vld [vmem:[%s11398_s24 + $0x1840] ss:$16 sps:$4 sm:$0xff]  }
 0x33f   : > { %7112 = vmatpush1.bf16.msra.mxu0 %v10553_v29  ;;  %7768 = vmatpush1.bf16.msra.mxu1 %v10556_v30  ;;  %v10640_v29 = vld [vmem:[%s11398_s24 + $0x1848] ss:$16 sps:$4 sm:$0xff]   ;;  %v10645_v30 = vld [vmem:[%s11398_s24 + $0x1864] ss:$16 sps:$4 sm:$0xff]  }
 0x340   : > { %7113 = vmatprep.subr.bf16.mxu0 %v10561_v31  ;;  %7769 = vmatprep.subr.bf16.mxu1 %v10564_v16  ;;  %v10648_v31 = vld [vmem:[%s11398_s24 + $0x186c] ss:$16 sps:$4 sm:$0xff]   ;;  %v10643_v16 = vld [vmem:[%s11398_s24 + $0x1860] ss:$16 sps:$4 sm:$0xff]  }
 0x343   : > { %7114 = vmatpush1.bf16.msra.mxu0 %v10559_v32  ;;  %7770 = vmatpush1.bf16.msra.mxu1 %v10562_v33  ;;  %v10646_v32 = vld [vmem:[%s11398_s24 + $0x1868] ss:$16 sps:$4 sm:$0xff]   ;;  %v10651_v33 = vld [vmem:[%s11398_s24 + $0x1884] ss:$16 sps:$4 sm:$0xff]  }
 0x344   : > { %7115 = vmatprep.subr.bf16.mxu0 %v10567_v34  ;;  %7771 = vmatprep.subr.bf16.mxu1 %v10570_v26  ;;  %v10654_v34 = vld [vmem:[%s11398_s24 + $0x188c] ss:$16 sps:$4 sm:$0xff]   ;;  %v10649_v26 = vld [vmem:[%s11398_s24 + $0x1880] ss:$16 sps:$4 sm:$0xff]  }
 0x347   : > { %7116 = vmatpush1.bf16.msra.mxu0 %v10565_v35  ;;  %7772 = vmatpush1.bf16.msra.mxu1 %v10568_v37  ;;  %v10652_v35 = vld [vmem:[%s11398_s24 + $0x1888] ss:$16 sps:$4 sm:$0xff]   ;;  %v10657_v37 = vld [vmem:[%s11398_s24 + $0x18a4] ss:$16 sps:$4 sm:$0xff]  }
 0x348   : > { %7117 = vmatprep.subr.bf16.mxu0 %v10573_v38  ;;  %7773 = vmatprep.subr.bf16.mxu1 %v10576_v40  ;;  %v10660_v38 = vld [vmem:[%s11398_s24 + $0x18ac] ss:$16 sps:$4 sm:$0xff]   ;;  %v10655_v40 = vld [vmem:[%s11398_s24 + $0x18a0] ss:$16 sps:$4 sm:$0xff]  }
 0x34b   : > { %7118 = vmatpush1.bf16.msra.mxu0 %v10571_v41  ;;  %7774 = vmatpush1.bf16.msra.mxu1 %v10574_v22  ;;  %v10658_v41 = vld [vmem:[%s11398_s24 + $0x18a8] ss:$16 sps:$4 sm:$0xff]   ;;  %v10663_v22 = vld [vmem:[%s11398_s24 + $0x18c4] ss:$16 sps:$4 sm:$0xff]  }
 0x34c   : > { %7119 = vmatprep.subr.bf16.mxu0 %v10579_v42  ;;  %7775 = vmatprep.subr.bf16.mxu1 %v10582_v43  ;;  %v10666_v42 = vld [vmem:[%s11398_s24 + $0x18cc] ss:$16 sps:$4 sm:$0xff]   ;;  %v10661_v43 = vld [vmem:[%s11398_s24 + $0x18c0] ss:$16 sps:$4 sm:$0xff]  }
 0x34f   : > { %7120 = vmatpush1.bf16.msra.mxu0 %v10577_v45  ;;  %7776 = vmatpush1.bf16.msra.mxu1 %v10580_v46  ;;  %v10664_v45 = vld [vmem:[%s11398_s24 + $0x18c8] ss:$16 sps:$4 sm:$0xff]   ;;  %v10669_v46 = vld [vmem:[%s11398_s24 + $0x18e4] ss:$16 sps:$4 sm:$0xff]  }
 0x350   : > { %7121 = vmatprep.subr.bf16.mxu0 %v10585_v47  ;;  %7777 = vmatprep.subr.bf16.mxu1 %v10588_v48  ;;  %v10672_v47 = vld [vmem:[%s11398_s24 + $0x18ec] ss:$16 sps:$4 sm:$0xff]   ;;  %v10667_v48 = vld [vmem:[%s11398_s24 + $0x18e0] ss:$16 sps:$4 sm:$0xff]  }
 0x353   : > { %7122 = vmatpush1.bf16.msra.mxu0 %v10583_v51  ;;  %7778 = vmatpush1.bf16.msra.mxu1 %v10586_v54  ;;  %v10670_v51 = vld [vmem:[%s11398_s24 + $0x18e8] ss:$16 sps:$4 sm:$0xff]   ;;  %v10675_v54 = vld [vmem:[%s11398_s24 + $0x1904] ss:$16 sps:$4 sm:$0xff]  }
 0x354   : > { %7123 = vmatprep.subr.bf16.mxu0 %v10591_v55  ;;  %7779 = vmatprep.subr.bf16.mxu1 %v10594_v56  ;;  %v10678_v55 = vld [vmem:[%s11398_s24 + $0x190c] ss:$16 sps:$4 sm:$0xff]   ;;  %v10673_v56 = vld [vmem:[%s11398_s24 + $0x1900] ss:$16 sps:$4 sm:$0xff]  }
 0x357   : > { %7124 = vmatpush1.bf16.msra.mxu0 %v10589_v39  ;;  %7780 = vmatpush1.bf16.msra.mxu1 %v10592_v57  ;;  %v10676_v39 = vld [vmem:[%s11398_s24 + $0x1908] ss:$16 sps:$4 sm:$0xff]   ;;  %v10681_v57 = vld [vmem:[%s11398_s24 + $0x1924] ss:$16 sps:$4 sm:$0xff]  }
 0x358   : > { %7125 = vmatprep.subr.bf16.mxu0 %v10597_v58  ;;  %7781 = vmatprep.subr.bf16.mxu1 %v10600_v59  ;;  %v10684_v58 = vld [vmem:[%s11398_s24 + $0x192c] ss:$16 sps:$4 sm:$0xff]   ;;  %v10679_v59 = vld [vmem:[%s11398_s24 + $0x1920] ss:$16 sps:$4 sm:$0xff]  }
 0x35b   : > { %7126 = vmatpush1.bf16.msra.mxu0 %v10595_v49  ;;  %7782 = vmatpush1.bf16.msra.mxu1 %v10598_v60  ;;  %v10682_v49 = vld [vmem:[%s11398_s24 + $0x1928] ss:$16 sps:$4 sm:$0xff]   ;;  %v10687_v60 = vld [vmem:[%s11398_s24 + $0x1944] ss:$16 sps:$4 sm:$0xff]  }
 0x35c   : > { %7127 = vmatprep.subr.bf16.mxu0 %v10603_v61  ;;  %7783 = vmatprep.subr.bf16.mxu1 %v10606_v14  ;;  %v10690_v61 = vld [vmem:[%s11398_s24 + $0x194c] ss:$16 sps:$4 sm:$0xff]   ;;  %v10685_v14 = vld [vmem:[%s11398_s24 + $0x1940] ss:$16 sps:$4 sm:$0xff]  }
 0x35f   : > { %7128 = vmatpush1.bf16.msra.mxu0 %v10601_v0  ;;  %7784 = vmatpush1.bf16.msra.mxu1 %v10604_v1  ;;  %v10688_v0 = vld [vmem:[%s11398_s24 + $0x1948] ss:$16 sps:$4 sm:$0xff]   ;;  %v10693_v1 = vld [vmem:[%s11398_s24 + $0x1964] ss:$16 sps:$4 sm:$0xff]  }
 0x360   : > { %7129 = vmatprep.subr.bf16.mxu0 %v10609_v36  ;;  %7785 = vmatprep.subr.bf16.mxu1 %v10612_v3  ;;  %v10696_v36 = vld [vmem:[%s11398_s24 + $0x196c] ss:$16 sps:$4 sm:$0xff]   ;;  %v10691_v3 = vld [vmem:[%s11398_s24 + $0x1960] ss:$16 sps:$4 sm:$0xff]  }
 0x363   : > { %7130 = vmatpush1.bf16.msra.mxu0 %v10607_v4  ;;  %7786 = vmatpush1.bf16.msra.mxu1 %v10610_v52  ;;  %v10694_v4 = vld [vmem:[%s11398_s24 + $0x1968] ss:$16 sps:$4 sm:$0xff]   ;;  %v10699_v52 = vld [vmem:[%s11398_s24 + $0x1984] ss:$16 sps:$4 sm:$0xff]  }
 0x364   : > { %7131 = vmatprep.subr.bf16.mxu0 %v10615_v5  ;;  %7787 = vmatprep.subr.bf16.mxu1 %v10618_v6  ;;  %v10702_v5 = vld [vmem:[%s11398_s24 + $0x198c] ss:$16 sps:$4 sm:$0xff]   ;;  %v10697_v6 = vld [vmem:[%s11398_s24 + $0x1980] ss:$16 sps:$4 sm:$0xff]  }
 0x367   : > { %7132 = vmatpush1.bf16.msra.mxu0 %v10613_v62  ;;  %7788 = vmatpush1.bf16.msra.mxu1 %v10616_v8  ;;  %v10700_v62 = vld [vmem:[%s11398_s24 + $0x1988] ss:$16 sps:$4 sm:$0xff]   ;;  %v10705_v8 = vld [vmem:[%s11398_s24 + $0x19a4] ss:$16 sps:$4 sm:$0xff]  }
 0x368   : > { %7133 = vmatprep.subr.bf16.mxu0 %v10621_v9  ;;  %7789 = vmatprep.subr.bf16.mxu1 %v10624_v11  ;;  %v10708_v9 = vld [vmem:[%s11398_s24 + $0x19ac] ss:$16 sps:$4 sm:$0xff]   ;;  %v10703_v11 = vld [vmem:[%s11398_s24 + $0x19a0] ss:$16 sps:$4 sm:$0xff]  }
 0x36b   : > { %7134 = vmatpush1.bf16.msra.mxu0 %v10619_v13  ;;  %7790 = vmatpush1.bf16.msra.mxu1 %v10622_v15  ;;  %v10706_v13 = vld [vmem:[%s11398_s24 + $0x19a8] ss:$16 sps:$4 sm:$0xff]   ;;  %v10711_v15 = vld [vmem:[%s11398_s24 + $0x19c4] ss:$16 sps:$4 sm:$0xff]  }
 0x36c   : > { %7144 = vmatprep.subr.bf16.mxu0 %v10627_v17  ;;  %7800 = vmatprep.subr.bf16.mxu1 %v10630_v2  ;;  %v10714_v17 = vld [vmem:[%s11398_s24 + $0x19cc] ss:$16 sps:$4 sm:$0xff]   ;;  %v10709_v2 = vld [vmem:[%s11398_s24 + $0x19c0] ss:$16 sps:$4 sm:$0xff]  }
 0x36e   : > { %7136 = vmatmul.mubr.bf16.vlgmr.msra.gmra.mrb[0].mxu0 %v1448_v18  ;;  %7792 = vmatmul.mubr.bf16.vlgmr.msra.gmra.mrb[0].mxu1 %v1448_v18  ;;  %v10717_v18 = vld [vmem:[%s11398_s24 + $0x19e4] ss:$16 sps:$4 sm:$0xff]  }
 0x36f   : > { %7145 = vmatpush1.bf16.msra.mxu0 %v10625_v19  ;;  %7801 = vmatpush1.bf16.msra.mxu1 %v10628_v10  ;;  %v10720_v19 = vld [vmem:[%s11398_s24 + $0x19ec] ss:$16 sps:$4 sm:$0xff]   ;;  %v10715_v10 = vld [vmem:[%s11398_s24 + $0x19e0] ss:$16 sps:$4 sm:$0xff]  }
 0x370   : > { %7146 = vmatprep.subr.bf16.mxu0 %v10633_v20  ;;  %7802 = vmatprep.subr.bf16.mxu1 %v10636_v21  ;;  %v10718_v20 = vld [vmem:[%s11398_s24 + $0x19e8] ss:$16 sps:$4 sm:$0xff]   ;;  %v10723_v21 = vld [vmem:[%s11398_s24 + $0x1a04] ss:$16 sps:$4 sm:$0xff]  }
 0x371   : > { %7176 = vmatprep.mubr.bf16.mxu0 %v12337_v23  ;;  %7832 = vmatprep.mubr.bf16.mxu1 %v12337_v23 }
 0x373   : > { %7147 = vmatpush1.bf16.msra.mxu0 %v10631_v63  ;;  %7803 = vmatpush1.bf16.msra.mxu1 %v10634_v24  ;;  %v10726_v63 = vld [vmem:[%s11398_s24 + $0x1a0c] ss:$16 sps:$4 sm:$0xff]   ;;  %v12403_v24 = vrot.slane %v12322_v12, %v11473_v50  ;;  %v10727_v12 = vld [vmem:[%s11398_s24 + $0x1a20] ss:$16 sps:$4 sm:$0xff]  }
 0x374   : > { %7148 = vmatprep.subr.bf16.mxu0 %v10639_v25  ;;  %7804 = vmatprep.subr.bf16.mxu1 %v10642_v27  ;;  %v10721_v25 = vld [vmem:[%s11398_s24 + $0x1a00] ss:$16 sps:$4 sm:$0xff]   ;;  %v10724_v27 = vld [vmem:[%s11398_s24 + $0x1a08] ss:$16 sps:$4 sm:$0xff]  }
 0x377   : > { %7149 = vmatpush1.bf16.msra.mxu0 %v10637_v28  ;;  %7805 = vmatpush1.bf16.msra.mxu1 %v10640_v29  ;;  %v10729_v28 = vld [vmem:[%s11398_s24 + $0x1a24] ss:$16 sps:$4 sm:$0xff]   ;;  %v10732_v29 = vld [vmem:[%s11398_s24 + $0x1a2c] ss:$16 sps:$4 sm:$0xff]  }
 0x378   : > { %7150 = vmatprep.subr.bf16.mxu0 %v10645_v30  ;;  %7806 = vmatprep.subr.bf16.mxu1 %v10648_v31  ;;  %v1498_v30 = vcombine.high %v12337_v23, %v12337_v23  ;;  %v10730_v31 = vld [vmem:[%s11398_s24 + $0x1a28] ss:$16 sps:$4 sm:$0xff]   ;;  %v10733_v23 = vld [vmem:[%s11398_s24 + $0x1a40] ss:$16 sps:$4 sm:$0xff]  }
 0x37b   : > { %7151 = vmatpush1.bf16.msra.mxu0 %v10643_v16  ;;  %7807 = vmatpush1.bf16.msra.mxu1 %v10646_v32  ;;  %v10735_v16 = vld [vmem:[%s11398_s24 + $0x1a44] ss:$16 sps:$4 sm:$0xff]   ;;  %v10738_v32 = vld [vmem:[%s11398_s24 + $0x1a4c] ss:$16 sps:$4 sm:$0xff]  }
 0x37c   : > { %7152 = vmatprep.subr.bf16.mxu0 %v10651_v33  ;;  %7808 = vmatprep.subr.bf16.mxu1 %v10654_v34  ;;  %v10736_v33 = vld [vmem:[%s11398_s24 + $0x1a48] ss:$16 sps:$4 sm:$0xff]   ;;  %v10741_v34 = vld [vmem:[%s11398_s24 + $0x1a64] ss:$16 sps:$4 sm:$0xff]  }
 0x37f   : > { %7153 = vmatpush1.bf16.msra.mxu0 %v10649_v26  ;;  %7809 = vmatpush1.bf16.msra.mxu1 %v10652_v35  ;;  %v10744_v26 = vld [vmem:[%s11398_s24 + $0x1a6c] ss:$16 sps:$4 sm:$0xff]   ;;  %v10739_v35 = vld [vmem:[%s11398_s24 + $0x1a60] ss:$16 sps:$4 sm:$0xff]  }
 0x380   : > { %7154 = vmatprep.subr.bf16.mxu0 %v10657_v37  ;;  %7810 = vmatprep.subr.bf16.mxu1 %v10660_v38  ;;  %v10742_v37 = vld [vmem:[%s11398_s24 + $0x1a68] ss:$16 sps:$4 sm:$0xff]   ;;  %v10747_v38 = vld [vmem:[%s11398_s24 + $0x1a84] ss:$16 sps:$4 sm:$0xff]  }
 0x383   : > { %7155 = vmatpush1.bf16.msra.mxu0 %v10655_v40  ;;  %7811 = vmatpush1.bf16.msra.mxu1 %v10658_v41  ;;  %v10750_v40 = vld [vmem:[%s11398_s24 + $0x1a8c] ss:$16 sps:$4 sm:$0xff]   ;;  %v10745_v41 = vld [vmem:[%s11398_s24 + $0x1a80] ss:$16 sps:$4 sm:$0xff]  }
 0x384   : > { %7156 = vmatprep.subr.bf16.mxu0 %v10663_v22  ;;  %7812 = vmatprep.subr.bf16.mxu1 %v10666_v42  ;;  %v10748_v22 = vld [vmem:[%s11398_s24 + $0x1a88] ss:$16 sps:$4 sm:$0xff]   ;;  %v10753_v42 = vld [vmem:[%s11398_s24 + $0x1aa4] ss:$16 sps:$4 sm:$0xff]  }
 0x387   : > { %7157 = vmatpush1.bf16.msra.mxu0 %v10661_v43  ;;  %7813 = vmatpush1.bf16.msra.mxu1 %v10664_v45  ;;  %v10756_v43 = vld [vmem:[%s11398_s24 + $0x1aac] ss:$16 sps:$4 sm:$0xff]   ;;  %v10751_v45 = vld [vmem:[%s11398_s24 + $0x1aa0] ss:$16 sps:$4 sm:$0xff]  }
 0x388   : > { %7158 = vmatprep.subr.bf16.mxu0 %v10669_v46  ;;  %7814 = vmatprep.subr.bf16.mxu1 %v10672_v47  ;;  %v10754_v46 = vld [vmem:[%s11398_s24 + $0x1aa8] ss:$16 sps:$4 sm:$0xff]   ;;  %v10759_v47 = vld [vmem:[%s11398_s24 + $0x1ac4] ss:$16 sps:$4 sm:$0xff]  }
 0x38b   : > { %7159 = vmatpush1.bf16.msra.mxu0 %v10667_v48  ;;  %7815 = vmatpush1.bf16.msra.mxu1 %v10670_v51  ;;  %v10762_v48 = vld [vmem:[%s11398_s24 + $0x1acc] ss:$16 sps:$4 sm:$0xff]   ;;  %v10757_v51 = vld [vmem:[%s11398_s24 + $0x1ac0] ss:$16 sps:$4 sm:$0xff]  }
 0x38c   : > { %7160 = vmatprep.subr.bf16.mxu0 %v10675_v54  ;;  %7816 = vmatprep.subr.bf16.mxu1 %v10678_v55  ;;  %v10760_v54 = vld [vmem:[%s11398_s24 + $0x1ac8] ss:$16 sps:$4 sm:$0xff]   ;;  %v10765_v55 = vld [vmem:[%s11398_s24 + $0x1ae4] ss:$16 sps:$4 sm:$0xff]  }
 0x38f   : > { %7161 = vmatpush1.bf16.msra.mxu0 %v10673_v56  ;;  %7817 = vmatpush1.bf16.msra.mxu1 %v10676_v39  ;;  %v10768_v56 = vld [vmem:[%s11398_s24 + $0x1aec] ss:$16 sps:$4 sm:$0xff]   ;;  %v10763_v39 = vld [vmem:[%s11398_s24 + $0x1ae0] ss:$16 sps:$4 sm:$0xff]  }
 0x390   : > { %7162 = vmatprep.subr.bf16.mxu0 %v10681_v57  ;;  %7818 = vmatprep.subr.bf16.mxu1 %v10684_v58  ;;  %v10766_v57 = vld [vmem:[%s11398_s24 + $0x1ae8] ss:$16 sps:$4 sm:$0xff]   ;;  %v10771_v58 = vld [vmem:[%s11398_s24 + $0x1b04] ss:$16 sps:$4 sm:$0xff]  }
 0x393   : > { %7163 = vmatpush1.bf16.msra.mxu0 %v10679_v59  ;;  %7819 = vmatpush1.bf16.msra.mxu1 %v10682_v49  ;;  %v10774_v59 = vld [vmem:[%s11398_s24 + $0x1b0c] ss:$16 sps:$4 sm:$0xff]   ;;  %v10769_v49 = vld [vmem:[%s11398_s24 + $0x1b00] ss:$16 sps:$4 sm:$0xff]  }
 0x394   : > { %7164 = vmatprep.subr.bf16.mxu0 %v10687_v60  ;;  %7820 = vmatprep.subr.bf16.mxu1 %v10690_v61  ;;  %v10772_v60 = vld [vmem:[%s11398_s24 + $0x1b08] ss:$16 sps:$4 sm:$0xff]   ;;  %v10777_v61 = vld [vmem:[%s11398_s24 + $0x1b24] ss:$16 sps:$4 sm:$0xff]  }
 0x397   : > { %7165 = vmatpush1.bf16.msra.mxu0 %v10685_v14  ;;  %7821 = vmatpush1.bf16.msra.mxu1 %v10688_v0  ;;  %v10780_v14 = vld [vmem:[%s11398_s24 + $0x1b2c] ss:$16 sps:$4 sm:$0xff]   ;;  %v10775_v0 = vld [vmem:[%s11398_s24 + $0x1b20] ss:$16 sps:$4 sm:$0xff]  }
 0x398   : > { %7166 = vmatprep.subr.bf16.mxu0 %v10693_v1  ;;  %7822 = vmatprep.subr.bf16.mxu1 %v10696_v36  ;;  %v10778_v1 = vld [vmem:[%s11398_s24 + $0x1b28] ss:$16 sps:$4 sm:$0xff]   ;;  %v10783_v36 = vld [vmem:[%s11398_s24 + $0x1b44] ss:$16 sps:$4 sm:$0xff]  }
 0x39b   : > { %7167 = vmatpush1.bf16.msra.mxu0 %v10691_v3  ;;  %7823 = vmatpush1.bf16.msra.mxu1 %v10694_v4  ;;  %v10786_v3 = vld [vmem:[%s11398_s24 + $0x1b4c] ss:$16 sps:$4 sm:$0xff]   ;;  %v10781_v4 = vld [vmem:[%s11398_s24 + $0x1b40] ss:$16 sps:$4 sm:$0xff]  }
 0x39c   : > { %7168 = vmatprep.subr.bf16.mxu0 %v10699_v52  ;;  %7824 = vmatprep.subr.bf16.mxu1 %v10702_v5  ;;  %v10784_v52 = vld [vmem:[%s11398_s24 + $0x1b48] ss:$16 sps:$4 sm:$0xff]   ;;  %v10789_v5 = vld [vmem:[%s11398_s24 + $0x1b64] ss:$16 sps:$4 sm:$0xff]  }
 0x39f   : > { %7169 = vmatpush1.bf16.msra.mxu0 %v10697_v6  ;;  %7825 = vmatpush1.bf16.msra.mxu1 %v10700_v62  ;;  %v10792_v6 = vld [vmem:[%s11398_s24 + $0x1b6c] ss:$16 sps:$4 sm:$0xff]   ;;  %v10787_v62 = vld [vmem:[%s11398_s24 + $0x1b60] ss:$16 sps:$4 sm:$0xff]  }
 0x3a0   : > { %7170 = vmatprep.subr.bf16.mxu0 %v10705_v8  ;;  %7826 = vmatprep.subr.bf16.mxu1 %v10708_v9  ;;  %v10790_v8 = vld [vmem:[%s11398_s24 + $0x1b68] ss:$16 sps:$4 sm:$0xff]   ;;  %v10795_v9 = vld [vmem:[%s11398_s24 + $0x1b84] ss:$16 sps:$4 sm:$0xff]  }
 0x3a3   : > { %7171 = vmatpush1.bf16.msra.mxu0 %v10703_v11  ;;  %7827 = vmatpush1.bf16.msra.mxu1 %v10706_v13  ;;  %v10798_v11 = vld [vmem:[%s11398_s24 + $0x1b8c] ss:$16 sps:$4 sm:$0xff]   ;;  %v10793_v13 = vld [vmem:[%s11398_s24 + $0x1b80] ss:$16 sps:$4 sm:$0xff]  }
 0x3a4   : > { %7172 = vmatprep.subr.bf16.mxu0 %v10711_v15  ;;  %7828 = vmatprep.subr.bf16.mxu1 %v10714_v17  ;;  %v10796_v15 = vld [vmem:[%s11398_s24 + $0x1b88] ss:$16 sps:$4 sm:$0xff]   ;;  %v10801_v17 = vld [vmem:[%s11398_s24 + $0x1ba4] ss:$16 sps:$4 sm:$0xff]  }
 0x3a7   : > { %7173 = vmatpush1.bf16.msra.mxu0 %v10709_v2  ;;  %7829 = vmatpush1.bf16.msra.mxu1 %v10712_v53  ;;  %v10804_v2 = vld [vmem:[%s11398_s24 + $0x1bac] ss:$16 sps:$4 sm:$0xff]   ;;  %v10799_v53 = vld [vmem:[%s11398_s24 + $0x1ba0] ss:$16 sps:$4 sm:$0xff]  }
 0x3a8   : > { %7174 = vmatprep.subr.bf16.mxu0 %v10717_v18  ;;  %7830 = vmatprep.subr.bf16.mxu1 %v10720_v19  ;;  %v10802_v18 = vld [vmem:[%s11398_s24 + $0x1ba8] ss:$16 sps:$4 sm:$0xff]   ;;  %v10807_v19 = vld [vmem:[%s11398_s24 + $0x1bc4] ss:$16 sps:$4 sm:$0xff]  }
 0x3ab   : > { %7175 = vmatpush1.bf16.msra.mxu0 %v10715_v10  ;;  %7831 = vmatpush1.bf16.msra.mxu1 %v10718_v20  ;;  %v10810_v10 = vld [vmem:[%s11398_s24 + $0x1bcc] ss:$16 sps:$4 sm:$0xff]   ;;  %v1451_v20 = vcombine.high %v12314_v7, %v12314_v7  ;;  %v10811_v7 = vld [vmem:[%s11398_s24 + $0x1be0] ss:$16 sps:$4 sm:$0xff]  }
 0x3ac   : > { %7185 = vmatprep.subr.bf16.mxu0 %v10723_v21  ;;  %7841 = vmatprep.subr.bf16.mxu1 %v10726_v63  ;;  %v10805_v21 = vld [vmem:[%s11398_s24 + $0x1bc0] ss:$16 sps:$4 sm:$0xff]   ;;  %v10808_v63 = vld [vmem:[%s11398_s24 + $0x1bc8] ss:$16 sps:$4 sm:$0xff]  }
 0x3ae   : > { %7177 = vmatmul.mubr.bf16.vlgmr.msra.gmra.mrb[0].mxu0 %v12403_v24  ;;  %7833 = vmatmul.mubr.bf16.vlgmr.msra.gmra.mrb[0].mxu1 %v12403_v24 }
 0x3af   : > { %7186 = vmatpush1.bf16.msra.mxu0 %v10721_v25  ;;  %7842 = vmatpush1.bf16.msra.mxu1 %v10724_v27  ;;  %v10813_v25 = vld [vmem:[%s11398_s24 + $0x1be4] ss:$16 sps:$4 sm:$0xff]   ;;  %v10816_v27 = vld [vmem:[%s11398_s24 + $0x1bec] ss:$16 sps:$4 sm:$0xff]  }
 0x3b0   : > { %7187 = vmatprep.subr.bf16.mxu0 %v10729_v28  ;;  %7843 = vmatprep.subr.bf16.mxu1 %v10732_v29  ;;  %v12472_v28 = vrot.slane %v1451_v20, %v11473_v50  ;;  %v10814_v29 = vld [vmem:[%s11398_s24 + $0x1be8] ss:$16 sps:$4 sm:$0xff]  }
 0x3b1   : > { %7217 = vmatprep.mubr.bf16.mxu0 %v1498_v30  ;;  %7873 = vmatprep.mubr.bf16.mxu1 %v1498_v30  ;;  %v10819_v30 = vld [vmem:[%s11398_s24 + $0x1c04] ss:$16 sps:$4 sm:$0xff]   ;;  %v10892_v20 = vld [vmem:[%s11398_s24 + $0x1d88] ss:$16 sps:$4 sm:$0xff]  }
 0x3b3   : > { %7188 = vmatpush1.bf16.msra.mxu0 %v10727_v12  ;;  %7844 = vmatpush1.bf16.msra.mxu1 %v10730_v31  ;;  %v10822_v12 = vld [vmem:[%s11398_s24 + $0x1c0c] ss:$16 sps:$4 sm:$0xff]   ;;  %v1467_v31 = vcombine.high %v12472_v28, %v12472_v28 }
 0x3b4   : > { %7189 = vmatprep.subr.bf16.mxu0 %v10735_v16  ;;  %7845 = vmatprep.subr.bf16.mxu1 %v10738_v32  ;;  %v1496_v16 = vcombine.high %v12403_v24, %v12403_v24  ;;  %v10817_v32 = vld [vmem:[%s11398_s24 + $0x1c00] ss:$16 sps:$4 sm:$0xff]  }
 0x3b5   : > { %v10823_v24 = vld [vmem:[%s11398_s24 + $0x1c20] ss:$16 sps:$4 sm:$0xff]  }
 0x3b7   : > { %7190 = vmatpush1.bf16.msra.mxu0 %v10733_v23  ;;  %7846 = vmatpush1.bf16.msra.mxu1 %v10736_v33  ;;  %v10820_v23 = vld [vmem:[%s11398_s24 + $0x1c08] ss:$16 sps:$4 sm:$0xff]   ;;  %v10825_v33 = vld [vmem:[%s11398_s24 + $0x1c24] ss:$16 sps:$4 sm:$0xff]  }
 0x3b8   : > { %7191 = vmatprep.subr.bf16.mxu0 %v10741_v34  ;;  %7847 = vmatprep.subr.bf16.mxu1 %v10744_v26  ;;  %v10828_v34 = vld [vmem:[%s11398_s24 + $0x1c2c] ss:$16 sps:$4 sm:$0xff]   ;;  %v12487_v26 = vrot.slane %v1467_v31, %v11473_v50  ;;  %v10909_v31 = vld [vmem:[%s11398_s24 + $0x1de4] ss:$16 sps:$4 sm:$0xff]  }
 0x3bb   : > { %7192 = vmatpush1.bf16.msra.mxu0 %v10739_v35  ;;  %7848 = vmatpush1.bf16.msra.mxu1 %v10742_v37  ;;  %v10826_v35 = vld [vmem:[%s11398_s24 + $0x1c28] ss:$16 sps:$4 sm:$0xff]   ;;  %v10831_v37 = vld [vmem:[%s11398_s24 + $0x1c44] ss:$16 sps:$4 sm:$0xff]  }
 0x3bc   : > { %7193 = vmatprep.subr.bf16.mxu0 %v10747_v38  ;;  %7849 = vmatprep.subr.bf16.mxu1 %v10750_v40  ;;  %v10834_v38 = vld [vmem:[%s11398_s24 + $0x1c4c] ss:$16 sps:$4 sm:$0xff]   ;;  %v10829_v40 = vld [vmem:[%s11398_s24 + $0x1c40] ss:$16 sps:$4 sm:$0xff]  }
 0x3bf   : > { %7194 = vmatpush1.bf16.msra.mxu0 %v10745_v41  ;;  %7850 = vmatpush1.bf16.msra.mxu1 %v10748_v22  ;;  %v10832_v41 = vld [vmem:[%s11398_s24 + $0x1c48] ss:$16 sps:$4 sm:$0xff]   ;;  %v10837_v22 = vld [vmem:[%s11398_s24 + $0x1c64] ss:$16 sps:$4 sm:$0xff]  }
 0x3c0   : > { %7195 = vmatprep.subr.bf16.mxu0 %v10753_v42  ;;  %7851 = vmatprep.subr.bf16.mxu1 %v10756_v43  ;;  %v10840_v42 = vld [vmem:[%s11398_s24 + $0x1c6c] ss:$16 sps:$4 sm:$0xff]   ;;  %v10835_v43 = vld [vmem:[%s11398_s24 + $0x1c60] ss:$16 sps:$4 sm:$0xff]  }
 0x3c3   : > { %7196 = vmatpush1.bf16.msra.mxu0 %v10751_v45  ;;  %7852 = vmatpush1.bf16.msra.mxu1 %v10754_v46  ;;  %v10838_v45 = vld [vmem:[%s11398_s24 + $0x1c68] ss:$16 sps:$4 sm:$0xff]   ;;  %v10843_v46 = vld [vmem:[%s11398_s24 + $0x1c84] ss:$16 sps:$4 sm:$0xff]  }
 0x3c4   : > { %7197 = vmatprep.subr.bf16.mxu0 %v10759_v47  ;;  %7853 = vmatprep.subr.bf16.mxu1 %v10762_v48  ;;  %v10846_v47 = vld [vmem:[%s11398_s24 + $0x1c8c] ss:$16 sps:$4 sm:$0xff]   ;;  %v10841_v48 = vld [vmem:[%s11398_s24 + $0x1c80] ss:$16 sps:$4 sm:$0xff]  }
 0x3c7   : > { %7198 = vmatpush1.bf16.msra.mxu0 %v10757_v51  ;;  %7854 = vmatpush1.bf16.msra.mxu1 %v10760_v54  ;;  %v10844_v51 = vld [vmem:[%s11398_s24 + $0x1c88] ss:$16 sps:$4 sm:$0xff]   ;;  %v10849_v54 = vld [vmem:[%s11398_s24 + $0x1ca4] ss:$16 sps:$4 sm:$0xff]  }
 0x3c8   : > { %7199 = vmatprep.subr.bf16.mxu0 %v10765_v55  ;;  %7855 = vmatprep.subr.bf16.mxu1 %v10768_v56  ;;  %v10852_v55 = vld [vmem:[%s11398_s24 + $0x1cac] ss:$16 sps:$4 sm:$0xff]   ;;  %v10847_v56 = vld [vmem:[%s11398_s24 + $0x1ca0] ss:$16 sps:$4 sm:$0xff]  }
 0x3cb   : > { %7200 = vmatpush1.bf16.msra.mxu0 %v10763_v39  ;;  %7856 = vmatpush1.bf16.msra.mxu1 %v10766_v57  ;;  %v10850_v39 = vld [vmem:[%s11398_s24 + $0x1ca8] ss:$16 sps:$4 sm:$0xff]   ;;  %v10855_v57 = vld [vmem:[%s11398_s24 + $0x1cc4] ss:$16 sps:$4 sm:$0xff]  }
 0x3cc   : > { %7201 = vmatprep.subr.bf16.mxu0 %v10771_v58  ;;  %7857 = vmatprep.subr.bf16.mxu1 %v10774_v59  ;;  %v10858_v58 = vld [vmem:[%s11398_s24 + $0x1ccc] ss:$16 sps:$4 sm:$0xff]   ;;  %v10853_v59 = vld [vmem:[%s11398_s24 + $0x1cc0] ss:$16 sps:$4 sm:$0xff]  }
 0x3cf   : > { %7202 = vmatpush1.bf16.msra.mxu0 %v10769_v49  ;;  %7858 = vmatpush1.bf16.msra.mxu1 %v10772_v60  ;;  %v10856_v49 = vld [vmem:[%s11398_s24 + $0x1cc8] ss:$16 sps:$4 sm:$0xff]   ;;  %v10861_v60 = vld [vmem:[%s11398_s24 + $0x1ce4] ss:$16 sps:$4 sm:$0xff]  }
 0x3d0   : > { %7203 = vmatprep.subr.bf16.mxu0 %v10777_v61  ;;  %7859 = vmatprep.subr.bf16.mxu1 %v10780_v14  ;;  %v10864_v61 = vld [vmem:[%s11398_s24 + $0x1cec] ss:$16 sps:$4 sm:$0xff]   ;;  %v10859_v14 = vld [vmem:[%s11398_s24 + $0x1ce0] ss:$16 sps:$4 sm:$0xff]  }
 0x3d3   : > { %7204 = vmatpush1.bf16.msra.mxu0 %v10775_v0  ;;  %7860 = vmatpush1.bf16.msra.mxu1 %v10778_v1  ;;  %v10862_v0 = vld [vmem:[%s11398_s24 + $0x1ce8] ss:$16 sps:$4 sm:$0xff]   ;;  %v10867_v1 = vld [vmem:[%s11398_s24 + $0x1d04] ss:$16 sps:$4 sm:$0xff]  }
 0x3d4   : > { %7205 = vmatprep.subr.bf16.mxu0 %v10783_v36  ;;  %7861 = vmatprep.subr.bf16.mxu1 %v10786_v3  ;;  %v10870_v36 = vld [vmem:[%s11398_s24 + $0x1d0c] ss:$16 sps:$4 sm:$0xff]   ;;  %v10865_v3 = vld [vmem:[%s11398_s24 + $0x1d00] ss:$16 sps:$4 sm:$0xff]  }
 0x3d7   : > { %7206 = vmatpush1.bf16.msra.mxu0 %v10781_v4  ;;  %7862 = vmatpush1.bf16.msra.mxu1 %v10784_v52  ;;  %v10868_v4 = vld [vmem:[%s11398_s24 + $0x1d08] ss:$16 sps:$4 sm:$0xff]   ;;  %v10873_v52 = vld [vmem:[%s11398_s24 + $0x1d24] ss:$16 sps:$4 sm:$0xff]  }
 0x3d8   : > { %7207 = vmatprep.subr.bf16.mxu0 %v10789_v5  ;;  %7863 = vmatprep.subr.bf16.mxu1 %v10792_v6  ;;  %v10876_v5 = vld [vmem:[%s11398_s24 + $0x1d2c] ss:$16 sps:$4 sm:$0xff]   ;;  %v10871_v6 = vld [vmem:[%s11398_s24 + $0x1d20] ss:$16 sps:$4 sm:$0xff]  }
 0x3db   : > { %7208 = vmatpush1.bf16.msra.mxu0 %v10787_v62  ;;  %7864 = vmatpush1.bf16.msra.mxu1 %v10790_v8  ;;  %v10874_v62 = vld [vmem:[%s11398_s24 + $0x1d28] ss:$16 sps:$4 sm:$0xff]   ;;  %v10879_v8 = vld [vmem:[%s11398_s24 + $0x1d44] ss:$16 sps:$4 sm:$0xff]  }
 0x3dc   : > { %7209 = vmatprep.subr.bf16.mxu0 %v10795_v9  ;;  %7865 = vmatprep.subr.bf16.mxu1 %v10798_v11  ;;  %v10882_v9 = vld [vmem:[%s11398_s24 + $0x1d4c] ss:$16 sps:$4 sm:$0xff]   ;;  %v10877_v11 = vld [vmem:[%s11398_s24 + $0x1d40] ss:$16 sps:$4 sm:$0xff]  }
 0x3df   : > { %7210 = vmatpush1.bf16.msra.mxu0 %v10793_v13  ;;  %7866 = vmatpush1.bf16.msra.mxu1 %v10796_v15  ;;  %v10880_v13 = vld [vmem:[%s11398_s24 + $0x1d48] ss:$16 sps:$4 sm:$0xff]   ;;  %v10885_v15 = vld [vmem:[%s11398_s24 + $0x1d64] ss:$16 sps:$4 sm:$0xff]  }
 0x3e0   : > { %7211 = vmatprep.subr.bf16.mxu0 %v10801_v17  ;;  %7867 = vmatprep.subr.bf16.mxu1 %v10804_v2  ;;  %v10888_v17 = vld [vmem:[%s11398_s24 + $0x1d6c] ss:$16 sps:$4 sm:$0xff]   ;;  %v10883_v2 = vld [vmem:[%s11398_s24 + $0x1d60] ss:$16 sps:$4 sm:$0xff]  }
 0x3e3   : > { %7212 = vmatpush1.bf16.msra.mxu0 %v10799_v53  ;;  %7868 = vmatpush1.bf16.msra.mxu1 %v10802_v18  ;;  %v10886_v53 = vld [vmem:[%s11398_s24 + $0x1d68] ss:$16 sps:$4 sm:$0xff]   ;;  %v10891_v18 = vld [vmem:[%s11398_s24 + $0x1d84] ss:$16 sps:$4 sm:$0xff]  }
 0x3e4   : > { %7213 = vmatprep.subr.bf16.mxu0 %v10807_v19  ;;  %7869 = vmatprep.subr.bf16.mxu1 %v10810_v10  ;;  %v10894_v19 = vld [vmem:[%s11398_s24 + $0x1d8c] ss:$16 sps:$4 sm:$0xff]   ;;  %v10889_v10 = vld [vmem:[%s11398_s24 + $0x1d80] ss:$16 sps:$4 sm:$0xff]  }
 0x3e7   : > { %7214 = vmatpush1.bf16.msra.mxu0 %v10805_v21  ;;  %7870 = vmatpush1.bf16.msra.mxu1 %v10808_v63  ;;  %v10897_v21 = vld [vmem:[%s11398_s24 + $0x1da4] ss:$16 sps:$4 sm:$0xff]   ;;  %v10900_v63 = vld [vmem:[%s11398_s24 + $0x1dac] ss:$16 sps:$4 sm:$0xff]  }
 0x3e8   : > { %7215 = vmatprep.subr.bf16.mxu0 %v10813_v25  ;;  %7871 = vmatprep.subr.bf16.mxu1 %v10816_v27  ;;  %v10895_v25 = vld [vmem:[%s11398_s24 + $0x1da0] ss:$16 sps:$4 sm:$0xff]   ;;  %v10898_v27 = vld [vmem:[%s11398_s24 + $0x1da8] ss:$16 sps:$4 sm:$0xff]  }
 0x3eb   : > { %7216 = vmatpush1.bf16.msra.mxu0 %v10811_v7  ;;  %7872 = vmatpush1.bf16.msra.mxu1 %v10814_v29  ;;  %v10903_v7 = vld [vmem:[%s11398_s24 + $0x1dc4] ss:$16 sps:$4 sm:$0xff]   ;;  %v10906_v29 = vld [vmem:[%s11398_s24 + $0x1dcc] ss:$16 sps:$4 sm:$0xff]  }
 0x3ec   : > { %7226 = vmatprep.subr.bf16.mxu0 %v10819_v30  ;;  %7882 = vmatprep.subr.bf16.mxu1 %v10822_v12  ;;  %v10901_v30 = vld [vmem:[%s11398_s24 + $0x1dc0] ss:$16 sps:$4 sm:$0xff]   ;;  %v10904_v12 = vld [vmem:[%s11398_s24 + $0x1dc8] ss:$16 sps:$4 sm:$0xff]  }
 0x3ee   : > { %7218 = vmatmul.mubr.bf16.vlgmr.msra.gmra.mrb[0].mxu0 %v1496_v16  ;;  %7874 = vmatmul.mubr.bf16.vlgmr.msra.gmra.mrb[0].mxu1 %v1496_v16  ;;  %v10912_v16 = vld [vmem:[%s11398_s24 + $0x1dec] ss:$16 sps:$4 sm:$0xff]  }
 0x3ef   : > { %7227 = vmatpush1.bf16.msra.mxu0 %v10817_v32  ;;  %7883 = vmatpush1.bf16.msra.mxu1 %v10820_v23  ;;  %v10907_v32 = vld [vmem:[%s11398_s24 + $0x1de0] ss:$16 sps:$4 sm:$0xff]   ;;  %v10910_v23 = vld [vmem:[%s11398_s24 + $0x1de8] ss:$16 sps:$4 sm:$0xff]  }
 0x3f0   : > { %7228 = vmatprep.subr.bf16.mxu0 %v10825_v33  ;;  %7884 = vmatprep.subr.bf16.mxu1 %v10828_v34  ;;  %v10916_v33 = vld [vmem:[%s11398_s24 + $0x1e04] ss:$16 sps:$4 sm:$0xff]   ;;  %v10919_v34 = vld [vmem:[%s11398_s24 + $0x1e0c] ss:$16 sps:$4 sm:$0xff]  }
 0x3f1   : > { %7258 = vmatprep.mubr.bf16.mxu0 %v12487_v26  ;;  %7914 = vmatprep.mubr.bf16.mxu1 %v12487_v26 }
 0x3f3   : > { %7229 = vmatpush1.bf16.msra.mxu0 %v10823_v24  ;;  %7885 = vmatpush1.bf16.msra.mxu1 %v10826_v35  ;;  %v12553_v24 = vrot.slane %v12472_v28, %v11473_v50  ;;  %v10914_v35 = vld [vmem:[%s11398_s24 + $0x1e00] ss:$16 sps:$4 sm:$0xff]  }
 0x3f4   : > { %7230 = vmatprep.subr.bf16.mxu0 %v10831_v37  ;;  %7886 = vmatprep.subr.bf16.mxu1 %v10834_v38  ;;  %v10917_v37 = vld [vmem:[%s11398_s24 + $0x1e08] ss:$16 sps:$4 sm:$0xff]   ;;  %v10922_v38 = vld [vmem:[%s11398_s24 + $0x1e24] ss:$16 sps:$4 sm:$0xff]   ;;  %v10920_v28 = vld [vmem:[%s11398_s24 + $0x1e20] ss:$16 sps:$4 sm:$0xff]  }
 0x3f7   : > { %7231 = vmatpush1.bf16.msra.mxu0 %v10829_v40  ;;  %7887 = vmatpush1.bf16.msra.mxu1 %v10832_v41  ;;  %v10925_v40 = vld [vmem:[%s11398_s24 + $0x1e2c] ss:$16 sps:$4 sm:$0xff]   ;;  %v1499_v41 = vcombine.high %v12487_v26, %v12487_v26  ;;  %v10926_v26 = vld [vmem:[%s11398_s24 + $0x1e40] ss:$16 sps:$4 sm:$0xff]  }
 0x3f8   : > { %7232 = vmatprep.subr.bf16.mxu0 %v10837_v22  ;;  %7888 = vmatprep.subr.bf16.mxu1 %v10840_v42  ;;  %v10923_v22 = vld [vmem:[%s11398_s24 + $0x1e28] ss:$16 sps:$4 sm:$0xff]   ;;  %v10928_v42 = vld [vmem:[%s11398_s24 + $0x1e44] ss:$16 sps:$4 sm:$0xff]  }
 0x3fb   : > { %7233 = vmatpush1.bf16.msra.mxu0 %v10835_v43  ;;  %7889 = vmatpush1.bf16.msra.mxu1 %v10838_v45  ;;  %v10931_v43 = vld [vmem:[%s11398_s24 + $0x1e4c] ss:$16 sps:$4 sm:$0xff]   ;;  %v10929_v45 = vld [vmem:[%s11398_s24 + $0x1e48] ss:$16 sps:$4 sm:$0xff]  }
 0x3fc   : > { %7234 = vmatprep.subr.bf16.mxu0 %v10843_v46  ;;  %7890 = vmatprep.subr.bf16.mxu1 %v10846_v47  ;;  %v10934_v46 = vld [vmem:[%s11398_s24 + $0x1e64] ss:$16 sps:$4 sm:$0xff]   ;;  %v10937_v47 = vld [vmem:[%s11398_s24 + $0x1e6c] ss:$16 sps:$4 sm:$0xff]  }
 0x3ff   : > { %7235 = vmatpush1.bf16.msra.mxu0 %v10841_v48  ;;  %7891 = vmatpush1.bf16.msra.mxu1 %v10844_v51  ;;  %v10932_v48 = vld [vmem:[%s11398_s24 + $0x1e60] ss:$16 sps:$4 sm:$0xff]   ;;  %v10935_v51 = vld [vmem:[%s11398_s24 + $0x1e68] ss:$16 sps:$4 sm:$0xff]  }
 0x400   : > { %7236 = vmatprep.subr.bf16.mxu0 %v10849_v54  ;;  %7892 = vmatprep.subr.bf16.mxu1 %v10852_v55  ;;  %v10940_v54 = vld [vmem:[%s11398_s24 + $0x1e84] ss:$16 sps:$4 sm:$0xff]   ;;  %v10943_v55 = vld [vmem:[%s11398_s24 + $0x1e8c] ss:$16 sps:$4 sm:$0xff]  }
 0x403   : > { %7237 = vmatpush1.bf16.msra.mxu0 %v10847_v56  ;;  %7893 = vmatpush1.bf16.msra.mxu1 %v10850_v39  ;;  %v10938_v56 = vld [vmem:[%s11398_s24 + $0x1e80] ss:$16 sps:$4 sm:$0xff]   ;;  %v10941_v39 = vld [vmem:[%s11398_s24 + $0x1e88] ss:$16 sps:$4 sm:$0xff]  }
 0x404   : > { %7238 = vmatprep.subr.bf16.mxu0 %v10855_v57  ;;  %7894 = vmatprep.subr.bf16.mxu1 %v10858_v58  ;;  %v10946_v57 = vld [vmem:[%s11398_s24 + $0x1ea4] ss:$16 sps:$4 sm:$0xff]   ;;  %v10949_v58 = vld [vmem:[%s11398_s24 + $0x1eac] ss:$16 sps:$4 sm:$0xff]  }
 0x407   : > { %7239 = vmatpush1.bf16.msra.mxu0 %v10853_v59  ;;  %7895 = vmatpush1.bf16.msra.mxu1 %v10856_v49  ;;  %v10944_v59 = vld [vmem:[%s11398_s24 + $0x1ea0] ss:$16 sps:$4 sm:$0xff]   ;;  %v10947_v49 = vld [vmem:[%s11398_s24 + $0x1ea8] ss:$16 sps:$4 sm:$0xff]  }
 0x408   : > { %7240 = vmatprep.subr.bf16.mxu0 %v10861_v60  ;;  %7896 = vmatprep.subr.bf16.mxu1 %v10864_v61  ;;  %v10952_v60 = vld [vmem:[%s11398_s24 + $0x1ec4] ss:$16 sps:$4 sm:$0xff]   ;;  %v10955_v61 = vld [vmem:[%s11398_s24 + $0x1ecc] ss:$16 sps:$4 sm:$0xff]  }
 0x40b   : > { %7241 = vmatpush1.bf16.msra.mxu0 %v10859_v14  ;;  %7897 = vmatpush1.bf16.msra.mxu1 %v10862_v0  ;;  %v10950_v14 = vld [vmem:[%s11398_s24 + $0x1ec0] ss:$16 sps:$4 sm:$0xff]   ;;  %v10953_v0 = vld [vmem:[%s11398_s24 + $0x1ec8] ss:$16 sps:$4 sm:$0xff]  }
 0x40c   : > { %7242 = vmatprep.subr.bf16.mxu0 %v10867_v1  ;;  %7898 = vmatprep.subr.bf16.mxu1 %v10870_v36  ;;  %v10958_v1 = vld [vmem:[%s11398_s24 + $0x1ee4] ss:$16 sps:$4 sm:$0xff]   ;;  %v10961_v36 = vld [vmem:[%s11398_s24 + $0x1eec] ss:$16 sps:$4 sm:$0xff]  }
 0x40f   : > { %7243 = vmatpush1.bf16.msra.mxu0 %v10865_v3  ;;  %7899 = vmatpush1.bf16.msra.mxu1 %v10868_v4  ;;  %v10956_v3 = vld [vmem:[%s11398_s24 + $0x1ee0] ss:$16 sps:$4 sm:$0xff]   ;;  %v10959_v4 = vld [vmem:[%s11398_s24 + $0x1ee8] ss:$16 sps:$4 sm:$0xff]  }
 0x410   : > { %7244 = vmatprep.subr.bf16.mxu0 %v10873_v52  ;;  %7900 = vmatprep.subr.bf16.mxu1 %v10876_v5  ;;  %v10964_v52 = vld [vmem:[%s11398_s24 + $0x1f04] ss:$16 sps:$4 sm:$0xff]   ;;  %v10967_v5 = vld [vmem:[%s11398_s24 + $0x1f0c] ss:$16 sps:$4 sm:$0xff]  }
 0x413   : > { %7245 = vmatpush1.bf16.msra.mxu0 %v10871_v6  ;;  %7901 = vmatpush1.bf16.msra.mxu1 %v10874_v62  ;;  %v10962_v6 = vld [vmem:[%s11398_s24 + $0x1f00] ss:$16 sps:$4 sm:$0xff]   ;;  %v10965_v62 = vld [vmem:[%s11398_s24 + $0x1f08] ss:$16 sps:$4 sm:$0xff]  }
 0x414   : > { %7246 = vmatprep.subr.bf16.mxu0 %v10879_v8  ;;  %7902 = vmatprep.subr.bf16.mxu1 %v10882_v9  ;;  %v10970_v8 = vld [vmem:[%s11398_s24 + $0x1f24] ss:$16 sps:$4 sm:$0xff]   ;;  %v10973_v9 = vld [vmem:[%s11398_s24 + $0x1f2c] ss:$16 sps:$4 sm:$0xff]  }
 0x417   : > { %7247 = vmatpush1.bf16.msra.mxu0 %v10877_v11  ;;  %7903 = vmatpush1.bf16.msra.mxu1 %v10880_v13  ;;  %v10968_v11 = vld [vmem:[%s11398_s24 + $0x1f20] ss:$16 sps:$4 sm:$0xff]   ;;  %v10971_v13 = vld [vmem:[%s11398_s24 + $0x1f28] ss:$16 sps:$4 sm:$0xff]  }
 0x418   : > { %7248 = vmatprep.subr.bf16.mxu0 %v10885_v15  ;;  %7904 = vmatprep.subr.bf16.mxu1 %v10888_v17  ;;  %v10976_v15 = vld [vmem:[%s11398_s24 + $0x1f44] ss:$16 sps:$4 sm:$0xff]   ;;  %v10979_v17 = vld [vmem:[%s11398_s24 + $0x1f4c] ss:$16 sps:$4 sm:$0xff]  }
 0x41b   : > { %7249 = vmatpush1.bf16.msra.mxu0 %v10883_v2  ;;  %7905 = vmatpush1.bf16.msra.mxu1 %v10886_v53  ;;  %v10974_v2 = vld [vmem:[%s11398_s24 + $0x1f40] ss:$16 sps:$4 sm:$0xff]   ;;  %v10977_v53 = vld [vmem:[%s11398_s24 + $0x1f48] ss:$16 sps:$4 sm:$0xff]  }
 0x41c   : > { %7250 = vmatprep.subr.bf16.mxu0 %v10891_v18  ;;  %7906 = vmatprep.subr.bf16.mxu1 %v10894_v19  ;;  %v10982_v18 = vld [vmem:[%s11398_s24 + $0x1f64] ss:$16 sps:$4 sm:$0xff]   ;;  %v10985_v19 = vld [vmem:[%s11398_s24 + $0x1f6c] ss:$16 sps:$4 sm:$0xff]  }
 0x41f   : > { %7251 = vmatpush1.bf16.msra.mxu0 %v10889_v10  ;;  %7907 = vmatpush1.bf16.msra.mxu1 %v10892_v20  ;;  %v10980_v10 = vld [vmem:[%s11398_s24 + $0x1f60] ss:$16 sps:$4 sm:$0xff]   ;;  %v10983_v20 = vld [vmem:[%s11398_s24 + $0x1f68] ss:$16 sps:$4 sm:$0xff]  }
 0x420   : > { %7252 = vmatprep.subr.bf16.mxu0 %v10897_v21  ;;  %7908 = vmatprep.subr.bf16.mxu1 %v10900_v63  ;;  %v10988_v21 = vld [vmem:[%s11398_s24 + $0x1f84] ss:$16 sps:$4 sm:$0xff]   ;;  %v10991_v63 = vld [vmem:[%s11398_s24 + $0x1f8c] ss:$16 sps:$4 sm:$0xff]  }
 0x423   : > { %7253 = vmatpush1.bf16.msra.mxu0 %v10895_v25  ;;  %7909 = vmatpush1.bf16.msra.mxu1 %v10898_v27  ;;  %v10986_v25 = vld [vmem:[%s11398_s24 + $0x1f80] ss:$16 sps:$4 sm:$0xff]   ;;  %v10989_v27 = vld [vmem:[%s11398_s24 + $0x1f88] ss:$16 sps:$4 sm:$0xff]  }
 0x424   : > { %7254 = vmatprep.subr.bf16.mxu0 %v10903_v7  ;;  %7910 = vmatprep.subr.bf16.mxu1 %v10906_v29  ;;  %v10994_v7 = vld [vmem:[%s11398_s24 + $0x1fa4] ss:$16 sps:$4 sm:$0xff]   ;;  %v10997_v29 = vld [vmem:[%s11398_s24 + $0x1fac] ss:$16 sps:$4 sm:$0xff]  }
 0x427   : > { %7255 = vmatpush1.bf16.msra.mxu0 %v10901_v30  ;;  %7911 = vmatpush1.bf16.msra.mxu1 %v10904_v12  ;;  %v10992_v30 = vld [vmem:[%s11398_s24 + $0x1fa0] ss:$16 sps:$4 sm:$0xff]   ;;  %v10995_v12 = vld [vmem:[%s11398_s24 + $0x1fa8] ss:$16 sps:$4 sm:$0xff]  }
 0x428   : > { %7256 = vmatprep.subr.bf16.mxu0 %v10909_v31  ;;  %7912 = vmatprep.subr.bf16.mxu1 %v10912_v16  ;;  %v11000_v31 = vld [vmem:[%s11398_s24 + $0x1fc4] ss:$16 sps:$4 sm:$0xff]   ;;  %v11003_v16 = vld [vmem:[%s11398_s24 + $0x1fcc] ss:$16 sps:$4 sm:$0xff]  }
 0x42b   : > { %7257 = vmatpush1.bf16.msra.mxu0 %v10907_v32  ;;  %7913 = vmatpush1.bf16.msra.mxu1 %v10910_v23  ;;  %v10998_v32 = vld [vmem:[%s11398_s24 + $0x1fc0] ss:$16 sps:$4 sm:$0xff]   ;;  %v11001_v23 = vld [vmem:[%s11398_s24 + $0x1fc8] ss:$16 sps:$4 sm:$0xff]  }
 0x42c   : > { %7267 = vmatprep.subr.bf16.mxu0 %v10916_v33  ;;  %7923 = vmatprep.subr.bf16.mxu1 %v10919_v34  ;;  %v11006_v33 = vld [vmem:[%s11398_s24 + $0x1fe4] ss:$16 sps:$4 sm:$0xff]   ;;  %v11009_v34 = vld [vmem:[%s11398_s24 + $0x1fec] ss:$16 sps:$4 sm:$0xff]  }
 0x42e   : > { %7259 = vmatmul.mubr.bf16.vlgmr.msra.gmra.mrb[0].mxu0 %v12553_v24  ;;  %7915 = vmatmul.mubr.bf16.vlgmr.msra.gmra.mrb[0].mxu1 %v12553_v24 }
 0x42f   : > { %7268 = vmatpush1.bf16.msra.mxu0 %v10914_v35  ;;  %7924 = vmatpush1.bf16.msra.mxu1 %v10917_v37  ;;  %v11004_v35 = vld [vmem:[%s11398_s24 + $0x1fe0] ss:$16 sps:$4 sm:$0xff]   ;;  %v11007_v37 = vld [vmem:[%s11398_s24 + $0x1fe8] ss:$16 sps:$4 sm:$0xff]  }
 0x430   : > { %7269 = vmatprep.subr.bf16.mxu0 %v10922_v38  ;;  %7925 = vmatprep.subr.bf16.mxu1 %v10925_v40  ;;  %v1497_v38 = vcombine.high %v12553_v24, %v12553_v24  ;;  %v11174_v40 = vmov 1983009808  }
 0x431   : > { %7299 = vmatprep.mubr.bf16.mxu0 %v1499_v41  ;;  %7955 = vmatprep.mubr.bf16.mxu1 %v1499_v41  ;;  %v7971_v41 = vunpack.c.l.s4 %v11174_v40 }
 0x433   : > { %7270 = vmatpush1.bf16.msra.mxu0 %v10920_v28  ;;  %7926 = vmatpush1.bf16.msra.mxu1 %v10923_v22  ;;  %v7972_v28 = vunpack.c.0.s8 %v7971_v41 }
 0x434   : > { %7271 = vmatprep.subr.bf16.mxu0 %v10928_v42  ;;  %7927 = vmatprep.subr.bf16.mxu1 %v10931_v43 }
 0x435   : > { %v7975_v43 = vsub.s32 %v7972_v28, %v11465_v44 }
 0x437   : > { %7272 = vmatpush1.bf16.msra.mxu0 %v10926_v26  ;;  %7928 = vmatpush1.bf16.msra.mxu1 %v10929_v45 }
 0x438   : > { %7273 = vmatprep.subr.bf16.mxu0 %v10934_v46  ;;  %7929 = vmatprep.subr.bf16.mxu1 %v10937_v47 }
 0x43b   : > { %7274 = vmatpush1.bf16.msra.mxu0 %v10932_v48  ;;  %7930 = vmatpush1.bf16.msra.mxu1 %v10935_v51 }
 0x43c   : > { %7275 = vmatprep.subr.bf16.mxu0 %v10940_v54  ;;  %7931 = vmatprep.subr.bf16.mxu1 %v10943_v55 }
 0x43f   : > { %7276 = vmatpush1.bf16.msra.mxu0 %v10938_v56  ;;  %7932 = vmatpush1.bf16.msra.mxu1 %v10941_v39  ;;  %v271_v39 = vld [vmem:[#allocation2] sm:$0xff] }
 0x440   : > { %7277 = vmatprep.subr.bf16.mxu0 %v10946_v57  ;;  %7933 = vmatprep.subr.bf16.mxu1 %v10949_v58 }
 0x443   : > { %7278 = vmatpush1.bf16.msra.mxu0 %v10944_v59  ;;  %7934 = vmatpush1.bf16.msra.mxu1 %v10947_v49  ;;  %v7993_v59 = vld [vmem:[%s223_s15] sm:$0xf] (!%p9237_p12)  ;;  %v7997_v49 = vsub.s32 (!%p9237_p12), 0, %v11465_v44 }
 0x444   : > { %7279 = vmatprep.subr.bf16.mxu0 %v10952_v60  ;;  %7935 = vmatprep.subr.bf16.mxu1 %v10955_v61  ;;  %v8001_v60 = vsub.s32 (!%p9237_p12), 1, %v11465_v44  ;;  %v8005_v61 = vsub.s32 (!%p9237_p12), 2, %v11465_v44 }
 0x447   : > { %7280 = vmatpush1.bf16.msra.mxu0 %v10950_v14  ;;  %7936 = vmatpush1.bf16.msra.mxu1 %v10953_v0  ;;  %v8009_v14 = vsub.s32 (!%p9237_p12), 3, %v11465_v44  ;;  %v7998_v0 = vrot.slane (!%p9237_p12), %v7993_v59, %v7997_v49 }
 0x448   : > { %7281 = vmatprep.subr.bf16.mxu0 %v10958_v1  ;;  %7937 = vmatprep.subr.bf16.mxu1 %v10961_v36  ;;  %v8002_v1 = vrot.slane (!%p9237_p12), %v7993_v59, %v8001_v60  ;;  %v8006_v36 = vrot.slane (!%p9237_p12), %v7993_v59, %v8005_v61 }
 0x44b   : > { %7282 = vmatpush1.bf16.msra.mxu0 %v10956_v3  ;;  %7938 = vmatpush1.bf16.msra.mxu1 %v10959_v4  ;;  %v8010_v3 = vrot.slane (!%p9237_p12), %v7993_v59, %v8009_v14  ;;  %v8011_v4 = vcombine.low (!%p9237_p12), %v7998_v0, %v8002_v1 }
 0x44c   : > { %7283 = vmatprep.subr.bf16.mxu0 %v10964_v52  ;;  %7939 = vmatprep.subr.bf16.mxu1 %v10967_v5 }
 0x44d   : > { %v8012_v52 = vcombine.low (!%p9237_p12), %v8006_v36, %v8010_v3  ;;  %v8019_v5 = vrot.slane (!%p9237_p12), %v8011_v4, %v7975_v43 }
 0x44f   : > { %7284 = vmatpush1.bf16.msra.mxu0 %v10962_v6  ;;  %7940 = vmatpush1.bf16.msra.mxu1 %v10965_v62  ;;  %v8026_v6 = vrot.slane (!%p9237_p12), %v8012_v52, %v7975_v43 }
 0x450   : > { %7285 = vmatprep.subr.bf16.mxu0 %v10970_v8  ;;  %7941 = vmatprep.subr.bf16.mxu1 %v10973_v9 }
 0x451   : > { %v8027_v8 = vcombine.low (!%p9237_p12), %v8019_v5, %v8026_v6 }
 0x453   : > { %7286 = vmatpush1.bf16.msra.mxu0 %v10968_v11  ;;  %7942 = vmatpush1.bf16.msra.mxu1 %v10971_v13 }
 0x454   : > { %7287 = vmatprep.subr.bf16.mxu0 %v10976_v15  ;;  %7943 = vmatprep.subr.bf16.mxu1 %v10979_v17 }
 0x457   : > { %7288 = vmatpush1.bf16.msra.mxu0 %v10974_v2  ;;  %7944 = vmatpush1.bf16.msra.mxu1 %v10977_v53 }
 0x458   : > { %7289 = vmatprep.subr.bf16.mxu0 %v10982_v18  ;;  %7945 = vmatprep.subr.bf16.mxu1 %v10985_v19 }
 0x45b   : > { %7290 = vmatpush1.bf16.msra.mxu0 %v10980_v10  ;;  %7946 = vmatpush1.bf16.msra.mxu1 %v10983_v20 }
 0x45c   : > { %7291 = vmatprep.subr.bf16.mxu0 %v10988_v21  ;;  %7947 = vmatprep.subr.bf16.mxu1 %v10991_v63 }
 0x45f   : > { %7292 = vmatpush1.bf16.msra.mxu0 %v10986_v25  ;;  %7948 = vmatpush1.bf16.msra.mxu1 %v10989_v27 }
 0x460   : > { %7293 = vmatprep.subr.bf16.mxu0 %v10994_v7  ;;  %7949 = vmatprep.subr.bf16.mxu1 %v10997_v29 }
 0x463   : > { %7294 = vmatpush1.bf16.msra.mxu0 %v10992_v30  ;;  %7950 = vmatpush1.bf16.msra.mxu1 %v10995_v12 }
 0x464   : > { %7295 = vmatprep.subr.bf16.mxu0 %v11000_v31  ;;  %7951 = vmatprep.subr.bf16.mxu1 %v11003_v16 }
 0x467   : > { %7296 = vmatpush1.bf16.msra.mxu0 %v10998_v32  ;;  %7952 = vmatpush1.bf16.msra.mxu1 %v11001_v23 }
 0x468   : > { %7297 = vmatprep.subr.bf16.mxu0 %v11006_v33  ;;  %7953 = vmatprep.subr.bf16.mxu1 %v11009_v34 }
 0x46b   : > { %7298 = vmatpush1.bf16.msra.mxu0 %v11004_v35  ;;  %7954 = vmatpush1.bf16.msra.mxu1 %v11007_v37 }
 0x46e   : > { %7300 = vmatmul.mubr.bf16.vlgmr.msra.gmra.mrb[0].mxu0 %v1497_v38  ;;  %7956 = vmatmul.mubr.bf16.vlgmr.msra.gmra.mrb[0].mxu1 %v1497_v38 }
 0x541   : > { %v7301_v22 = vpop.f32.mrb[0].mxu0  ;;  %v7957_v42 = vpop.f32.mrb[0].mxu1 }
 0x542   : > { %v7303_v26 = vpop.f32.mrb[1].mxu0  ;;  %v7959_v45 = vpop.f32.mrb[1].mxu1 }
 0x543   : > { %v7968_v46 = vcombine.low %v7301_v22, %v7303_v26  ;;  %v7969_v47 = vcombine.low %v7957_v42, %v7959_v45  ;;  %v7305_v48 = vpop.f32.mrb[2].mxu0  ;;  %v7961_v51 = vpop.f32.mrb[2].mxu1 }
 0x544   : > { %v7306_v54 = vpop.f32.mrb[3].mxu0  ;;  %v7962_v55 = vpop.f32.mrb[3].mxu1 }
 0x545   : > { %v7976_v24 = vrot.slane %v7968_v46, %v7975_v43  ;;  %v7983_v56 = vrot.slane %v7969_v47, %v7975_v43  ;;  %7991 = sbr.rel (%p9237_p12) target bundleno = 1380 (0x564), region = 48 }
 0x547   : > { %v7984_v57 = vcombine.low %v7976_v24, %v7983_v56 }
 0x549   : > { %v7986_v58 = vadd.f32 %v7984_v57, %v271_v39 }
 0x54b   : > { %7987 = vst [vmem:[#allocation2] sm:$0xff] %v7986_v58 }
 0x552   : > { %v7992_v62 = vld [vmem:[#allocation2] sm:$0xff] }
 0x553   : > { %v8029_v9 = vadd.f32 %v8027_v8, %v7992_v62 }
 0x555   : > { %v8030_v11 = vmax.f32 %v8029_v9, 0.0 }
 0x557   : > { %v8032_v13 = vcombine.high %v8030_v11, %v8030_v11  ;;  %v8039_v15 = vrot.slane %v8030_v11, %v7975_v43 }
 0x559   : > { %v8046_v17 = vrot.slane %v8032_v13, %v7975_v43  ;;  %v8047_v2 = vcombine.high %v8039_v15, %v8039_v15 }
 0x55b   : > { %v8048_v53 = vcombine.high %v8046_v17, %v8046_v17  ;;  %v9238_v18 = vpack.c.bf16 %v8047_v2, %v8039_v15 }
 0x55d   : > { %v9239_v44 = vpack.c.bf16 %v8048_v53, %v8046_v17  ;;  %v8069_v19 = vrot.slane %v9238_v18, %v11473_v50 }
 0x55f   : > { %v8076_v10 = vrot.slane %v9239_v44, %v11473_v50 }
 0x561   : > { %v8077_v20 = vcombine.low %v8069_v19, %v8076_v10 }
 0x563   : > { %9240 = vst.sshfl [vmem:[%s264_s8] sm:$0x55 pattern:$0x73625140] %v8077_v20 }
 0x564 PF: > { %s19_s22 = sadd.s32 1, %s11166_s22   ;;  %s12695_s18 = sld [smem:[#allocation9_spill]] }
 0x565   : > { %p16_p8 = scmp.ge.s32.totalorder %s19_s22, 10   ;;  %s12696_s20 = sld [smem:[#allocation10_spill]] }
 0x566   : > { %s12697_s11 = sld [smem:[#allocation11_spill]]  ;;  %s12698_s12 = smov %s11130_s13 }
 0x567   : > { %s12699_s13 = smov %s11134_s14  ;;  %s12700_s14 = smov %s11347_s23 }
 0x568   : > { %s12701_s15 = smov %s11142_s16  ;;  %s12702_s16 = smov %s11146_s17 }
 0x569   : > { %s12703_s17 = smov %s11281_s9  ;;  %s12704_s19 = smov %s11162_s21 }
 0x56a   :  { %18 = sbr.rel (!%p16_p8) target bundleno = 9 (0x9), region = 96 }
 0x56c   : > { %s12705_s21 = smov %s12697_s11 }
 0x571   :  { %8107 = vsyncpa [#allocation4], 1 }
 0x572   :  { %8109 = vsyncpa [#allocation4 + $0x1], 1 }
 0x573   :  { %8110 = vsyncpa [#allocation6], 1 }
 0x574   :  { %8112 = vsyncpa [#allocation6 + $0x1], 1 }

// kernel: cifarnet4_forward.3
= control target key start
LH: loop header
LB: loop body
LE: loop exit
PB: predicated region body
PF: predicated region fallthrough
CT: control target
= control target key end

     0   :  { %12 = vsyncpa [#allocation4], 0  ;;  %s16212_s0 = inlined_call_operand.vmem [shape: f32[2,8,1024], index: 0, kind: input, shape index: {}]   ;;  %s16213_s1 = inlined_call_operand.vmem [shape: f32[9,16,8], index: 1, kind: input, shape index: {}]   ;;  %s16214_s2 = inlined_call_operand.vmem [shape: f32[16,1], index: 2, kind: input, shape index: {}]   ;;  %s16215_s3 = inlined_call_operand.hbm [shape: f32[9,16,16], index: 3, kind: input, shape index: {}]   ;;  %s16216_s4 = inlined_call_operand.vmem [shape: f32[16,1], index: 4, kind: input, shape index: {}]   ;;  %s16217_s5 = inlined_call_operand.hbm [shape: f32[9,16,16], index: 5, kind: input, shape index: {}]   ;;  %s16218_s6 = inlined_call_operand.vmem [shape: f32[16,1], index: 6, kind: input, shape index: {}]   ;;  %s16219_s7 = inlined_call_operand.vmem [shape: bf16[2,16,1024], index: 7, kind: output, shape index: {}]  }
   0x1   :  { %13 = vsyncpa [#allocation6], 0  ;;  %s13623_s24 = smov 0  }
   0x2 LB: > { %s13629_s25 = sadd.s32 4294967295, %s13567_s24   ;;  %p11463_p0 = scmp.ge.s32.totalorder %s13567_s24, 1  ;;  %s13567_s24 = sphi %s13623_s24, %s19_s24  }
   0x3   : > { %p202_p1 = scmp.lt.s32.totalorder %s13567_s24, 3  ;;  %s13569_s26 = smov [#allocation3]  }
   0x4   : > { %s220_s27 = sshll.u32 %s13569_s26, 4  ;;  %p16220_p3 = scmp.eq.s32.totalorder %s13629_s25, 0  ;;  %s221_s27 = int_to_ptr.vmem [resolvable:$true] %s220_s27 }
   0x5   : > { %p13633_p2 = pnand %p11463_p0, %p202_p1  ;;  %s13570_s29 = smov [#allocation5]  }
   0x6   : > { %s236_s30 = sshll.u32 %s13570_s29, 4  ;;  %s13497_s11 = scalar_lea.hbm %s16215_s3, 2304  ;;  %s13646_s30 = int_to_ptr.vmem [resolvable:$true] %s236_s30 }
   0x7   : > { %s16285_s28 = scalar_select %p13633_p2, 1, 0 }
   0x8   : > { %p12742_p4 = pneg %p13633_p2  ;;  %p13498_p6 = scmp.ne.s32.totalorder %s16215_s3, %s13497_s11 }
   0x9   : > { %p13504_p10 = scmp.lt.u32.totalorder %s13497_s11, %s16215_s3 }
   0xa   : > { %p13642_p5 = pnand %p16220_p3, %p12742_p4 }
   0xc   : > { %p13499_p7 = pneg %p13642_p5 }
   0xe   : > { %p13500_p8 = pnand %p13499_p7, %p13498_p6 }
  0x10   : > { %p13501_p9 = pneg %p13500_p8 }
  0x12   : > { %p13506_p11 = pnand %p13504_p10, %p13501_p9 }
  0x14   : > { %13509 = shalt.err (!%p13506_p11)
}
  0x15   : > { %s13510_s16 = scalar_lea.vmem %s221_s27, 2304  ;;  %p13518_p1 = scmp.lt.s32.totalorder %s221_s27, %s221_s27 }
  0x16   : > { %p13511_p12 = scmp.ne.s32.totalorder %s221_s27, %s13510_s16  ;;  %p13519_p4 = scmp.lt.s32.totalorder %s13510_s16, %s13510_s16 }
  0x18   : > { %p13513_p13 = pnand %p13511_p12, %p13499_p7  ;;  %p13520_p3 = por %p13519_p4, %p13518_p1 }
  0x1a   : > { %p13514_p0 = pneg %p13513_p13 }
  0x1c   : > { %p13521_p2 = pnand %p13520_p3, %p13514_p0 }
  0x1e   : > { %13524 = shalt.err (!%p13521_p2)
}
  0x1f   : > { %s13571_s17 = smov 128   ;;  %s13572_s18 = smov 8  }
  0x20   : > { %12745 = dma.hbm_to_vmem [thread:$0]  (!%p13642_p5), %s16215_s3, 2304, %s221_s27, [#allocation4], %s13571_s17, %s13571_s17, %s13572_s18  }
  0x21   : > { %s13525_s23 = scalar_lea.hbm %s16217_s5, 2304 }
  0x22   : > { %p13526_p6 = scmp.ne.s32.totalorder %s16217_s5, %s13525_s23  ;;  %p13532_p8 = scmp.lt.u32.totalorder %s13525_s23, %s16217_s5 }
  0x24   : > { %p13528_p2 = pnand %p13526_p6, %p13499_p7 }
  0x26   : > { %p13529_p3 = pneg %p13528_p2 }
  0x28   : > { %p13534_p9 = pnand %p13532_p8, %p13529_p3 }
  0x2a   : > { %13537 = shalt.err (!%p13534_p9)
}
  0x2b   : > { %s13538_s27 = scalar_lea.vmem %s13646_s30, 2304  ;;  %p13546_p13 = scmp.lt.s32.totalorder %s13646_s30, %s13646_s30 }
  0x2c   : > { %p13539_p10 = scmp.ne.s32.totalorder %s13646_s30, %s13538_s27  ;;  %p13547_p0 = scmp.lt.s32.totalorder %s13538_s27, %s13538_s27 }
  0x2e   : > { %p13541_p11 = pnand %p13539_p10, %p13499_p7  ;;  %p13548_p1 = por %p13547_p0, %p13546_p13 }
  0x30   : > { %p13542_p12 = pneg %p13541_p11 }
  0x32   : > { %p13549_p4 = pnand %p13548_p1, %p13542_p12 }
  0x34   : > { %13552 = shalt.err (!%p13549_p4)
}
  0x35   : > { %12748 = dma.hbm_to_vmem [thread:$0]  (!%p13642_p5), %s16217_s5, 2304, %s13646_s30, [#allocation6], %s13571_s17, %s13571_s17, %s13572_s18  }
  0x36   : > { %p16287_p6 = scmp.ne.s32.totalorder %s16285_s28, 0 }
  0x38   : > { %263 = sbr.rel (%p16287_p6) target bundleno = 1563 (0x61b), region = 48 }
  0x3f   : > { %p16288_p2 = scmp.eq.s32.totalorder %s13629_s25, 0 }
  0x41   : > { %13558 = dma.done.wait (%p16288_p2), [#allocation4], 2304   ;;  %p16289_p7 = pmov %p16288_p2 }
  0x42   : > { %p16290_p3 = pmov %p16288_p2 }
  0x43   : > { %13560 = vsyncadd (%p16289_p7), [#allocation4], 4294964992 }
  0x44   : > { %13562 = dma.done.wait (%p16290_p3), [#allocation6], 2304   ;;  %p16291_p8 = pmov %p16288_p2 }
  0x45   : > { %p299_p9 = scmp.lt.s32.totalorder %s13629_s25, 1  ;;  %v16248_v0 = vmov 0.0   ;;  %s13574_s30 = smov 32   ;;  %v313_v10 = vlaneseq  ;;  %vm16223_vm0 = vcmask 261120   ;;  %v11474_v19 = vld [vmem:[%s16213_s1 + $0x10] sm:$0xff]  ;;  %vm16224_vm1 = vcmask 64512  }
  0x46   : > { %13564 = vsyncadd (%p16291_p8), [#allocation6], 4294964992  ;;  %532 = vrot.lane.b32.xlu0 %v16248_v0, %s13574_s30  ;;  %638 = vmatprep.mubr.f32.mxu0 %v16248_v0  ;;  %s13575_s15 = smov 33   ;;  %s13576_s16 = smov 31   ;;  %v11475_v26 = vld [vmem:[%s16213_s1 + $0x18] sm:$0xff]  ;;  %vm16222_vm2 = vcmask 269312  }
  0x47   : > { %s16796_s25 = smov (!%p299_p9, %s13629_s25), 1  ;;  %715 = vmatprep.mubr.f32.mxu1 %v16248_v0  ;;  %s13577_s17 = smov 1   ;;  %v13855_v13 = vand.u32 127, %v313_v10  ;;  %v527_v49 = vld [vmem:[%s16213_s1] sm:$0xff]  ;;  %v528_v58 = vld [vmem:[%s16213_s1 + $0x8] sm:$0xff]  ;;  %vm16225_vm11 = vcmask 252928  }
  0x48   : > { %s11956_s28 = sshll.u32 %s16796_s25, 6  ;;  %s13578_s18 = smov 127   ;;  %v3811_v10 = vld [vmem:[%s16214_s2] sm:$0xff] }
  0x49   : > { %s303_s14 = scalar_lea.vmem %s16212_s0, %s11956_s28  ;;  %s13579_s19 = smov 97   ;;  %v13865_v21 = vadd.s32 128, %v13855_v13  ;;  %v13882_v28 = vadd.s32 384, %v13855_v13  ;;  %v13888_v31 = vadd.s32 256, %v13855_v13  ;;  %v326_v41 = vand.u32 31, %v13855_v13 }
  0x4a   : > { %v13719_v1 = vld [vmem:[%s303_s14 + $0x10] sm:$0xff]  ;;  %v13721_v2 = vld [vmem:[%s303_s14] sm:$0xff]  ;;  %v13727_v3 = vld [vmem:[%s303_s14 + $0x18] sm:$0xff]  ;;  %s13580_s20 = smov 96   ;;  %s13581_s29 = smov 95   ;;  %v13924_v42 = vadd.s32 640, %v13855_v13 }
  0x4b   : > { %538 = vrot.lane.b32.xlu1 %v13719_v1, %s13574_s30  ;;  %534 = vrot.lane.b32.xlu0 %v13721_v2, %s13574_s30  ;;  %v13729_v4 = vld [vmem:[%s303_s14 + $0x8] sm:$0xff]  ;;  %v13735_v5 = vld [vmem:[%s303_s14 + $0x20] sm:$0xff]  ;;  %v333_v27 = vand.u32 31, %v13865_v21  ;;  %v347_v35 = vand.u32 31, %v13882_v28  ;;  %v340_v38 = vand.u32 31, %v13888_v31  ;;  %v13936_v46 = vadd.s32 512, %v13855_v13 }
  0x4c   : > { %v13737_v6 = vld [vmem:[%s303_s14 + $0x28] sm:$0xff]  ;;  %v13743_v7 = vld [vmem:[%s303_s14 + $0x30] sm:$0xff]  ;;  %v13745_v8 = vld [vmem:[%s303_s14 + $0x38] sm:$0xff]  ;;  %vm13953_vm6 = vcmp.ne.s32.totalorder %v326_v41, 0  ;;  %v361_v51 = vand.u32 31, %v13924_v42  ;;  %v13960_v52 = vadd.s32 896, %v13855_v13 }
  0x4d   : > { %vm13898_vm3 = vcmp.ne.s32.totalorder %v333_v27, 0  ;;  %vm13917_vm4 = vcmp.ne.s32.totalorder %v347_v35, 0  ;;  %vm13930_vm5 = vcmp.ne.s32.totalorder %v340_v38, 0  ;;  %v354_v55 = vand.u32 31, %v13936_v46  ;;  %v11501_v42 = vld [vmem:[%s16213_s1 + $0x28] sm:$0xff] }
  0x4e   : > { %v13966_v56 = vadd.s32 768, %v13855_v13  ;;  %vm13980_vm7 = vcmp.ne.s32.totalorder %v361_v51, 0  ;;  %v375_v60 = vand.u32 31, %v13960_v52  ;;  %vm14032_vm12 = vcmp.ne.s32.totalorder %v333_v27, 31 }
  0x4f   : > { %540 = vrot.lane.b32.xlu1 %v13727_v3, %s13574_s30  ;;  %536 = vrot.lane.b32.xlu0 %v13729_v4, %s13574_s30  ;;  %vm13988_vm8 = vcmp.ne.s32.totalorder %v354_v55, 0  ;;  %vm14045_vm13 = vcmp.ne.s32.totalorder %v326_v41, 31  ;;  %v16310_v21 = vmov 0  ;;  %vm14051_vm14 = vcmp.ne.s32.totalorder %v347_v35, 31 }
  0x50   : > { %vm14012_vm9 = vcmp.ne.s32.totalorder %v375_v60, 0  ;;  %v16311_v21 = vsel %vm14045_vm13, 4294967295, %v16310_v21  ;;  %v16312_v27 = vmov 0  ;;  %vm14058_vm15 = vcmp.ne.s32.totalorder %v340_v38, 31 }
  0x51   : > { %v16313_v27 = vsel %vm14051_vm14, 4294967295, %v16312_v27  ;;  %v16316_v35 = vmov 0  ;;  %v16318_v38 = vmov 0 }
  0x53   : > { %542 = vrot.lane.b32.xlu1 %v13735_v5, %s13574_s30  ;;  %544 = vrot.lane.b32.xlu0 %v13737_v6, %s13574_s30 }
  0x57   : > { %546 = vrot.lane.b32.xlu1 %v13743_v7, %s13574_s30  ;;  %548 = vrot.lane.b32.xlu0 %v13745_v8, %s13574_s30 }
  0x5b   : > { %486 = vrot.lane.b32.xlu1 %v13721_v2, %s13575_s15  ;;  %488 = vrot.lane.b32.xlu0 %v13729_v4, %s13575_s15 }
  0x5f   : > { %490 = vrot.lane.b32.xlu1 %v13719_v1, %s13575_s15  ;;  %492 = vrot.lane.b32.xlu0 %v13727_v3, %s13575_s15 }
  0x63   : > { %484 = vrot.lane.b32.xlu1 %v16248_v0, %s13575_s15  ;;  %494 = vrot.lane.b32.xlu0 %v13735_v5, %s13575_s15 }
  0x67   : > { %496 = vrot.lane.b32.xlu1 %v13737_v6, %s13575_s15  ;;  %498 = vrot.lane.b32.xlu0 %v13743_v7, %s13575_s15 }
  0x6b   : > { %500 = vrot.lane.b32.xlu1 %v13745_v8, %s13575_s15  ;;  %1214 = vrot.lane.b32.xlu0 %v13721_v2, %s13576_s16 }
  0x6f   : > { %1216 = vrot.lane.b32.xlu1 %v13729_v4, %s13576_s16  ;;  %1218 = vrot.lane.b32.xlu0 %v13719_v1, %s13576_s16 }
  0x73   : > { %1220 = vrot.lane.b32.xlu1 %v13727_v3, %s13576_s16  ;;  %1212 = vrot.lane.b32.xlu0 %v16248_v0, %s13576_s16 }
  0x77   : > { %1222 = vrot.lane.b32.xlu1 %v13735_v5, %s13576_s16  ;;  %1224 = vrot.lane.b32.xlu0 %v13737_v6, %s13576_s16 }
  0x7b   : > { %1226 = vrot.lane.b32.xlu1 %v13743_v7, %s13576_s16  ;;  %1228 = vrot.lane.b32.xlu0 %v13745_v8, %s13576_s16 }
  0x7f   : > { %1590 = vrot.lane.b32.xlu1 %v13721_v2, %s13577_s17  ;;  %1592 = vrot.lane.b32.xlu0 %v13729_v4, %s13577_s17 }
  0x83   : > { %1594 = vrot.lane.b32.xlu1 %v13719_v1, %s13577_s17  ;;  %1596 = vrot.lane.b32.xlu0 %v13727_v3, %s13577_s17 }
  0x87   : > { %1588 = vrot.lane.b32.xlu1 %v16248_v0, %s13577_s17  ;;  %1598 = vrot.lane.b32.xlu0 %v13735_v5, %s13577_s17 }
  0x8b   : > { %1600 = vrot.lane.b32.xlu1 %v13737_v6, %s13577_s17  ;;  %1602 = vrot.lane.b32.xlu0 %v13743_v7, %s13577_s17 }
  0x8f   : > { %1604 = vrot.lane.b32.xlu1 %v13745_v8, %s13577_s17  ;;  %2317 = vrot.lane.b32.xlu0 %v13729_v4, %s13578_s18 }
  0x93   : > { %2319 = vrot.lane.b32.xlu1 %v13719_v1, %s13578_s18  ;;  %2321 = vrot.lane.b32.xlu0 %v13727_v3, %s13578_s18 }
  0x97   : > { %2323 = vrot.lane.b32.xlu1 %v13735_v5, %s13578_s18  ;;  %2315 = vrot.lane.b32.xlu0 %v13721_v2, %s13578_s18 }
  0x9b   : > { %2325 = vrot.lane.b32.xlu1 %v13737_v6, %s13578_s18  ;;  %2327 = vrot.lane.b32.xlu0 %v13743_v7, %s13578_s18 }
  0x9f   : > { %2329 = vrot.lane.b32.xlu1 %v13745_v8, %s13578_s18  ;;  %2331 = vrot.lane.b32.xlu0 %v16248_v0, %s13578_s18 }
  0xa3   : > { %2693 = vrot.lane.b32.xlu1 %v13729_v4, %s13579_s19  ;;  %2695 = vrot.lane.b32.xlu0 %v13719_v1, %s13579_s19 }
  0xa7   : > { %2697 = vrot.lane.b32.xlu1 %v13727_v3, %s13579_s19  ;;  %2699 = vrot.lane.b32.xlu0 %v13735_v5, %s13579_s19 }
  0xab   : > { %2691 = vrot.lane.b32.xlu1 %v13721_v2, %s13579_s19  ;;  %2701 = vrot.lane.b32.xlu0 %v13737_v6, %s13579_s19 }
  0xaf   : > { %2703 = vrot.lane.b32.xlu1 %v13743_v7, %s13579_s19  ;;  %2705 = vrot.lane.b32.xlu0 %v13745_v8, %s13579_s19 }
  0xb3   : > { %2707 = vrot.lane.b32.xlu1 %v16248_v0, %s13579_s19  ;;  %3072 = vrot.lane.b32.xlu0 %v13729_v4, %s13580_s20 }
  0xb7   : > { %3074 = vrot.lane.b32.xlu1 %v13719_v1, %s13580_s20  ;;  %3076 = vrot.lane.b32.xlu0 %v13727_v3, %s13580_s20 }
  0xb8   : > { %v533_v9 = vpop.permute.xlu0 %532 }
  0xbb   : > { %3078 = vrot.lane.b32.xlu1 %v13735_v5, %s13580_s20  ;;  %3070 = vrot.lane.b32.xlu0 %v13721_v2, %s13580_s20 }
  0xbd   : > { %v539_v11 = vpop.permute.xlu1 %538  ;;  %v535_v12 = vpop.permute.xlu0 %534 }
  0xbe   : > { %v551_v20 = vsel %vm16223_vm0, %v533_v9, %v535_v12  ;;  %v368_v9 = vand.u32 31, %v13966_v56 }
  0xbf   : > { %3080 = vrot.lane.b32.xlu1 %v13737_v6, %s13580_s20  ;;  %3082 = vrot.lane.b32.xlu0 %v13743_v7, %s13580_s20 }
  0xc0   : > { %vm14019_vm10 = vcmp.ne.s32.totalorder %v368_v9, 0 }
  0xc1   : > { %v541_v14 = vpop.permute.xlu1 %540  ;;  %v537_v15 = vpop.permute.xlu0 %536 }
  0xc2   : > { %v554_v16 = vsel %vm16223_vm0, %v539_v11, %v541_v14  ;;  %v552_v17 = vsel %vm16223_vm0, %v535_v12, %v537_v15  ;;  %v553_v18 = vsel %vm16223_vm0, %v537_v15, %v539_v11  ;;  %v13582_v12 = vmov 0   ;;  %v3812_v15 = vld [vmem:[%s16214_s2 + $0x8] sm:$0xff] }
  0xc3   : > { %651 = vmatprep.subr.mxu1 %v554_v16  ;;  %574 = vmatprep.subr.mxu0 %v552_v17 }
  0xc4   : > { %575 = vmatpush1.msra.mxu0 %v551_v20  ;;  %652 = vmatpush1.msra.mxu1 %v553_v18 }
  0xc5   : > { %v543_v22 = vpop.permute.xlu1 %542  ;;  %v545_v23 = vpop.permute.xlu0 %544  ;;  %3084 = vrot.lane.b32.xlu1 %v13745_v8, %s13580_s20  ;;  %11476 = vmatmul.mubr.msk.f32.vlgmr.msra.gmra.mrb[0].mxu0 %vm16224_vm1, %v11474_v19 }
  0xc6   : > { %v556_v24 = vsel %vm16223_vm0, %v543_v22, %v545_v23  ;;  %v555_v25 = vsel %vm16223_vm0, %v541_v14, %v543_v22  ;;  %3086 = vrot.lane.b32.xlu0 %v16248_v0, %s13580_s20  ;;  %11478 = vmatmul.mubr.msk.f32.vlgmr.msra.gmra.mrb[0].mxu1 %vm16224_vm1, %v11474_v19 }
  0xc7   : > { %728 = vmatprep.subr.mxu0 %v556_v24  ;;  %644 = vmatprep.mubr.f32.mxu0 %v16248_v0 }
  0xc8   : > { %729 = vmatpush1.msra.mxu0 %v555_v25  ;;  %721 = vmatprep.mubr.f32.mxu1 %v16248_v0 }
  0xc9   : > { %v547_v29 = vpop.permute.xlu1 %546  ;;  %v549_v30 = vpop.permute.xlu0 %548  ;;  %3437 = vrot.lane.b32.xlu1 %v13729_v4, %s13581_s29  ;;  %11477 = vmatmul.mubr.msk.f32.gmra.mrb[2].mxu0 %vm16224_vm1, %v11475_v26 }
  0xca   : > { %v558_v32 = vsel %vm16223_vm0, %v547_v29, %v549_v30  ;;  %v557_v33 = vsel %vm16223_vm0, %v545_v23, %v547_v29  ;;  %3439 = vrot.lane.b32.xlu0 %v13719_v1, %s13581_s29  ;;  %11479 = vmatmul.mubr.msk.f32.gmra.mrb[2].mxu1 %vm16224_vm1, %v11475_v26  ;;  %v16308_v23 = vmov 0  ;;  %vm14086_vm0 = vcmp.ne.s32.totalorder %v354_v55, 31 }
  0xcb   : > { %805 = vmatprep.subr.mxu1 %v558_v32  ;;  %792 = vmatprep.mubr.f32.mxu0 %v16248_v0  ;;  %v16309_v23 = vsel %vm14032_vm12, 4294967295, %v16308_v23  ;;  %v16314_v32 = vmov 0  ;;  %v16319_v38 = vsel %vm14086_vm0, 4294967295, %v16318_v38 }
  0xcc   : > { %806 = vmatpush1.msra.mxu1 %v557_v33  ;;  %869 = vmatprep.mubr.f32.mxu1 %v16248_v0  ;;  %v16315_v32 = vsel %vm14058_vm15, 4294967295, %v16314_v32  ;;  %v11500_v33 = vld [vmem:[%s16213_s1 + $0x20] sm:$0xff] }
  0xcd   : > { %v487_v36 = vpop.permute.xlu1 %486  ;;  %v489_v37 = vpop.permute.xlu0 %488  ;;  %3441 = vrot.lane.b32.xlu1 %v13727_v3, %s13581_s29  ;;  %11480 = vmatmul.mubr.msk.f32.vlgmr.msra.gmra.mrb[4].mxu0 %vm16224_vm1, %v11474_v19 }
  0xce   : > { %v504_v39 = vsel %vm16222_vm2, %v487_v36, %v489_v37  ;;  %3443 = vrot.lane.b32.xlu0 %v13735_v5, %s13581_s29  ;;  %11482 = vmatmul.mubr.msk.f32.vlgmr.msra.gmra.mrb[4].mxu1 %vm16224_vm1, %v11474_v19  ;;  %v16306_v19 = vmov 0 }
  0xcf   : > { %11484 = vmatprep.subr.msk.mxu0 %vm13898_vm3, %v504_v39  ;;  %798 = vmatprep.mubr.f32.mxu0 %v16248_v0  ;;  %v16307_v19 = vsel %vm14019_vm10, 4294967295, %v16306_v19 }
  0xd0   : > { %875 = vmatprep.mubr.f32.mxu1 %v16248_v0  ;;  %12775 = vset.pattern.permute.xlu0 %v13582_v12 }
  0xd1   : > { %v491_v43 = vpop.permute.xlu1 %490  ;;  %v493_v44 = vpop.permute.xlu0 %492  ;;  %3435 = vrot.lane.b32.xlu1 %v13721_v2, %s13581_s29  ;;  %11481 = vmatmul.mubr.msk.f32.gmra.mrb[6].mxu0 %vm16224_vm1, %v11475_v26 }
  0xd2   : > { %v505_v47 = vsel %vm16222_vm2, %v489_v37, %v491_v43  ;;  %v506_v48 = vsel %vm16222_vm2, %v491_v43, %v493_v44  ;;  %3445 = vrot.lane.b32.xlu0 %v13737_v6, %s13581_s29  ;;  %11483 = vmatmul.mubr.msk.f32.gmra.mrb[6].mxu1 %vm16224_vm1, %v11475_v26  ;;  %v16320_v43 = vmov 0 }
  0xd3   : > { %11488 = vmatprep.subr.msk.mxu1 %vm13917_vm4, %v506_v48  ;;  %952 = vmatprep.mubr.f32.mxu0 %v16248_v0 }
  0xd4   : > { %11489 = vmatpush1.msk.msra.mxu1 %vm13930_vm5, %v505_v47  ;;  %1029 = vmatprep.mubr.f32.mxu1 %v16248_v0  ;;  %v16323_v47 = vmov 0 }
  0xd5   : > { %v485_v53 = vpop.permute.xlu1 %484  ;;  %v495_v54 = vpop.permute.xlu0 %494  ;;  %3447 = vrot.lane.b32.xlu1 %v13743_v7, %s13581_s29 }
  0xd6   : > { %v503_v57 = vsel %vm16222_vm2, %v485_v53, %v487_v36  ;;  %11490 = vmatmul.mubr.msk.f32.vlgmr.msra.gmra.mrb[0].mxu1 %vm16224_vm1, %v527_v49  ;;  %3449 = vrot.lane.b32.xlu0 %v13745_v8, %s13581_s29  ;;  %v507_v14 = vsel %vm16222_vm2, %v493_v44, %v495_v54 }
  0xd7   : > { %11485 = vmatpush1.msk.msra.mxu0 %vm13953_vm6, %v503_v57  ;;  %1035 = vmatprep.mubr.f32.mxu1 %v16248_v0 }
  0xd8   : > { %11486 = vmatmul.mubr.msk.f32.vlgmr.msra.gmra.mrb[0].mxu0 %vm16224_vm1, %v527_v49  ;;  %12776 = vset.pattern.permute.xlu1 %v13582_v12 }
  0xd9   : > { %v497_v61 = vpop.permute.xlu1 %496  ;;  %v499_v62 = vpop.permute.xlu0 %498  ;;  %3451 = vrot.lane.b32.xlu1 %v16248_v0, %s13581_s29  ;;  %958 = vmatprep.mubr.f32.mxu0 %v16248_v0 }
  0xda   : > { %v508_v11 = vsel %vm16222_vm2, %v495_v54, %v497_v61  ;;  %11491 = vmatmul.mubr.msk.f32.gmra.mrb[2].mxu1 %vm16224_vm1, %v528_v58  ;;  %3815 = vperm.xlu0 %12775, %v3811_v10   ;;  %v509_v22 = vsel %vm16222_vm2, %v497_v61, %v499_v62 }
  0xdb   : > { %11492 = vmatprep.subr.msk.mxu0 %vm13980_vm7, %v508_v11  ;;  %1183 = vmatprep.mubr.f32.mxu1 %v16248_v0 }
  0xdc   : > { %11493 = vmatpush1.msk.msra.mxu0 %vm13988_vm8, %v507_v14 }
  0xdd   : > { %v501_v17 = vpop.permute.xlu1 %500  ;;  %v1215_v18 = vpop.permute.xlu0 %1214  ;;  %11487 = vmatmul.mubr.msk.f32.gmra.mrb[2].mxu0 %vm16224_vm1, %v528_v58  ;;  %3820 = vperm.xlu1 %12776, %v3812_v15  }
  0xde   : > { %v510_v20 = vsel %vm16222_vm2, %v499_v62, %v501_v17  ;;  %1106 = vmatprep.mubr.f32.mxu0 %v16248_v0  ;;  %vm14079_vm2 = vcmp.ne.s32.totalorder %v361_v51, 31 }
  0xdf   : > { %11496 = vmatprep.subr.msk.mxu1 %vm14012_vm9, %v510_v20  ;;  %v16317_v35 = vsel %vm14079_vm2, 4294967295, %v16316_v35 }
  0xe0   : > { %11497 = vmatpush1.msk.msra.mxu1 %vm14019_vm10, %v509_v22 }
  0xe1   : > { %v1217_v24 = vpop.permute.xlu1 %1216  ;;  %v1219_v25 = vpop.permute.xlu0 %1218  ;;  %11494 = vmatmul.mubr.msk.f32.vlgmr.msra.gmra.mrb[4].mxu0 %vm16224_vm1, %v527_v49  ;;  %11498 = vmatmul.mubr.msk.f32.vlgmr.msra.gmra.mrb[4].mxu1 %vm16224_vm1, %v527_v49 }
  0xe2   : > { %v1232_v26 = vsel %vm16225_vm11, %v1215_v18, %v1217_v24  ;;  %1112 = vmatprep.mubr.f32.mxu0 %v16248_v0  ;;  %1189 = vmatprep.mubr.f32.mxu1 %v16248_v0  ;;  %v1233_v31 = vsel %vm16225_vm11, %v1217_v24, %v1219_v25 }
  0xe3   : > { %11502 = vmatprep.subr.msk.mxu0 %vm14032_vm12, %v1232_v26  ;;  %12778 = vrot.lane.b32.xlu1 %v16248_v0, %s13574_s30 }
  0xe5   : > { %v1221_v29 = vpop.permute.xlu1 %1220  ;;  %v1213_v30 = vpop.permute.xlu0 %1212  ;;  %11495 = vmatmul.mubr.msk.f32.gmra.mrb[6].mxu0 %vm16224_vm1, %v528_v58  ;;  %11499 = vmatmul.mubr.msk.f32.gmra.mrb[6].mxu1 %vm16224_vm1, %v528_v58  ;;  %v11518_v58 = vld [vmem:[%s16213_s1 + $0x30] sm:$0xff] }
  0xe6   : > { %v1231_v13 = vsel %vm16225_vm11, %v1213_v30, %v1215_v18  ;;  %v1234_v28 = vsel %vm16225_vm11, %v1219_v25, %v1221_v29  ;;  %1328 = vmatprep.mubr.f32.mxu0 %v16248_v0  ;;  %1405 = vmatprep.mubr.f32.mxu1 %v16248_v0 }
  0xe7   : > { %11503 = vmatpush1.msk.msra.mxu0 %vm14045_vm13, %v1231_v13  ;;  %11506 = vmatprep.subr.msk.mxu1 %vm14051_vm14, %v1234_v28  ;;  %vm16326_vm13 = vcmask 252928  }
  0xe8   : > { %11507 = vmatpush1.msk.msra.mxu1 %vm14058_vm15, %v1233_v31  ;;  %vm14111_vm15 = vcmp.ne.s32.totalorder %v368_v9, 31  ;;  %v11519_v9 = vld [vmem:[%s16213_s1 + $0x38] sm:$0xff] }
  0xe9   : > { %v1223_v36 = vpop.permute.xlu1 %1222  ;;  %v1225_v37 = vpop.permute.xlu0 %1224  ;;  %11504 = vmatmul.mubr.msk.f32.vlgmr.msra.gmra.mrb[0].mxu0 %vm16224_vm1, %v11500_v33  ;;  %11508 = vmatmul.mubr.msk.f32.vlgmr.msra.gmra.mrb[0].mxu1 %vm16224_vm1, %v11500_v33  ;;  %vm14104_vm1 = vcmp.ne.s32.totalorder %v375_v60, 31  ;;  %v16324_v47 = vsel %vm14111_vm15, 4294967295, %v16323_v47 }
  0xea   : > { %v1235_v39 = vsel %vm16225_vm11, %v1221_v29, %v1223_v36  ;;  %v1236_v41 = vsel %vm16225_vm11, %v1223_v36, %v1225_v37  ;;  %1334 = vmatprep.mubr.f32.mxu0 %v16248_v0  ;;  %1411 = vmatprep.mubr.f32.mxu1 %v16248_v0  ;;  %v16321_v43 = vsel %vm14104_vm1, 4294967295, %v16320_v43  ;;  %vm16322_vm11 = vcmask 64512   ;;  %v11546_v36 = vld [vmem:[%s16213_s1 + $0x50] sm:$0xff] }
  0xeb   : > { %11510 = vmatprep.subr.msk.mxu0 %vm14079_vm2, %v1236_v41  ;;  %vm16325_vm2 = vmmov %vm16322_vm11 }
  0xec   : > { %11511 = vmatpush1.msk.msra.mxu0 %vm14086_vm0, %v1235_v39  ;;  %vm16327_vm0 = vmmov %vm16326_vm13 }
  0xed   : > { %v1227_v44 = vpop.permute.xlu1 %1226  ;;  %v1229_v46 = vpop.permute.xlu0 %1228  ;;  %11505 = vmatmul.mubr.msk.f32.gmra.mrb[2].mxu0 %vm16322_vm11, %v11501_v42  ;;  %11509 = vmatmul.mubr.msk.f32.gmra.mrb[2].mxu1 %vm16325_vm2, %v11501_v42  ;;  %vm16236_vm11 = vcmask 7168   ;;  %vm16328_vm14 = vmmov %vm16325_vm2 }
  0xee   : > { %v1237_v48 = vsel %vm16326_vm13, %v1225_v37, %v1227_v44  ;;  %v1238_v49 = vsel %vm16327_vm0, %v1227_v44, %v1229_v46  ;;  %1482 = vmatprep.mubr.f32.mxu0 %v16248_v0  ;;  %1559 = vmatprep.mubr.f32.mxu1 %v16248_v0  ;;  %vm16329_vm0 = vmmov %vm16325_vm2  ;;  %v11547_v46 = vld [vmem:[%s16213_s1 + $0x58] sm:$0xff] }
  0xef   : > { %11514 = vmatprep.subr.msk.mxu1 %vm14104_vm1, %v1238_v49  ;;  %vm16330_vm13 = vmmov %vm16329_vm0 }
  0xf0   : > { %11515 = vmatpush1.msk.msra.mxu1 %vm14111_vm15, %v1237_v48 }
  0xf1   : > { %v1591_v51 = vpop.permute.xlu1 %1590  ;;  %v1593_v52 = vpop.permute.xlu0 %1592  ;;  %11512 = vmatmul.mubr.msk.f32.vlgmr.msra.gmra.mrb[4].mxu0 %vm16328_vm14, %v11500_v33  ;;  %11516 = vmatmul.mubr.msk.f32.vlgmr.msra.gmra.mrb[4].mxu1 %vm16325_vm2, %v11500_v33  ;;  %vm16331_vm14 = vmmov %vm16329_vm0 }
  0xf2   : > { %v1608_v53 = vsel %vm16236_vm11, %v1591_v51, %v1593_v52  ;;  %1488 = vmatprep.mubr.f32.mxu0 %v16248_v0  ;;  %1565 = vmatprep.mubr.f32.mxu1 %v16248_v0  ;;  %vm16332_vm2 = vmmov %vm16329_vm0 }
  0xf3   : > { %11520 = vmatprep.subr.msk.mxu0 %vm13898_vm3, %v1608_v53 }
  0xf5   : > { %v1595_v54 = vpop.permute.xlu1 %1594  ;;  %v1597_v55 = vpop.permute.xlu0 %1596  ;;  %11513 = vmatmul.mubr.msk.f32.gmra.mrb[6].mxu0 %vm16329_vm0, %v11501_v42  ;;  %11517 = vmatmul.mubr.msk.f32.gmra.mrb[6].mxu1 %vm16330_vm13, %v11501_v42  ;;  %vm16333_vm13 = vmmov %vm16329_vm0 }
  0xf6   : > { %v1609_v56 = vsel %vm16236_vm11, %v1593_v52, %v1595_v54  ;;  %v1610_v57 = vsel %vm16236_vm11, %v1595_v54, %v1597_v55  ;;  %1704 = vmatprep.mubr.f32.mxu0 %v16248_v0  ;;  %1781 = vmatprep.mubr.f32.mxu1 %v16248_v0 }
  0xf7   : > { %11524 = vmatprep.subr.msk.mxu1 %vm13917_vm4, %v1610_v57 }
  0xf8   : > { %11525 = vmatpush1.msk.msra.mxu1 %vm13930_vm5, %v1609_v56 }
  0xf9   : > { %v1589_v60 = vpop.permute.xlu1 %1588  ;;  %v1599_v61 = vpop.permute.xlu0 %1598  ;;  %11526 = vmatmul.mubr.msk.f32.vlgmr.msra.gmra.mrb[0].mxu1 %vm16331_vm14, %v11518_v58  ;;  %vm16334_vm14 = vmmov %vm16329_vm0 }
  0xfa   : > { %v1607_v62 = vsel %vm16236_vm11, %v1589_v60, %v1591_v51  ;;  %1787 = vmatprep.mubr.f32.mxu1 %v16248_v0  ;;  %v1611_v14 = vsel %vm16236_vm11, %v1597_v55, %v1599_v61 }
  0xfb   : > { %11521 = vmatpush1.msk.msra.mxu0 %vm13953_vm6, %v1607_v62 }
  0xfc   : > { %11522 = vmatmul.mubr.msk.f32.vlgmr.msra.gmra.mrb[0].mxu0 %vm16332_vm2, %v11518_v58  ;;  %vm16335_vm2 = vmmov %vm16329_vm0 }
  0xfd   : > { %v1601_v10 = vpop.permute.xlu1 %1600  ;;  %v1603_v11 = vpop.permute.xlu0 %1602  ;;  %1710 = vmatprep.mubr.f32.mxu0 %v16248_v0  ;;  %11527 = vmatmul.mubr.msk.f32.gmra.mrb[2].mxu1 %vm16329_vm0, %v11519_v9 }
  0xfe   : > { %v1612_v12 = vsel %vm16236_vm11, %v1599_v61, %v1601_v10  ;;  %1935 = vmatprep.mubr.f32.mxu1 %v16248_v0  ;;  %v1613_v20 = vsel %vm16236_vm11, %v1601_v10, %v1603_v11  ;;  %v11564_v61 = vld [vmem:[%s16213_s1 + $0x60] sm:$0xff] }
  0xff   : > { %11528 = vmatprep.subr.msk.mxu0 %vm13980_vm7, %v1612_v12 }
 0x100   : > { %11523 = vmatmul.mubr.msk.f32.gmra.mrb[2].mxu0 %vm16333_vm13, %v11519_v9  ;;  %vm16239_vm13 = vcmask 1039360  }
 0x101   : > { %11529 = vmatpush1.msk.msra.mxu0 %vm13988_vm8, %v1611_v14  ;;  %v1605_v15 = vpop.permute.xlu1 %1604  ;;  %1858 = vmatprep.mubr.f32.mxu0 %v16248_v0  ;;  %v2318_v17 = vpop.permute.xlu0 %2317  ;;  %v11565_v14 = vld [vmem:[%s16213_s1 + $0x68] sm:$0xff] }
 0x102   : > { %v1614_v18 = vsel %vm16236_vm11, %v1603_v11, %v1605_v15  ;;  %1973 = vmatprep.subr.mxu0 %v13729_v4  ;;  %v11536_v4 = vld [vmem:[%s16213_s1 + $0x40] sm:$0xff]  ;;  %vm16340_vm11 = vmmov %vm16329_vm0 }
 0x103   : > { %11532 = vmatprep.subr.msk.mxu1 %vm14012_vm9, %v1614_v18 }
 0x104   : > { %11530 = vmatmul.mubr.msk.f32.vlgmr.msra.gmra.mrb[4].mxu0 %vm16334_vm14, %v11518_v58  ;;  %11533 = vmatpush1.msk.msra.mxu1 %vm14019_vm10, %v1613_v20  ;;  %vm16336_vm14 = vmmov %vm16329_vm0 }
 0x105   : > { %11534 = vmatmul.mubr.msk.f32.vlgmr.msra.gmra.mrb[4].mxu1 %vm16335_vm2, %v11518_v58  ;;  %1864 = vmatprep.mubr.f32.mxu0 %v16248_v0  ;;  %v2320_v22 = vpop.permute.xlu1 %2319  ;;  %v2322_v24 = vpop.permute.xlu0 %2321  ;;  %vm16337_vm2 = vmmov %vm16329_vm0 }
 0x106   : > { %1941 = vmatprep.mubr.f32.mxu1 %v16248_v0  ;;  %1974 = vmatpush1.msra.mxu0 %v13721_v2  ;;  %v2335_v2 = vsel %vm16239_vm13, %v2318_v17, %v2320_v22 }
 0x107   : > { %2050 = vmatprep.subr.mxu1 %v13727_v3  ;;  %2127 = vmatprep.subr.mxu0 %v13737_v6 }
 0x108   : > { %11531 = vmatmul.mubr.msk.f32.gmra.mrb[6].mxu0 %vm16329_vm0, %v11519_v9  ;;  %2051 = vmatpush1.msra.mxu1 %v13719_v1  ;;  %v11537_v1 = vld [vmem:[%s16213_s1 + $0x48] sm:$0xff] }
 0x109   : > { %11535 = vmatmul.mubr.msk.f32.gmra.mrb[6].mxu1 %vm16336_vm14, %v11519_v9  ;;  %2037 = vmatprep.mubr.f32.mxu0 %v16248_v0  ;;  %v2324_v25 = vpop.permute.xlu1 %2323  ;;  %v2316_v26 = vpop.permute.xlu0 %2315  ;;  %vm16338_vm14 = vmmov %vm16329_vm0 }
 0x10a   : > { %2114 = vmatprep.mubr.f32.mxu1 %v16248_v0  ;;  %2204 = vmatprep.subr.mxu1 %v13745_v8  ;;  %v2337_v29 = vsel %vm16239_vm13, %v2322_v24, %v2324_v25  ;;  %v2334_v30 = vsel %vm16239_vm13, %v2316_v26, %v2318_v17 }
 0x10c   : > { %11538 = vmatmul.mubr.msk.f32.vlgmr.msra.gmra.mrb[0].mxu0 %vm16337_vm2, %v11536_v4  ;;  %vm16339_vm2 = vnez %v16313_v27 }
 0x10d   : > { %11540 = vmatmul.mubr.msk.f32.vlgmr.msra.gmra.mrb[0].mxu1 %vm16329_vm0, %v11536_v4  ;;  %2128 = vmatpush1.msra.mxu0 %v13735_v5  ;;  %v2326_v3 = vpop.permute.xlu1 %2325  ;;  %v2328_v6 = vpop.permute.xlu0 %2327 }
 0x10e   : > { %2043 = vmatprep.mubr.f32.mxu0 %v16248_v0  ;;  %11548 = vmatprep.subr.msk.mxu0 %vm14032_vm12, %v2335_v2  ;;  %v2339_v13 = vsel %vm16239_vm13, %v2326_v3, %v2328_v6 }
 0x10f   : > { %2120 = vmatprep.mubr.f32.mxu1 %v16248_v0  ;;  %2205 = vmatpush1.msra.mxu1 %v13743_v7  ;;  %v2336_v7 = vsel %vm16239_vm13, %v2320_v22, %v2322_v24 }
 0x110   : > { %11539 = vmatmul.mubr.msk.f32.gmra.mrb[2].mxu0 %vm16338_vm14, %v11537_v1  ;;  %11552 = vmatprep.subr.msk.mxu1 %vm16339_vm2, %v2337_v29  ;;  %vm16341_vm14 = vnez %v16311_v21  ;;  %vm16342_vm2 = vmmov %vm16329_vm0 }
 0x111   : > { %11541 = vmatmul.mubr.msk.f32.gmra.mrb[2].mxu1 %vm16329_vm0, %v11537_v1  ;;  %2191 = vmatprep.mubr.f32.mxu0 %v16248_v0  ;;  %v2330_v5 = vpop.permute.xlu1 %2329  ;;  %v2332_v8 = vpop.permute.xlu0 %2331  ;;  %vm16343_vm0 = vnez %v16315_v32  ;;  %vm16345_vm12 = vmmov %vm16342_vm2 }
 0x112   : > { %2268 = vmatprep.mubr.f32.mxu1 %v16248_v0  ;;  %v2341_v28 = vsel %vm16239_vm13, %v2330_v5, %v2332_v8  ;;  %vm16242_vm13 = vcmask 793600  }
 0x114   : > { %11542 = vmatmul.mubr.msk.f32.vlgmr.msra.gmra.mrb[4].mxu0 %vm16340_vm11, %v11536_v4  ;;  %vm16344_vm11 = vnez %v16317_v35 }
 0x115   : > { %11549 = vmatpush1.msk.msra.mxu0 %vm16341_vm14, %v2334_v30  ;;  %11544 = vmatmul.mubr.msk.f32.vlgmr.msra.gmra.mrb[4].mxu1 %vm16342_vm2, %v11536_v4  ;;  %v2694_v33 = vpop.permute.xlu1 %2693  ;;  %v2696_v31 = vpop.permute.xlu0 %2695  ;;  %v11583_v30 = vld [vmem:[%s16213_s1 + $0x78] sm:$0xff] }
 0x116   : > { %11553 = vmatpush1.msk.msra.mxu1 %vm16343_vm0, %v2336_v7  ;;  %2197 = vmatprep.mubr.f32.mxu0 %v16248_v0  ;;  %vm16346_vm0 = vcmask 1039360   ;;  %v2711_v42 = vsel %vm16242_vm13, %v2694_v33, %v2696_v31 }
 0x117   : > { %2274 = vmatprep.mubr.f32.mxu1 %v16248_v0  ;;  %11556 = vmatprep.subr.msk.mxu0 %vm16344_vm11, %v2339_v13  ;;  %v2338_v41 = vsel %vm16346_vm0, %v2324_v25, %v2326_v3  ;;  %vm16347_vm11 = vmmov %vm16342_vm2 }
 0x118   : > { %11543 = vmatmul.mubr.msk.f32.gmra.mrb[6].mxu0 %vm16345_vm12, %v11537_v1  ;;  %11560 = vmatprep.subr.msk.mxu1 %vm14104_vm1, %v2341_v28  ;;  %vm16348_vm12 = vmmov %vm16346_vm0 }
 0x119   : > { %11545 = vmatmul.mubr.msk.f32.gmra.mrb[6].mxu1 %vm16342_vm2, %v11537_v1  ;;  %2431 = vmatprep.mubr.f32.mxu0 %v16248_v0  ;;  %v2698_v37 = vpop.permute.xlu1 %2697  ;;  %v2700_v39 = vpop.permute.xlu0 %2699  ;;  %v2340_v44 = vsel %vm16348_vm12, %v2328_v6, %v2330_v5  ;;  %vm16349_vm2 = vnez %v16319_v38  ;;  %vm16350_vm1 = vmmov %vm16347_vm11  ;;  %v11582_v1 = vld [vmem:[%s16213_s1 + $0x70] sm:$0xff] }
 0x11a   : > { %2508 = vmatprep.mubr.f32.mxu1 %v16248_v0  ;;  %v2713_v51 = vsel %vm16242_vm13, %v2698_v37, %v2700_v39  ;;  %vm16351_vm0 = vmmov %vm16350_vm1  ;;  %v2712_v56 = vsel %vm16242_vm13, %v2696_v31, %v2698_v37 }
 0x11b   : > { %vm16354_vm12 = vmmov %vm16351_vm0 }
 0x11c   : > { %11550 = vmatmul.mubr.msk.f32.vlgmr.msra.gmra.mrb[0].mxu0 %vm16347_vm11, %v11546_v36  ;;  %vm16353_vm11 = vmmov %vm16351_vm0 }
 0x11d   : > { %11557 = vmatpush1.msk.msra.mxu0 %vm16349_vm2, %v2338_v41  ;;  %11554 = vmatmul.mubr.msk.f32.vlgmr.msra.gmra.mrb[0].mxu1 %vm16350_vm1, %v11546_v36  ;;  %v2692_v48 = vpop.permute.xlu1 %2691  ;;  %v2702_v49 = vpop.permute.xlu0 %2701  ;;  %vm16352_vm1 = vmmov %vm16351_vm0 }
 0x11e   : > { %11561 = vmatpush1.msk.msra.mxu1 %vm14111_vm15, %v2340_v44  ;;  %2437 = vmatprep.mubr.f32.mxu0 %v16248_v0  ;;  %v2710_v54 = vsel %vm16242_vm13, %v2692_v48, %v2694_v33  ;;  %v2714_v11 = vsel %vm16242_vm13, %v2700_v39, %v2702_v49  ;;  %v11592_v44 = vld [vmem:[%s16213_s1 + $0x80] sm:$0xff] }
 0x11f   : > { %2514 = vmatprep.mubr.f32.mxu1 %v16248_v0  ;;  %11566 = vmatprep.subr.msk.mxu0 %vm13898_vm3, %v2711_v42 }
 0x120   : > { %11551 = vmatmul.mubr.msk.f32.gmra.mrb[2].mxu0 %vm16351_vm0, %v11547_v46  ;;  %11570 = vmatprep.subr.msk.mxu1 %vm13917_vm4, %v2713_v51 }
 0x121   : > { %11555 = vmatmul.mubr.msk.f32.gmra.mrb[2].mxu1 %vm16352_vm1, %v11547_v46  ;;  %2585 = vmatprep.mubr.f32.mxu0 %v16248_v0  ;;  %v2704_v52 = vpop.permute.xlu1 %2703  ;;  %v2706_v53 = vpop.permute.xlu0 %2705  ;;  %vm16355_vm1 = vmmov %vm16351_vm0 }
 0x122   : > { %2662 = vmatprep.mubr.f32.mxu1 %v16248_v0  ;;  %v2715_v55 = vsel %vm16242_vm13, %v2702_v49, %v2704_v52  ;;  %v2716_v10 = vsel %vm16242_vm13, %v2704_v52, %v2706_v53  ;;  %v11593_v52 = vld [vmem:[%s16213_s1 + $0x88] sm:$0xff] }
 0x124   : > { %11558 = vmatmul.mubr.msk.f32.vlgmr.msra.gmra.mrb[4].mxu0 %vm16353_vm11, %v11546_v36  ;;  %vm16243_vm11 = vcmask 785408  }
 0x125   : > { %11567 = vmatpush1.msk.msra.mxu0 %vm13953_vm6, %v2710_v54  ;;  %11562 = vmatmul.mubr.msk.f32.vlgmr.msra.gmra.mrb[4].mxu1 %vm16354_vm12, %v11546_v36  ;;  %v2708_v57 = vpop.permute.xlu1 %2707  ;;  %v3073_v58 = vpop.permute.xlu0 %3072  ;;  %vm16356_vm12 = vmmov %vm16351_vm0 }
 0x126   : > { %11571 = vmatpush1.msk.msra.mxu1 %vm13930_vm5, %v2712_v56  ;;  %2591 = vmatprep.mubr.f32.mxu0 %v16248_v0  ;;  %v2717_v60 = vsel %vm16242_vm13, %v2706_v53, %v2708_v57  ;;  %vm16359_vm13 = vmmov %vm16351_vm0 }
 0x127   : > { %2668 = vmatprep.mubr.f32.mxu1 %v16248_v0  ;;  %11574 = vmatprep.subr.msk.mxu0 %vm13980_vm7, %v2715_v55 }
 0x128   : > { %11559 = vmatmul.mubr.msk.f32.gmra.mrb[6].mxu0 %vm16351_vm0, %v11547_v46  ;;  %11578 = vmatprep.subr.msk.mxu1 %vm14012_vm9, %v2717_v60 }
 0x129   : > { %11563 = vmatmul.mubr.msk.f32.gmra.mrb[6].mxu1 %vm16355_vm1, %v11547_v46  ;;  %2807 = vmatprep.mubr.f32.mxu0 %v16248_v0  ;;  %v3075_v62 = vpop.permute.xlu1 %3074  ;;  %v3077_v9 = vpop.permute.xlu0 %3076  ;;  %vm16357_vm1 = vmmov %vm16351_vm0 }
 0x12a   : > { %2884 = vmatprep.mubr.f32.mxu1 %v16248_v0  ;;  %v3090_v12 = vsel %vm16243_vm11, %v3073_v58, %v3075_v62  ;;  %v3091_v4 = vsel %vm16243_vm11, %v3075_v62, %v3077_v9 }
 0x12c   : > { %11568 = vmatmul.mubr.msk.f32.vlgmr.msra.gmra.mrb[0].mxu0 %vm16356_vm12, %v11564_v61  ;;  %vm16358_vm12 = vmmov %vm16351_vm0 }
 0x12d   : > { %11575 = vmatpush1.msk.msra.mxu0 %vm13988_vm8, %v2714_v11  ;;  %11572 = vmatmul.mubr.msk.f32.vlgmr.msra.gmra.mrb[0].mxu1 %vm16351_vm0, %v11564_v61  ;;  %v3079_v15 = vpop.permute.xlu1 %3078  ;;  %v3071_v17 = vpop.permute.xlu0 %3070 }
 0x12e   : > { %2813 = vmatprep.mubr.f32.mxu0 %v16248_v0  ;;  %11579 = vmatpush1.msk.msra.mxu1 %vm14019_vm10, %v2716_v10  ;;  %v3092_v18 = vsel %vm16243_vm11, %v3077_v9, %v3079_v15  ;;  %v3089_v24 = vsel %vm16243_vm11, %v3071_v17, %v3073_v58  ;;  %vm16366_vm10 = vmmov %vm16351_vm0 }
 0x12f   : > { %2890 = vmatprep.mubr.f32.mxu1 %v16248_v0  ;;  %3111 = vmatprep.subr.mxu0 %v3090_v12 }
 0x130   : > { %11569 = vmatmul.mubr.msk.f32.gmra.mrb[2].mxu0 %vm16357_vm1, %v11565_v14  ;;  %3188 = vmatprep.subr.mxu1 %v3092_v18  ;;  %vm16360_vm1 = vmmov %vm16351_vm0 }
 0x131   : > { %11573 = vmatmul.mubr.msk.f32.gmra.mrb[2].mxu1 %vm16358_vm12, %v11565_v14  ;;  %2961 = vmatprep.mubr.f32.mxu0 %v16248_v0  ;;  %v3081_v20 = vpop.permute.xlu1 %3080  ;;  %v3083_v22 = vpop.permute.xlu0 %3082  ;;  %vm16361_vm12 = vmmov %vm16351_vm0 }
 0x132   : > { %3038 = vmatprep.mubr.f32.mxu1 %v16248_v0  ;;  %v3094_v25 = vsel %vm16243_vm11, %v3081_v20, %v3083_v22  ;;  %v3093_v6 = vsel %vm16243_vm11, %v3079_v15, %v3081_v20 }
 0x134   : > { %11576 = vmatmul.mubr.msk.f32.vlgmr.msra.gmra.mrb[4].mxu0 %vm16351_vm0, %v11564_v61 }
 0x135   : > { %3112 = vmatpush1.msra.mxu0 %v3089_v24  ;;  %11580 = vmatmul.mubr.msk.f32.vlgmr.msra.gmra.mrb[4].mxu1 %vm16359_vm13, %v11564_v61  ;;  %vm16246_vm13 = vcmask 777216  }
 0x136   : > { %2967 = vmatprep.mubr.f32.mxu0 %v16248_v0  ;;  %3189 = vmatpush1.msra.mxu1 %v3091_v4 }
 0x137   : > { %3044 = vmatprep.mubr.f32.mxu1 %v16248_v0  ;;  %v3085_v26 = vpop.permute.xlu1 %3084  ;;  %3265 = vmatprep.subr.mxu0 %v3094_v25 }
 0x138   : > { %11577 = vmatmul.mubr.msk.f32.gmra.mrb[6].mxu0 %vm16360_vm1, %v11565_v14  ;;  %v3087_v2 = vpop.permute.xlu0 %3086  ;;  %v3095_v5 = vsel %vm16243_vm11, %v3083_v22, %v3085_v26  ;;  %vm16362_vm1 = vmmov %vm16351_vm0 }
 0x139   : > { %11581 = vmatmul.mubr.msk.f32.gmra.mrb[6].mxu1 %vm16361_vm12, %v11565_v14  ;;  %3175 = vmatprep.mubr.f32.mxu0 %v16248_v0  ;;  %v3096_v3 = vsel %vm16243_vm11, %v3085_v26, %v3087_v2  ;;  %vm16363_vm12 = vnez %v16309_v23  ;;  %vm16364_vm11 = vmmov %vm16351_vm0  ;;  %v16424_v23 = vmov 0 }
 0x13a   : > { %3252 = vmatprep.mubr.f32.mxu1 %v16248_v0  ;;  %3342 = vmatprep.subr.mxu1 %v3096_v3 }
 0x13b   : > { %v3438_v29 = vpop.permute.xlu1 %3437 }
 0x13c   : > { %11584 = vmatmul.mubr.msk.f32.vlgmr.msra.gmra.mrb[0].mxu0 %vm16351_vm0, %v11582_v1  ;;  %v3440_v8 = vpop.permute.xlu0 %3439 }
 0x13d   : > { %3266 = vmatpush1.msra.mxu0 %v3093_v6  ;;  %11586 = vmatmul.mubr.msk.f32.vlgmr.msra.gmra.mrb[0].mxu1 %vm16362_vm1, %v11582_v1  ;;  %v3455_v13 = vsel %vm16246_vm13, %v3438_v29, %v3440_v8  ;;  %vm16365_vm1 = vnez %v16313_v27 }
 0x13e   : > { %3181 = vmatprep.mubr.f32.mxu0 %v16248_v0  ;;  %3343 = vmatpush1.msra.mxu1 %v3095_v5 }
 0x13f   : > { %3258 = vmatprep.mubr.f32.mxu1 %v16248_v0  ;;  %v3442_v7 = vpop.permute.xlu1 %3441  ;;  %11594 = vmatprep.subr.msk.mxu0 %vm16363_vm12, %v3455_v13 }
 0x140   : > { %11585 = vmatmul.mubr.msk.f32.gmra.mrb[2].mxu0 %vm16351_vm0, %v11583_v30  ;;  %v3444_v28 = vpop.permute.xlu0 %3443  ;;  %v3456_v31 = vsel %vm16246_vm13, %v3440_v8, %v3442_v7 }
 0x141   : > { %11587 = vmatmul.mubr.msk.f32.gmra.mrb[2].mxu1 %vm16364_vm11, %v11583_v30  ;;  %3329 = vmatprep.mubr.f32.mxu0 %v16248_v0  ;;  %v3457_v33 = vsel %vm16246_vm13, %v3442_v7, %v3444_v28  ;;  %vm16367_vm11 = vnez %v16315_v32 }
 0x142   : > { %3406 = vmatprep.mubr.f32.mxu1 %v16248_v0  ;;  %11598 = vmatprep.subr.msk.mxu1 %vm16365_vm1, %v3457_v33  ;;  %vm16368_vm1 = vmmov %vm16351_vm0 }
 0x143   : > { %v3436_v36 = vpop.permute.xlu1 %3435 }
 0x144   : > { %11588 = vmatmul.mubr.msk.f32.vlgmr.msra.gmra.mrb[4].mxu0 %vm16366_vm10, %v11582_v1  ;;  %v3454_v37 = vsel %vm16246_vm13, %v3436_v36, %v3438_v29  ;;  %v3446_v39 = vpop.permute.xlu0 %3445  ;;  %vm16369_vm10 = vmmov %vm16351_vm0 }
 0x145   : > { %11590 = vmatmul.mubr.msk.f32.vlgmr.msra.gmra.mrb[4].mxu1 %vm16351_vm0, %v11582_v1  ;;  %3335 = vmatprep.mubr.f32.mxu0 %v16248_v0  ;;  %v3458_v48 = vsel %vm16246_vm13, %v3444_v28, %v3446_v39  ;;  %vm16370_vm0 = vnez %v16317_v35 }
 0x146   : > { %11595 = vmatpush1.msk.msra.mxu0 %vm16341_vm14, %v3454_v37  ;;  %11599 = vmatpush1.msk.msra.mxu1 %vm16367_vm11, %v3456_v31 }
 0x147   : > { %3412 = vmatprep.mubr.f32.mxu1 %v16248_v0  ;;  %v3448_v41 = vpop.permute.xlu1 %3447 }
 0x148   : > { %11589 = vmatmul.mubr.msk.f32.gmra.mrb[6].mxu0 %vm16368_vm1, %v11583_v30  ;;  %v3459_v42 = vsel %vm16246_vm13, %v3446_v39, %v3448_v41  ;;  %v3450_v46 = vpop.permute.xlu0 %3449 }
 0x149   : > { %11591 = vmatmul.mubr.msk.f32.gmra.mrb[6].mxu1 %vm16369_vm10, %v11583_v30  ;;  %3551 = vmatprep.mubr.f32.mxu0 %v16248_v0  ;;  %vm16371_vm10 = vmmov %vm16368_vm1  ;;  %v3460_v53 = vsel %vm16246_vm13, %v3448_v41, %v3450_v46 }
 0x14a   : > { %11602 = vmatprep.subr.msk.mxu0 %vm16370_vm0, %v3459_v42  ;;  %3628 = vmatprep.mubr.f32.mxu1 %v16248_v0  ;;  %vm16372_vm0 = vnez %v16321_v43 }
 0x14b   : > { %v3452_v49 = vpop.permute.xlu1 %3451 }
 0x14c   : > { %11596 = vmatmul.mubr.msk.f32.vlgmr.msra.gmra.mrb[0].mxu0 %vm16368_vm1, %v11592_v44  ;;  %v3461_v51 = vsel %vm16246_vm13, %v3450_v46, %v3452_v49  ;;  %vm16375_vm13 = vmmov %vm16368_vm1 }
 0x14d   : > { %11603 = vmatpush1.msk.msra.mxu0 %vm16349_vm2, %v3458_v48  ;;  %11600 = vmatmul.mubr.msk.f32.vlgmr.msra.gmra.mrb[0].mxu1 %vm16371_vm10, %v11592_v44  ;;  %vm16373_vm2 = vmmov %vm16368_vm1 }
 0x14e   : > { %3557 = vmatprep.mubr.f32.mxu0 %v16248_v0  ;;  %3634 = vmatprep.mubr.f32.mxu1 %v16248_v0  ;;  %vm16374_vm10 = vmmov %vm16368_vm1 }
 0x14f   : > { %11606 = vmatprep.subr.msk.mxu1 %vm16372_vm0, %v3461_v51  ;;  %vm16376_vm0 = vmmov %vm16368_vm1 }
 0x150   : > { %11597 = vmatmul.mubr.msk.f32.gmra.mrb[2].mxu0 %vm16368_vm1, %v11593_v52  ;;  %11607 = vmatpush1.msk.msra.mxu1 %vm14111_vm15, %v3460_v53  ;;  %vm16377_vm1 = vmmov %vm16376_vm0 }
 0x151   : > { %11601 = vmatmul.mubr.msk.f32.gmra.mrb[2].mxu1 %vm16373_vm2, %v11593_v52  ;;  %3705 = vmatprep.mubr.f32.mxu0 %v16248_v0  ;;  %vm16378_vm2 = vcmask 261120  }
 0x152   : > { %3782 = vmatprep.mubr.f32.mxu1 %v16248_v0 }
 0x154   : > { %11604 = vmatmul.mubr.msk.f32.vlgmr.msra.gmra.mrb[4].mxu0 %vm16374_vm10, %v11592_v44 }
 0x155   : > { %11608 = vmatmul.mubr.msk.f32.vlgmr.msra.gmra.mrb[4].mxu1 %vm16375_vm13, %v11592_v44  ;;  %3711 = vmatprep.mubr.f32.mxu0 %v16248_v0  ;;  %vm16379_vm13 = vmmov %vm16378_vm2 }
 0x156   : > { %3788 = vmatprep.mubr.f32.mxu1 %v16248_v0 }
 0x158   : > { %11605 = vmatmul.mubr.msk.f32.gmra.mrb[6].mxu0 %vm16376_vm0, %v11593_v52  ;;  %vm16380_vm0 = vmmov %vm16378_vm2 }
 0x159   : > { %11609 = vmatmul.mubr.msk.f32.gmra.mrb[6].mxu1 %vm16377_vm1, %v11593_v52  ;;  %4135 = vmatprep.mubr.f32.mxu0 %v16248_v0  ;;  %v3816_v54 = vpop.permute.xlu0 %3815  ;;  %vm16381_vm10 = vmmov %vm16380_vm0 }
 0x15a   : > { %4212 = vmatprep.mubr.f32.mxu1 %v16248_v0  ;;  %vm16382_vm1 = vmmov %vm16380_vm0 }
 0x15b   : > { %vm16384_vm15 = vmmov %vm16380_vm0 }
 0x15c   : > { %v3821_v9 = vpop.permute.xlu1 %3820 }
 0x21f   : > { %v3553_v55 = vpop.f32.mrb[0].mxu0 }
 0x220   : > { %v3823_v56 = vadd.f32 %v3816_v54, %v3553_v55  ;;  %v3555_v57 = vpop.f32.mrb[1].mxu0  ;;  %v3630_v58 = vpop.f32.mrb[0].mxu1 }
 0x221   : > { %v3824_v60 = vadd.f32 %v3816_v54, %v3555_v57  ;;  %v3825_v61 = vadd.f32 %v3816_v54, %v3630_v58  ;;  %v3632_v62 = vpop.f32.mrb[1].mxu1 }
 0x222   : > { %v14378_v10 = vmax.f32 %v3823_v56, 0.0  ;;  %v3826_v11 = vadd.f32 %v3816_v54, %v3632_v62 }
 0x223   : > { %v14380_v12 = vmax.f32 %v3824_v60, 0.0  ;;  %v14382_v14 = vmax.f32 %v3825_v61, 0.0  ;;  %v3559_v15 = vpop.f32.mrb[2].mxu0 }
 0x224   : > { %v14384_v17 = vmax.f32 %v3826_v11, 0.0  ;;  %v3831_v18 = vadd.f32 %v3821_v9, %v3559_v15  ;;  %v3561_v20 = vpop.f32.mrb[3].mxu0  ;;  %v3636_v22 = vpop.f32.mrb[2].mxu1 }
 0x225   : > { %v3832_v24 = vadd.f32 %v3821_v9, %v3561_v20  ;;  %v3833_v4 = vadd.f32 %v3821_v9, %v3636_v22  ;;  %v3638_v25 = vpop.f32.mrb[3].mxu1  ;;  %v14388_v26 = vpack.i.bf16 %v14380_v12, %v14378_v10  ;;  %v14441_v15 = vpack.i.bf16 %v14382_v14, %v14380_v12 }
 0x226   : > { %v14390_v2 = vmax.f32 %v3831_v18, 0.0  ;;  %v3834_v1 = vadd.f32 %v3821_v9, %v3638_v25  ;;  %v14394_v3 = vpack.i.bf16 %v14384_v17, %v14382_v14 }
 0x227   : > { %v14396_v6 = vmax.f32 %v3832_v24, 0.0  ;;  %v14398_v29 = vmax.f32 %v3833_v4, 0.0  ;;  %v3707_v5 = vpop.f32.mrb[4].mxu0  ;;  %12783 = vrot.lane.b32.xlu1 %v14388_v26, %s13574_s30 }
 0x228   : > { %v14402_v8 = vmax.f32 %v3834_v1, 0.0  ;;  %v3827_v30 = vadd.f32 %v3816_v54, %v3707_v5  ;;  %v3709_v13 = vpop.f32.mrb[5].mxu0  ;;  %v3784_v7 = vpop.f32.mrb[4].mxu1  ;;  %12788 = vrot.lane.b32.xlu0 %v14394_v3, %s13574_s30  ;;  %v14458_v24 = vpack.i.bf16 %v14390_v2, %v14378_v10 }
 0x229   : > { %v3828_v28 = vadd.f32 %v3816_v54, %v3709_v13  ;;  %v3829_v33 = vadd.f32 %v3816_v54, %v3784_v7  ;;  %v3786_v31 = vpop.f32.mrb[5].mxu1  ;;  %v14408_v36 = vpack.i.bf16 %v14396_v6, %v14390_v2  ;;  %v14450_v20 = vpack.i.bf16 %v14398_v29, %v14396_v6 }
 0x22a   : > { %v14410_v37 = vmax.f32 %v3827_v30, 0.0  ;;  %v3830_v39 = vadd.f32 %v3816_v54, %v3786_v31  ;;  %v12807_v41 = vpack.i.bf16 %v14402_v8, %v14398_v29 }
 0x22b   : > { %v14414_v42 = vmax.f32 %v3828_v28, 0.0  ;;  %v14416_v44 = vmax.f32 %v3829_v33, 0.0  ;;  %v3713_v46 = vpop.f32.mrb[6].mxu0  ;;  %12798 = vrot.lane.b32.xlu1 %v14394_v3, %s13575_s15 }
 0x22c   : > { %v14420_v48 = vmax.f32 %v3830_v39, 0.0  ;;  %v3835_v49 = vadd.f32 %v3821_v9, %v3713_v46  ;;  %v3715_v51 = vpop.f32.mrb[7].mxu0  ;;  %v3790_v52 = vpop.f32.mrb[6].mxu1  ;;  %12793 = vrot.lane.b32.xlu0 %v14388_v26, %s13575_s15  ;;  %v14454_v22 = vpack.i.bf16 %v14410_v37, %v14384_v17 }
 0x22d   : > { %v3836_v53 = vadd.f32 %v3821_v9, %v3715_v51  ;;  %v3837_v54 = vadd.f32 %v3821_v9, %v3790_v52  ;;  %v3792_v55 = vpop.f32.mrb[7].mxu1  ;;  %v12817_v56 = vpack.i.bf16 %v14414_v42, %v14410_v37  ;;  %v14468_v25 = vpack.i.bf16 %v14416_v44, %v14414_v42 }
 0x22e   : > { %v14426_v57 = vmax.f32 %v3835_v49, 0.0  ;;  %v3838_v58 = vadd.f32 %v3821_v9, %v3792_v55  ;;  %v12822_v60 = vpack.i.bf16 %v14420_v48, %v14416_v44 }
 0x22f   : > { %v14430_v61 = vmax.f32 %v3836_v53, 0.0  ;;  %v14432_v62 = vmax.f32 %v3837_v54, 0.0  ;;  %12803 = vrot.lane.b32.xlu1 %v14408_v36, %s13574_s30 }
 0x230   : > { %v14436_v11 = vmax.f32 %v3838_v58, 0.0  ;;  %12808 = vrot.lane.b32.xlu0 %v12807_v41, %s13574_s30  ;;  %v14462_v4 = vpack.i.bf16 %v14426_v57, %v14402_v8 }
 0x231   : > { %v12827_v9 = vpack.i.bf16 %v14430_v61, %v14426_v57  ;;  %v14472_v1 = vpack.i.bf16 %v14432_v62, %v14430_v61 }
 0x232   : > { %v12832_v18 = vpack.i.bf16 %v14436_v11, %v14432_v62 }
 0x233   : > { %12823 = vrot.lane.b32.xlu1 %v12822_v60, %s13574_s30 }
 0x234   : > { %12813 = vrot.lane.b32.xlu0 %v14408_v36, %s13575_s15 }
 0x237   : > { %12833 = vrot.lane.b32.xlu1 %v12832_v18, %s13574_s30 }
 0x238   : > { %12818 = vrot.lane.b32.xlu0 %v12817_v56, %s13574_s30 }
 0x23b   : > { %12838 = vrot.lane.b32.xlu1 %v12807_v41, %s13575_s15 }
 0x23c   : > { %12828 = vrot.lane.b32.xlu0 %v12827_v9, %s13574_s30 }
 0x23f   : > { %12848 = vrot.lane.b32.xlu1 %v12817_v56, %s13575_s15 }
 0x240   : > { %12843 = vrot.lane.b32.xlu0 %v16248_v0, %s13575_s15 }
 0x243   : > { %12858 = vrot.lane.b32.xlu1 %v14388_v26, %s13576_s16 }
 0x244   : > { %12853 = vrot.lane.b32.xlu0 %v12822_v60, %s13575_s15 }
 0x247   : > { %12868 = vrot.lane.b32.xlu1 %v12827_v9, %s13575_s15 }
 0x248   : > { %12863 = vrot.lane.b32.xlu0 %v14394_v3, %s13576_s16 }
 0x24b   : > { %12873 = vrot.lane.b32.xlu1 %v14408_v36, %s13576_s16 }
 0x24c   : > { %12878 = vrot.lane.b32.xlu0 %v12832_v18, %s13575_s15 }
 0x24f   : > { %12888 = vrot.lane.b32.xlu1 %v16248_v0, %s13576_s16 }
 0x250   : > { %12883 = vrot.lane.b32.xlu0 %v12807_v41, %s13576_s16 }
 0x253   : > { %12898 = vrot.lane.b32.xlu1 %v12822_v60, %s13576_s16 }
 0x254   : > { %12893 = vrot.lane.b32.xlu0 %v12817_v56, %s13576_s16 }
 0x257   : > { %12913 = vrot.lane.b32.xlu1 %v12832_v18, %s13576_s16 }
 0x258   : > { %12903 = vrot.lane.b32.xlu0 %v14388_v26, %s13577_s17  ;;  %v14538_v26 = vpack.i.bf16 %v16248_v0, %v14420_v48 }
 0x25b   : > { %12918 = vrot.lane.b32.xlu1 %v14394_v3, %s13577_s17  ;;  %v14550_v3 = vpack.i.bf16 %v16248_v0, %v14436_v11 }
 0x25c   : > { %12908 = vrot.lane.b32.xlu0 %v12827_v9, %s13576_s16 }
 0x25f   : > { %12928 = vrot.lane.b32.xlu1 %v12807_v41, %s13577_s17 }
 0x260   : > { %12923 = vrot.lane.b32.xlu0 %v14408_v36, %s13577_s17  ;;  %v12779_v36 = vpop.permute.xlu1 %12778 }
 0x261   : > { %v12780_v52 = vunpack.i.l.bf16 %v12779_v36 }
 0x263   : > { %12938 = vrot.lane.b32.xlu1 %v12817_v56, %s13577_s17 }
 0x264   : > { %12933 = vrot.lane.b32.xlu0 %v16248_v0, %s13577_s17 }
 0x267   : > { %12948 = vrot.lane.b32.xlu1 %v12827_v9, %s13577_s17 }
 0x268   : > { %12943 = vrot.lane.b32.xlu0 %v12822_v60, %s13577_s17  ;;  %v12781_v60 = vunpack.i.h.bf16 %v12779_v36 }
 0x26b   : > { %12958 = vrot.lane.b32.xlu1 %v14441_v15, %s13578_s18 }
 0x26c   : > { %12953 = vrot.lane.b32.xlu0 %v12832_v18, %s13577_s17 }
 0x26f   : > { %12968 = vrot.lane.b32.xlu1 %v14450_v20, %s13578_s18 }
 0x270   : > { %12963 = vrot.lane.b32.xlu0 %v14454_v22, %s13578_s18 }
 0x273   : > { %12978 = vrot.lane.b32.xlu1 %v14458_v24, %s13578_s18 }
 0x274   : > { %12973 = vrot.lane.b32.xlu0 %v14462_v4, %s13578_s18 }
 0x277   : > { %12988 = vrot.lane.b32.xlu1 %v14538_v26, %s13578_s18 }
 0x278   : > { %12983 = vrot.lane.b32.xlu0 %v14468_v25, %s13578_s18 }
 0x27b   : > { %12998 = vrot.lane.b32.xlu1 %v14454_v22, %s13579_s19 }
 0x27c   : > { %12993 = vrot.lane.b32.xlu0 %v14441_v15, %s13579_s19 }
 0x27f   : > { %13013 = vrot.lane.b32.xlu1 %v14550_v3, %s13578_s18 }
 0x280   : > { %13003 = vrot.lane.b32.xlu0 %v14450_v20, %s13579_s19 }
 0x283   : > { %13018 = vrot.lane.b32.xlu1 %v14462_v4, %s13579_s19 }
 0x284   : > { %13008 = vrot.lane.b32.xlu0 %v14472_v1, %s13578_s18 }
 0x287   : > { %13028 = vrot.lane.b32.xlu1 %v14468_v25, %s13579_s19 }
 0x288   : > { %13023 = vrot.lane.b32.xlu0 %v14458_v24, %s13579_s19 }
 0x28b   : > { %13038 = vrot.lane.b32.xlu1 %v14441_v15, %s13580_s20 }
 0x28c   : > { %13033 = vrot.lane.b32.xlu0 %v14538_v26, %s13579_s19 }
 0x28f   : > { %13048 = vrot.lane.b32.xlu1 %v14472_v1, %s13579_s19 }
 0x290   : > { %13043 = vrot.lane.b32.xlu0 %v14454_v22, %s13580_s20 }
 0x293   : > { %13053 = vrot.lane.b32.xlu1 %v14450_v20, %s13580_s20 }
 0x294   : > { %13058 = vrot.lane.b32.xlu0 %v14550_v3, %s13579_s19 }
 0x297   : > { %13068 = vrot.lane.b32.xlu1 %v14458_v24, %s13580_s20 }
 0x298   : > { %13063 = vrot.lane.b32.xlu0 %v14462_v4, %s13580_s20 }
 0x299   : > { %v12784_v41 = vpop.permute.xlu1 %12783 }
 0x29a   : > { %v14580_v46 = vpop.permute.xlu0 %12788  ;;  %v12786_v53 = vunpack.i.h.bf16 %v12784_v41  ;;  %v12785_v54 = vunpack.i.l.bf16 %v12784_v41 }
 0x29b   : > { %13078 = vrot.lane.b32.xlu1 %v14538_v26, %s13580_s20  ;;  %v16250_v55 = vunpack.i.h.bf16 %v14580_v46  ;;  %v12790_v56 = vunpack.i.l.bf16 %v14580_v46 }
 0x29c   : > { %13073 = vrot.lane.b32.xlu0 %v14468_v25, %s13580_s20  ;;  %v4032_v31 = vsel %vm16378_vm2, %v12780_v52, %v12785_v54  ;;  %v4033_v28 = vsel %vm16379_vm13, %v12785_v54, %v12786_v53  ;;  %vm16383_vm2 = vmmov %vm16380_vm0 }
 0x29d   : > { %v14586_v49 = vpop.permute.xlu1 %12798  ;;  %v4034_v7 = vsel %vm16380_vm0, %v12786_v53, %v12790_v56  ;;  %v4035_v52 = vsel %vm16383_vm2, %v12790_v56, %v16250_v55  ;;  %vm16385_vm13 = vmmov %vm16380_vm0  ;;  %v7548_v55 = vld [vmem:[%s16216_s4] sm:$0xff] }
 0x29e   : > { %v14588_v51 = vpop.permute.xlu0 %12793 }
 0x29f   : > { %13093 = vrot.lane.b32.xlu1 %v14550_v3, %s13580_s20 }
 0x2a0   : > { %13083 = vrot.lane.b32.xlu0 %v14441_v15, %s13581_s29 }
 0x2a1   : > { %v12804_v58 = vpop.permute.xlu1 %12803 }
 0x2a2   : > { %v12806_v9 = vunpack.i.h.bf16 %v12804_v58  ;;  %v12805_v18 = vunpack.i.l.bf16 %v12804_v58  ;;  %v14596_v39 = vpop.permute.xlu0 %12808 }
 0x2a3   : > { %v12811_v41 = vunpack.i.h.bf16 %v14596_v39  ;;  %v12810_v33 = vunpack.i.l.bf16 %v14596_v39  ;;  %13098 = vrot.lane.b32.xlu1 %v14454_v22, %s13581_s29  ;;  %v16397_v39 = vunpack.i.h.bf16 %v14580_v46 }
 0x2a4   : > { %v4040_v15 = vsel %vm16381_vm10, %v12781_v60, %v12805_v18  ;;  %13088 = vrot.lane.b32.xlu0 %v14472_v1, %s13580_s20  ;;  %v4041_v36 = vsel %vm16382_vm1, %v12805_v18, %v12806_v9  ;;  %vm16386_vm10 = vmmov %vm16380_vm0  ;;  %vm16388_vm1 = vcmask 269312  }
 0x2a5   : > { %v4042_v58 = vsel %vm16384_vm15, %v12806_v9, %v12810_v33  ;;  %v12824_v13 = vpop.permute.xlu1 %12823  ;;  %v11966_v30 = vpack.c.bf16 %v4041_v36, %v4033_v28  ;;  %v11968_v22 = vpack.c.bf16 %v4040_v15, %v4032_v31  ;;  %v4043_v53 = vsel %vm16385_vm13, %v12810_v33, %v12811_v41  ;;  %v14622_v28 = vld [vmem:[#allocation3 + $0x10] sm:$0xff]  ;;  %vm16389_vm2 = vmmov %vm16388_vm1 }
 0x2a6   : > { %v14616_v54 = vpop.permute.xlu0 %12813  ;;  %v11970_v60 = vpack.c.bf16 %v4043_v53, %v4035_v52  ;;  %v11972_v5 = vpack.c.bf16 %v4042_v58, %v4034_v7  ;;  %v12826_v18 = vunpack.i.h.bf16 %v12824_v13  ;;  %v12825_v0 = vunpack.i.l.bf16 %v12824_v13  ;;  %vm16390_vm13 = vmmov %vm16380_vm0 }
 0x2a7   : > { %13108 = vrot.lane.b32.xlu1 %v14462_v4, %s13581_s29  ;;  %11967 = vmatprep.subr.bf16.mxu0 %v11966_v30  ;;  %vm16261_vm15 = vcmask 130048   ;;  %v16252_v7 = vunpack.i.h.bf16 %v14586_v49  ;;  %v12800_v4 = vunpack.i.l.bf16 %v14586_v49  ;;  %v12816_v30 = vunpack.i.h.bf16 %v14616_v54 }
 0x2a8   : > { %13103 = vrot.lane.b32.xlu0 %v14450_v20, %s13581_s29  ;;  %11969 = vmatpush1.bf16.msra.mxu0 %v11968_v22  ;;  %v12815_v13 = vunpack.i.l.bf16 %v14616_v54  ;;  %v16387_v52 = vmov 0.0   ;;  %v12796_v53 = vunpack.i.h.bf16 %v14588_v51 }
 0x2a9   : > { %11971 = vmatprep.subr.bf16.mxu1 %v11970_v60  ;;  %v12834_v31 = vpop.permute.xlu1 %12833 }
 0x2aa   : > { %v12836_v33 = vunpack.i.h.bf16 %v12834_v31  ;;  %v12835_v56 = vunpack.i.l.bf16 %v12834_v31  ;;  %11973 = vmatpush1.bf16.msra.mxu1 %v11972_v5  ;;  %v12819_v9 = vpop.permute.xlu0 %12818  ;;  %v4039_v5 = vsel %vm16380_vm0, %v12825_v0, %v12826_v18  ;;  %v3946_v18 = vsel %vm16388_vm1, %v12800_v4, %v16252_v7 }
 0x2ab   : > { %13118 = vrot.lane.b32.xlu1 %v14468_v25, %s13581_s29  ;;  %11610 = vmatmul.mubr.msk.f32.vlgmr.msra.gmra.mrb[8].mxu0 %vm16261_vm15, %v14622_v28  ;;  %v12821_v20 = vunpack.i.h.bf16 %v12819_v9  ;;  %v12820_v15 = vunpack.i.l.bf16 %v12819_v9  ;;  %v14641_v25 = vld [vmem:[#allocation3 + $0x18] sm:$0xff]  ;;  %v12795_v31 = vunpack.i.l.bf16 %v14588_v51 }
 0x2ac   : > { %13113 = vrot.lane.b32.xlu0 %v14458_v24, %s13581_s29  ;;  %v4047_v36 = vsel %vm16386_vm10, %v12835_v56, %v12836_v33  ;;  %4141 = vmatprep.mubr.f32.mxu0 %v16387_v52  ;;  %vm16391_vm10 = vmmov %vm16388_vm1 }
 0x2ad   : > { %v14637_v58 = vpop.permute.xlu1 %12838  ;;  %v11978_v22 = vpack.c.bf16 %v4047_v36, %v4039_v5  ;;  %11612 = vmatmul.mubr.msk.f32.vlgmr.msra.gmra.mrb[8].mxu1 %vm16261_vm15, %v14622_v28  ;;  %v3952_v5 = vsel %vm16389_vm2, %v12815_v13, %v12816_v30  ;;  %v4038_v36 = vsel %vm16390_vm13, %v12821_v20, %v12825_v0  ;;  %v4037_v51 = vsel %vm16380_vm0, %v12820_v15, %v12821_v20  ;;  %vm16392_vm1 = vmmov %vm16380_vm0 }
 0x2ae   : > { %v16251_v54 = vunpack.i.h.bf16 %v14637_v58  ;;  %v12840_v24 = vunpack.i.l.bf16 %v14637_v58  ;;  %v12829_v60 = vpop.permute.xlu0 %12828  ;;  %4218 = vmatprep.mubr.f32.mxu1 %v16387_v52  ;;  %vm16393_vm2 = vmmov %vm16380_vm0 }
 0x2af   : > { %v12831_v33 = vunpack.i.h.bf16 %v12829_v60  ;;  %v12830_v9 = vunpack.i.l.bf16 %v12829_v60  ;;  %13128 = vrot.lane.b32.xlu1 %v14472_v1, %s13581_s29  ;;  %11979 = vmatprep.subr.bf16.mxu1 %v11978_v22  ;;  %vm16394_vm13 = vmmov %vm16380_vm0 }
 0x2b0   : > { %13123 = vrot.lane.b32.xlu0 %v14538_v26, %s13581_s29  ;;  %11611 = vmatmul.mubr.msk.f32.gmra.mrb[10].mxu0 %vm16261_vm15, %v14641_v25  ;;  %v3954_v1 = vsel %vm16391_vm10, %v12840_v24, %v16251_v54  ;;  %vm14680_vm0 = vmpackc.low %vm13898_vm3, %vm13898_vm3  ;;  %vm16401_vm3 = vcmask 269312  }
 0x2b1   : > { %v4044_v0 = vsel %vm16392_vm1, %v12811_v41, %v12830_v9  ;;  %v4046_v22 = vsel %vm16393_vm2, %v12831_v33, %v12835_v56  ;;  %v14672_v26 = vpop.permute.xlu1 %12848  ;;  %11613 = vmatmul.mubr.msk.f32.gmra.mrb[10].mxu1 %vm16261_vm15, %v14641_v25  ;;  %v4045_v60 = vsel %vm16394_vm13, %v12830_v9, %v12831_v33  ;;  %vm16398_vm10 = vmmov %vm16392_vm1  ;;  %4289 = vmatprep.mubr.f32.mxu0 %v16387_v52 }
 0x2b2   : > { %v4036_v41 = vsel %vm16398_vm10, %v16397_v39, %v12820_v15  ;;  %v12844_v54 = vpop.permute.xlu0 %12843  ;;  %v11974_v56 = vpack.c.bf16 %v4045_v60, %v4037_v51  ;;  %v11980_v7 = vpack.c.bf16 %v4046_v22, %v4038_v36  ;;  %4366 = vmatprep.mubr.f32.mxu1 %v16387_v52  ;;  %vm14692_vm1 = vmpackc.low %vm13917_vm4, %vm13917_vm4  ;;  %v3944_v33 = vsel %vm16401_vm3, %v12795_v31, %v12796_v53 }
 0x2b3   : > { %v12846_v9 = vunpack.i.h.bf16 %v12844_v54  ;;  %v12845_v46 = vunpack.i.l.bf16 %v12844_v54  ;;  %7552 = vperm.xlu1 %12776, %v7548_v55   ;;  %v11976_v15 = vpack.c.bf16 %v4044_v0, %v4036_v41  ;;  %v11988_v36 = vpack.c.bf16 %v3954_v1, %v3946_v18  ;;  %vm16402_vm2 = vmmov %vm16401_vm3  ;;  %v7549_v55 = vld [vmem:[%s16216_s4 + $0x8] sm:$0xff] }
 0x2b4   : > { %13133 = vrot.lane.b32.xlu0 %v14550_v3, %s13581_s29  ;;  %11975 = vmatprep.subr.bf16.mxu0 %v11974_v56  ;;  %v11982_v51 = vpack.c.bf16 %v3952_v5, %v3944_v33  ;;  %v3953_v22 = vsel %vm16402_vm2, %v12816_v30, %v12840_v24  ;;  %vm16403_vm13 = vmmov %vm16402_vm2  ;;  %v16408_v24 = vmov 0  ;;  %v12851_v50 = vunpack.i.h.bf16 %v14672_v26 }
 0x2b5   : > { %v3943_v40 = vsel %vm16403_vm13, %v12845_v46, %v12795_v31  ;;  %vm16404_vm4 = vmmov %vm16402_vm2  ;;  %11981 = vmatpush1.bf16.msra.mxu1 %v11980_v7  ;;  %v14702_v39 = vpop.permute.xlu1 %12858  ;;  %11977 = vmatpush1.bf16.msra.mxu0 %v11976_v15  ;;  %v16410_v5 = vunpack.i.h.bf16 %v14586_v49  ;;  %v16412_v56 = vunpack.i.h.bf16 %v14637_v58 }
 0x2b6   : > { %v3951_v60 = vsel %vm16404_vm4, %v12846_v9, %v12815_v13  ;;  %11990 = vmatprep.subr.msk.bf16.mxu1 %vm14692_vm1, %v11988_v36  ;;  %v12854_v3 = vpop.permute.xlu0 %12853  ;;  %11984 = vmatprep.subr.msk.bf16.mxu0 %vm14680_vm0, %v11982_v51  ;;  %vm14714_vm10 = vmpackc.low %vm13953_vm6, %vm13953_vm6  ;;  %v12850_v13 = vunpack.i.l.bf16 %v14672_v26  ;;  %v12861_v0 = vunpack.i.h.bf16 %v14702_v39  ;;  %v3991_v36 = vld [vmem:[#allocation3] sm:$0xff] }
 0x2b7   : > { %v11985_v54 = vpack.c.bf16 %v3951_v60, %v3943_v40  ;;  %vm16407_vm3 = vmmov %vm16402_vm2  ;;  %v12856_v26 = vunpack.i.h.bf16 %v12854_v3  ;;  %v12855_v41 = vunpack.i.l.bf16 %v12854_v3  ;;  %v16417_v60 = vmov 0  ;;  %13138 = vrot.lane.b32.xlu1 %v16387_v52, %s13574_s30 }
 0x2b8   : > { %v3945_v30 = vsel %vm16407_vm3, %v12796_v53, %v12800_v4  ;;  %vm14725_vm2 = vmpackc.low %vm13930_vm5, %vm13930_vm5  ;;  %7557 = vperm.xlu0 %12775, %v7549_v55   ;;  %11614 = vmatmul.mubr.msk.f32.vlgmr.msra.gmra.mrb[12].mxu0 %vm16261_vm15, %v14622_v28  ;;  %v3948_v46 = vsel %vm16407_vm3, %v12850_v13, %v12851_v50  ;;  %v16420_v3 = vmov 0 }
 0x2b9   : > { %v16409_v24 = vsel %vm14725_vm2, 4294967295, %v16408_v24  ;;  %v11991_v18 = vpack.c.bf16 %v3953_v22, %v3945_v30  ;;  %11616 = vmatmul.mubr.msk.f32.vlgmr.msra.gmra.mrb[12].mxu1 %vm16261_vm15, %v14622_v28  ;;  %v12869_v4 = vpop.permute.xlu1 %12868  ;;  %11987 = vmatpush1.bf16.msk.msra.mxu0 %vm14714_vm10, %v11985_v54  ;;  %vm16411_vm5 = vmmov %vm16407_vm3  ;;  %v12860_v28 = vunpack.i.l.bf16 %v14702_v39  ;;  %v3950_v30 = vsel %vm16407_vm3, %v12855_v41, %v12856_v26 }
 0x2ba   : > { %v12871_v45 = vunpack.i.h.bf16 %v12869_v4  ;;  %v12870_v53 = vunpack.i.l.bf16 %v12869_v4  ;;  %v14738_v31 = vpop.permute.xlu0 %12863  ;;  %4295 = vmatprep.mubr.f32.mxu0 %v16387_v52  ;;  %v3947_v1 = vsel %vm16411_vm5, %v16410_v5, %v12850_v13  ;;  %4372 = vmatprep.mubr.f32.mxu1 %v16387_v52  ;;  %vm16413_vm6 = vmmov %vm16407_vm3  ;;  %vm16419_vm5 = vcmask 252928  }
 0x2bb   : > { %11993 = vmatpush1.bf16.msk.msra.mxu1 %vm14725_vm2, %v11991_v18  ;;  %vm16414_vm13 = vmmov %vm16407_vm3  ;;  %v4730_v39 = vsel %vm16419_vm5, %v12860_v28, %v12861_v0  ;;  %v12866_v13 = vunpack.i.h.bf16 %v14738_v31 }
 0x2bc   : > { %v3955_v33 = vsel %vm16413_vm6, %v16412_v56, %v12870_v53  ;;  %v3956_v9 = vsel %vm16414_vm13, %v12870_v53, %v12871_v45  ;;  %11615 = vmatmul.mubr.msk.f32.gmra.mrb[14].mxu0 %vm16261_vm15, %v14641_v25  ;;  %vm14756_vm4 = vmpackc.low %vm13980_vm7, %vm13980_vm7 }
 0x2bd   : > { %v11997_v15 = vpack.c.bf16 %v3955_v33, %v3947_v1  ;;  %11617 = vmatmul.mubr.msk.f32.gmra.mrb[14].mxu1 %vm16261_vm15, %v14641_v25  ;;  %v12874_v58 = vpop.permute.xlu1 %12873  ;;  %4449 = vmatprep.mubr.f32.mxu0 %v16387_v52  ;;  %v11994_v59 = vpack.c.bf16 %v3956_v9, %v3948_v46  ;;  %vm14768_vm7 = vmpackc.low %vm13988_vm8, %vm13988_vm8  ;;  %v12865_v25 = vunpack.i.l.bf16 %v14738_v31  ;;  %v3992_v1 = vld [vmem:[#allocation3 + $0x8] sm:$0xff] }
 0x2be   : > { %v12876_v51 = vunpack.i.h.bf16 %v12874_v58  ;;  %v12875_v22 = vunpack.i.l.bf16 %v12874_v58  ;;  %v12879_v40 = vpop.permute.xlu0 %12878  ;;  %4526 = vmatprep.mubr.f32.mxu1 %v16387_v52  ;;  %v16418_v60 = vsel %vm14768_vm7, 4294967295, %v16417_v60  ;;  %vm14777_vm6 = vmpackc.low %vm16363_vm12, %vm16363_vm12 }
 0x2bf   : > { %v12881_v55 = vunpack.i.h.bf16 %v12879_v40  ;;  %v12880_v54 = vunpack.i.l.bf16 %v12879_v40  ;;  %v16421_v3 = vsel %vm14777_vm6, 4294967295, %v16420_v3  ;;  %vm16422_vm13 = vmmov %vm16407_vm3  ;;  %11996 = vmatprep.subr.msk.bf16.mxu0 %vm14756_vm4, %v11994_v59 }
 0x2c0   : > { %v3949_v63 = vsel %vm16422_vm13, %v12851_v50, %v12855_v41  ;;  %vm16423_vm8 = vmmov %vm16419_vm5  ;;  %11622 = vmatmul.mubr.msk.f32.vlgmr.msra.gmra.mrb[8].mxu0 %vm16261_vm15, %v3991_v36 }
 0x2c1   : > { %v4738_v18 = vsel %vm16423_vm8, %v12875_v22, %v12876_v51  ;;  %vm14791_vm12 = vmpackc.low %vm14012_vm9, %vm14012_vm9  ;;  %11628 = vmatmul.mubr.msk.f32.vlgmr.msra.gmra.mrb[8].mxu1 %vm16261_vm15, %v3991_v36  ;;  %11999 = vmatpush1.bf16.msk.msra.mxu0 %vm14768_vm7, %v11997_v15  ;;  %v12889_v53 = vpop.permute.xlu1 %12888  ;;  %v16430_v15 = vmov 0 }
 0x2c2   : > { %v16425_v23 = vsel %vm14791_vm12, 4294967295, %v16424_v23  ;;  %vm16426_vm5 = vmmov %vm16407_vm3  ;;  %v12006_v5 = vpack.c.bf16 %v4738_v18, %v4730_v39  ;;  %v12891_v41 = vunpack.i.h.bf16 %v12889_v53  ;;  %v12890_v16 = vunpack.i.l.bf16 %v12889_v53  ;;  %v14800_v56 = vpop.permute.xlu0 %12883  ;;  %4455 = vmatprep.mubr.f32.mxu0 %v16387_v52  ;;  %4532 = vmatprep.mubr.f32.mxu1 %v16387_v52 }
 0x2c3   : > { %v3957_v50 = vsel %vm16426_vm5, %v12871_v45, %v12880_v54  ;;  %vm16427_vm13 = vmmov %vm16407_vm3  ;;  %v12886_v9 = vunpack.i.h.bf16 %v14800_v56  ;;  %v12885_v46 = vunpack.i.l.bf16 %v14800_v56  ;;  %vm16429_vm3 = vnez %v16307_v19 }
 0x2c4   : > { %v3958_v4 = vsel %vm16427_vm13, %v12880_v54, %v12881_v55  ;;  %v12003_v26 = vpack.c.bf16 %v3957_v50, %v3949_v63  ;;  %vm16428_vm9 = vmmov %vm16423_vm8  ;;  %12008 = vmatprep.subr.msk.bf16.mxu0 %vm14777_vm6, %v12006_v5  ;;  %11623 = vmatmul.mubr.msk.f32.gmra.mrb[10].mxu0 %vm16261_vm15, %v3992_v1  ;;  %vm16435_vm6 = vnez %v16313_v27  ;;  %v16436_v19 = vmov 0 }
 0x2c5   : > { %v12000_v45 = vpack.c.bf16 %v3958_v4, %v3950_v30  ;;  %v4731_v33 = vsel %vm16428_vm9, %v12861_v0, %v12865_v25  ;;  %vm14812_vm8 = vmpackc.low %vm16429_vm3, %vm16429_vm3  ;;  %11629 = vmatmul.mubr.msk.f32.gmra.mrb[10].mxu1 %vm16261_vm15, %v3992_v1  ;;  %4603 = vmatprep.mubr.f32.mxu0 %v16387_v52  ;;  %v16439_v55 = vmov 0  ;;  %v16441_v54 = vmov 0 }
 0x2c6   : > { %v16431_v15 = vsel %vm14812_vm8, 4294967295, %v16430_v15  ;;  %vm16432_vm5 = vmmov %vm16428_vm9  ;;  %v12894_v27 = vpop.permute.xlu0 %12893  ;;  %4680 = vmatprep.mubr.f32.mxu1 %v16387_v52 }
 0x2c7   : > { %v4732_v58 = vsel %vm16432_vm5, %v12865_v25, %v12866_v13  ;;  %vm16433_vm13 = vmmov %vm16432_vm5  ;;  %12002 = vmatprep.subr.msk.bf16.mxu1 %vm14791_vm12, %v12000_v45  ;;  %v4740_v25 = vsel %vm16432_vm5, %v12885_v46, %v12886_v9  ;;  %v12895_v18 = vunpack.i.l.bf16 %v12894_v27  ;;  %v12896_v5 = vunpack.i.h.bf16 %v12894_v27 }
 0x2c8   : > { %v4729_v0 = vsel %vm16433_vm13, %v12890_v16, %v12860_v28  ;;  %vm16434_vm9 = vmmov %vm16432_vm5  ;;  %v12899_v28 = vpop.permute.xlu1 %12898  ;;  %12005 = vmatpush1.bf16.msk.msra.mxu1 %vm14812_vm8, %v12003_v26  ;;  %11634 = vmatmul.mubr.msk.f32.vlgmr.msra.gmra.mrb[12].mxu0 %vm16261_vm15, %v3991_v36  ;;  %v16453_v27 = vmov 0 }
 0x2c9   : > { %v4737_v40 = vsel %vm16434_vm9, %v12891_v41, %v12875_v22  ;;  %vm14827_vm3 = vmpackc.low %vm16435_vm6, %vm16435_vm6  ;;  %v12901_v63 = vunpack.i.h.bf16 %v12899_v28  ;;  %v12900_v30 = vunpack.i.l.bf16 %v12899_v28  ;;  %4609 = vmatprep.mubr.f32.mxu0 %v16387_v52  ;;  %v4733_v56 = vsel %vm16432_vm5, %v12866_v13, %v12895_v18 }
 0x2ca   : > { %v16437_v19 = vsel %vm14827_vm3, 4294967295, %v16436_v19  ;;  %v12009_v59 = vpack.c.bf16 %v4737_v40, %v4729_v0  ;;  %vm16438_vm7 = vmmov %vm16432_vm5  ;;  %v14860_v4 = vpop.permute.xlu0 %12903 }
 0x2cb   : > { %v4739_v39 = vsel %vm16438_vm7, %v12876_v51, %v12885_v46  ;;  %vm14841_vm6 = vmpackc.low %vm16341_vm14, %vm16341_vm14  ;;  %v12012_v51 = vpack.c.bf16 %v4740_v25, %v4732_v58  ;;  %11640 = vmatmul.mubr.msk.f32.vlgmr.msra.gmra.mrb[12].mxu1 %vm16261_vm15, %v3991_v36  ;;  %vm16443_vm14 = vnez %v16321_v43  ;;  %v16444_v36 = vmov 0  ;;  %v4778_v43 = vld [vmem:[#allocation3 + $0x20] sm:$0xff] }
 0x2cc   : > { %v12015_v22 = vpack.c.bf16 %v4739_v39, %v4731_v33  ;;  %v16440_v55 = vsel %vm14841_vm6, 4294967295, %v16439_v55  ;;  %vm14848_vm7 = vmpackc.low %vm16367_vm11, %vm16367_vm11  ;;  %12011 = vmatpush1.bf16.msk.msra.mxu0 %vm14841_vm6, %v12009_v59  ;;  %v12914_v21 = vpop.permute.xlu1 %12913  ;;  %4686 = vmatprep.mubr.f32.mxu1 %v16387_v52  ;;  %v12906_v33 = vunpack.i.h.bf16 %v14860_v4  ;;  %v12905_v46 = vunpack.i.l.bf16 %v14860_v4 }
 0x2cd   : > { %v16442_v54 = vsel %vm14848_vm7, 4294967295, %v16441_v54  ;;  %12014 = vmatprep.subr.msk.bf16.mxu1 %vm14827_vm3, %v12012_v51  ;;  %v12916_v32 = vunpack.i.h.bf16 %v12914_v21  ;;  %v12915_v50 = vunpack.i.l.bf16 %v12914_v21  ;;  %vm14867_vm11 = vmpackc.low %vm16443_vm14, %vm16443_vm14  ;;  %11635 = vmatmul.mubr.msk.f32.gmra.mrb[14].mxu0 %vm16261_vm15, %v3992_v1  ;;  %vm16465_vm3 = vcmask 130048  }
 0x2ce   : > { %12017 = vmatpush1.bf16.msk.msra.mxu1 %vm14848_vm7, %v12015_v22  ;;  %v16445_v36 = vsel %vm14867_vm11, 4294967295, %v16444_v36  ;;  %vm16446_vm13 = vmmov %vm16432_vm5  ;;  %4850 = vmatprep.mubr.f32.mxu0 %v16387_v52  ;;  %v12909_v45 = vpop.permute.xlu0 %12908  ;;  %v4779_v22 = vld [vmem:[#allocation3 + $0x28] sm:$0xff] }
 0x2cf   : > { %v4736_v53 = vsel %vm16446_vm13, %v12900_v30, %v12901_v63  ;;  %vm16447_vm9 = vmmov %vm16432_vm5  ;;  %11641 = vmatmul.mubr.msk.f32.gmra.mrb[14].mxu1 %vm16261_vm15, %v3992_v1  ;;  %v12911_v58 = vunpack.i.h.bf16 %v12909_v45  ;;  %v12910_v0 = vunpack.i.l.bf16 %v12909_v45 }
 0x2d0   : > { %v4744_v26 = vsel %vm16447_vm9, %v12915_v50, %v12916_v32  ;;  %v14875_v41 = vpop.permute.xlu1 %12918  ;;  %4927 = vmatprep.mubr.f32.mxu1 %v16387_v52  ;;  %vm16448_vm14 = vmmov %vm16432_vm5 }
 0x2d1   : > { %v12024_v16 = vpack.c.bf16 %v4744_v26, %v4736_v53  ;;  %v4734_v1 = vsel %vm16448_vm14, %v12895_v18, %v12896_v5  ;;  %vm16449_vm13 = vmmov %vm16432_vm5  ;;  %v12921_v31 = vunpack.i.h.bf16 %v14875_v41  ;;  %v12920_v13 = vunpack.i.l.bf16 %v14875_v41  ;;  %11646 = vmatmul.mubr.msk.f32.vlgmr.msra.gmra.mrb[8].mxu0 %vm16261_vm15, %v4778_v43 }
 0x2d2   : > { %v4735_v40 = vsel %vm16449_vm13, %v12896_v5, %v12900_v30  ;;  %vm16450_vm9 = vmmov %vm16432_vm5  ;;  %v4742_v39 = vsel %vm16432_vm5, %v12910_v0, %v12911_v58  ;;  %4856 = vmatprep.mubr.f32.mxu0 %v16387_v52  ;;  %vm16452_vm14 = vnez %v16324_v47  ;;  %v12924_v18 = vpop.permute.xlu0 %12923 }
 0x2d3   : > { %12026 = vmatprep.subr.msk.bf16.mxu1 %vm14867_vm11, %v12024_v16  ;;  %v4741_v59 = vsel %vm16450_vm9, %v12886_v9, %v12910_v0  ;;  %vm16451_vm7 = vmmov %vm16432_vm5  ;;  %11652 = vmatmul.mubr.msk.f32.vlgmr.msra.gmra.mrb[8].mxu1 %vm16261_vm15, %v4778_v43  ;;  %vm16455_vm11 = vnez %v16317_v35  ;;  %v16456_v9 = vmov 0  ;;  %v12926_v32 = vunpack.i.h.bf16 %v12924_v18 }
 0x2d4   : > { %v4743_v25 = vsel %vm16451_vm7, %v12911_v58, %v12915_v50  ;;  %v12929_v28 = vpop.permute.xlu1 %12928  ;;  %vm14899_vm13 = vmpackc.low %vm16452_vm14, %vm16452_vm14  ;;  %v12021_v51 = vpack.c.bf16 %v4741_v59, %v4733_v56  ;;  %4933 = vmatprep.mubr.f32.mxu1 %v16387_v52  ;;  %vm16458_vm7 = vcmask 7168   ;;  %v12925_v50 = vunpack.i.l.bf16 %v12924_v18 }
 0x2d5   : > { %v16454_v27 = vsel %vm14899_vm13, 4294967295, %v16453_v27  ;;  %vm14906_vm9 = vmpackc.low %vm16455_vm11, %vm16455_vm11  ;;  %v12027_v63 = vpack.c.bf16 %v4743_v25, %v4735_v40  ;;  %v12931_v30 = vunpack.i.h.bf16 %v12929_v28  ;;  %v12930_v21 = vunpack.i.l.bf16 %v12929_v28  ;;  %11647 = vmatmul.mubr.msk.f32.gmra.mrb[10].mxu0 %vm16465_vm3, %v4779_v22 }
 0x2d6   : > { %v16457_v9 = vsel %vm14906_vm9, 4294967295, %v16456_v9  ;;  %v5147_v47 = vsel %vm16458_vm7, %v12905_v46, %v12906_v33  ;;  %v12018_v4 = vpack.c.bf16 %v4742_v39, %v4734_v1  ;;  %vm16459_vm5 = vnez %v16319_v38  ;;  %vm16462_vm11 = vmmov %vm16458_vm7  ;;  %v12934_v58 = vpop.permute.xlu0 %12933  ;;  %5004 = vmatprep.mubr.f32.mxu0 %v16387_v52 }
 0x2d7   : > { %vm14915_vm14 = vmpackc.low %vm16459_vm5, %vm16459_vm5  ;;  %v16460_v35 = vmov 0  ;;  %v5148_v53 = vsel %vm16462_vm11, %v12906_v33, %v12920_v13  ;;  %12029 = vmatpush1.bf16.msk.msra.mxu1 %vm14899_vm13, %v12027_v63  ;;  %v12936_v1 = vunpack.i.h.bf16 %v12934_v58  ;;  %v12935_v40 = vunpack.i.l.bf16 %v12934_v58 }
 0x2d8   : > { %v16461_v35 = vsel %vm14915_vm14, 4294967295, %v16460_v35  ;;  %vm16463_vm15 = vmmov %vm16458_vm7  ;;  %12020 = vmatprep.subr.msk.bf16.mxu0 %vm14906_vm9, %v12018_v4  ;;  %v12939_v56 = vpop.permute.xlu1 %12938 }
 0x2d9   : > { %v5149_v5 = vsel %vm16463_vm15, %v12920_v13, %v12921_v31  ;;  %vm16464_vm6 = vmmov %vm16458_vm7  ;;  %12023 = vmatpush1.bf16.msk.msra.mxu0 %vm14915_vm14, %v12021_v51  ;;  %v12941_v13 = vunpack.i.h.bf16 %v12939_v56  ;;  %v12940_v59 = vunpack.i.l.bf16 %v12939_v56 }
 0x2da   : > { %v5157_v26 = vsel %vm16464_vm6, %v12930_v21, %v12931_v30  ;;  %vm16466_vm7 = vmmov %vm16464_vm6  ;;  %v12944_v18 = vpop.permute.xlu0 %12943 }
 0x2db   : > { %v5155_v38 = vsel %vm16466_vm7, %v12925_v50, %v12926_v32  ;;  %vm16467_vm8 = vmmov %vm16464_vm6  ;;  %v12036_v45 = vpack.c.bf16 %v5157_v26, %v5149_v5  ;;  %v12946_v4 = vunpack.i.h.bf16 %v12944_v18 }
 0x2dc   : > { %v5156_v16 = vsel %vm16467_vm8, %v12926_v32, %v12930_v21  ;;  %vm16468_vm5 = vmmov %vm16465_vm3  ;;  %v12030_v0 = vpack.c.bf16 %v5155_v38, %v5147_v47  ;;  %11658 = vmatmul.mubr.msk.f32.vlgmr.msra.gmra.mrb[12].mxu0 %vm16465_vm3, %v4778_v43  ;;  %v12949_v28 = vpop.permute.xlu1 %12948  ;;  %v12945_v32 = vunpack.i.l.bf16 %v12944_v18  ;;  %v5195_v38 = vld [vmem:[#allocation3 + $0x30] sm:$0xff]  ;;  %v16491_v18 = vpack.c.bf16 %v14430_v61, %v14414_v42  ;;  %v5528_v61 = vld [vmem:[#allocation3 + $0x40] sm:$0xff] }
 0x2dd   : > { %11653 = vmatmul.mubr.msk.f32.gmra.mrb[10].mxu1 %vm16468_vm5, %v4779_v22  ;;  %v12039_v33 = vpack.c.bf16 %v5156_v16, %v5148_v53  ;;  %12038 = vmatprep.subr.msk.bf16.mxu1 %vm14692_vm1, %v12036_v45  ;;  %vm16469_vm15 = vmmov %vm16464_vm6  ;;  %v12951_v63 = vunpack.i.h.bf16 %v12949_v28  ;;  %v12950_v21 = vunpack.i.l.bf16 %v12949_v28 }
 0x2de   : > { %5081 = vmatprep.mubr.f32.mxu1 %v16387_v52  ;;  %12032 = vmatprep.subr.msk.bf16.mxu0 %vm14680_vm0, %v12030_v0  ;;  %v5146_v39 = vsel %vm16469_vm15, %v12935_v40, %v12905_v46  ;;  %vm16470_vm8 = vmmov %vm16464_vm6  ;;  %v12954_v5 = vpop.permute.xlu0 %12953 }
 0x2df   : > { %v5154_v25 = vsel %vm16470_vm8, %v12936_v1, %v12925_v50  ;;  %vm16471_vm6 = vmmov %vm16465_vm3  ;;  %5010 = vmatprep.mubr.f32.mxu0 %v16387_v52  ;;  %v5159_v47 = vsel %vm16466_vm7, %v12950_v21, %v12951_v63  ;;  %v12956_v41 = vunpack.i.h.bf16 %v12954_v5  ;;  %v12955_v16 = vunpack.i.l.bf16 %v12954_v5  ;;  %v5196_v1 = vld [vmem:[#allocation3 + $0x38] sm:$0xff] }
 0x2e0   : > { %v12033_v51 = vpack.c.bf16 %v5154_v25, %v5146_v39  ;;  %vm16472_vm11 = vmmov %vm16466_vm7  ;;  %v14958_v53 = vpop.permute.xlu1 %12958 }
 0x2e1   : > { %11664 = vmatmul.mubr.msk.f32.vlgmr.msra.gmra.mrb[12].mxu1 %vm16471_vm6, %v4778_v43  ;;  %v5158_v46 = vsel %vm16472_vm11, %v12931_v30, %v12950_v21  ;;  %vm16473_vm5 = vmmov %vm16466_vm7 }
 0x2e2   : > { %12041 = vmatpush1.bf16.msk.msra.mxu1 %vm14725_vm2, %v12039_v33  ;;  %5087 = vmatprep.mubr.f32.mxu1 %v16387_v52  ;;  %v5150_v43 = vsel %vm16473_vm5, %v12921_v31, %v12940_v59  ;;  %vm16474_vm15 = vmmov %vm16473_vm5  ;;  %v5161_v45 = vsel %vm16473_vm5, %v12955_v16, %v12956_v41  ;;  %v14974_v0 = vpop.permute.xlu0 %12963 }
 0x2e3   : > { %12035 = vmatpush1.bf16.msk.msra.mxu0 %vm14714_vm10, %v12033_v51  ;;  %v5151_v50 = vsel %vm16474_vm15, %v12940_v59, %v12941_v13  ;;  %vm16475_vm8 = vmmov %vm16465_vm3  ;;  %v12045_v30 = vpack.c.bf16 %v5158_v46, %v5150_v43  ;;  %v16492_v46 = vpack.c.bf16 %v14436_v11, %v14420_v48 }
 0x2e4   : > { %11659 = vmatmul.mubr.msk.f32.gmra.mrb[14].mxu0 %vm16475_vm8, %v4779_v22  ;;  %v12042_v26 = vpack.c.bf16 %v5159_v47, %v5151_v50  ;;  %vm16476_vm6 = vmmov %vm16473_vm5  ;;  %v14970_v33 = vpop.permute.xlu1 %12968  ;;  %v12961_v47 = vunpack.i.h.bf16 %v14958_v53 }
 0x2e5   : > { %11665 = vmatmul.mubr.msk.f32.gmra.mrb[14].mxu1 %vm16465_vm3, %v4779_v22  ;;  %5267 = vmatprep.mubr.f32.mxu0 %v16387_v52  ;;  %v5152_v31 = vsel %vm16476_vm6, %v12941_v13, %v12945_v32  ;;  %vm16477_vm11 = vmmov %vm16473_vm5  ;;  %v16482_v13 = vpack.c.bf16 %v14396_v6, %v14380_v12  ;;  %v16486_v12 = vpack.c.bf16 %v14402_v8, %v14384_v17  ;;  %v12971_v25 = vunpack.i.h.bf16 %v14970_v33 }
 0x2e6   : > { %5344 = vmatprep.mubr.f32.mxu1 %v16387_v52  ;;  %12044 = vmatprep.subr.msk.bf16.mxu0 %vm14756_vm4, %v12042_v26  ;;  %v5153_v56 = vsel %vm16477_vm11, %v12945_v32, %v12946_v4  ;;  %vm16478_vm7 = vmmov %vm16473_vm5  ;;  %v14987_v39 = vpop.permute.xlu0 %12973  ;;  %v12970_v28 = vunpack.i.l.bf16 %v14970_v33  ;;  %v16489_v17 = vpack.c.bf16 %v14390_v2, %v14378_v10  ;;  %v16490_v8 = vpack.c.bf16 %v14398_v29, %v14382_v14 }
 0x2e7   : > { %v5160_v22 = vsel %vm16478_vm7, %v12951_v63, %v12955_v16  ;;  %vm16479_vm15 = vmmov %vm16465_vm3  ;;  %v12048_v40 = vpack.c.bf16 %v5161_v45, %v5153_v56  ;;  %vm16485_vm7 = vnez %v16431_v15  ;;  %v12976_v51 = vunpack.i.h.bf16 %v14987_v39  ;;  %v5529_v16 = vld [vmem:[#allocation3 + $0x48] sm:$0xff] }
 0x2e8   : > { %11670 = vmatmul.mubr.msk.f32.vlgmr.msra.gmra.mrb[8].mxu0 %vm16479_vm15, %v5195_v38  ;;  %vm16480_vm8 = vmmov %vm16465_vm3  ;;  %v12051_v58 = vpack.c.bf16 %v5160_v22, %v5152_v31  ;;  %vm16481_vm3 = vnez %v16418_v60  ;;  %v12979_v59 = vpop.permute.xlu1 %12978  ;;  %v12975_v63 = vunpack.i.l.bf16 %v14987_v39  ;;  %v12960_v32 = vunpack.i.l.bf16 %v14958_v53  ;;  %v5981_v39 = vld [vmem:[#allocation3 + $0x50] sm:$0xff] }
 0x2e9   : > { %11676 = vmatmul.mubr.msk.f32.vlgmr.msra.gmra.mrb[8].mxu1 %vm16480_vm8, %v5195_v38  ;;  %12047 = vmatpush1.bf16.msk.msra.mxu0 %vm16481_vm3, %v12045_v30  ;;  %vm16483_vm6 = vmmov %vm16480_vm8  ;;  %v12966_v10 = vunpack.i.h.bf16 %v14974_v0  ;;  %v12965_v2 = vunpack.i.l.bf16 %v14974_v0  ;;  %v12981_v50 = vunpack.i.h.bf16 %v12979_v59  ;;  %v12980_v4 = vunpack.i.l.bf16 %v12979_v59 }
 0x2ea   : > { %5273 = vmatprep.mubr.f32.mxu0 %v16387_v52  ;;  %12055 = vmatprep.subr.bf16.mxu0 %v16482_v13  ;;  %vm16484_vm11 = vmmov %vm16483_vm6  ;;  %v15008_v21 = vpop.permute.xlu0 %12983  ;;  %v16500_v26 = vpack.c.bf16 %v14426_v57, %v14410_v37 }
 0x2eb   : > { %5350 = vmatprep.mubr.f32.mxu1 %v16387_v52  ;;  %12050 = vmatprep.subr.msk.bf16.mxu1 %vm14791_vm12, %v12048_v40  ;;  %vm16487_vm5 = vmmov %vm16483_vm6  ;;  %v12986_v33 = vunpack.i.h.bf16 %v15008_v21 }
 0x2ec   : > { %11671 = vmatmul.mubr.msk.f32.gmra.mrb[10].mxu0 %vm16483_vm6, %v5196_v1  ;;  %12053 = vmatpush1.bf16.msk.msra.mxu1 %vm16485_vm7, %v12051_v58  ;;  %vm16488_vm15 = vmmov %vm16487_vm5  ;;  %v14996_v6 = vpop.permute.xlu1 %12988  ;;  %v12985_v58 = vunpack.i.l.bf16 %v15008_v21 }
 0x2ed   : > { %11677 = vmatmul.mubr.msk.f32.gmra.mrb[10].mxu1 %vm16484_vm11, %v5196_v1  ;;  %5421 = vmatprep.mubr.f32.mxu0 %v16387_v52  ;;  %vm16493_vm8 = vmmov %vm16487_vm5  ;;  %vm16495_vm11 = vcmask 1039360   ;;  %v12991_v57 = vunpack.i.h.bf16 %v14996_v6 }
 0x2ee   : > { %12059 = vmatprep.subr.bf16.mxu1 %v16486_v12  ;;  %5498 = vmatprep.mubr.f32.mxu1 %v16387_v52  ;;  %vm16494_vm6 = vmmov %vm16487_vm5  ;;  %v5941_v29 = vsel %vm16495_vm11, %v12970_v28, %v12971_v25  ;;  %v15030_v48 = vpop.permute.xlu0 %12993 }
 0x2f0   : > { %11682 = vmatmul.mubr.msk.f32.vlgmr.msra.gmra.mrb[12].mxu0 %vm16487_vm5, %v5195_v38  ;;  %v15024_v14 = vpop.permute.xlu1 %12998  ;;  %vm16496_vm5 = vmmov %vm16495_vm11 }
 0x2f1   : > { %11688 = vmatmul.mubr.msk.f32.vlgmr.msra.gmra.mrb[12].mxu1 %vm16488_vm15, %v5195_v38  ;;  %12057 = vmatpush1.bf16.msra.mxu0 %v16489_v17  ;;  %v5943_v42 = vsel %vm16496_vm5, %v12975_v63, %v12976_v51  ;;  %vm16497_vm15 = vmmov %vm16496_vm5  ;;  %v16501_v38 = vpack.c.bf16 %v14432_v62, %v14416_v44  ;;  %v12990_v62 = vunpack.i.l.bf16 %v14996_v6 }
 0x2f2   : > { %12061 = vmatpush1.bf16.msra.mxu1 %v16490_v8  ;;  %12063 = vmatprep.subr.bf16.mxu0 %v16491_v18  ;;  %v5933_v11 = vsel %vm16497_vm15, %v12960_v32, %v12961_v47  ;;  %vm16499_vm11 = vmmov %vm16494_vm6  ;;  %v15046_v41 = vpop.permute.xlu0 %13003  ;;  %vm16503_vm15 = vnez %v16437_v19 }
 0x2f3   : > { %12067 = vmatprep.subr.bf16.mxu1 %v16492_v46  ;;  %5427 = vmatprep.mubr.f32.mxu0 %v16387_v52  ;;  %v12070_v30 = vpack.c.bf16 %v5941_v29, %v5933_v11  ;;  %vm16505_vm7 = vmmov %vm16499_vm11  ;;  %v13006_v21 = vunpack.i.h.bf16 %v15046_v41  ;;  %v13005_v18 = vunpack.i.l.bf16 %v15046_v41  ;;  %v13000_v11 = vunpack.i.l.bf16 %v15024_v14 }
 0x2f4   : > { %5504 = vmatprep.mubr.f32.mxu1 %v16387_v52  ;;  %11683 = vmatmul.mubr.msk.f32.gmra.mrb[14].mxu0 %vm16493_vm8, %v5196_v1  ;;  %vm16498_vm8 = vmmov %vm16496_vm5  ;;  %v13014_v53 = vpop.permute.xlu1 %13013  ;;  %vm16502_vm5 = vnez %v16421_v3 }
 0x2f5   : > { %11689 = vmatmul.mubr.msk.f32.gmra.mrb[14].mxu1 %vm16494_vm6, %v5196_v1  ;;  %5600 = vmatprep.mubr.f32.mxu0 %v16387_v52  ;;  %v5935_v43 = vsel %vm16498_vm8, %v12965_v2, %v12966_v10  ;;  %v13016_v31 = vunpack.i.h.bf16 %v13014_v53  ;;  %v13015_v56 = vunpack.i.l.bf16 %v13014_v53  ;;  %v5932_v37 = vsel %vm16498_vm8, %v12980_v4, %v12960_v32 }
 0x2f6   : > { %5677 = vmatprep.mubr.f32.mxu1 %v16387_v52  ;;  %v12076_v5 = vpack.c.bf16 %v5943_v42, %v5935_v43  ;;  %v13009_v1 = vpop.permute.xlu0 %13008  ;;  %v13001_v42 = vunpack.i.h.bf16 %v15024_v14  ;;  %v12995_v43 = vunpack.i.l.bf16 %v15030_v48 }
 0x2f7   : > { %v13011_v13 = vunpack.i.h.bf16 %v13009_v1  ;;  %v13010_v59 = vunpack.i.l.bf16 %v13009_v1 }
 0x2f8   : > { %11690 = vmatmul.mubr.msk.f32.vlgmr.msra.gmra.mrb[8].mxu0 %vm16494_vm6, %v5528_v61  ;;  %vm16504_vm6 = vmmov %vm16498_vm8  ;;  %v15060_v22 = vpop.permute.xlu1 %13018 }
 0x2f9   : > { %11692 = vmatmul.mubr.msk.f32.vlgmr.msra.gmra.mrb[8].mxu1 %vm16499_vm11, %v5528_v61  ;;  %12065 = vmatpush1.bf16.msra.mxu0 %v16500_v26  ;;  %v5940_v44 = vsel %vm16504_vm6, %v12981_v50, %v12970_v28  ;;  %v13021_v32 = vunpack.i.h.bf16 %v15060_v22 }
 0x2fa   : > { %12069 = vmatpush1.bf16.msra.mxu1 %v16501_v38  ;;  %12072 = vmatprep.subr.msk.bf16.mxu0 %vm16502_vm5, %v12070_v30  ;;  %vm16506_vm5 = vmmov %vm16504_vm6  ;;  %v12073_v6 = vpack.c.bf16 %v5940_v44, %v5932_v37 }
 0x2fb   : > { %12078 = vmatprep.subr.msk.bf16.mxu1 %vm16503_vm15, %v12076_v5  ;;  %5606 = vmatprep.mubr.f32.mxu0 %v16387_v52  ;;  %v5942_v45 = vsel %vm16506_vm5, %v12971_v25, %v12975_v63  ;;  %vm16507_vm8 = vmmov %vm16506_vm5  ;;  %v5945_v25 = vsel %vm16506_vm5, %v13010_v59, %v13011_v13  ;;  %v5944_v50 = vsel %vm16506_vm5, %v12976_v51, %v13010_v59 }
 0x2fc   : > { %5683 = vmatprep.mubr.f32.mxu1 %v16387_v52  ;;  %11691 = vmatmul.mubr.msk.f32.gmra.mrb[10].mxu0 %vm16499_vm11, %v5529_v16  ;;  %v5947_v40 = vsel %vm16507_vm8, %v13015_v56, %v13016_v31  ;;  %vm16508_vm6 = vmmov %vm16506_vm5  ;;  %v15072_v63 = vpop.permute.xlu1 %13028  ;;  %v5936_v51 = vsel %vm16506_vm5, %v12966_v10, %v12985_v58 }
 0x2fd   : > { %11693 = vmatmul.mubr.msk.f32.gmra.mrb[10].mxu1 %vm16505_vm7, %v5529_v16  ;;  %5754 = vmatprep.mubr.f32.mxu0 %v16387_v52  ;;  %v5934_v12 = vsel %vm16508_vm6, %v12961_v47, %v12965_v2  ;;  %vm16509_vm7 = vmmov %vm16506_vm5  ;;  %vm16512_vm6 = vnez %v16440_v55  ;;  %v13024_v47 = vpop.permute.xlu0 %13023  ;;  %v13020_v2 = vunpack.i.l.bf16 %v15060_v22  ;;  %v13031_v1 = vunpack.i.h.bf16 %v15072_v63  ;;  %v6398_v22 = vld [vmem:[#allocation3 + $0x60] sm:$0xff] }
 0x2fe   : > { %5831 = vmatprep.mubr.f32.mxu1 %v16387_v52  ;;  %v12079_v28 = vpack.c.bf16 %v5942_v45, %v5934_v12  ;;  %v5939_v17 = vsel %vm16509_vm7, %v12990_v62, %v12991_v57  ;;  %vm16510_vm15 = vmmov %vm16506_vm5  ;;  %vm16513_vm7 = vnez %v16442_v54  ;;  %v13025_v0 = vunpack.i.l.bf16 %v13024_v47 }
 0x2ff   : > { %v5937_v8 = vsel %vm16510_vm15, %v12985_v58, %v12986_v33  ;;  %vm16511_vm8 = vmmov %vm16499_vm11  ;;  %v12088_v46 = vpack.c.bf16 %v5947_v40, %v5939_v17  ;;  %vm16514_vm15 = vnez %v16445_v36  ;;  %v13030_v40 = vunpack.i.l.bf16 %v15072_v63 }
 0x300   : > { %11694 = vmatmul.mubr.msk.f32.vlgmr.msra.gmra.mrb[12].mxu0 %vm16499_vm11, %v5528_v61  ;;  %v12082_v29 = vpack.c.bf16 %v5945_v25, %v5937_v8  ;;  %vm16515_vm11 = vmmov %vm16511_vm8  ;;  %v15098_v4 = vpop.permute.xlu1 %13038 }
 0x301   : > { %11696 = vmatmul.mubr.msk.f32.vlgmr.msra.gmra.mrb[12].mxu1 %vm16511_vm8, %v5528_v61  ;;  %12075 = vmatpush1.bf16.msk.msra.mxu0 %vm16512_vm6, %v12073_v6  ;;  %v12996_v61 = vunpack.i.h.bf16 %v15030_v48  ;;  %vm16516_vm8 = vcmask 793600   ;;  %vm16518_vm6 = vmmov %vm16515_vm11  ;;  %v15103_v30 = vpop.permute.xlu0 %13033 }
 0x302   : > { %12081 = vmatpush1.bf16.msk.msra.mxu1 %vm16513_vm7, %v12079_v28  ;;  %5760 = vmatprep.mubr.f32.mxu0 %v16387_v52  ;;  %v6358_v53 = vsel %vm16516_vm8, %v13005_v18, %v13006_v21  ;;  %vm16517_vm7 = vmmov %vm16506_vm5  ;;  %v13036_v12 = vunpack.i.h.bf16 %v15103_v30  ;;  %v13035_v6 = vunpack.i.l.bf16 %v15103_v30 }
 0x303   : > { %12090 = vmatprep.subr.msk.bf16.mxu1 %vm16514_vm15, %v12088_v46  ;;  %5837 = vmatprep.mubr.f32.mxu1 %v16387_v52  ;;  %v5946_v48 = vsel %vm16517_vm7, %v13011_v13, %v13015_v56  ;;  %v13026_v56 = vunpack.i.h.bf16 %v13024_v47  ;;  %vm16523_vm15 = vcmask 130048  }
 0x304   : > { %11695 = vmatmul.mubr.msk.f32.gmra.mrb[14].mxu0 %vm16515_vm11, %v5529_v16  ;;  %12084 = vmatprep.subr.msk.bf16.mxu0 %vm14906_vm9, %v12082_v29  ;;  %vm16519_vm11 = vmmov %vm16516_vm8  ;;  %v13049_v10 = vpop.permute.xlu1 %13048 }
 0x305   : > { %11697 = vmatmul.mubr.msk.f32.gmra.mrb[14].mxu1 %vm16518_vm6, %v5529_v16  ;;  %6053 = vmatprep.mubr.f32.mxu0 %v16387_v52  ;;  %v6360_v5 = vsel %vm16519_vm11, %v13020_v2, %v13021_v32  ;;  %vm16520_vm8 = vmmov %vm16506_vm5  ;;  %v12085_v16 = vpack.c.bf16 %v5944_v50, %v5936_v51  ;;  %v13051_v44 = vunpack.i.h.bf16 %v13049_v10  ;;  %v13050_v57 = vunpack.i.l.bf16 %v13049_v10  ;;  %v15122_v45 = vpop.permute.xlu0 %13043 }
 0x306   : > { %6130 = vmatprep.mubr.f32.mxu1 %v16387_v52  ;;  %v5938_v26 = vsel %vm16520_vm8, %v12986_v33, %v12990_v62  ;;  %vm16521_vm6 = vmmov %vm16519_vm11  ;;  %v5982_v33 = vld [vmem:[#allocation3 + $0x58] sm:$0xff] }
 0x307   : > { %v6352_v38 = vsel %vm16521_vm6, %v13000_v11, %v13001_v42  ;;  %vm16522_vm7 = vmmov %vm16521_vm6  ;;  %v12091_v31 = vpack.c.bf16 %v5946_v48, %v5938_v26  ;;  %v13045_v26 = vunpack.i.l.bf16 %v15122_v45 }
 0x308   : > { %v6350_v41 = vsel %vm16522_vm7, %v12995_v43, %v12996_v61  ;;  %11702 = vmatmul.mubr.msk.f32.vlgmr.msra.gmra.mrb[8].mxu0 %vm16523_vm15, %v5981_v39  ;;  %vm16524_vm5 = vmmov %vm16523_vm15  ;;  %v12100_v62 = vpack.c.bf16 %v6360_v5, %v6352_v38  ;;  %v15140_v28 = vpop.permute.xlu1 %13053  ;;  %v6362_v17 = vsel %vm16522_vm7, %v13050_v57, %v13051_v44  ;;  %v13046_v5 = vunpack.i.h.bf16 %v15122_v45 }
 0x309   : > { %v12094_v37 = vpack.c.bf16 %v6358_v53, %v6350_v41  ;;  %11708 = vmatmul.mubr.msk.f32.vlgmr.msra.gmra.mrb[8].mxu1 %vm16524_vm5, %v5981_v39  ;;  %12087 = vmatpush1.bf16.msk.msra.mxu0 %vm14915_vm14, %v12085_v16  ;;  %vm16525_vm15 = vmmov %vm16521_vm6  ;;  %v13059_v25 = vpop.permute.xlu0 %13058  ;;  %v13055_v48 = vunpack.i.l.bf16 %v15140_v28 }
 0x30a   : > { %12093 = vmatpush1.bf16.msk.msra.mxu1 %vm14899_vm13, %v12091_v31  ;;  %v6359_v58 = vsel %vm16525_vm15, %v13006_v21, %v13020_v2  ;;  %6059 = vmatprep.mubr.f32.mxu0 %v16387_v52  ;;  %vm16526_vm11 = vmmov %vm16521_vm6  ;;  %v13061_v8 = vunpack.i.h.bf16 %v13059_v25  ;;  %v13060_v21 = vunpack.i.l.bf16 %v13059_v25  ;;  %v13041_v2 = vunpack.i.h.bf16 %v15098_v4 }
 0x30b   : > { %12096 = vmatprep.subr.msk.bf16.mxu0 %vm14680_vm0, %v12094_v37  ;;  %12102 = vmatprep.subr.msk.bf16.mxu1 %vm14692_vm1, %v12100_v62  ;;  %v6349_v13 = vsel %vm16526_vm11, %v13025_v0, %v12995_v43  ;;  %vm16527_vm8 = vmmov %vm16521_vm6 }
 0x30c   : > { %v6357_v59 = vsel %vm16527_vm8, %v13026_v56, %v13005_v18  ;;  %6136 = vmatprep.mubr.f32.mxu1 %v16387_v52  ;;  %vm16528_vm6 = vmmov %vm16524_vm5  ;;  %v13069_v53 = vpop.permute.xlu1 %13068 }
 0x30d   : > { %11703 = vmatmul.mubr.msk.f32.gmra.mrb[10].mxu0 %vm16528_vm6, %v5982_v33  ;;  %11709 = vmatmul.mubr.msk.f32.gmra.mrb[10].mxu1 %vm16524_vm5, %v5982_v33  ;;  %vm16529_vm15 = vmmov %vm16522_vm7  ;;  %v12097_v47 = vpack.c.bf16 %v6357_v59, %v6349_v13  ;;  %v15158_v51 = vpop.permute.xlu0 %13063 }
 0x30e   : > { %6207 = vmatprep.mubr.f32.mxu0 %v16387_v52  ;;  %v6351_v63 = vsel %vm16529_vm15, %v12996_v61, %v13000_v11  ;;  %6284 = vmatprep.mubr.f32.mxu1 %v16387_v52  ;;  %vm16530_vm11 = vmmov %vm16522_vm7  ;;  %v13040_v11 = vunpack.i.l.bf16 %v15098_v4  ;;  %v13056_v61 = vunpack.i.h.bf16 %v15140_v28  ;;  %v13066_v38 = vunpack.i.h.bf16 %v15158_v51 }
 0x30f   : > { %v12103_v18 = vpack.c.bf16 %v6359_v58, %v6351_v63  ;;  %v6354_v46 = vsel %vm16530_vm11, %v13030_v40, %v13031_v1  ;;  %vm16531_vm8 = vmmov %vm16522_vm7  ;;  %v13065_v41 = vunpack.i.l.bf16 %v15158_v51  ;;  %v13070_v58 = vunpack.i.l.bf16 %v13069_v53  ;;  %v6731_v51 = vld [vmem:[#allocation3 + $0x70] sm:$0xff] }
 0x310   : > { %v6356_v29 = vsel %vm16531_vm8, %v13035_v6, %v13036_v12  ;;  %v12106_v43 = vpack.c.bf16 %v6362_v17, %v6354_v46  ;;  %vm16532_vm6 = vmmov %vm16522_vm7  ;;  %v15176_v16 = vpop.permute.xlu1 %13078  ;;  %vm16536_vm8 = vcmask 785408  }
 0x311   : > { %v6364_v50 = vsel %vm16532_vm6, %v13060_v21, %v13061_v8  ;;  %vm16533_vm7 = vmmov %vm16524_vm5  ;;  %11720 = vmatmul.mubr.msk.f32.vlgmr.msra.gmra.mrb[12].mxu1 %vm16524_vm5, %v5981_v39  ;;  %v6780_v31 = vsel %vm16536_vm8, %v13065_v41, %v13066_v38  ;;  %v6363_v56 = vsel %vm16532_vm6, %v13051_v44, %v13060_v21  ;;  %v15183_v0 = vpop.permute.xlu0 %13073  ;;  %v13081_v25 = vunpack.i.h.bf16 %v15176_v16 }
 0x312   : > { %11714 = vmatmul.mubr.msk.f32.vlgmr.msra.gmra.mrb[12].mxu0 %vm16533_vm7, %v5981_v39  ;;  %v12112_v30 = vpack.c.bf16 %v6364_v50, %v6356_v29  ;;  %12105 = vmatpush1.bf16.msk.msra.mxu1 %vm14725_vm2, %v12103_v18  ;;  %vm16534_vm15 = vmmov %vm16532_vm6  ;;  %v13080_v63 = vunpack.i.l.bf16 %v15176_v16  ;;  %v13076_v8 = vunpack.i.h.bf16 %v15183_v0  ;;  %v13075_v21 = vunpack.i.l.bf16 %v15183_v0 }
 0x313   : > { %12099 = vmatpush1.bf16.msk.msra.mxu0 %vm14714_vm10, %v12097_v47  ;;  %6213 = vmatprep.mubr.f32.mxu0 %v16387_v52  ;;  %v6361_v39 = vsel %vm16534_vm15, %v13021_v32, %v13050_v57  ;;  %vm16535_vm11 = vmmov %vm16524_vm5 }
 0x314   : > { %12108 = vmatprep.subr.msk.bf16.mxu0 %vm14756_vm4, %v12106_v43  ;;  %6290 = vmatprep.mubr.f32.mxu1 %v16387_v52  ;;  %vm16537_vm7 = vmmov %vm16524_vm5  ;;  %v13094_v14 = vpop.permute.xlu1 %13093 }
 0x315   : > { %12114 = vmatprep.subr.msk.bf16.mxu1 %vm14791_vm12, %v12112_v30  ;;  %11721 = vmatmul.mubr.msk.f32.gmra.mrb[14].mxu1 %vm16537_vm7, %v5982_v33  ;;  %vm16538_vm5 = vmmov %vm16536_vm8  ;;  %v13096_v12 = vunpack.i.h.bf16 %v13094_v14  ;;  %vm16575_vm12 = vnez %v16442_v54 }
 0x316   : > { %11715 = vmatmul.mubr.msk.f32.gmra.mrb[14].mxu0 %vm16535_vm11, %v5982_v33  ;;  %v6778_v32 = vsel %vm16538_vm5, %v13055_v48, %v13056_v61  ;;  %vm16539_vm15 = vmmov %vm16532_vm6  ;;  %6547 = vmatprep.mubr.f32.mxu1 %v16387_v52  ;;  %v13071_v33 = vunpack.i.h.bf16 %v13069_v53 }
 0x317   : > { %6470 = vmatprep.mubr.f32.mxu0 %v16387_v52  ;;  %v6353_v10 = vsel %vm16539_vm15, %v13001_v42, %v13030_v40  ;;  %vm16540_vm11 = vmmov %vm16532_vm6  ;;  %v6399_v40 = vld [vmem:[#allocation3 + $0x68] sm:$0xff]  ;;  %vm16544_vm15 = vnez %v16431_v15 }
 0x318   : > { %v6355_v37 = vsel %vm16540_vm11, %v13031_v1, %v13035_v6  ;;  %vm16541_vm8 = vmmov %vm16538_vm5  ;;  %v12109_v62 = vpack.c.bf16 %v6361_v39, %v6353_v10  ;;  %v15202_v1 = vpop.permute.xlu0 %13083  ;;  %v13095_v6 = vunpack.i.l.bf16 %v13094_v14  ;;  %v15215_v18 = vpop.permute.xlu1 %13098 }
 0x319   : > { %v6770_v44 = vsel %vm16541_vm8, %v13040_v11, %v13041_v2  ;;  %vm16542_vm6 = vmmov %vm16538_vm5  ;;  %v12115_v59 = vpack.c.bf16 %v6363_v56, %v6355_v37  ;;  %v13086_v16 = vunpack.i.h.bf16 %v15202_v1  ;;  %v13101_v37 = vunpack.i.h.bf16 %v15215_v18 }
 0x31a   : > { %v6772_v57 = vsel %vm16542_vm6, %v13045_v26, %v13046_v5  ;;  %11726 = vmatmul.mubr.msk.f32.vlgmr.msra.gmra.mrb[8].mxu0 %vm16537_vm7, %v6398_v22  ;;  %v12118_v42 = vpack.c.bf16 %v6778_v32, %v6770_v44  ;;  %vm16543_vm5 = vmmov %vm16537_vm7 }
 0x31b   : > { %v12122_v13 = vpack.c.bf16 %v6780_v31, %v6772_v57  ;;  %11732 = vmatmul.mubr.msk.f32.vlgmr.msra.gmra.mrb[8].mxu1 %vm16543_vm5, %v6398_v22  ;;  %12111 = vmatpush1.bf16.msk.msra.mxu0 %vm16481_vm3, %v12109_v62  ;;  %vm16545_vm11 = vmmov %vm16542_vm6  ;;  %v13085_v31 = vunpack.i.l.bf16 %v15202_v1 }
 0x31c   : > { %12117 = vmatpush1.bf16.msk.msra.mxu1 %vm16544_vm15, %v12115_v59  ;;  %12119 = vmatprep.subr.bf16.mxu0 %v12118_v42  ;;  %v6769_v28 = vsel %vm16545_vm11, %v13070_v58, %v13040_v11  ;;  %vm16546_vm8 = vmmov %vm16542_vm6  ;;  %v13089_v47 = vpop.permute.xlu0 %13088 }
 0x31d   : > { %v6777_v17 = vsel %vm16546_vm8, %v13071_v33, %v13055_v48  ;;  %12123 = vmatprep.subr.bf16.mxu1 %v12122_v13  ;;  %6476 = vmatprep.mubr.f32.mxu0 %v16387_v52  ;;  %vm16547_vm6 = vmmov %vm16543_vm5  ;;  %v13091_v29 = vunpack.i.h.bf16 %v13089_v47  ;;  %v13090_v43 = vunpack.i.l.bf16 %v13089_v47 }
 0x31e   : > { %6553 = vmatprep.mubr.f32.mxu1 %v16387_v52  ;;  %11727 = vmatmul.mubr.msk.f32.gmra.mrb[10].mxu0 %vm16547_vm6, %v6399_v40  ;;  %vm16548_vm7 = vmmov %vm16546_vm8  ;;  %v12120_v11 = vpack.c.bf16 %v6777_v17, %v6769_v28 }
 0x31f   : > { %v6779_v46 = vsel %vm16548_vm7, %v13056_v61, %v13065_v41  ;;  %11733 = vmatmul.mubr.msk.f32.gmra.mrb[10].mxu1 %vm16543_vm5, %v6399_v40  ;;  %6624 = vmatprep.mubr.f32.mxu0 %v16387_v52  ;;  %vm16549_vm11 = vmmov %vm16548_vm7  ;;  %v15226_v61 = vpop.permute.xlu1 %13108  ;;  %v6776_v30 = vsel %vm16548_vm7, %v13080_v63, %v13081_v25 }
 0x320   : > { %6701 = vmatprep.mubr.f32.mxu1 %v16387_v52  ;;  %v6784_v50 = vsel %vm16549_vm11, %v13095_v6, %v13096_v12  ;;  %vm16550_vm8 = vmmov %vm16548_vm7  ;;  %v13111_v4 = vunpack.i.h.bf16 %v15226_v61  ;;  %v13110_v56 = vunpack.i.l.bf16 %v15226_v61 }
 0x321   : > { %v6771_v53 = vsel %vm16550_vm8, %v13041_v2, %v13045_v26  ;;  %vm16551_vm6 = vmmov %vm16543_vm5  ;;  %v12130_v2 = vpack.c.bf16 %v6784_v50, %v6776_v30  ;;  %v13104_v26 = vpop.permute.xlu0 %13103  ;;  %vm16556_vm8 = vcmask 777216  }
 0x322   : > { %v12124_v48 = vpack.c.bf16 %v6779_v46, %v6771_v53  ;;  %11738 = vmatmul.mubr.msk.f32.vlgmr.msra.gmra.mrb[12].mxu0 %vm16551_vm6, %v6398_v22  ;;  %vm16552_vm5 = vmmov %vm16548_vm7  ;;  %v13106_v0 = vunpack.i.h.bf16 %v13104_v26  ;;  %v13105_v32 = vunpack.i.l.bf16 %v13104_v26 }
 0x323   : > { %v6774_v41 = vsel %vm16552_vm5, %v13075_v21, %v13076_v8  ;;  %vm16553_vm15 = vmmov %vm16552_vm5  ;;  %12121 = vmatpush1.bf16.msra.mxu0 %v12120_v11  ;;  %6630 = vmatprep.mubr.f32.mxu0 %v16387_v52  ;;  %v15245_v62 = vpop.permute.xlu1 %13118  ;;  %v6783_v58 = vsel %vm16552_vm5, %v13091_v29, %v13095_v6 }
 0x324   : > { %v6782_v39 = vsel %vm16553_vm15, %v13090_v43, %v13091_v29  ;;  %vm16554_vm11 = vmmov %vm16551_vm6  ;;  %v7176_v57 = vsel %vm16556_vm8, %v13105_v32, %v13106_v0  ;;  %v13121_v47 = vunpack.i.h.bf16 %v15245_v62  ;;  %v13120_v29 = vunpack.i.l.bf16 %v15245_v62 }
 0x325   : > { %11744 = vmatmul.mubr.msk.f32.vlgmr.msra.gmra.mrb[12].mxu1 %vm16554_vm11, %v6398_v22  ;;  %v12126_v10 = vpack.c.bf16 %v6782_v39, %v6774_v41  ;;  %v13100_v22 = vunpack.i.l.bf16 %v15215_v18  ;;  %vm16555_vm15 = vmmov %vm16552_vm5  ;;  %v13114_v13 = vpop.permute.xlu0 %13113 }
 0x326   : > { %12125 = vmatpush1.bf16.msra.mxu1 %v12124_v48  ;;  %6707 = vmatprep.mubr.f32.mxu1 %v16387_v52  ;;  %v6781_v44 = vsel %vm16555_vm15, %v13066_v38, %v13090_v43  ;;  %vm16557_vm7 = vmmov %vm16556_vm8  ;;  %v13115_v17 = vunpack.i.l.bf16 %v13114_v13 }
 0x327   : > { %12131 = vmatprep.subr.bf16.mxu1 %v12130_v2  ;;  %11739 = vmatmul.mubr.msk.f32.gmra.mrb[14].mxu0 %vm16551_vm6, %v6399_v40  ;;  %v7168_v33 = vsel %vm16557_vm7, %v13085_v31, %v13086_v16  ;;  %vm16558_vm11 = vmmov %vm16551_vm6  ;;  %v13129_v45 = vpop.permute.xlu1 %13128 }
 0x328   : > { %12127 = vmatprep.subr.bf16.mxu0 %v12126_v10  ;;  %6871 = vmatprep.mubr.f32.mxu0 %v16387_v52  ;;  %vm16559_vm15 = vmmov %vm16552_vm5  ;;  %v12134_v14 = vpack.c.bf16 %v7176_v57, %v7168_v33  ;;  %v13130_v46 = vunpack.i.l.bf16 %v13129_v45  ;;  %v7167_v53 = vsel %vm16557_vm7, %v13115_v17, %v13085_v31 }
 0x329   : > { %11745 = vmatmul.mubr.msk.f32.gmra.mrb[14].mxu1 %vm16558_vm11, %v6399_v40  ;;  %v6773_v38 = vsel %vm16559_vm15, %v13046_v5, %v13075_v21  ;;  %vm16560_vm8 = vmmov %vm16557_vm7  ;;  %v7170_v40 = vsel %vm16557_vm7, %v13100_v22, %v13101_v37  ;;  %v13116_v5 = vunpack.i.h.bf16 %v13114_v13  ;;  %v13124_v25 = vpop.permute.xlu0 %13123  ;;  %v13131_v21 = vunpack.i.h.bf16 %v13129_v45 }
 0x32a   : > { %v7178_v59 = vsel %vm16560_vm8, %v13110_v56, %v13111_v4  ;;  %6948 = vmatprep.mubr.f32.mxu1 %v16387_v52  ;;  %vm16561_vm6 = vmmov %vm16552_vm5  ;;  %v12128_v12 = vpack.c.bf16 %v6781_v44, %v6773_v38  ;;  %vm16564_vm15 = vnez %v16421_v3  ;;  %v13126_v43 = vunpack.i.h.bf16 %v13124_v25  ;;  %v7216_v44 = vld [vmem:[#allocation3 + $0x80] sm:$0xff] }
 0x32b   : > { %v6775_v42 = vsel %vm16561_vm6, %v13076_v8, %v13080_v63  ;;  %vm16562_vm5 = vmmov %vm16558_vm11  ;;  %v12140_v28 = vpack.c.bf16 %v7178_v59, %v7170_v40  ;;  %v6732_v63 = vld [vmem:[#allocation3 + $0x78] sm:$0xff]  ;;  %vm16566_vm6 = vnez %v16437_v19  ;;  %v13125_v50 = vunpack.i.l.bf16 %v13124_v25 }
 0x32c   : > { %v12132_v6 = vpack.c.bf16 %v6783_v58, %v6775_v42  ;;  %11746 = vmatmul.mubr.msk.f32.vlgmr.msra.gmra.mrb[8].mxu0 %vm16562_vm5, %v6731_v51  ;;  %vm16563_vm11 = vmmov %vm16562_vm5 }
 0x32d   : > { %11748 = vmatmul.mubr.msk.f32.vlgmr.msra.gmra.mrb[8].mxu1 %vm16563_vm11, %v6731_v51  ;;  %12129 = vmatpush1.bf16.msra.mxu0 %v12128_v12  ;;  %vm16565_vm8 = vmmov %vm16557_vm7  ;;  %v13134_v48 = vpop.permute.xlu0 %13133 }
 0x32e   : > { %12133 = vmatpush1.bf16.msra.mxu1 %v12132_v6  ;;  %12136 = vmatprep.subr.msk.bf16.mxu0 %vm16564_vm15, %v12134_v14  ;;  %v7177_v8 = vsel %vm16565_vm8, %v13106_v0, %v13110_v56  ;;  %vm16567_vm5 = vmmov %vm16557_vm7  ;;  %v13136_v39 = vunpack.i.h.bf16 %v13134_v48  ;;  %v13135_v2 = vunpack.i.l.bf16 %v13134_v48 }
 0x32f   : > { %12142 = vmatprep.subr.msk.bf16.mxu1 %vm16566_vm6, %v12140_v28  ;;  %6877 = vmatprep.mubr.f32.mxu0 %v16387_v52  ;;  %v7175_v11 = vsel %vm16567_vm5, %v13116_v5, %v13105_v32  ;;  %vm16568_vm8 = vmmov %vm16563_vm11  ;;  %v7174_v0 = vsel %vm16567_vm5, %v13125_v50, %v13126_v43 }
 0x330   : > { %6954 = vmatprep.mubr.f32.mxu1 %v16387_v52  ;;  %11747 = vmatmul.mubr.msk.f32.gmra.mrb[10].mxu0 %vm16563_vm11, %v6732_v63  ;;  %vm16569_vm6 = vmmov %vm16567_vm5  ;;  %v12137_v56 = vpack.c.bf16 %v7175_v11, %v7167_v53 }
 0x331   : > { %11749 = vmatmul.mubr.msk.f32.gmra.mrb[10].mxu1 %vm16568_vm8, %v6732_v63  ;;  %v7169_v30 = vsel %vm16569_vm6, %v13086_v16, %v13100_v22  ;;  %vm16570_vm15 = vmmov %vm16567_vm5  ;;  %7025 = vmatprep.mubr.f32.mxu0 %v16387_v52  ;;  %v7179_v16 = vsel %vm16567_vm5, %v13111_v4, %v13130_v46  ;;  %v7217_v4 = vld [vmem:[#allocation3 + $0x88] sm:$0xff] }
 0x332   : > { %v7180_v41 = vsel %vm16570_vm15, %v13130_v46, %v13131_v21  ;;  %7102 = vmatprep.mubr.f32.mxu1 %v16387_v52  ;;  %v12143_v31 = vpack.c.bf16 %v7177_v8, %v7169_v30  ;;  %vm16571_vm7 = vmmov %vm16567_vm5  ;;  %vm16574_vm15 = vnez %v16440_v55  ;;  %v7553_v18 = vpop.permute.xlu1 %7552 }
 0x333   : > { %v7172_v26 = vsel %vm16571_vm7, %v13120_v29, %v13121_v47  ;;  %vm16572_vm11 = vmmov %vm16567_vm5  ;;  %vm16576_vm7 = vnez %v16445_v36 }
 0x334   : > { %v7182_v32 = vsel %vm16572_vm11, %v13135_v2, %v13136_v39  ;;  %v12146_v10 = vpack.c.bf16 %v7180_v41, %v7172_v26  ;;  %11750 = vmatmul.mubr.msk.f32.vlgmr.msra.gmra.mrb[12].mxu0 %vm16568_vm8, %v6731_v51  ;;  %vm16573_vm6 = vmmov %vm16568_vm8 }
 0x335   : > { %v12152_v1 = vpack.c.bf16 %v7182_v32, %v7174_v0  ;;  %11752 = vmatmul.mubr.msk.f32.vlgmr.msra.gmra.mrb[12].mxu1 %vm16573_vm6, %v6731_v51  ;;  %12139 = vmatpush1.bf16.msk.msra.mxu0 %vm16574_vm15, %v12137_v56  ;;  %vm16577_vm11 = vmmov %vm16567_vm5 }
 0x336   : > { %12145 = vmatpush1.bf16.msk.msra.mxu1 %vm16575_vm12, %v12143_v31  ;;  %12148 = vmatprep.subr.msk.bf16.mxu0 %vm14906_vm9, %v12146_v10  ;;  %v7181_v22 = vsel %vm16577_vm11, %v13131_v21, %v13135_v2  ;;  %vm16578_vm8 = vmmov %vm16573_vm6 }
 0x337   : > { %7031 = vmatprep.mubr.f32.mxu0 %v16387_v52  ;;  %7108 = vmatprep.mubr.f32.mxu1 %v16387_v52  ;;  %vm16579_vm9 = vmmov %vm16567_vm5  ;;  %v7558_v12 = vpop.permute.xlu0 %7557 }
 0x338   : > { %12154 = vmatprep.subr.msk.bf16.mxu1 %vm16576_vm7, %v12152_v1  ;;  %11751 = vmatmul.mubr.msk.f32.gmra.mrb[14].mxu0 %vm16578_vm8, %v6732_v63  ;;  %v7171_v57 = vsel %vm16579_vm9, %v13101_v37, %v13120_v29  ;;  %vm16580_vm7 = vmmov %vm16567_vm5 }
 0x339   : > { %11753 = vmatmul.mubr.msk.f32.gmra.mrb[14].mxu1 %vm16573_vm6, %v6732_v63  ;;  %7288 = vmatprep.mubr.f32.mxu0 %v16387_v52  ;;  %v7173_v62 = vsel %vm16580_vm7, %v13121_v47, %v13125_v50  ;;  %v12149_v61 = vpack.c.bf16 %v7179_v16, %v7171_v57  ;;  %vm16581_vm5 = vmmov %vm16573_vm6 }
 0x33a   : > { %7365 = vmatprep.mubr.f32.mxu1 %v16387_v52  ;;  %v12155_v33 = vpack.c.bf16 %v7181_v22, %v7173_v62  ;;  %vm16582_vm11 = vmmov %vm16581_vm5 }
 0x33b   : > { %vm16583_vm9 = vmmov %vm16581_vm5 }
 0x33c   : > { %11758 = vmatmul.mubr.msk.f32.vlgmr.msra.gmra.mrb[8].mxu0 %vm16581_vm5, %v7216_v44  ;;  %vm16584_vm7 = vmmov %vm16581_vm5 }
 0x33d   : > { %11764 = vmatmul.mubr.msk.f32.vlgmr.msra.gmra.mrb[8].mxu1 %vm16582_vm11, %v7216_v44  ;;  %12151 = vmatpush1.bf16.msk.msra.mxu0 %vm14915_vm14, %v12149_v61  ;;  %vm16585_vm8 = vmmov %vm16581_vm5 }
 0x33e   : > { %12157 = vmatpush1.bf16.msk.msra.mxu1 %vm14899_vm13, %v12155_v33  ;;  %7294 = vmatprep.mubr.f32.mxu0 %v16387_v52  ;;  %vm16586_vm6 = vmmov %vm16581_vm5 }
 0x33f   : > { %7371 = vmatprep.mubr.f32.mxu1 %v16387_v52  ;;  %vm16587_vm11 = vmmov %vm16581_vm5 }
 0x340   : > { %11759 = vmatmul.mubr.msk.f32.gmra.mrb[10].mxu0 %vm16583_vm9, %v7217_v4  ;;  %vm16589_vm9 = vcmask 261120  }
 0x341   : > { %11765 = vmatmul.mubr.msk.f32.gmra.mrb[10].mxu1 %vm16584_vm7, %v7217_v4  ;;  %7442 = vmatprep.mubr.f32.mxu0 %v16387_v52  ;;  %vm16590_vm7 = vmmov %vm16589_vm9 }
 0x342   : > { %7519 = vmatprep.mubr.f32.mxu1 %v16387_v52 }
 0x344   : > { %11770 = vmatmul.mubr.msk.f32.vlgmr.msra.gmra.mrb[12].mxu0 %vm16585_vm8, %v7216_v44  ;;  %vm16591_vm8 = vmmov %vm16590_vm7 }
 0x345   : > { %11776 = vmatmul.mubr.msk.f32.vlgmr.msra.gmra.mrb[12].mxu1 %vm16586_vm6, %v7216_v44  ;;  %7448 = vmatprep.mubr.f32.mxu0 %v16387_v52  ;;  %vm16592_vm6 = vmmov %vm16590_vm7 }
 0x346   : > { %7525 = vmatprep.mubr.f32.mxu1 %v16387_v52 }
 0x348   : > { %11771 = vmatmul.mubr.msk.f32.gmra.mrb[14].mxu0 %vm16581_vm5, %v7217_v4  ;;  %vm16593_vm5 = vmmov %vm16592_vm6 }
 0x349   : > { %11777 = vmatmul.mubr.msk.f32.gmra.mrb[14].mxu1 %vm16587_vm11, %v7217_v4  ;;  %7871 = vmatprep.mubr.f32.mxu0 %v16387_v52  ;;  %vm16594_vm11 = vmmov %vm16593_vm5 }
 0x34a   : > { %7948 = vmatprep.mubr.f32.mxu1 %v16387_v52 }
 0x40f   : > { %v7290_v37 = vpop.f32.mrb[8].mxu0 }
 0x410   : > { %v7367_v58 = vpop.f32.mrb[8].mxu1  ;;  %v7560_v13 = vadd.f32 %v7553_v18, %v7290_v37  ;;  %v7292_v38 = vpop.f32.mrb[9].mxu0 }
 0x411   : > { %v7562_v51 = vadd.f32 %v7553_v18, %v7367_v58  ;;  %v7369_v59 = vpop.f32.mrb[9].mxu1  ;;  %v7561_v14 = vadd.f32 %v7553_v18, %v7292_v38 }
 0x412   : > { %v7563_v42 = vadd.f32 %v7553_v18, %v7369_v59  ;;  %v15334_v40 = vmax.f32 %v7560_v13, 0.0 }
 0x413   : > { %v15336_v6 = vmax.f32 %v7562_v51, 0.0  ;;  %v15338_v45 = vmax.f32 %v7561_v14, 0.0  ;;  %v7296_v5 = vpop.f32.mrb[10].mxu0 }
 0x414   : > { %v15340_v28 = vmax.f32 %v7563_v42, 0.0  ;;  %v7373_v17 = vpop.f32.mrb[10].mxu1  ;;  %v7568_v25 = vadd.f32 %v7558_v12, %v7296_v5  ;;  %v7298_v46 = vpop.f32.mrb[11].mxu0 }
 0x415   : > { %v7570_v21 = vadd.f32 %v7558_v12, %v7373_v17  ;;  %v7375_v63 = vpop.f32.mrb[11].mxu1  ;;  %v7569_v8 = vadd.f32 %v7558_v12, %v7298_v46  ;;  %v15348_v43 = vpack.i.bf16 %v15338_v45, %v15334_v40 }
 0x416   : > { %v7571_v47 = vadd.f32 %v7558_v12, %v7375_v63  ;;  %v15344_v29 = vpack.i.bf16 %v15340_v28, %v15336_v6  ;;  %v15350_v50 = vmax.f32 %v7568_v25, 0.0 }
 0x417   : > { %v15352_v53 = vmax.f32 %v7570_v21, 0.0  ;;  %v15354_v11 = vmax.f32 %v7569_v8, 0.0  ;;  %13143 = vrot.lane.b32.xlu1 %v15348_v43, %s13574_s30  ;;  %v7444_v41 = vpop.f32.mrb[12].mxu0 }
 0x418   : > { %v15356_v48 = vmax.f32 %v7571_v47, 0.0  ;;  %13148 = vrot.lane.b32.xlu0 %v15344_v29, %s13574_s30  ;;  %v7521_v30 = vpop.f32.mrb[12].mxu1  ;;  %v7564_v2 = vadd.f32 %v7553_v18, %v7444_v41  ;;  %v7446_v31 = vpop.f32.mrb[13].mxu0  ;;  %v15412_v46 = vpack.i.bf16 %v15350_v50, %v15334_v40 }
 0x419   : > { %v7566_v39 = vadd.f32 %v7553_v18, %v7521_v30  ;;  %v7523_v26 = vpop.f32.mrb[13].mxu1  ;;  %v7565_v56 = vadd.f32 %v7553_v18, %v7446_v31  ;;  %v13162_v10 = vpack.i.bf16 %v15354_v11, %v15350_v50  ;;  %v15398_v5 = vpack.i.bf16 %v15352_v53, %v15354_v11 }
 0x41a   : > { %v7567_v0 = vadd.f32 %v7553_v18, %v7523_v26  ;;  %v13167_v32 = vpack.i.bf16 %v15356_v48, %v15352_v53  ;;  %v15368_v16 = vmax.f32 %v7564_v2, 0.0 }
 0x41b   : > { %v15366_v1 = vmax.f32 %v7566_v39, 0.0  ;;  %v15370_v22 = vmax.f32 %v7565_v56, 0.0  ;;  %13158 = vrot.lane.b32.xlu1 %v15344_v29, %s13575_s15  ;;  %v7450_v62 = vpop.f32.mrb[14].mxu0 }
 0x41c   : > { %16588 = vst [vmem:[#allocation9_spill] sm:$0xff] %v15368_v16  ;;  %v15372_v44 = vmax.f32 %v7567_v0, 0.0  ;;  %v7527_v57 = vpop.f32.mrb[14].mxu1  ;;  %13153 = vrot.lane.b32.xlu0 %v15348_v43, %s13575_s15  ;;  %v7572_v33 = vadd.f32 %v7558_v12, %v7450_v62  ;;  %v7452_v4 = vpop.f32.mrb[15].mxu0  ;;  %v15408_v21 = vpack.i.bf16 %v15368_v16, %v15340_v28 }
 0x41d   : > { %v7574_v61 = vadd.f32 %v7558_v12, %v7527_v57  ;;  %v7529_v18 = vpop.f32.mrb[15].mxu1  ;;  %v7573_v37 = vadd.f32 %v7558_v12, %v7452_v4  ;;  %v13177_v51 = vpack.i.bf16 %v15370_v22, %v15368_v16  ;;  %v15420_v8 = vpack.i.bf16 %v15366_v1, %v15370_v22 }
 0x41e   : > { %v7575_v58 = vadd.f32 %v7558_v12, %v7529_v18  ;;  %v13182_v13 = vpack.i.bf16 %v15372_v44, %v15366_v1  ;;  %v15384_v59 = vmax.f32 %v7572_v33, 0.0  ;;  %v15394_v12 = vpack.i.bf16 %v15336_v6, %v15338_v45 }
 0x41f   : > { %v15382_v38 = vmax.f32 %v7574_v61, 0.0  ;;  %v15386_v14 = vmax.f32 %v7573_v37, 0.0  ;;  %13163 = vrot.lane.b32.xlu1 %v13162_v10, %s13574_s30 }
 0x420   : > { %v15388_v42 = vmax.f32 %v7575_v58, 0.0  ;;  %13168 = vrot.lane.b32.xlu0 %v13167_v32, %s13574_s30  ;;  %v15416_v63 = vpack.i.bf16 %v15384_v59, %v15356_v48 }
 0x421   : > { %v13187_v25 = vpack.i.bf16 %v15386_v14, %v15384_v59  ;;  %v15424_v47 = vpack.i.bf16 %v15382_v38, %v15386_v14 }
 0x422   : > { %v13192_v17 = vpack.i.bf16 %v15388_v42, %v15382_v38 }
 0x423   : > { %13183 = vrot.lane.b32.xlu1 %v13182_v13, %s13574_s30 }
 0x424   : > { %13173 = vrot.lane.b32.xlu0 %v13162_v10, %s13575_s15 }
 0x427   : > { %13193 = vrot.lane.b32.xlu1 %v13192_v17, %s13574_s30 }
 0x428   : > { %13178 = vrot.lane.b32.xlu0 %v13177_v51, %s13574_s30 }
 0x42b   : > { %13198 = vrot.lane.b32.xlu1 %v13167_v32, %s13575_s15 }
 0x42c   : > { %13188 = vrot.lane.b32.xlu0 %v13187_v25, %s13574_s30 }
 0x42f   : > { %13208 = vrot.lane.b32.xlu1 %v13177_v51, %s13575_s15 }
 0x430   : > { %13203 = vrot.lane.b32.xlu0 %v16387_v52, %s13575_s15 }
 0x433   : > { %13218 = vrot.lane.b32.xlu1 %v15348_v43, %s13576_s16 }
 0x434   : > { %13213 = vrot.lane.b32.xlu0 %v13182_v13, %s13575_s15 }
 0x437   : > { %13228 = vrot.lane.b32.xlu1 %v13187_v25, %s13575_s15 }
 0x438   : > { %13223 = vrot.lane.b32.xlu0 %v15344_v29, %s13576_s16 }
 0x43b   : > { %13233 = vrot.lane.b32.xlu1 %v13162_v10, %s13576_s16 }
 0x43c   : > { %13238 = vrot.lane.b32.xlu0 %v13192_v17, %s13575_s15 }
 0x43f   : > { %13248 = vrot.lane.b32.xlu1 %v16387_v52, %s13576_s16 }
 0x440   : > { %13243 = vrot.lane.b32.xlu0 %v13167_v32, %s13576_s16 }
 0x443   : > { %13258 = vrot.lane.b32.xlu1 %v13182_v13, %s13576_s16 }
 0x444   : > { %13253 = vrot.lane.b32.xlu0 %v13177_v51, %s13576_s16 }
 0x447   : > { %13273 = vrot.lane.b32.xlu1 %v13192_v17, %s13576_s16 }
 0x448   : > { %13263 = vrot.lane.b32.xlu0 %v15348_v43, %s13577_s17  ;;  %v15500_v43 = vpack.i.bf16 %v16387_v52, %v15388_v42 }
 0x44b   : > { %13278 = vrot.lane.b32.xlu1 %v15344_v29, %s13577_s17  ;;  %v15488_v29 = vpack.i.bf16 %v16387_v52, %v15372_v44 }
 0x44c   : > { %13268 = vrot.lane.b32.xlu0 %v13187_v25, %s13576_s16 }
 0x44f   : > { %13288 = vrot.lane.b32.xlu1 %v13167_v32, %s13577_s17  ;;  %v13139_v32 = vpop.permute.xlu1 %13138 }
 0x450   : > { %13283 = vrot.lane.b32.xlu0 %v13162_v10, %s13577_s17  ;;  %v13140_v18 = vunpack.i.l.bf16 %v13139_v32 }
 0x453   : > { %13298 = vrot.lane.b32.xlu1 %v13177_v51, %s13577_s17 }
 0x454   : > { %13293 = vrot.lane.b32.xlu0 %v16387_v52, %s13577_s17 }
 0x457   : > { %13308 = vrot.lane.b32.xlu1 %v13187_v25, %s13577_s17 }
 0x458   : > { %13303 = vrot.lane.b32.xlu0 %v13182_v13, %s13577_s17  ;;  %v13141_v13 = vunpack.i.h.bf16 %v13139_v32 }
 0x45b   : > { %13318 = vrot.lane.b32.xlu1 %v15394_v12, %s13578_s18 }
 0x45c   : > { %13313 = vrot.lane.b32.xlu0 %v13192_v17, %s13577_s17 }
 0x45f   : > { %13328 = vrot.lane.b32.xlu1 %v15398_v5, %s13578_s18 }
 0x460   : > { %13323 = vrot.lane.b32.xlu0 %v15408_v21, %s13578_s18 }
 0x463   : > { %13338 = vrot.lane.b32.xlu1 %v15412_v46, %s13578_s18 }
 0x464   : > { %13333 = vrot.lane.b32.xlu0 %v15416_v63, %s13578_s18 }
 0x467   : > { %13348 = vrot.lane.b32.xlu1 %v15488_v29, %s13578_s18 }
 0x468   : > { %13343 = vrot.lane.b32.xlu0 %v15420_v8, %s13578_s18 }
 0x46b   : > { %13358 = vrot.lane.b32.xlu1 %v15408_v21, %s13579_s19 }
 0x46c   : > { %13353 = vrot.lane.b32.xlu0 %v15394_v12, %s13579_s19 }
 0x46f   : > { %13373 = vrot.lane.b32.xlu1 %v15500_v43, %s13578_s18 }
 0x470   : > { %13363 = vrot.lane.b32.xlu0 %v15398_v5, %s13579_s19 }
 0x473   : > { %13378 = vrot.lane.b32.xlu1 %v15416_v63, %s13579_s19 }
 0x474   : > { %13368 = vrot.lane.b32.xlu0 %v15424_v47, %s13578_s18 }
 0x477   : > { %13388 = vrot.lane.b32.xlu1 %v15420_v8, %s13579_s19 }
 0x478   : > { %13383 = vrot.lane.b32.xlu0 %v15412_v46, %s13579_s19 }
 0x47b   : > { %13398 = vrot.lane.b32.xlu1 %v15394_v12, %s13580_s20 }
 0x47c   : > { %13393 = vrot.lane.b32.xlu0 %v15488_v29, %s13579_s19 }
 0x47f   : > { %13408 = vrot.lane.b32.xlu1 %v15424_v47, %s13579_s19 }
 0x480   : > { %13403 = vrot.lane.b32.xlu0 %v15408_v21, %s13580_s20 }
 0x483   : > { %13413 = vrot.lane.b32.xlu1 %v15398_v5, %s13580_s20 }
 0x484   : > { %13418 = vrot.lane.b32.xlu0 %v15500_v43, %s13579_s19 }
 0x487   : > { %13428 = vrot.lane.b32.xlu1 %v15412_v46, %s13580_s20 }
 0x488   : > { %13423 = vrot.lane.b32.xlu0 %v15416_v63, %s13580_s20 }
 0x489   : > { %v13144_v57 = vpop.permute.xlu1 %13143 }
 0x48a   : > { %v15530_v10 = vpop.permute.xlu0 %13148  ;;  %v13146_v61 = vunpack.i.h.bf16 %v13144_v57  ;;  %v13145_v58 = vunpack.i.l.bf16 %v13144_v57 }
 0x48b   : > { %13438 = vrot.lane.b32.xlu1 %v15488_v29, %s13580_s20  ;;  %v13150_v62 = vunpack.i.l.bf16 %v15530_v10  ;;  %v16273_v37 = vunpack.i.h.bf16 %v15530_v10 }
 0x48c   : > { %13433 = vrot.lane.b32.xlu0 %v15420_v8, %s13580_s20  ;;  %v7769_v57 = vsel %vm16590_vm7, %v13140_v18, %v13145_v58  ;;  %vm16596_vm7 = vmmov %vm16593_vm5 }
 0x48d   : > { %v15539_v4 = vpop.permute.xlu1 %13158  ;;  %v7771_v51 = vsel %vm16589_vm9, %v13146_v61, %v13150_v62  ;;  %v7772_v32 = vsel %vm16592_vm6, %v13150_v62, %v16273_v37  ;;  %vm16595_vm9 = vmmov %vm16593_vm5 }
 0x48e   : > { %v15537_v33 = vpop.permute.xlu0 %13153  ;;  %vm16598_vm6 = vmmov %vm16593_vm5 }
 0x48f   : > { %13453 = vrot.lane.b32.xlu1 %v15500_v43, %s13580_s20 }
 0x490   : > { %13443 = vrot.lane.b32.xlu0 %v15394_v12, %s13581_s29  ;;  %v7770_v12 = vsel %vm16591_vm8, %v13145_v58, %v13146_v61  ;;  %vm16597_vm8 = vmmov %vm16593_vm5 }
 0x491   : > { %v13164_v25 = vpop.permute.xlu1 %13163 }
 0x492   : > { %v15547_v17 = vpop.permute.xlu0 %13168  ;;  %v13166_v31 = vunpack.i.h.bf16 %v13164_v25  ;;  %v13165_v39 = vunpack.i.l.bf16 %v13164_v25 }
 0x493   : > { %v13171_v56 = vunpack.i.h.bf16 %v15547_v17  ;;  %v13170_v0 = vunpack.i.l.bf16 %v15547_v17  ;;  %13458 = vrot.lane.b32.xlu1 %v15408_v21, %s13581_s29 }
 0x494   : > { %13448 = vrot.lane.b32.xlu0 %v15424_v47, %s13580_s20  ;;  %v7777_v2 = vsel %vm16594_vm11, %v13141_v13, %v13165_v39  ;;  %v7778_v25 = vsel %vm16595_vm9, %v13165_v39, %v13166_v31  ;;  %v16274_v13 = vunpack.i.h.bf16 %v15539_v4  ;;  %vm16601_vm9 = vcmask 269312   ;;  %s16199_s20 = scalar_lea.vmem %s16219_s7, %s11956_s28 }
 0x495   : > { %v7779_v26 = vsel %vm16593_vm5, %v13166_v31, %v13170_v0  ;;  %v7780_v18 = vsel %vm16596_vm7, %v13170_v0, %v13171_v56  ;;  %v12160_v41 = vpack.c.bf16 %v7777_v2, %v7769_v57  ;;  %v13184_v16 = vpop.permute.xlu1 %13183  ;;  %v12158_v61 = vpack.c.bf16 %v7778_v25, %v7770_v12  ;;  %v15572_v0 = vld [vmem:[#allocation5 + $0x10] sm:$0xff]  ;;  %vm16602_vm7 = vmmov %vm16598_vm6 }
 0x496   : > { %v12164_v21 = vpack.c.bf16 %v7779_v26, %v7771_v51  ;;  %v15566_v30 = vpop.permute.xlu0 %13173  ;;  %v12162_v58 = vpack.c.bf16 %v7780_v18, %v7772_v32  ;;  %v13186_v62 = vunpack.i.h.bf16 %v13184_v16  ;;  %v13185_v37 = vunpack.i.l.bf16 %v13184_v16 }
 0x497   : > { %12159 = vmatprep.subr.bf16.mxu0 %v12158_v61  ;;  %13468 = vrot.lane.b32.xlu1 %v15416_v63, %s13581_s29  ;;  %v13160_v51 = vunpack.i.l.bf16 %v15539_v4  ;;  %vm16599_vm5 = vcmask 130048   ;;  %v13156_v18 = vunpack.i.h.bf16 %v15537_v33  ;;  %v13176_v61 = vunpack.i.h.bf16 %v15566_v30 }
 0x498   : > { %12163 = vmatprep.subr.bf16.mxu1 %v12162_v58  ;;  %13463 = vrot.lane.b32.xlu0 %v15398_v5, %s13581_s29  ;;  %v7776_v16 = vsel %vm16597_vm8, %v13185_v37, %v13186_v62  ;;  %vm16600_vm11 = vmmov %vm16599_vm5  ;;  %v15597_v62 = vld [vmem:[#allocation5 + $0x18] sm:$0xff] }
 0x499   : > { %12161 = vmatpush1.bf16.msra.mxu0 %v12160_v41  ;;  %12165 = vmatpush1.bf16.msra.mxu1 %v12164_v21  ;;  %v13194_v39 = vpop.permute.xlu1 %13193  ;;  %v7683_v21 = vsel %vm16601_vm9, %v13160_v51, %v16274_v13  ;;  %vm16603_vm8 = vmmov %vm16601_vm9 }
 0x49a   : > { %v13179_v31 = vpop.permute.xlu0 %13178  ;;  %v13196_v2 = vunpack.i.h.bf16 %v13194_v39  ;;  %v13195_v26 = vunpack.i.l.bf16 %v13194_v39  ;;  %v13175_v39 = vunpack.i.l.bf16 %v15566_v30  ;;  %vm16605_vm9 = vmmov %vm16600_vm11 }
 0x49b   : > { %v13181_v57 = vunpack.i.h.bf16 %v13179_v31  ;;  %13478 = vrot.lane.b32.xlu1 %v15420_v8, %s13581_s29  ;;  %v13180_v58 = vunpack.i.l.bf16 %v13179_v31 }
 0x49c   : > { %13473 = vrot.lane.b32.xlu0 %v15412_v46, %s13581_s29  ;;  %v7784_v5 = vsel %vm16598_vm6, %v13195_v26, %v13196_v2  ;;  %11778 = vmatmul.mubr.msk.f32.vlgmr.msra.gmra.mrb[16].mxu0 %vm16599_vm5, %v15572_v0  ;;  %vm16604_vm5 = vmmov %vm16598_vm6 }
 0x49d   : > { %v15582_v63 = vpop.permute.xlu1 %13198  ;;  %11780 = vmatmul.mubr.msk.f32.vlgmr.msra.gmra.mrb[16].mxu1 %vm16600_vm11, %v15572_v0  ;;  %v12170_v12 = vpack.c.bf16 %v7784_v5, %v7776_v16  ;;  %7877 = vmatprep.mubr.f32.mxu0 %v16387_v52  ;;  %v7775_v2 = vsel %vm16602_vm7, %v13181_v57, %v13185_v37  ;;  %vm16607_vm7 = vmmov %vm16604_vm5 }
 0x49e   : > { %v13189_v41 = vpop.permute.xlu0 %13188  ;;  %v16275_v32 = vunpack.i.h.bf16 %v15582_v63  ;;  %v13200_v8 = vunpack.i.l.bf16 %v15582_v63  ;;  %7954 = vmatprep.mubr.f32.mxu1 %v16387_v52 }
 0x49f   : > { %v13191_v25 = vunpack.i.h.bf16 %v13189_v41  ;;  %v13190_v46 = vunpack.i.l.bf16 %v13189_v41  ;;  %12171 = vmatprep.subr.bf16.mxu1 %v12170_v12  ;;  %13488 = vrot.lane.b32.xlu1 %v15424_v47, %s13581_s29  ;;  %v11284_v12 = vld [vmem:[%s16218_s6] sm:$0xff] }
 0x4a0   : > { %v7691_v16 = vsel %vm16603_vm8, %v13200_v8, %v16275_v32  ;;  %13483 = vrot.lane.b32.xlu0 %v15488_v29, %s13581_s29  ;;  %11779 = vmatmul.mubr.msk.f32.gmra.mrb[18].mxu0 %vm16600_vm11, %v15597_v62  ;;  %v7690_v17 = vsel %vm16603_vm8, %v13176_v61, %v13200_v8 }
 0x4a1   : > { %v7783_v5 = vsel %vm16598_vm6, %v13191_v25, %v13195_v26  ;;  %v12180_v41 = vpack.c.bf16 %v7691_v16, %v7683_v21  ;;  %v7781_v31 = vsel %vm16604_vm5, %v13171_v56, %v13190_v46  ;;  %v15612_v30 = vpop.permute.xlu1 %13208  ;;  %v13155_v26 = vunpack.i.l.bf16 %v15537_v33  ;;  %11781 = vmatmul.mubr.msk.f32.gmra.mrb[18].mxu1 %vm16605_vm9, %v15597_v62  ;;  %vm16608_vm6 = vmmov %vm16604_vm5  ;;  %8025 = vmatprep.mubr.f32.mxu0 %v16387_v52 }
 0x4a2   : > { %v12172_v13 = vpack.c.bf16 %v7783_v5, %v7775_v2  ;;  %v13204_v37 = vpop.permute.xlu0 %13203  ;;  %v16606_v56 = vunpack.i.h.bf16 %v15530_v10  ;;  %v7782_v21 = vsel %vm16608_vm6, %v13190_v46, %v13191_v25  ;;  %vm16609_vm5 = vmmov %vm16603_vm8  ;;  %8102 = vmatprep.mubr.f32.mxu1 %v16387_v52 }
 0x4a3   : > { %v13206_v32 = vunpack.i.h.bf16 %v13204_v37  ;;  %v13205_v47 = vunpack.i.l.bf16 %v13204_v37  ;;  %v7682_v33 = vsel %vm16609_vm5, %v13156_v18, %v13160_v51  ;;  %vm16610_vm14 = vmmov %vm16609_vm5  ;;  %11288 = vperm.xlu1 %12776, %v11284_v12  }
 0x4a4   : > { %v7773_v29 = vsel %vm16607_vm7, %v16606_v56, %v13180_v58  ;;  %12173 = vmatpush1.bf16.msra.mxu1 %v12172_v13  ;;  %v7689_v2 = vsel %vm16610_vm14, %v13175_v39, %v13176_v61  ;;  %vm16611_vm11 = vmmov %vm16608_vm6  ;;  %13493 = vrot.lane.b32.xlu0 %v15500_v43, %s13581_s29  ;;  %v12183_v46 = vpack.c.bf16 %v7690_v17, %v7682_v33  ;;  %v13211_v43 = vunpack.i.h.bf16 %v15612_v30  ;;  %v15668_v33 = vld [vmem:[#allocation5] sm:$0xff] }
 0x4a5   : > { %v12168_v16 = vpack.c.bf16 %v7781_v31, %v7773_v29  ;;  %v7774_v5 = vsel %vm16611_vm11, %v13180_v58, %v13181_v57  ;;  %vm16612_vm9 = vmmov %vm16609_vm5  ;;  %12182 = vmatprep.subr.msk.bf16.mxu1 %vm14692_vm1, %v12180_v41  ;;  %v15637_v13 = vpop.permute.xlu1 %13218  ;;  %v11285_v57 = vld [vmem:[%s16218_s6 + $0x8] sm:$0xff]  ;;  %v13210_v61 = vunpack.i.l.bf16 %v15612_v30  ;;  %v16619_v29 = vunpack.i.h.bf16 %v15582_v63 }
 0x4a6   : > { %v7688_v37 = vsel %vm16612_vm9, %v13206_v32, %v13175_v39  ;;  %vm16613_vm13 = vmmov %vm16609_vm5  ;;  %v12166_v8 = vpack.c.bf16 %v7782_v21, %v7774_v5  ;;  %v13214_v51 = vpop.permute.xlu0 %13213  ;;  %v13220_v39 = vunpack.i.l.bf16 %v15637_v13 }
 0x4a7   : > { %v7680_v10 = vsel %vm16613_vm13, %v13205_v47, %v13155_v26  ;;  %vm16614_vm7 = vmmov %vm16609_vm5  ;;  %vm16615_vm13 = vcmask 130048   ;;  %v13216_v30 = vunpack.i.h.bf16 %v13214_v51  ;;  %v13215_v47 = vunpack.i.l.bf16 %v13214_v51 }
 0x4a8   : > { %v7681_v25 = vsel %vm16614_vm7, %v13155_v26, %v13156_v18  ;;  %12167 = vmatprep.subr.bf16.mxu0 %v12166_v8  ;;  %11784 = vmatmul.mubr.msk.f32.vlgmr.msra.gmra.mrb[20].mxu1 %vm16615_vm13, %v15572_v0  ;;  %v12177_v58 = vpack.c.bf16 %v7688_v37, %v7680_v10  ;;  %v13221_v18 = vunpack.i.h.bf16 %v15637_v13  ;;  %vm16616_vm14 = vmmov %vm16615_vm13  ;;  %vm16623_vm7 = vcmask 252928  }
 0x4a9   : > { %v12174_v32 = vpack.c.bf16 %v7689_v2, %v7681_v25  ;;  %12169 = vmatpush1.bf16.msra.mxu0 %v12168_v16  ;;  %12185 = vmatpush1.bf16.msk.msra.mxu1 %vm14725_vm2, %v12183_v46  ;;  %v13229_v41 = vpop.permute.xlu1 %13228  ;;  %vm16617_vm8 = vmmov %vm16615_vm13  ;;  %v16621_v2 = vunpack.i.h.bf16 %v15539_v4 }
 0x4aa   : > { %11293 = vperm.xlu0 %12775, %v11285_v57   ;;  %v15654_v31 = vpop.permute.xlu0 %13223  ;;  %v13231_v12 = vunpack.i.h.bf16 %v13229_v41  ;;  %v13230_v26 = vunpack.i.l.bf16 %v13229_v41  ;;  %8108 = vmatprep.mubr.f32.mxu1 %v16387_v52  ;;  %vm16618_vm6 = vmmov %vm16609_vm5  ;;  %v8466_v16 = vsel %vm16623_vm7, %v13220_v39, %v13221_v18 }
 0x4ab   : > { %12176 = vmatprep.subr.msk.bf16.mxu0 %vm14680_vm0, %v12174_v32  ;;  %v7685_v56 = vsel %vm16618_vm6, %v13210_v61, %v13211_v43  ;;  %vm16620_vm11 = vmmov %vm16609_vm5  ;;  %v13226_v57 = vunpack.i.h.bf16 %v15654_v31  ;;  %v13225_v32 = vunpack.i.l.bf16 %v15654_v31 }
 0x4ac   : > { %11782 = vmatmul.mubr.msk.f32.vlgmr.msra.gmra.mrb[20].mxu0 %vm16616_vm14, %v15572_v0  ;;  %11785 = vmatmul.mubr.msk.f32.gmra.mrb[22].mxu1 %vm16617_vm8, %v15597_v62  ;;  %v7692_v17 = vsel %vm16609_vm5, %v16619_v29, %v13230_v26  ;;  %v7693_v21 = vsel %vm16620_vm11, %v13230_v26, %v13231_v12  ;;  %vm16622_vm9 = vmmov %vm16609_vm5 }
 0x4ad   : > { %12179 = vmatpush1.bf16.msk.msra.mxu0 %vm14714_vm10, %v12177_v58  ;;  %v7684_v0 = vsel %vm16622_vm9, %v16621_v2, %v13210_v61  ;;  %v12186_v5 = vpack.c.bf16 %v7693_v21, %v7685_v56  ;;  %8031 = vmatprep.mubr.f32.mxu0 %v16387_v52  ;;  %v13234_v37 = vpop.permute.xlu1 %13233  ;;  %vm16624_vm13 = vmmov %vm16609_vm5 }
 0x4ae   : > { %v13239_v10 = vpop.permute.xlu0 %13238  ;;  %8262 = vmatprep.mubr.f32.mxu1 %v16387_v52  ;;  %v13236_v63 = vunpack.i.h.bf16 %v13234_v37  ;;  %v13235_v8 = vunpack.i.l.bf16 %v13234_v37  ;;  %v7686_v25 = vsel %vm16624_vm13, %v13211_v43, %v13215_v47  ;;  %vm16625_vm14 = vmmov %vm16609_vm5  ;;  %v12189_v4 = vpack.c.bf16 %v7692_v17, %v7684_v0  ;;  %v7729_v43 = vld [vmem:[#allocation5 + $0x8] sm:$0xff] }
 0x4af   : > { %v13241_v13 = vunpack.i.h.bf16 %v13239_v10  ;;  %v13240_v51 = vunpack.i.l.bf16 %v13239_v10  ;;  %v7687_v46 = vsel %vm16625_vm14, %v13215_v47, %v13216_v30  ;;  %vm16626_vm6 = vmmov %vm16617_vm8  ;;  %12188 = vmatprep.subr.msk.bf16.mxu0 %vm14756_vm4, %v12186_v5 }
 0x4b0   : > { %11783 = vmatmul.mubr.msk.f32.gmra.mrb[22].mxu0 %vm16617_vm8, %v15597_v62  ;;  %11796 = vmatmul.mubr.msk.f32.vlgmr.msra.gmra.mrb[16].mxu1 %vm16626_vm6, %v15668_v33  ;;  %vm16627_vm5 = vmmov %vm16623_vm7 }
 0x4b1   : > { %v8474_v61 = vsel %vm16627_vm5, %v13235_v8, %v13236_v63  ;;  %vm16628_vm11 = vmmov %vm16622_vm9  ;;  %v7695_v41 = vsel %vm16622_vm9, %v13240_v51, %v13241_v13  ;;  %8185 = vmatprep.mubr.f32.mxu0 %v16387_v52  ;;  %v13249_v47 = vpop.permute.xlu1 %13248  ;;  %8268 = vmatprep.mubr.f32.mxu1 %v16387_v52 }
 0x4b2   : > { %v7694_v58 = vsel %vm16628_vm11, %v13231_v12, %v13240_v51  ;;  %v12198_v26 = vpack.c.bf16 %v8474_v61, %v8466_v16  ;;  %v12192_v30 = vpack.c.bf16 %v7695_v41, %v7687_v46  ;;  %v15690_v56 = vpop.permute.xlu0 %13243  ;;  %v13251_v29 = vunpack.i.h.bf16 %v13249_v47  ;;  %vm16629_vm7 = vmmov %vm16626_vm6 }
 0x4b3   : > { %v12195_v62 = vpack.c.bf16 %v7694_v58, %v7686_v25  ;;  %v13250_v17 = vunpack.i.l.bf16 %v13249_v47  ;;  %v13246_v12 = vunpack.i.h.bf16 %v15690_v56  ;;  %v13245_v21 = vunpack.i.l.bf16 %v15690_v56  ;;  %vm16630_vm13 = vmmov %vm16626_vm6 }
 0x4b4   : > { %11790 = vmatmul.mubr.msk.f32.vlgmr.msra.gmra.mrb[16].mxu0 %vm16629_vm7, %v15668_v33  ;;  %11797 = vmatmul.mubr.msk.f32.gmra.mrb[18].mxu1 %vm16630_vm13, %v7729_v43  ;;  %vm16631_vm14 = vmmov %vm16627_vm5  ;;  %vm16636_vm7 = vnez %v16425_v23  ;;  %vm16637_vm13 = vnez %v16421_v3  ;;  %v10134_v23 = vld [vmem:[#allocation5 + $0x60] sm:$0xff] }
 0x4b5   : > { %v8467_v2 = vsel %vm16631_vm14, %v13221_v18, %v13225_v32  ;;  %vm16632_vm8 = vmmov %vm16627_vm5  ;;  %12191 = vmatpush1.bf16.msk.msra.mxu0 %vm16481_vm3, %v12189_v4  ;;  %v8476_v5 = vsel %vm16627_vm5, %v13245_v21, %v13246_v12  ;;  %8191 = vmatprep.mubr.f32.mxu0 %v16387_v52  ;;  %v13259_v18 = vpop.permute.xlu1 %13258  ;;  %vm16638_vm14 = vnez %v16431_v15 }
 0x4b6   : > { %v8468_v0 = vsel %vm16632_vm8, %v13225_v32, %v13226_v57  ;;  %vm16633_vm6 = vmmov %vm16627_vm5  ;;  %12194 = vmatprep.subr.msk.bf16.mxu1 %vm16636_vm7, %v12192_v30  ;;  %v13254_v51 = vpop.permute.xlu0 %13253  ;;  %12200 = vmatprep.subr.msk.bf16.mxu0 %vm16637_vm13, %v12198_v26  ;;  %vm16639_vm8 = vcmask 130048   ;;  %vm16657_vm13 = vnez %v16457_v9 }
 0x4b7   : > { %v8475_v16 = vsel %vm16633_vm6, %v13236_v63, %v13245_v21  ;;  %vm16634_vm11 = vmmov %vm16627_vm5  ;;  %v12204_v13 = vpack.c.bf16 %v8476_v5, %v8468_v0  ;;  %12197 = vmatpush1.bf16.msk.msra.mxu1 %vm16638_vm14, %v12195_v62  ;;  %8416 = vmatprep.mubr.f32.mxu1 %v16387_v52  ;;  %v13261_v63 = vunpack.i.h.bf16 %v13259_v18  ;;  %v13256_v58 = vunpack.i.h.bf16 %v13254_v51 }
 0x4b8   : > { %v8465_v37 = vsel %vm16634_vm11, %v13250_v17, %v13220_v39  ;;  %vm16635_vm9 = vmmov %vm16627_vm5  ;;  %v12207_v25 = vpack.c.bf16 %v8475_v16, %v8467_v2  ;;  %11791 = vmatmul.mubr.msk.f32.gmra.mrb[18].mxu0 %vm16639_vm8, %v7729_v43  ;;  %vm16641_vm5 = vnez %v16437_v19  ;;  %v13255_v41 = vunpack.i.l.bf16 %v13254_v51 }
 0x4b9   : > { %v8473_v10 = vsel %vm16635_vm9, %v13251_v29, %v13235_v8  ;;  %v13260_v8 = vunpack.i.l.bf16 %v13259_v18  ;;  %8339 = vmatprep.mubr.f32.mxu0 %v16387_v52  ;;  %vm16640_vm6 = vmmov %vm16639_vm8  ;;  %12206 = vmatprep.subr.msk.bf16.mxu1 %vm16641_vm5, %v12204_v13  ;;  %v13274_v46 = vpop.permute.xlu1 %13273  ;;  %vm16660_vm5 = vcmask 130048  }
 0x4ba   : > { %v12201_v39 = vpack.c.bf16 %v8473_v10, %v8465_v37  ;;  %11808 = vmatmul.mubr.msk.f32.vlgmr.msra.gmra.mrb[20].mxu1 %vm16640_vm6, %v15668_v33  ;;  %v15722_v4 = vpop.permute.xlu0 %13263  ;;  %v13276_v32 = vunpack.i.h.bf16 %v13274_v46  ;;  %v13275_v61 = vunpack.i.l.bf16 %v13274_v46  ;;  %vm16642_vm11 = vmmov %vm16640_vm6 }
 0x4bb   : > { %12209 = vmatpush1.bf16.msk.msra.mxu1 %vm16575_vm12, %v12207_v25  ;;  %8422 = vmatprep.mubr.f32.mxu1 %v16387_v52  ;;  %v8472_v26 = vsel %vm16635_vm9, %v13260_v8, %v13261_v63  ;;  %vm16643_vm8 = vmmov %vm16635_vm9  ;;  %v13266_v0 = vunpack.i.h.bf16 %v15722_v4  ;;  %v13265_v16 = vunpack.i.l.bf16 %v15722_v4  ;;  %v8515_v4 = vld [vmem:[#allocation5 + $0x28] sm:$0xff] }
 0x4bc   : > { %11802 = vmatmul.mubr.msk.f32.vlgmr.msra.gmra.mrb[20].mxu0 %vm16642_vm11, %v15668_v33  ;;  %v8480_v30 = vsel %vm16643_vm8, %v13275_v61, %v13276_v32  ;;  %v8514_v33 = vld [vmem:[#allocation5 + $0x20] sm:$0xff]  ;;  %vm16644_vm11 = vmmov %vm16643_vm8 }
 0x4bd   : > { %12203 = vmatpush1.bf16.msk.msra.mxu0 %vm16574_vm15, %v12201_v39  ;;  %8345 = vmatprep.mubr.f32.mxu0 %v16387_v52  ;;  %v12216_v62 = vpack.c.bf16 %v8480_v30, %v8472_v26  ;;  %v15735_v47 = vpop.permute.xlu1 %13278  ;;  %v8471_v21 = vsel %vm16644_vm11, %v13256_v58, %v13260_v8  ;;  %vm16645_vm9 = vmmov %vm16643_vm8 }
 0x4be   : > { %11809 = vmatmul.mubr.msk.f32.gmra.mrb[22].mxu1 %vm16640_vm6, %v7729_v43  ;;  %v13269_v56 = vpop.permute.xlu0 %13268  ;;  %v8469_v2 = vsel %vm16645_vm9, %v13226_v57, %v13255_v41  ;;  %vm16646_vm8 = vmmov %vm16640_vm6  ;;  %vm16647_vm6 = vnez %v16445_v36  ;;  %v13281_v5 = vunpack.i.h.bf16 %v15735_v47  ;;  %v13280_v37 = vunpack.i.l.bf16 %v15735_v47 }
 0x4bf   : > { %v13271_v29 = vunpack.i.h.bf16 %v13269_v56  ;;  %v13270_v17 = vunpack.i.l.bf16 %v13269_v56  ;;  %8663 = vmatprep.mubr.f32.mxu1 %v16387_v52  ;;  %12218 = vmatprep.subr.msk.bf16.mxu1 %vm16647_vm6, %v12216_v62  ;;  %vm16648_vm12 = vmmov %vm16645_vm9  ;;  %v8470_v31 = vsel %vm16645_vm9, %v13255_v41, %v13256_v58 }
 0x4c0   : > { %11803 = vmatmul.mubr.msk.f32.gmra.mrb[22].mxu0 %vm16646_vm8, %v7729_v43  ;;  %vm16649_vm11 = vmmov %vm16645_vm9 }
 0x4c1   : > { %v8479_v10 = vsel %vm16648_vm12, %v13271_v29, %v13275_v61  ;;  %v8477_v13 = vsel %vm16649_vm11, %v13246_v12, %v13270_v17  ;;  %8586 = vmatprep.mubr.f32.mxu0 %v16387_v52  ;;  %vm16650_vm15 = vmmov %vm16645_vm9  ;;  %v13289_v43 = vpop.permute.xlu1 %13288  ;;  %vm16651_vm12 = vcmask 7168  }
 0x4c2   : > { %v8478_v57 = vsel %vm16650_vm15, %v13270_v17, %v13271_v29  ;;  %v12213_v18 = vpack.c.bf16 %v8477_v13, %v8469_v2  ;;  %v12219_v51 = vpack.c.bf16 %v8479_v10, %v8471_v21  ;;  %11820 = vmatmul.mubr.msk.f32.vlgmr.msra.gmra.mrb[16].mxu1 %vm16646_vm8, %v8514_v33  ;;  %v13284_v25 = vpop.permute.xlu0 %13283  ;;  %v13291_v63 = vunpack.i.h.bf16 %v13289_v43  ;;  %vm16652_vm11 = vmmov %vm16646_vm8 }
 0x4c3   : > { %v12210_v39 = vpack.c.bf16 %v8478_v57, %v8470_v31  ;;  %v13290_v8 = vunpack.i.l.bf16 %v13289_v43  ;;  %v13286_v46 = vunpack.i.h.bf16 %v13284_v25  ;;  %8669 = vmatprep.mubr.f32.mxu1 %v16387_v52  ;;  %v8883_v12 = vsel %vm16651_vm12, %v13265_v16, %v13266_v0  ;;  %vm16654_vm9 = vmmov %vm16651_vm12 }
 0x4c4   : > { %11814 = vmatmul.mubr.msk.f32.vlgmr.msra.gmra.mrb[16].mxu0 %vm16652_vm11, %v8514_v33  ;;  %v13285_v32 = vunpack.i.l.bf16 %v13284_v25  ;;  %vm16653_vm15 = vnez %v16454_v27  ;;  %v8885_v61 = vsel %vm16654_vm9, %v13280_v37, %v13281_v5  ;;  %vm16655_vm8 = vmmov %vm16654_vm9 }
 0x4c5   : > { %12221 = vmatpush1.bf16.msk.msra.mxu1 %vm16653_vm15, %v12219_v51  ;;  %v8893_v58 = vsel %vm16655_vm8, %v13290_v8, %v13291_v63  ;;  %vm16656_vm6 = vmmov %vm16655_vm8  ;;  %8592 = vmatprep.mubr.f32.mxu0 %v16387_v52  ;;  %vm16661_vm15 = vnez %v16461_v35  ;;  %v13299_v56 = vpop.permute.xlu1 %13298 }
 0x4c6   : > { %v8892_v41 = vsel %vm16656_vm6, %v13286_v46, %v13290_v8  ;;  %12212 = vmatprep.subr.msk.bf16.mxu0 %vm16657_vm13, %v12210_v39  ;;  %vm16658_vm12 = vmmov %vm16656_vm6  ;;  %v12228_v30 = vpack.c.bf16 %v8893_v58, %v8885_v61  ;;  %11821 = vmatmul.mubr.msk.f32.gmra.mrb[18].mxu1 %vm16660_vm5, %v8515_v4  ;;  %v13294_v29 = vpop.permute.xlu0 %13293 }
 0x4c7   : > { %v8884_v26 = vsel %vm16658_vm12, %v13266_v0, %v13280_v37  ;;  %vm16659_vm11 = vmmov %vm16656_vm6  ;;  %12215 = vmatpush1.bf16.msk.msra.mxu0 %vm16661_vm15, %v12213_v18  ;;  %v13296_v2 = vunpack.i.h.bf16 %v13294_v29  ;;  %8817 = vmatprep.mubr.f32.mxu1 %v16387_v52  ;;  %v13295_v10 = vunpack.i.l.bf16 %v13294_v29  ;;  %v13301_v0 = vunpack.i.h.bf16 %v13299_v56 }
 0x4c8   : > { %v8891_v62 = vsel %vm16659_vm11, %v13285_v32, %v13286_v46  ;;  %v12231_v21 = vpack.c.bf16 %v8892_v41, %v8884_v26  ;;  %vm16662_vm6 = vmmov %vm16660_vm5  ;;  %12230 = vmatprep.subr.msk.bf16.mxu1 %vm14692_vm1, %v12228_v30  ;;  %v13300_v37 = vunpack.i.l.bf16 %v13299_v56  ;;  %v8931_v26 = vld [vmem:[#allocation5 + $0x30] sm:$0xff] }
 0x4c9   : > { %v12222_v17 = vpack.c.bf16 %v8891_v62, %v8883_v12  ;;  %11815 = vmatmul.mubr.msk.f32.gmra.mrb[18].mxu0 %vm16662_vm6, %v8515_v4  ;;  %vm16663_vm9 = vmmov %vm16655_vm8  ;;  %v13309_v57 = vpop.permute.xlu1 %13308 }
 0x4ca   : > { %v8890_v13 = vsel %vm16663_vm9, %v13296_v2, %v13285_v32  ;;  %8740 = vmatprep.mubr.f32.mxu0 %v16387_v52  ;;  %vm16664_vm5 = vmmov %vm16655_vm8  ;;  %v13304_v18 = vpop.permute.xlu0 %13303  ;;  %v13311_v43 = vunpack.i.h.bf16 %v13309_v57  ;;  %v13310_v25 = vunpack.i.l.bf16 %v13309_v57  ;;  %v8932_v2 = vld [vmem:[#allocation5 + $0x38] sm:$0xff] }
 0x4cb   : > { %12224 = vmatprep.subr.msk.bf16.mxu0 %vm14680_vm0, %v12222_v17  ;;  %v8882_v31 = vsel %vm16664_vm5, %v13295_v10, %v13265_v16  ;;  %vm16665_vm8 = vmmov %vm16662_vm6  ;;  %v13306_v46 = vunpack.i.h.bf16 %v13304_v18  ;;  %v13305_v16 = vunpack.i.l.bf16 %v13304_v18  ;;  %v16678_v10 = vpack.c.bf16 %v15354_v11, %v15338_v45 }
 0x4cc   : > { %11832 = vmatmul.mubr.msk.f32.vlgmr.msra.gmra.mrb[20].mxu1 %vm16665_vm8, %v8514_v33  ;;  %v12225_v51 = vpack.c.bf16 %v8890_v13, %v8882_v31  ;;  %vm16666_vm12 = vmmov %vm16662_vm6  ;;  %v16680_v13 = vpack.c.bf16 %v15356_v48, %v15340_v28  ;;  %v16682_v31 = vpack.c.bf16 %v15352_v53, %v15336_v6  ;;  %v16684_v28 = vpack.c.bf16 %v15388_v42, %v15372_v44 }
 0x4cd   : > { %12233 = vmatpush1.bf16.msk.msra.mxu1 %vm14725_vm2, %v12231_v21  ;;  %8823 = vmatprep.mubr.f32.mxu1 %v16387_v52  ;;  %vm16667_vm11 = vmmov %vm16664_vm5  ;;  %v15794_v61 = vpop.permute.xlu1 %13318  ;;  %v16685_v6 = vpack.c.bf16 %v15350_v50, %v15334_v40  ;;  %v9264_v50 = vld [vmem:[#allocation5 + $0x40] sm:$0xff] }
 0x4ce   : > { %11826 = vmatmul.mubr.msk.f32.vlgmr.msra.gmra.mrb[20].mxu0 %vm16666_vm12, %v8514_v33  ;;  %v8887_v39 = vsel %vm16667_vm11, %v13300_v37, %v13301_v0  ;;  %vm16668_vm6 = vmmov %vm16664_vm5  ;;  %v13314_v58 = vpop.permute.xlu0 %13313 }
 0x4cf   : > { %v8895_v8 = vsel %vm16668_vm6, %v13310_v25, %v13311_v43  ;;  %8746 = vmatprep.mubr.f32.mxu0 %v16387_v52  ;;  %12227 = vmatpush1.bf16.msk.msra.mxu0 %vm14714_vm10, %v12225_v51  ;;  %vm16669_vm9 = vmmov %vm16664_vm5  ;;  %v13316_v33 = vunpack.i.h.bf16 %v13314_v58  ;;  %v13315_v41 = vunpack.i.l.bf16 %v13314_v58 }
 0x4d0   : > { %v8894_v12 = vsel %vm16669_vm9, %v13291_v63, %v13310_v25  ;;  %v12234_v32 = vpack.c.bf16 %v8895_v8, %v8887_v39  ;;  %vm16670_vm5 = vmmov %vm16665_vm8  ;;  %v16686_v25 = vpack.c.bf16 %v15386_v14, %v15370_v22  ;;  %v13321_v39 = vunpack.i.h.bf16 %v15794_v61 }
 0x4d1   : > { %11833 = vmatmul.mubr.msk.f32.gmra.mrb[22].mxu1 %vm16670_vm5, %v8515_v4  ;;  %vm16671_vm8 = vmmov %vm16668_vm6  ;;  %v8896_v56 = vsel %vm16668_vm6, %v13311_v43, %v13315_v41  ;;  %v15809_v47 = vpop.permute.xlu1 %13328  ;;  %v13320_v8 = vunpack.i.l.bf16 %v15794_v61 }
 0x4d2   : > { %9080 = vmatprep.mubr.f32.mxu1 %v16387_v52  ;;  %v8886_v30 = vsel %vm16671_vm8, %v13281_v5, %v13300_v37  ;;  %vm16672_vm12 = vmmov %vm16670_vm5  ;;  %12236 = vmatprep.subr.msk.bf16.mxu0 %vm14756_vm4, %v12234_v32  ;;  %v15811_v5 = vpop.permute.xlu0 %13323  ;;  %v13331_v48 = vunpack.i.h.bf16 %v15809_v47  ;;  %v13330_v51 = vunpack.i.l.bf16 %v15809_v47 }
 0x4d3   : > { %11827 = vmatmul.mubr.msk.f32.gmra.mrb[22].mxu0 %vm16672_vm12, %v8515_v4  ;;  %v12237_v63 = vpack.c.bf16 %v8894_v12, %v8886_v30  ;;  %vm16673_vm11 = vmmov %vm16668_vm6  ;;  %v13326_v53 = vunpack.i.h.bf16 %v15811_v5  ;;  %v13325_v43 = vunpack.i.l.bf16 %v15811_v5  ;;  %v16694_v30 = vpack.c.bf16 %v15382_v38, %v15366_v1 }
 0x4d4   : > { %v8889_v62 = vsel %vm16673_vm11, %v13305_v16, %v13306_v46  ;;  %vm16674_vm9 = vmmov %vm16668_vm6  ;;  %9003 = vmatprep.mubr.f32.mxu0 %v16387_v52 }
 0x4d5   : > { %v8897_v29 = vsel %vm16674_vm9, %v13315_v41, %v13316_v33  ;;  %vm16675_vm5 = vmmov %vm16668_vm6 }
 0x4d6   : > { %v8888_v17 = vsel %vm16675_vm5, %v13301_v0, %v13305_v16  ;;  %v12240_v21 = vpack.c.bf16 %v8897_v29, %v8889_v62  ;;  %vm16676_vm2 = vmmov %vm16672_vm12  ;;  %v15824_v0 = vpop.permute.xlu1 %13338  ;;  %v15826_v37 = vpop.permute.xlu0 %13333  ;;  %vm16688_vm5 = vcmask 1039360  }
 0x4d7   : > { %11844 = vmatmul.mubr.msk.f32.vlgmr.msra.gmra.mrb[16].mxu1 %vm16676_vm2, %v8931_v26  ;;  %v12243_v4 = vpack.c.bf16 %v8896_v56, %v8888_v17  ;;  %vm16677_vm8 = vmmov %vm16676_vm2  ;;  %v13336_v57 = vunpack.i.h.bf16 %v15826_v37  ;;  %v13335_v18 = vunpack.i.l.bf16 %v15826_v37  ;;  %v13341_v41 = vunpack.i.h.bf16 %v15824_v0  ;;  %v16695_v56 = vld [vmem:[#allocation9_spill] sm:$0xff]  ;;  %v9265_v17 = vld [vmem:[#allocation5 + $0x48] sm:$0xff] }
 0x4d8   : > { %9086 = vmatprep.mubr.f32.mxu1 %v16387_v52  ;;  %11838 = vmatmul.mubr.msk.f32.vlgmr.msra.gmra.mrb[16].mxu0 %vm16677_vm8, %v8931_v26  ;;  %vm16679_vm12 = vmmov %vm16676_vm2  ;;  %v16696_v29 = vpack.c.bf16 %v15384_v59, %v16695_v56 }
 0x4d9   : > { %12242 = vmatprep.subr.msk.bf16.mxu1 %vm16636_vm7, %v12240_v21  ;;  %12239 = vmatpush1.bf16.msk.msra.mxu0 %vm16481_vm3, %v12237_v63  ;;  %vm16681_vm11 = vmmov %vm16676_vm2  ;;  %v9679_v40 = vsel %vm16688_vm5, %v13335_v18, %v13336_v57 }
 0x4da   : > { %9009 = vmatprep.mubr.f32.mxu0 %v16387_v52  ;;  %12247 = vmatprep.subr.bf16.mxu0 %v16678_v10  ;;  %v15837_v45 = vpop.permute.xlu1 %13348  ;;  %v15839_v11 = vpop.permute.xlu0 %13343  ;;  %vm16683_vm6 = vmmov %vm16676_vm2 }
 0x4db   : > { %11845 = vmatmul.mubr.msk.f32.gmra.mrb[18].mxu1 %vm16676_vm2, %v8932_v2  ;;  %vm16687_vm9 = vmmov %vm16676_vm2  ;;  %v13351_v63 = vunpack.i.h.bf16 %v15837_v45  ;;  %v13350_v62 = vunpack.i.l.bf16 %v15837_v45  ;;  %v13346_v21 = vunpack.i.h.bf16 %v15839_v11  ;;  %v13345_v47 = vunpack.i.l.bf16 %v15839_v11 }
 0x4dc   : > { %12245 = vmatpush1.bf16.msk.msra.mxu1 %vm16638_vm14, %v12243_v4  ;;  %9234 = vmatprep.mubr.f32.mxu1 %v16387_v52  ;;  %vm16689_vm8 = vmmov %vm16676_vm2 }
 0x4dd   : > { %11839 = vmatmul.mubr.msk.f32.gmra.mrb[18].mxu0 %vm16679_vm12, %v8932_v2  ;;  %12251 = vmatprep.subr.bf16.mxu1 %v16680_v13  ;;  %vm16690_vm2 = vmmov %vm16688_vm5  ;;  %vm16697_vm5 = vnez %v16437_v19 }
 0x4de   : > { %9157 = vmatprep.mubr.f32.mxu0 %v16387_v52  ;;  %v15862_v44 = vpop.permute.xlu1 %13358  ;;  %v15864_v42 = vpop.permute.xlu0 %13353  ;;  %v9677_v22 = vsel %vm16690_vm2, %v13330_v51, %v13331_v48  ;;  %vm16691_vm12 = vmmov %vm16690_vm2 }
 0x4df   : > { %11856 = vmatmul.mubr.msk.f32.vlgmr.msra.gmra.mrb[20].mxu1 %vm16681_vm11, %v8931_v26  ;;  %v9671_v14 = vsel %vm16691_vm12, %v13325_v43, %v13326_v53  ;;  %vm16692_vm11 = vmmov %vm16690_vm2 }
 0x4e0   : > { %12253 = vmatpush1.bf16.msra.mxu1 %v16682_v31  ;;  %9240 = vmatprep.mubr.f32.mxu1 %v16387_v52  ;;  %v9669_v12 = vsel %vm16692_vm11, %v13320_v8, %v13321_v39  ;;  %v12268_v32 = vpack.c.bf16 %v9679_v40, %v9671_v14  ;;  %vm16699_vm12 = vmmov %vm16690_vm2  ;;  %v9673_v31 = vsel %vm16690_vm2, %v13345_v47, %v13346_v21  ;;  %v13361_v14 = vunpack.i.h.bf16 %v15862_v44 }
 0x4e1   : > { %11850 = vmatmul.mubr.msk.f32.vlgmr.msra.gmra.mrb[20].mxu0 %vm16683_vm6, %v8931_v26  ;;  %12259 = vmatprep.subr.bf16.mxu1 %v16684_v28  ;;  %v12262_v33 = vpack.c.bf16 %v9677_v22, %v9669_v12  ;;  %v13340_v26 = vunpack.i.l.bf16 %v15824_v0  ;;  %vm16700_vm11 = vmmov %vm16690_vm2  ;;  %v13355_v12 = vunpack.i.l.bf16 %v15864_v42 }
 0x4e2   : > { %12249 = vmatpush1.bf16.msra.mxu0 %v16685_v6  ;;  %9163 = vmatprep.mubr.f32.mxu0 %v16387_v52  ;;  %v15879_v46 = vpop.permute.xlu1 %13373  ;;  %v15881_v16 = vpop.permute.xlu0 %13363  ;;  %v9676_v0 = vsel %vm16700_vm11, %v13341_v41, %v13330_v51  ;;  %vm16704_vm14 = vmmov %vm16690_vm2 }
 0x4e3   : > { %12255 = vmatprep.subr.bf16.mxu0 %v16686_v25  ;;  %11857 = vmatmul.mubr.msk.f32.gmra.mrb[22].mxu1 %vm16687_vm9, %v8932_v2  ;;  %v13376_v61 = vunpack.i.h.bf16 %v15879_v46  ;;  %v13375_v58 = vunpack.i.l.bf16 %v15879_v46  ;;  %vm16693_vm9 = vmmov %vm16683_vm6  ;;  %v9668_v10 = vsel %vm16699_vm12, %v13340_v26, %v13320_v8  ;;  %v9670_v11 = vsel %vm16704_vm14, %v13321_v39, %v13325_v43  ;;  %v9717_v26 = vld [vmem:[#allocation5 + $0x50] sm:$0xff] }
 0x4e4   : > { %9413 = vmatprep.mubr.f32.mxu1 %v16387_v52  ;;  %vm16705_vm3 = vmmov %vm16690_vm2  ;;  %v13366_v43 = vunpack.i.h.bf16 %v15881_v16  ;;  %v13365_v39 = vunpack.i.l.bf16 %v15881_v16  ;;  %vm16708_vm14 = vnez %v16442_v54  ;;  %v13360_v46 = vunpack.i.l.bf16 %v15862_v44  ;;  %v10952_v54 = vld [vmem:[#allocation5 + $0x80] sm:$0xff] }
 0x4e5   : > { %11851 = vmatmul.mubr.msk.f32.gmra.mrb[22].mxu0 %vm16689_vm8, %v8932_v2  ;;  %vm16698_vm8 = vnez %v16421_v3  ;;  %v9683_v4 = vsel %vm16690_vm2, %v13375_v58, %v13376_v61  ;;  %vm16709_vm12 = vnez %v16445_v36  ;;  %vm16710_vm11 = vmmov %vm16690_vm2  ;;  %v10953_v36 = vld [vmem:[#allocation5 + $0x88] sm:$0xff] }
 0x4e6   : > { %9336 = vmatprep.mubr.f32.mxu0 %v16387_v52  ;;  %v15905_v1 = vpop.permute.xlu1 %13378  ;;  %v13369_v38 = vpop.permute.xlu0 %13368 }
 0x4e7   : > { %11860 = vmatmul.mubr.msk.f32.vlgmr.msra.gmra.mrb[16].mxu1 %vm16683_vm6, %v9264_v50  ;;  %v13371_v59 = vunpack.i.h.bf16 %v13369_v38  ;;  %v13370_v2 = vunpack.i.l.bf16 %v13369_v38  ;;  %vm16701_vm6 = vmmov %vm16690_vm2  ;;  %v13381_v40 = vunpack.i.h.bf16 %v15905_v1  ;;  %v13380_v22 = vunpack.i.l.bf16 %v15905_v1 }
 0x4e8   : > { %12261 = vmatpush1.bf16.msra.mxu1 %v16694_v30  ;;  %9419 = vmatprep.mubr.f32.mxu1 %v16387_v52  ;;  %v9678_v13 = vsel %vm16701_vm6, %v13331_v48, %v13335_v18  ;;  %v12265_v48 = vpack.c.bf16 %v9676_v0, %v9668_v10  ;;  %vm16711_vm6 = vmmov %vm16690_vm2 }
 0x4e9   : > { %11858 = vmatmul.mubr.msk.f32.vlgmr.msra.gmra.mrb[16].mxu0 %vm16693_vm9, %v9264_v50  ;;  %12270 = vmatprep.subr.msk.bf16.mxu1 %vm16697_vm5, %v12268_v32  ;;  %vm16702_vm5 = vmmov %vm16693_vm9  ;;  %v9681_v6 = vsel %vm16705_vm3, %v13370_v2, %v13371_v59  ;;  %v12271_v25 = vpack.c.bf16 %v9678_v13, %v9670_v11  ;;  %vm16707_vm3 = vnez %v16440_v55  ;;  %v9682_v61 = vsel %vm16710_vm11, %v13371_v59, %v13375_v58 }
 0x4ea   : > { %12257 = vmatpush1.bf16.msra.mxu0 %v16696_v29  ;;  %9342 = vmatprep.mubr.f32.mxu0 %v16387_v52  ;;  %v15920_v51 = vpop.permute.xlu1 %13388  ;;  %v15922_v18 = vpop.permute.xlu0 %13383  ;;  %v12274_v8 = vpack.c.bf16 %v9681_v6, %v9673_v31  ;;  %vm16716_vm11 = vmmov %vm16711_vm6  ;;  %v9672_v37 = vsel %vm16711_vm6, %v13326_v53, %v13345_v47 }
 0x4eb   : > { %12264 = vmatprep.subr.msk.bf16.mxu0 %vm16698_vm8, %v12262_v33  ;;  %11861 = vmatmul.mubr.msk.f32.gmra.mrb[18].mxu1 %vm16702_vm5, %v9265_v17  ;;  %vm16703_vm8 = vmmov %vm16690_vm2  ;;  %v9674_v58 = vsel %vm16716_vm11, %v13346_v21, %v13350_v62  ;;  %v13386_v53 = vunpack.i.h.bf16 %v15922_v18  ;;  %v13385_v47 = vunpack.i.l.bf16 %v15922_v18  ;;  %v13390_v59 = vunpack.i.l.bf16 %v15920_v51 }
 0x4ec   : > { %v9675_v45 = vsel %vm16703_vm8, %v13350_v62, %v13351_v63  ;;  %9567 = vmatprep.mubr.f32.mxu1 %v16387_v52  ;;  %vm16706_vm8 = vmmov %vm16702_vm5  ;;  %vm16721_vm11 = vnez %v16454_v27 }
 0x4ed   : > { %11859 = vmatmul.mubr.msk.f32.gmra.mrb[18].mxu0 %vm16693_vm9, %v9265_v17  ;;  %v12280_v28 = vpack.c.bf16 %v9683_v4, %v9675_v45  ;;  %vm16712_vm9 = vmmov %vm16702_vm5  ;;  %v13391_v4 = vunpack.i.h.bf16 %v15920_v51 }
 0x4ee   : > { %9490 = vmatprep.mubr.f32.mxu0 %v16387_v52  ;;  %v15941_v16 = vpop.permute.xlu1 %13398  ;;  %v15943_v32 = vpop.permute.xlu0 %13393  ;;  %vm16713_vm2 = vmmov %vm16702_vm5 }
 0x4ef   : > { %11864 = vmatmul.mubr.msk.f32.vlgmr.msra.gmra.mrb[20].mxu1 %vm16706_vm8, %v9264_v50  ;;  %v13396_v10 = vunpack.i.h.bf16 %v15943_v32  ;;  %v13395_v0 = vunpack.i.l.bf16 %v15943_v32 }
 0x4f0   : > { %12273 = vmatpush1.bf16.msk.msra.mxu1 %vm16708_vm14, %v12271_v25  ;;  %9573 = vmatprep.mubr.f32.mxu1 %v16387_v52 }
 0x4f1   : > { %11862 = vmatmul.mubr.msk.f32.vlgmr.msra.gmra.mrb[20].mxu0 %vm16702_vm5, %v9264_v50  ;;  %v13356_v50 = vunpack.i.h.bf16 %v15864_v42  ;;  %12282 = vmatprep.subr.msk.bf16.mxu1 %vm16709_vm12, %v12280_v28  ;;  %v9680_v42 = vsel %vm16711_vm6, %v13336_v57, %v13370_v2  ;;  %vm16714_vm5 = vcmask 793600   ;;  %v9718_v2 = vld [vmem:[#allocation5 + $0x58] sm:$0xff] }
 0x4f2   : > { %12267 = vmatpush1.bf16.msk.msra.mxu0 %vm16707_vm3, %v12265_v48  ;;  %9496 = vmatprep.mubr.f32.mxu0 %v16387_v52  ;;  %v10094_v33 = vsel %vm16714_vm5, %v13365_v39, %v13366_v43  ;;  %vm16715_vm8 = vmmov %vm16714_vm5  ;;  %v15968_v63 = vpop.permute.xlu1 %13408  ;;  %v15970_v56 = vpop.permute.xlu0 %13403  ;;  %v12277_v29 = vpack.c.bf16 %v9680_v42, %v9672_v37  ;;  %v13401_v37 = vunpack.i.h.bf16 %v15941_v16 }
 0x4f3   : > { %12276 = vmatprep.subr.msk.bf16.mxu0 %vm16657_vm13, %v12274_v8  ;;  %11865 = vmatmul.mubr.msk.f32.gmra.mrb[22].mxu1 %vm16713_vm2, %v9265_v17  ;;  %v10096_v41 = vsel %vm16715_vm8, %v13380_v22, %v13381_v40  ;;  %vm16718_vm2 = vmmov %vm16714_vm5  ;;  %v13411_v38 = vunpack.i.h.bf16 %v15968_v63  ;;  %v13410_v62 = vunpack.i.l.bf16 %v15968_v63  ;;  %v13406_v42 = vunpack.i.h.bf16 %v15970_v56 }
 0x4f4   : > { %9866 = vmatprep.mubr.f32.mxu1 %v16387_v52  ;;  %v10086_v30 = vsel %vm16718_vm2, %v13355_v12, %v13356_v50  ;;  %vm16722_vm6 = vmmov %vm16718_vm2  ;;  %v10085_v18 = vsel %vm16718_vm2, %v13385_v47, %v13355_v12 }
 0x4f5   : > { %11863 = vmatmul.mubr.msk.f32.gmra.mrb[22].mxu0 %vm16712_vm9, %v9265_v17  ;;  %vm16717_vm9 = vmmov %vm16714_vm5  ;;  %v12283_v17 = vpack.c.bf16 %v9682_v61, %v9674_v58  ;;  %v12286_v21 = vpack.c.bf16 %v10094_v33, %v10086_v30  ;;  %vm16719_vm5 = vcmask 130048   ;;  %v10095_v11 = vsel %vm16722_vm6, %v13366_v43, %v13380_v22 }
 0x4f6   : > { %9789 = vmatprep.mubr.f32.mxu0 %v16387_v52  ;;  %v10088_v57 = vsel %vm16717_vm9, %v13360_v46, %v13361_v14  ;;  %vm16720_vm8 = vmmov %vm16719_vm5  ;;  %v15990_v13 = vpop.permute.xlu1 %13413  ;;  %v13419_v45 = vpop.permute.xlu0 %13418  ;;  %v10092_v43 = vsel %vm16718_vm2, %v13395_v0, %v13396_v10  ;;  %v13405_v33 = vunpack.i.l.bf16 %v15970_v56 }
 0x4f7   : > { %v12292_v5 = vpack.c.bf16 %v10096_v41, %v10088_v57  ;;  %11876 = vmatmul.mubr.msk.f32.vlgmr.msra.gmra.mrb[16].mxu1 %vm16720_vm8, %v9717_v26  ;;  %vm16723_vm9 = vmmov %vm16718_vm2  ;;  %v13421_v28 = vunpack.i.h.bf16 %v13419_v45  ;;  %v13420_v6 = vunpack.i.l.bf16 %v13419_v45  ;;  %v13416_v41 = vunpack.i.h.bf16 %v15990_v13 }
 0x4f8   : > { %12285 = vmatpush1.bf16.msk.msra.mxu1 %vm16721_vm11, %v12283_v17  ;;  %v10098_v31 = vsel %vm16723_vm9, %v13410_v62, %v13411_v38  ;;  %9872 = vmatprep.mubr.f32.mxu1 %v16387_v52  ;;  %vm16728_vm6 = vmmov %vm16718_vm2  ;;  %v13415_v58 = vunpack.i.l.bf16 %v15990_v13  ;;  %v13400_v57 = vunpack.i.l.bf16 %v15941_v16 }
 0x4f9   : > { %11870 = vmatmul.mubr.msk.f32.vlgmr.msra.gmra.mrb[16].mxu0 %vm16719_vm5, %v9717_v26  ;;  %12294 = vmatprep.subr.msk.bf16.mxu1 %vm14692_vm1, %v12292_v5  ;;  %vm16724_vm5 = vmmov %vm16718_vm2  ;;  %v10090_v48 = vsel %vm16728_vm6, %v13390_v59, %v13391_v4 }
 0x4fa   : > { %12279 = vmatpush1.bf16.msk.msra.mxu0 %vm16661_vm15, %v12277_v29  ;;  %9795 = vmatprep.mubr.f32.mxu0 %v16387_v52  ;;  %v10093_v20 = vsel %vm16724_vm5, %v13386_v53, %v13365_v39  ;;  %vm16729_vm9 = vmmov %vm16718_vm2  ;;  %v12298_v39 = vpack.c.bf16 %v10098_v31, %v10090_v48  ;;  %v16008_v22 = vpop.permute.xlu1 %13428  ;;  %v16010_v12 = vpop.permute.xlu0 %13423 }
 0x4fb   : > { %12288 = vmatprep.subr.msk.bf16.mxu0 %vm14680_vm0, %v12286_v21  ;;  %vm16725_vm0 = vmmov %vm16720_vm8  ;;  %v10100_v25 = vsel %vm16729_vm9, %v13420_v6, %v13421_v28  ;;  %v12289_v32 = vpack.c.bf16 %v10093_v20, %v10085_v18  ;;  %v13425_v61 = vunpack.i.l.bf16 %v16010_v12  ;;  %v13431_v44 = vunpack.i.h.bf16 %v16008_v22 }
 0x4fc   : > { %vm16726_vm1 = vmmov %vm16725_vm0 }
 0x4fd   : > { %11871 = vmatmul.mubr.msk.f32.gmra.mrb[18].mxu0 %vm16725_vm0, %v9718_v2  ;;  %11877 = vmatmul.mubr.msk.f32.gmra.mrb[18].mxu1 %vm16726_vm1, %v9718_v2  ;;  %vm16727_vm8 = vmmov %vm16718_vm2  ;;  %vm16731_vm1 = vnez %v16409_v24 }
 0x4fe   : > { %v10087_v34 = vsel %vm16727_vm8, %v13356_v50, %v13360_v46  ;;  %9943 = vmatprep.mubr.f32.mxu0 %v16387_v52  ;;  %10020 = vmatprep.mubr.f32.mxu1 %v16387_v52  ;;  %v12304_v46 = vpack.c.bf16 %v10100_v25, %v10092_v43  ;;  %v13426_v50 = vunpack.i.h.bf16 %v16010_v12  ;;  %vm16730_vm5 = vmmov %vm16725_vm0  ;;  %v16031_v30 = vpop.permute.xlu0 %13433 }
 0x4ff   : > { %v12295_v8 = vpack.c.bf16 %v10095_v11, %v10087_v34  ;;  %vm16733_vm8 = vmmov %vm16718_vm2  ;;  %v13436_v10 = vunpack.i.h.bf16 %v16031_v30 }
 0x500   : > { %v10097_v24 = vsel %vm16733_vm8, %v13381_v40, %v13410_v62  ;;  %vm16735_vm6 = vmmov %vm16725_vm0 }
 0x501   : > { %11882 = vmatmul.mubr.msk.f32.vlgmr.msra.gmra.mrb[20].mxu0 %vm16730_vm5, %v9717_v26  ;;  %11888 = vmatmul.mubr.msk.f32.vlgmr.msra.gmra.mrb[20].mxu1 %vm16725_vm0, %v9717_v26  ;;  %v16029_v26 = vpop.permute.xlu1 %13438  ;;  %vm16736_vm9 = vmmov %vm16725_vm0 }
 0x502   : > { %12291 = vmatpush1.bf16.msk.msra.mxu0 %vm14714_vm10, %v12289_v32  ;;  %12297 = vmatpush1.bf16.msk.msra.mxu1 %vm16731_vm1, %v12295_v8  ;;  %vm16732_vm10 = vcmask 785408   ;;  %v16060_v62 = vpop.permute.xlu0 %13443  ;;  %vm16743_vm8 = vmmov %vm16735_vm6 }
 0x503   : > { %12300 = vmatprep.subr.msk.bf16.mxu0 %vm14756_vm4, %v12298_v39  ;;  %9949 = vmatprep.mubr.f32.mxu0 %v16387_v52  ;;  %v10516_v7 = vsel %vm16732_vm10, %v13425_v61, %v13426_v50  ;;  %vm16734_vm4 = vmmov %vm16718_vm2 }
 0x504   : > { %10026 = vmatprep.mubr.f32.mxu1 %v16387_v52  ;;  %12306 = vmatprep.subr.msk.bf16.mxu1 %vm16636_vm7, %v12304_v46  ;;  %v10099_v49 = vsel %vm16734_vm4, %v13411_v38, %v13420_v6  ;;  %vm16737_vm7 = vmmov %vm16732_vm10 }
 0x505   : > { %11883 = vmatmul.mubr.msk.f32.gmra.mrb[22].mxu0 %vm16735_vm6, %v9718_v2  ;;  %11889 = vmatmul.mubr.msk.f32.gmra.mrb[22].mxu1 %vm16736_vm9, %v9718_v2  ;;  %v10514_v16 = vsel %vm16737_vm7, %v13415_v58, %v13416_v41  ;;  %vm16738_vm2 = vmmov %vm16737_vm7  ;;  %v16058_v38 = vpop.permute.xlu1 %13453  ;;  %v10135_v2 = vld [vmem:[#allocation5 + $0x68] sm:$0xff] }
 0x506   : > { %10206 = vmatprep.mubr.f32.mxu0 %v16387_v52  ;;  %10283 = vmatprep.mubr.f32.mxu1 %v16387_v52  ;;  %v10508_v63 = vsel %vm16738_vm2, %v13405_v33, %v13406_v42  ;;  %vm16739_vm5 = vmmov %vm16734_vm4  ;;  %v13456_v53 = vunpack.i.h.bf16 %v16058_v38  ;;  %v13455_v47 = vunpack.i.l.bf16 %v16058_v38  ;;  %v13449_v45 = vpop.permute.xlu0 %13448 }
 0x507   : > { %v10089_v1 = vsel %vm16739_vm5, %v13361_v14, %v13390_v59  ;;  %vm16740_vm0 = vmmov %vm16734_vm4  ;;  %v12314_v17 = vpack.c.bf16 %v10516_v7, %v10508_v63  ;;  %v13430_v14 = vunpack.i.l.bf16 %v16008_v22  ;;  %v13440_v59 = vunpack.i.l.bf16 %v16029_v26 }
 0x508   : > { %v10091_v40 = vsel %vm16740_vm0, %v13391_v4, %v13395_v0  ;;  %vm16741_vm1 = vmmov %vm16738_vm2  ;;  %v12301_v21 = vpack.c.bf16 %v10097_v24, %v10089_v1  ;;  %v13441_v4 = vunpack.i.h.bf16 %v16029_v26  ;;  %vm16744_vm4 = vnez %v16418_v60 }
 0x509   : > { %v10506_v29 = vsel %vm16741_vm1, %v13400_v57, %v13401_v37  ;;  %v12307_v5 = vpack.c.bf16 %v10099_v49, %v10091_v40  ;;  %vm16742_vm10 = vmmov %vm16735_vm6  ;;  %11900 = vmatmul.mubr.msk.f32.vlgmr.msra.gmra.mrb[16].mxu1 %vm16743_vm8, %v10134_v23  ;;  %vm16745_vm6 = vnez %v16431_v15  ;;  %v13435_v0 = vunpack.i.l.bf16 %v16031_v30  ;;  %v16076_v13 = vpop.permute.xlu1 %13458  ;;  %v10467_v40 = vld [vmem:[#allocation5 + $0x70] sm:$0xff] }
 0x50a   : > { %11894 = vmatmul.mubr.msk.f32.vlgmr.msra.gmra.mrb[16].mxu0 %vm16742_vm10, %v10134_v23  ;;  %v12310_v51 = vpack.c.bf16 %v10514_v16, %v10506_v29  ;;  %10289 = vmatprep.mubr.f32.mxu1 %v16387_v52  ;;  %v13451_v11 = vunpack.i.h.bf16 %v13449_v45  ;;  %v13450_v60 = vunpack.i.l.bf16 %v13449_v45  ;;  %vm16746_vm9 = vmmov %vm16741_vm1  ;;  %v16094_v22 = vpop.permute.xlu0 %13463  ;;  %v13460_v26 = vunpack.i.l.bf16 %v16076_v13 }
 0x50b   : > { %12303 = vmatpush1.bf16.msk.msra.mxu0 %vm16744_vm4, %v12301_v21  ;;  %12309 = vmatpush1.bf16.msk.msra.mxu1 %vm16745_vm6, %v12307_v5  ;;  %v10520_v31 = vsel %vm16746_vm9, %v13455_v47, %v13456_v53  ;;  %vm16747_vm7 = vmmov %vm16741_vm1 }
 0x50c   : > { %12311 = vmatprep.subr.bf16.mxu0 %v12310_v51  ;;  %12315 = vmatprep.subr.bf16.mxu1 %v12314_v17  ;;  %v10505_v15 = vsel %vm16747_vm7, %v13430_v14, %v13400_v57  ;;  %vm16748_vm2 = vmmov %vm16741_vm1  ;;  %v13461_v57 = vunpack.i.h.bf16 %v16076_v13 }
 0x50d   : > { %10212 = vmatprep.mubr.f32.mxu0 %v16387_v52  ;;  %v10513_v28 = vsel %vm16748_vm2, %v13431_v44, %v13415_v58  ;;  %vm16749_vm5 = vmmov %vm16741_vm1  ;;  %v16092_v39 = vpop.permute.xlu1 %13468  ;;  %v13446_v58 = vunpack.i.h.bf16 %v16060_v62 }
 0x50e   : > { %v10515_v6 = vsel %vm16749_vm5, %v13416_v41, %v13425_v61  ;;  %vm16750_vm0 = vmmov %vm16743_vm8  ;;  %v12312_v8 = vpack.c.bf16 %v10513_v28, %v10505_v15  ;;  %v13471_v46 = vunpack.i.h.bf16 %v16092_v39  ;;  %v13470_v61 = vunpack.i.l.bf16 %v16092_v39  ;;  %v13474_v49 = vpop.permute.xlu0 %13473 }
 0x50f   : > { %11895 = vmatmul.mubr.msk.f32.gmra.mrb[18].mxu0 %vm16750_vm0, %v10135_v2  ;;  %vm16751_vm1 = vmmov %vm16750_vm0  ;;  %v13465_v41 = vunpack.i.l.bf16 %v16094_v22  ;;  %v13476_v5 = vunpack.i.h.bf16 %v13474_v49  ;;  %v13475_v53 = vunpack.i.l.bf16 %v13474_v49 }
 0x510   : > { %11901 = vmatmul.mubr.msk.f32.gmra.mrb[18].mxu1 %vm16751_vm1, %v10135_v2  ;;  %10360 = vmatprep.mubr.f32.mxu0 %v16387_v52  ;;  %vm16752_vm10 = vmmov %vm16748_vm2 }
 0x511   : > { %v10512_v18 = vsel %vm16752_vm10, %v13440_v59, %v13441_v4  ;;  %vm16753_vm8 = vmmov %vm16748_vm2  ;;  %10437 = vmatprep.mubr.f32.mxu1 %v16387_v52  ;;  %v16112_v24 = vpop.permute.xlu1 %13478 }
 0x512   : > { %v10507_v20 = vsel %vm16753_vm8, %v13401_v37, %v13405_v33  ;;  %v12322_v34 = vpack.c.bf16 %v10520_v31, %v10512_v18  ;;  %vm16754_vm4 = vmmov %vm16748_vm2  ;;  %v13466_v33 = vunpack.i.h.bf16 %v16094_v22  ;;  %v13445_v37 = vunpack.i.l.bf16 %v16060_v62  ;;  %v13484_v14 = vpop.permute.xlu0 %13483 }
 0x513   : > { %v10510_v48 = vsel %vm16754_vm4, %v13435_v0, %v13436_v10  ;;  %vm16755_vm6 = vmmov %vm16748_vm2  ;;  %v12316_v43 = vpack.c.bf16 %v10515_v6, %v10507_v20  ;;  %vm16758_vm2 = vcmask 777216   ;;  %v13481_v51 = vunpack.i.h.bf16 %v16112_v24 }
 0x514   : > { %v10518_v25 = vsel %vm16755_vm6, %v13450_v60, %v13451_v11  ;;  %vm16756_vm9 = vmmov %vm16750_vm0  ;;  %v10914_v30 = vsel %vm16758_vm2, %v13470_v61, %v13471_v46  ;;  %v13480_v56 = vunpack.i.l.bf16 %v16112_v24 }
 0x515   : > { %v12318_v32 = vpack.c.bf16 %v10518_v25, %v10510_v48  ;;  %11906 = vmatmul.mubr.msk.f32.vlgmr.msra.gmra.mrb[20].mxu0 %vm16756_vm9, %v10134_v23  ;;  %vm16757_vm7 = vmmov %vm16750_vm0  ;;  %v13489_v21 = vpop.permute.xlu1 %13488 }
 0x516   : > { %11912 = vmatmul.mubr.msk.f32.vlgmr.msra.gmra.mrb[20].mxu1 %vm16757_vm7, %v10134_v23  ;;  %12313 = vmatpush1.bf16.msra.mxu0 %v12312_v8  ;;  %vm16759_vm5 = vmmov %vm16758_vm2  ;;  %v13490_v44 = vunpack.i.l.bf16 %v13489_v21  ;;  %v13494_v45 = vpop.permute.xlu0 %13493 }
 0x517   : > { %12317 = vmatpush1.bf16.msra.mxu1 %v12316_v43  ;;  %10366 = vmatprep.mubr.f32.mxu0 %v16387_v52  ;;  %v10912_v7 = vsel %vm16759_vm5, %v13465_v41, %v13466_v33  ;;  %vm16760_vm0 = vmmov %vm16754_vm4 }
 0x518   : > { %12323 = vmatprep.subr.bf16.mxu1 %v12322_v34  ;;  %10443 = vmatprep.mubr.f32.mxu1 %v16387_v52  ;;  %v10519_v23 = vsel %vm16760_vm0, %v13451_v11, %v13455_v47  ;;  %vm16761_vm1 = vmmov %vm16760_vm0  ;;  %v13491_v47 = vunpack.i.h.bf16 %v13489_v21  ;;  %v13496_v11 = vunpack.i.h.bf16 %v13494_v45 }
 0x519   : > { %12319 = vmatprep.subr.bf16.mxu0 %v12318_v32  ;;  %v10517_v16 = vsel %vm16761_vm1, %v13426_v50, %v13450_v60  ;;  %vm16762_vm10 = vmmov %vm16757_vm7  ;;  %vm16771_vm1 = vnez %v16437_v19  ;;  %v13495_v60 = vunpack.i.l.bf16 %v13494_v45 }
 0x51a   : > { %11907 = vmatmul.mubr.msk.f32.gmra.mrb[22].mxu0 %vm16762_vm10, %v10135_v2  ;;  %vm16763_vm8 = vmmov %vm16757_vm7 }
 0x51b   : > { %11913 = vmatmul.mubr.msk.f32.gmra.mrb[22].mxu1 %vm16763_vm8, %v10135_v2  ;;  %vm16764_vm4 = vmmov %vm16758_vm2  ;;  %10607 = vmatprep.mubr.f32.mxu0 %v16387_v52  ;;  %v13485_v2 = vunpack.i.l.bf16 %v13484_v14 }
 0x51c   : > { %v10904_v63 = vsel %vm16764_vm4, %v13445_v37, %v13446_v58  ;;  %vm16765_vm6 = vmmov %vm16758_vm2  ;;  %10684 = vmatprep.mubr.f32.mxu1 %v16387_v52 }
 0x51d   : > { %v10906_v1 = vsel %vm16765_vm6, %v13460_v26, %v13461_v57  ;;  %vm16766_vm9 = vmmov %vm16760_vm0  ;;  %v12326_v17 = vpack.c.bf16 %v10912_v7, %v10904_v63 }
 0x51e   : > { %v10511_v29 = vsel %vm16766_vm9, %v13436_v10, %v13440_v59  ;;  %vm16767_vm7 = vmmov %vm16760_vm0  ;;  %v12332_v50 = vpack.c.bf16 %v10914_v30, %v10906_v1  ;;  %vm16770_vm0 = vnez %v16421_v3  ;;  %v13486_v59 = vunpack.i.h.bf16 %v13484_v14 }
 0x51f   : > { %v10509_v12 = vsel %vm16767_vm7, %v13406_v42, %v13435_v0  ;;  %v12324_v62 = vpack.c.bf16 %v10519_v23, %v10511_v29  ;;  %vm16768_vm2 = vmmov %vm16763_vm8  ;;  %v10468_v42 = vld [vmem:[#allocation5 + $0x78] sm:$0xff]  ;;  %v10911_v0 = vsel %vm16764_vm4, %v13476_v5, %v13465_v41 }
 0x520   : > { %v12320_v38 = vpack.c.bf16 %v10517_v16, %v10509_v12  ;;  %11914 = vmatmul.mubr.msk.f32.vlgmr.msra.gmra.mrb[16].mxu0 %vm16768_vm2, %v10467_v40  ;;  %vm16769_vm5 = vmmov %vm16768_vm2 }
 0x521   : > { %11916 = vmatmul.mubr.msk.f32.vlgmr.msra.gmra.mrb[16].mxu1 %vm16769_vm5, %v10467_v40  ;;  %vm16772_vm10 = vmmov %vm16764_vm4  ;;  %10613 = vmatprep.mubr.f32.mxu0 %v16387_v52 }
 0x522   : > { %12321 = vmatpush1.bf16.msra.mxu0 %v12320_v38  ;;  %12325 = vmatpush1.bf16.msra.mxu1 %v12324_v62  ;;  %v10916_v4 = vsel %vm16772_vm10, %v13490_v44, %v13491_v47  ;;  %vm16773_vm8 = vmmov %vm16764_vm4  ;;  %v11289_v27 = vpop.permute.xlu1 %11288 }
 0x523   : > { %12328 = vmatprep.subr.msk.bf16.mxu0 %vm16770_vm0, %v12326_v17  ;;  %12334 = vmatprep.subr.msk.bf16.mxu1 %vm16771_vm1, %v12332_v50  ;;  %v10903_v10 = vsel %vm16773_vm8, %v13475_v53, %v13445_v37  ;;  %vm16774_vm6 = vmmov %vm16768_vm2 }
 0x524   : > { %10690 = vmatprep.mubr.f32.mxu1 %v16387_v52  ;;  %11915 = vmatmul.mubr.msk.f32.gmra.mrb[18].mxu0 %vm16774_vm6, %v10468_v42  ;;  %vm16775_vm9 = vmmov %vm16764_vm4  ;;  %v12329_v28 = vpack.c.bf16 %v10911_v0, %v10903_v10 }
 0x525   : > { %v10913_v3 = vsel %vm16775_vm9, %v13466_v33, %v13470_v61  ;;  %vm16776_vm7 = vmmov %vm16764_vm4  ;;  %11917 = vmatmul.mubr.msk.f32.gmra.mrb[18].mxu1 %vm16768_vm2, %v10468_v42  ;;  %10761 = vmatprep.mubr.f32.mxu0 %v16387_v52 }
 0x526   : > { %v10908_v19 = vsel %vm16776_vm7, %v13480_v56, %v13481_v51  ;;  %10838 = vmatprep.mubr.f32.mxu1 %v16387_v52  ;;  %vm16777_vm5 = vmmov %vm16764_vm4 }
 0x527   : > { %v12338_v31 = vpack.c.bf16 %v10916_v4, %v10908_v19  ;;  %v10905_v15 = vsel %vm16777_vm5, %v13446_v58, %v13460_v26  ;;  %vm16778_vm0 = vmmov %vm16764_vm4 }
 0x528   : > { %v10910_v6 = vsel %vm16778_vm0, %v13485_v2, %v13486_v59  ;;  %vm16779_vm1 = vmmov %vm16778_vm0  ;;  %v12335_v20 = vpack.c.bf16 %v10913_v3, %v10905_v15 }
 0x529   : > { %v10918_v18 = vsel %vm16779_vm1, %v13495_v60, %v13496_v11  ;;  %vm16780_vm10 = vmmov %vm16768_vm2  ;;  %v11294_v58 = vpop.permute.xlu0 %11293 }
 0x52a   : > { %v12344_v34 = vpack.c.bf16 %v10918_v18, %v10910_v6  ;;  %11918 = vmatmul.mubr.msk.f32.vlgmr.msra.gmra.mrb[20].mxu0 %vm16780_vm10, %v10467_v40  ;;  %vm16781_vm8 = vmmov %vm16768_vm2 }
 0x52b   : > { %11920 = vmatmul.mubr.msk.f32.vlgmr.msra.gmra.mrb[20].mxu1 %vm16781_vm8, %v10467_v40  ;;  %12331 = vmatpush1.bf16.msk.msra.mxu0 %vm16707_vm3, %v12329_v28  ;;  %vm16782_vm4 = vmmov %vm16778_vm0 }
 0x52c   : > { %12337 = vmatpush1.bf16.msk.msra.mxu1 %vm16708_vm14, %v12335_v20  ;;  %12340 = vmatprep.subr.msk.bf16.mxu0 %vm16657_vm13, %v12338_v31  ;;  %v10915_v48 = vsel %vm16782_vm4, %v13471_v46, %v13490_v44  ;;  %vm16783_vm6 = vmmov %vm16768_vm2 }
 0x52d   : > { %10767 = vmatprep.mubr.f32.mxu0 %v16387_v52  ;;  %10844 = vmatprep.mubr.f32.mxu1 %v16387_v52  ;;  %vm16784_vm3 = vmmov %vm16778_vm0 }
 0x52e   : > { %11919 = vmatmul.mubr.msk.f32.gmra.mrb[22].mxu0 %vm16783_vm6, %v10468_v42  ;;  %12346 = vmatprep.subr.msk.bf16.mxu1 %vm16709_vm12, %v12344_v34  ;;  %v10917_v55 = vsel %vm16784_vm3, %v13491_v47, %v13495_v60  ;;  %vm16785_vm9 = vmmov %vm16768_vm2 }
 0x52f   : > { %11921 = vmatmul.mubr.msk.f32.gmra.mrb[22].mxu1 %vm16785_vm9, %v10468_v42  ;;  %11024 = vmatprep.mubr.f32.mxu0 %v16387_v52  ;;  %vm16786_vm13 = vmmov %vm16778_vm0 }
 0x530   : > { %v10907_v9 = vsel %vm16786_vm13, %v13461_v57, %v13480_v56  ;;  %11101 = vmatprep.mubr.f32.mxu1 %v16387_v52  ;;  %vm16787_vm14 = vmmov %vm16778_vm0 }
 0x531   : > { %v12341_v25 = vpack.c.bf16 %v10915_v48, %v10907_v9  ;;  %v10909_v8 = vsel %vm16787_vm14, %v13481_v51, %v13485_v2  ;;  %vm16788_vm7 = vmmov %vm16768_vm2 }
 0x532   : > { %v12347_v43 = vpack.c.bf16 %v10917_v55, %v10909_v8  ;;  %11926 = vmatmul.mubr.msk.f32.vlgmr.msra.gmra.mrb[16].mxu0 %vm16788_vm7, %v10952_v54  ;;  %vm16789_vm12 = vmmov %vm16768_vm2 }
 0x533   : > { %11932 = vmatmul.mubr.msk.f32.vlgmr.msra.gmra.mrb[16].mxu1 %vm16789_vm12, %v10952_v54  ;;  %12343 = vmatpush1.bf16.msk.msra.mxu0 %vm16661_vm15, %v12341_v25  ;;  %vm16790_vm5 = vmmov %vm16768_vm2 }
 0x534   : > { %12349 = vmatpush1.bf16.msk.msra.mxu1 %vm16721_vm11, %v12347_v43  ;;  %11030 = vmatprep.mubr.f32.mxu0 %v16387_v52  ;;  %vm16791_vm0 = vmmov %vm16768_vm2 }
 0x535   : > { %11107 = vmatprep.mubr.f32.mxu1 %v16387_v52  ;;  %vm16792_vm1 = vmmov %vm16791_vm0 }
 0x536   : > { %11927 = vmatmul.mubr.msk.f32.gmra.mrb[18].mxu0 %vm16768_vm2, %v10953_v36  ;;  %vm16793_vm15 = vmmov %vm16791_vm0 }
 0x537   : > { %11933 = vmatmul.mubr.msk.f32.gmra.mrb[18].mxu1 %vm16790_vm5, %v10953_v36  ;;  %11178 = vmatprep.mubr.f32.mxu0 %v16387_v52  ;;  %vm16794_vm11 = vmmov %vm16791_vm0 }
 0x538   : > { %11255 = vmatprep.mubr.f32.mxu1 %v16387_v52 }
 0x53a   : > { %11938 = vmatmul.mubr.msk.f32.vlgmr.msra.gmra.mrb[20].mxu0 %vm16791_vm0, %v10952_v54 }
 0x53b   : > { %11944 = vmatmul.mubr.msk.f32.vlgmr.msra.gmra.mrb[20].mxu1 %vm16792_vm1, %v10952_v54  ;;  %11184 = vmatprep.mubr.f32.mxu0 %v16387_v52 }
 0x53c   : > { %11261 = vmatprep.mubr.f32.mxu1 %v16387_v52 }
 0x53e   : > { %11939 = vmatmul.mubr.msk.f32.gmra.mrb[22].mxu0 %vm16793_vm15, %v10953_v36 }
 0x53f   : > { %11945 = vmatmul.mubr.msk.f32.gmra.mrb[22].mxu1 %vm16794_vm11, %v10953_v36 }
 0x605   : > { %v11026_v35 = vpop.f32.mrb[16].mxu0 }
 0x606   : > { %v11296_v13 = vadd.f32 %v11289_v27, %v11026_v35  ;;  %v11103_v39 = vpop.f32.mrb[16].mxu1  ;;  %v11028_v22 = vpop.f32.mrb[17].mxu0 }
 0x607   : > { %v11298_v32 = vadd.f32 %v11289_v27, %v11103_v39  ;;  %v11297_v46 = vadd.f32 %v11289_v27, %v11028_v22  ;;  %v11105_v61 = vpop.f32.mrb[17].mxu1 }
 0x608   : > { %v11312_v33 = vmax.f32 %v11296_v13, 0.0  ;;  %v11299_v41 = vadd.f32 %v11289_v27, %v11105_v61 }
 0x609   : > { %v11314_v37 = vmax.f32 %v11298_v32, 0.0  ;;  %v11313_v57 = vmax.f32 %v11297_v46, 0.0  ;;  %v11032_v26 = vpop.f32.mrb[18].mxu0 }
 0x60a   : > { %v11315_v52 = vmax.f32 %v11299_v41, 0.0  ;;  %v11304_v30 = vadd.f32 %v11294_v58, %v11032_v26  ;;  %v11109_v7 = vpop.f32.mrb[18].mxu1  ;;  %v11034_v24 = vpop.f32.mrb[19].mxu0 }
 0x60b   : > { %v11958_v49 = vpack.c.bf16 %v11313_v57, %v11312_v33  ;;  %v11306_v23 = vadd.f32 %v11294_v58, %v11109_v7  ;;  %v11305_v16 = vadd.f32 %v11294_v58, %v11034_v24  ;;  %v11111_v63 = vpop.f32.mrb[19].mxu1 }
 0x60c   : > { %v11959_v1 = vpack.c.bf16 %v11315_v52, %v11314_v37  ;;  %v11320_v40 = vmax.f32 %v11304_v30, 0.0  ;;  %v11307_v29 = vadd.f32 %v11294_v58, %v11111_v63 }
 0x60d   : > { %11376 = vst [vmem:[%s16199_s20] sm:$0xff] %v11958_v49  ;;  %v11322_v12 = vmax.f32 %v11306_v23, 0.0  ;;  %v11321_v50 = vmax.f32 %v11305_v16, 0.0  ;;  %v11180_v17 = vpop.f32.mrb[20].mxu0 }
 0x60e   : > { %11377 = vst [vmem:[%s16199_s20 + $0x8] sm:$0xff] %v11959_v1  ;;  %v11323_v38 = vmax.f32 %v11307_v29, 0.0  ;;  %v11300_v62 = vadd.f32 %v11289_v27, %v11180_v17  ;;  %v11257_v21 = vpop.f32.mrb[20].mxu1  ;;  %v11182_v5 = vpop.f32.mrb[21].mxu0 }
 0x60f   : > { %v11962_v53 = vpack.c.bf16 %v11321_v50, %v11320_v40  ;;  %v11302_v47 = vadd.f32 %v11289_v27, %v11257_v21  ;;  %v11301_v44 = vadd.f32 %v11289_v27, %v11182_v5  ;;  %v11259_v14 = vpop.f32.mrb[21].mxu1 }
 0x610   : > { %v11963_v51 = vpack.c.bf16 %v11323_v38, %v11322_v12  ;;  %v11316_v56 = vmax.f32 %v11300_v62, 0.0  ;;  %v11303_v42 = vadd.f32 %v11289_v27, %v11259_v14 }
 0x611   : > { %11380 = vst [vmem:[%s16199_s20 + $0x20] sm:$0xff] %v11962_v53  ;;  %v11318_v4 = vmax.f32 %v11302_v47, 0.0  ;;  %v11317_v59 = vmax.f32 %v11301_v44, 0.0  ;;  %v11186_v2 = vpop.f32.mrb[22].mxu0 }
 0x612   : > { %11381 = vst [vmem:[%s16199_s20 + $0x28] sm:$0xff] %v11963_v51  ;;  %v11319_v10 = vmax.f32 %v11303_v42, 0.0  ;;  %v11308_v0 = vadd.f32 %v11294_v58, %v11186_v2  ;;  %v11263_v45 = vpop.f32.mrb[22].mxu1  ;;  %v11188_v3 = vpop.f32.mrb[23].mxu0 }
 0x613   : > { %v11960_v19 = vpack.c.bf16 %v11317_v59, %v11316_v56  ;;  %v11310_v11 = vadd.f32 %v11294_v58, %v11263_v45  ;;  %v11309_v60 = vadd.f32 %v11294_v58, %v11188_v3  ;;  %v11265_v31 = vpop.f32.mrb[23].mxu1 }
 0x614   : > { %v11961_v15 = vpack.c.bf16 %v11319_v10, %v11318_v4  ;;  %v11324_v28 = vmax.f32 %v11308_v0, 0.0  ;;  %v11311_v6 = vadd.f32 %v11294_v58, %v11265_v31 }
 0x615   : > { %11378 = vst [vmem:[%s16199_s20 + $0x10] sm:$0xff] %v11960_v19  ;;  %v11326_v18 = vmax.f32 %v11310_v11, 0.0  ;;  %v11325_v20 = vmax.f32 %v11309_v60, 0.0 }
 0x616   : > { %11379 = vst [vmem:[%s16199_s20 + $0x18] sm:$0xff] %v11961_v15  ;;  %v11327_v34 = vmax.f32 %v11311_v6, 0.0 }
 0x617   : > { %v11964_v48 = vpack.c.bf16 %v11325_v20, %v11324_v28 }
 0x618   : > { %v11965_v55 = vpack.c.bf16 %v11327_v34, %v11326_v18 }
 0x619   : > { %11382 = vst [vmem:[%s16199_s20 + $0x30] sm:$0xff] %v11964_v48 }
 0x61a   : > { %11383 = vst [vmem:[%s16199_s20 + $0x38] sm:$0xff] %v11965_v55 }
 0x61b PF: > { %s19_s24 = sadd.s32 1, %s13567_s24  }
 0x61c   : > { %p16_p5 = scmp.ge.s32.totalorder %s19_s24, 4  }
 0x61e   :  { %18 = sbr.rel (!%p16_p5) target bundleno = 2 (0x2), region = 111 }
 0x625   :  { %11405 = vsyncpa [#allocation4], 1 }
 0x626   :  { %11407 = vsyncpa [#allocation4 + $0x1], 1 }
 0x627   :  { %11408 = vsyncpa [#allocation6], 1 }

</bundles_post_ra>
